<compile_context>
chip_gen: v7x
topology: tpu7x:2x2x1
jax: 0.10.0
libtpu: 0.0.40
codegen_flags: <defaults>
</compile_context>

<pallas_src>
import jax
import jax.numpy as jnp
import numpy as np
from jax import lax
from jax.experimental import pallas as pl
from jax.experimental.pallas import tpu as pltpu


# --------------------------------------------------------------------------
# Kernel
# --------------------------------------------------------------------------
def _bottleneck_kernel(x_ref, xh_ref, w1_ref, b1_ref, w2_ref, b2_ref,
                       w3_ref, b3_ref, o_ref):
    _, TH, W, Cin = x_ref.shape            # (1, tile_h, W, Cin) block
    P = w1_ref.shape[1]
    HW = TH * W
    G = 8                                  # zero guard rows (sublane aligned)

    r = pl.program_id(1)
    num_r = pl.num_programs(1)

    xin = x_ref[0].reshape(HW, Cin)        # f32, also used for the residual
    xh = xh_ref[0].reshape(2 * W, Cin)     # halo rows: [row above, row below]

    # --- conv1 (1x1) + bias + relu: tile rows and both halo rows in one dot.
    x_all = jnp.concatenate([xin, xh], axis=0).astype(jnp.bfloat16)
    h1 = jnp.dot(x_all, w1_ref[...], preferred_element_type=jnp.float32)
    h1 = jnp.maximum(h1 + b1_ref[...], 0.0)                  # (HW + 2W, P) f32

    h1_main = h1[:HW]
    # Zero padding of the 3x3 conv acts on h1 (post conv1/bn1/relu), so the
    # halo rows must be zeroed at the image boundary (decided by r, not by x:
    # conv1(0-row) + bias -> relu is generally nonzero).
    h1_top = jnp.where(r > 0, h1[HW:HW + W], 0.0)
    h1_bot = jnp.where(r < num_r - 1, h1[HW + W:], 0.0)

    # h1 for rows -1 .. TH, flattened row-major, with G zero guard rows on
    # each side so every 3x3 tap is a static, in-bounds value slice.  Cast to
    # bf16 ONCE here so all 9 shifted views / masks / concat are half-width.
    zguard = jnp.zeros((G, P), jnp.float32)
    g = jnp.concatenate([zguard, h1_top, h1_main, h1_bot, zguard],
                        axis=0).astype(jnp.bfloat16)

    # --- conv2 (3x3, pad=1) as one im2col matmul (single large-K MXU dot) ---
    col = lax.broadcasted_iota(jnp.int32, (HW, 1), 0) % W    # column index
    mask_l = col >= 1                                        # has left neighbor
    mask_r = col <= W - 2                                    # has right neighbor
    taps = []
    for dy in (-1, 0, 1):
        for dx in (-1, 0, 1):
            s = G + (dy + 1) * W + dx          # static start offset into g
            win = g[s:s + HW]                  # bf16 value slice (sublane shift)
            if dx == -1:
                win = jnp.where(mask_l, win, jnp.bfloat16(0))
            elif dx == 1:
                win = jnp.where(mask_r, win, jnp.bfloat16(0))
            taps.append(win)
    im2col = jnp.concatenate(taps, axis=-1)                  # (HW, 9P) bf16

    h2 = jnp.dot(im2col, w2_ref[...], preferred_element_type=jnp.float32)
    h2 = jnp.maximum(h2 + b2_ref[...], 0.0)                  # (HW, P) f32

    # --- conv3 (1x1) + bias + residual + relu --------------------------------
    h3 = jnp.dot(h2.astype(jnp.bfloat16), w3_ref[...],
                 preferred_element_type=jnp.float32)
    h3 = h3 + b3_ref[...]                                    # (HW, 4P) f32

    out = jnp.maximum(h3 + xin, 0.0)                         # residual in f32
    o_ref[0] = out.reshape(TH, W, Cin).astype(o_ref.dtype)


# --------------------------------------------------------------------------
# Wrapper
# --------------------------------------------------------------------------
def _fold_bn(gamma, beta, mean, var, eps=1e-5):
    scale = gamma / jnp.sqrt(var + eps)
    bias = beta - mean * scale
    return scale, bias


def fold_bottleneck_params(w1, w2_hwio, w3, bn1, bn2, bn3):
    """Fold inference-mode BN into the conv weights (bf16) + f32 biases."""
    s1, b1 = _fold_bn(*bn1)
    s2, b2 = _fold_bn(*bn2)
    s3, b3 = _fold_bn(*bn3)
    P = w2_hwio.shape[2]
    w1f = (w1 * s1[None, :]).astype(jnp.bfloat16)                    # (Cin, P)
    w2f = (w2_hwio * s2[None, None, None, :]).reshape(9 * P, -1)     # (9P, P)
    w2f = w2f.astype(jnp.bfloat16)
    w3f = (w3 * s3[None, :]).astype(jnp.bfloat16)                    # (P, 4P)
    return w1f, b1[None, :], w2f, b2[None, :], w3f, b3[None, :]


def _auto_tile_h(H, W, Cin, P, budget_bytes):
    """Largest row-slab (multiple of 8 dividing H, or H itself) that fits."""
    candidates = [th for th in range(8, H + 1, 8) if H % th == 0]
    if H not in candidates:
        candidates.append(H)
    best = candidates[0]
    for th in sorted(candidates):
        hw = th * W
        est = (2 * 2 * th * W * Cin * 4          # x in + out, double-buffered
               + 2 * 2 * 2 * W * Cin * 4         # halo rows, double-buffered
               + hw * 9 * P * 2                  # im2col (bf16)
               + (hw + 2 * W + 16) * P * 4 * 2   # h1 + guarded copy (f32)
               + hw * P * 4                      # h2 (f32)
               + 2 * hw * Cin * 4)               # h3 + out (f32)
        if est <= budget_bytes:
            best = th
    return best


def bottleneck_forward(x_nhwc, w1f, b1, w2f, b2, w3f, b3, *, tile_h=None,
                       vmem_limit_bytes=64 * 1024 * 1024):
    N, H, W, Cin = x_nhwc.shape
    P = w1f.shape[1]
    Cout = w3f.shape[1]
    assert Cin == Cout == 4 * P, "residual requires inplanes == 4 * planes"
    if tile_h is None:
        tile_h = _auto_tile_h(H, W, Cin, P, vmem_limit_bytes // 2)
    assert H % tile_h == 0, "H must be divisible by tile_h"
    R = H // tile_h

    # Row above / below every tile (zero rows at the image boundary).  This
    # is the only data shared between row tiles; grid steps stay independent,
    # so both grid axes can be "parallel".
    xp = jnp.pad(x_nhwc, ((0, 0), (1, 1), (0, 0), (0, 0)))
    top = xp[:, 0:H:tile_h]                        # row tile_h*r - 1
    bot = xp[:, tile_h + 1:H + 2:tile_h]           # row tile_h*r + tile_h
    x_halo = jnp.stack([top, bot], axis=2).reshape(N, 2 * R, W, Cin)

    grid_spec = pltpu.PrefetchScalarGridSpec(
        num_scalar_prefetch=0,
        grid=(N, R),
        in_specs=[
            pl.BlockSpec((1, tile_h, W, Cin), lambda n, r: (n, r, 0, 0)),  # x
            pl.BlockSpec((1, 2, W, Cin), lambda n, r: (n, r, 0, 0)),       # halo
            pl.BlockSpec((Cin, P), lambda n, r: (0, 0)),                   # w1
            pl.BlockSpec((1, P), lambda n, r: (0, 0)),                     # b1
            pl.BlockSpec((9 * P, P), lambda n, r: (0, 0)),                 # w2
            pl.BlockSpec((1, P), lambda n, r: (0, 0)),                     # b2
            pl.BlockSpec((P, Cout), lambda n, r: (0, 0)),                  # w3
            pl.BlockSpec((1, Cout), lambda n, r: (0, 0)),                  # b3
        ],
        out_specs=pl.BlockSpec((1, tile_h, W, Cout), lambda n, r: (n, r, 0, 0)),
    )
    return pl.pallas_call(
        _bottleneck_kernel,
        out_shape=jax.ShapeDtypeStruct((N, H, W, Cout), x_nhwc.dtype),
        grid_spec=grid_spec,
        compiler_params=pltpu.CompilerParams(
            dimension_semantics=("parallel", "parallel"),
            vmem_limit_bytes=vmem_limit_bytes),
    )(x_nhwc, x_halo, w1f, b1, w2f, b2, w3f, b3)


# --------------------------------------------------------------------------
# Pure-JAX f32 reference (eval-mode BatchNorm, true module semantics)
# --------------------------------------------------------------------------
def _reference(x_nhwc, w1, w2_hwio, w3, bn1, bn2, bn3):
    s1, b1 = _fold_bn(*bn1)
    s2, b2 = _fold_bn(*bn2)
    s3, b3 = _fold_bn(*bn3)
    h = jnp.einsum('nhwc,cp->nhwp', x_nhwc, w1)
    h = jax.nn.relu(h * s1 + b1)
    h = lax.conv_general_dilated(h, w2_hwio, window_strides=(1, 1),
                                 padding='SAME',
                                 dimension_numbers=('NHWC', 'HWIO', 'NHWC'))
    h = jax.nn.relu(h * s2 + b2)
    h = jnp.einsum('nhwp,pq->nhwq', h, w3)
    h = h * s3 + b3
    return jax.nn.relu(h + x_nhwc)


if __name__ == "__main__":
    # Small but lane-aligned config (real ResNet channel counts, reduced
    # spatial size): inplanes = 512, planes = 128, expansion = 4.
    N, H, W = 2, 32, 32
    planes = 128
    inplanes = 4 * planes

    key = jax.random.PRNGKey(0)
    ks = jax.random.split(key, 16)

    # PyTorch-convention NCHW input, converted to NHWC for the kernel.
    x_nchw = jax.random.normal(ks[0], (N, inplanes, H, W), jnp.float32)
    x_nhwc = jnp.transpose(x_nchw, (0, 2, 3, 1))

    # Conv weights (fan-in scaled so activations stay O(1)).
    # conv1: torch (planes, inplanes, 1, 1) -> matmul form (inplanes, planes)
    w1 = jax.random.normal(ks[1], (inplanes, planes), jnp.float32) / np.sqrt(inplanes)
    # conv2: torch (planes, planes, 3, 3)   -> HWIO (3, 3, planes, planes)
    w2_hwio = jax.random.normal(ks[2], (3, 3, planes, planes), jnp.float32) / np.sqrt(9 * planes)
    # conv3: torch (4*planes, planes, 1, 1) -> matmul form (planes, 4*planes)
    w3 = jax.random.normal(ks[3], (planes, inplanes), jnp.float32) / np.sqrt(planes)

    def bn_params(c, k0, k1, k2, k3):
        gamma = 0.8 + 0.4 * jax.random.uniform(k0, (c,), jnp.float32)
        beta = 0.1 * jax.random.normal(k1, (c,), jnp.float32)
        mean = 0.1 * jax.random.normal(k2, (c,), jnp.float32)
        var = 0.8 + 0.4 * jax.random.uniform(k3, (c,), jnp.float32)
        return gamma, beta, mean, var

    bn1 = bn_params(planes, *ks[4:8])
    bn2 = bn_params(planes, *ks[8:12])
    bn3 = bn_params(inplanes, *ks[12:16])

    w1f, b1, w2f, b2, w3f, b3 = fold_bottleneck_params(w1, w2_hwio, w3,
                                                       bn1, bn2, bn3)

    ref = _reference(x_nhwc, w1, w2_hwio, w3, bn1, bn2, bn3)

    # bf16 MXU operands with f32 accumulation: loose elementwise tolerance
    # plus a tight aggregate-error check.
    def check(out):
        np.testing.assert_allclose(np.asarray(out), np.asarray(ref),
                                   rtol=5e-2, atol=1e-1)
        assert float(jnp.mean(jnp.abs(out - ref))) < 1e-2

    # 1) Multi-tile config: exercises the cross-tile halo path.
    out_small = bottleneck_forward(x_nhwc, w1f, b1, w2f, b2, w3f, b3, tile_h=8)
    out_small = jax.block_until_ready(out_small)
    check(out_small)

    # 2) Auto (largest-fit) tile: the performance default.
    out_auto = bottleneck_forward(x_nhwc, w1f, b1, w2f, b2, w3f, b3)
    out_auto = jax.block_until_ready(out_auto)
    check(out_auto)

    print("KERNEL_OK")
</pallas_src>

<mosaic_0001>
module attributes {stable_mosaic.version = 11 : i64} {
  func.func @_bottleneck_kernel(%arg0: i32, %arg1: i32, %arg2: memref<1x8x32x512xf32, #tpu.memory_space<vmem>>, %arg3: memref<1x2x32x512xf32, #tpu.memory_space<vmem>>, %arg4: memref<512x128xbf16, #tpu.memory_space<vmem>>, %arg5: memref<1x128xf32, #tpu.memory_space<vmem>>, %arg6: memref<1152x128xbf16, #tpu.memory_space<vmem>>, %arg7: memref<1x128xf32, #tpu.memory_space<vmem>>, %arg8: memref<128x512xbf16, #tpu.memory_space<vmem>>, %arg9: memref<1x512xf32, #tpu.memory_space<vmem>>, %arg10: memref<1x8x32x512xf32, #tpu.memory_space<vmem>>) attributes {dimension_semantics = [#tpu.dimension_semantics<parallel>, #tpu.dimension_semantics<parallel>], iteration_bounds = array<i64: 2, 4>, scalar_prefetch = 0 : i64, scratch_operands = 0 : i64, tpu.core_type = #tpu.core_type<tc>, window_params = [{transform_indices = @transform_0, window_bounds = array<i64: 1, 8, 32, 512>}, {transform_indices = @transform_1, window_bounds = array<i64: 1, 2, 32, 512>}, {pipeline_mode = #tpu.pipeline_mode<synchronous>, transform_indices = @transform_2, window_bounds = array<i64: 512, 128>}, {pipeline_mode = #tpu.pipeline_mode<synchronous>, transform_indices = @transform_3, window_bounds = array<i64: 1, 128>}, {pipeline_mode = #tpu.pipeline_mode<synchronous>, transform_indices = @transform_4, window_bounds = array<i64: 1152, 128>}, {pipeline_mode = #tpu.pipeline_mode<synchronous>, transform_indices = @transform_5, window_bounds = array<i64: 1, 128>}, {pipeline_mode = #tpu.pipeline_mode<synchronous>, transform_indices = @transform_6, window_bounds = array<i64: 128, 512>}, {pipeline_mode = #tpu.pipeline_mode<synchronous>, transform_indices = @transform_7, window_bounds = array<i64: 1, 512>}, {transform_indices = @transform_8, window_bounds = array<i64: 1, 8, 32, 512>}]} {
    %c0 = arith.constant 0 : index
    %c0_0 = arith.constant 0 : index
    %c0_1 = arith.constant 0 : index
    %c0_2 = arith.constant 0 : index
    %0 = vector.load %arg2[%c0, %c0_0, %c0_1, %c0_2] : memref<1x8x32x512xf32, #tpu.memory_space<vmem>>, vector<1x8x32x512xf32>
    %1 = vector.shape_cast %0 : vector<1x8x32x512xf32> to vector<8x32x512xf32>
    %2 = vector.shape_cast %1 : vector<8x32x512xf32> to vector<256x512xf32>
    %c0_3 = arith.constant 0 : index
    %c0_4 = arith.constant 0 : index
    %c0_5 = arith.constant 0 : index
    %c0_6 = arith.constant 0 : index
    %3 = vector.load %arg3[%c0_3, %c0_4, %c0_5, %c0_6] : memref<1x2x32x512xf32, #tpu.memory_space<vmem>>, vector<1x2x32x512xf32>
    %4 = vector.shape_cast %3 : vector<1x2x32x512xf32> to vector<2x32x512xf32>
    %5 = vector.shape_cast %4 : vector<2x32x512xf32> to vector<64x512xf32>
    %6 = tpu.concatenate %2, %5 in 0 : vector<256x512xf32>, vector<64x512xf32> -> vector<320x512xf32>
    %7 = arith.truncf %6 : vector<320x512xf32> to vector<320x512xbf16>
    %c0_7 = arith.constant 0 : index
    %c0_8 = arith.constant 0 : index
    %8 = vector.load %arg4[%c0_7, %c0_8] : memref<512x128xbf16, #tpu.memory_space<vmem>>, vector<512x128xbf16>
    %cst = arith.constant dense<0.000000e+00> : vector<320x128xf32>
    %9 = tpu.matmul %7, %8, %cst {dimension_numbers = #tpu.dot_dimension_numbers<[1], [0], [0], [1], [0, 0, 1, 1], [], []>} : vector<320x512xbf16>, vector<512x128xbf16>, vector<320x128xf32> -> vector<320x128xf32>
    %c0_9 = arith.constant 0 : index
    %c0_10 = arith.constant 0 : index
    %10 = vector.load %arg5[%c0_9, %c0_10] : memref<1x128xf32, #tpu.memory_space<vmem>>, vector<1x128xf32>
    %11 = vector.broadcast %10 : vector<1x128xf32> to vector<320x128xf32>
    %12 = arith.addf %9, %11 : vector<320x128xf32>
    %cst_11 = arith.constant 0.000000e+00 : f32
    %13 = vector.broadcast %cst_11 : f32 to vector<320x128xf32>
    %14 = arith.maximumf %12, %13 : vector<320x128xf32>
    %15 = vector.extract_strided_slice %14 {offsets = [0, 0], sizes = [256, 128], strides = [1, 1]} : vector<320x128xf32> to vector<256x128xf32>
    %c0_i32 = arith.constant 0 : i32
    %16 = arith.cmpi sgt, %arg1, %c0_i32 : i32
    %17 = vector.extract_strided_slice %14 {offsets = [256, 0], sizes = [32, 128], strides = [1, 1]} : vector<320x128xf32> to vector<32x128xf32>
    %cst_12 = arith.constant 0.000000e+00 : f32
    %18 = vector.broadcast %cst_12 : f32 to vector<32x128xf32>
    %19 = arith.select %16, %17, %18 : vector<32x128xf32>
    %c3_i32 = arith.constant 3 : i32
    %20 = arith.cmpi slt, %arg1, %c3_i32 : i32
    %21 = vector.extract_strided_slice %14 {offsets = [288, 0], sizes = [32, 128], strides = [1, 1]} : vector<320x128xf32> to vector<32x128xf32>
    %cst_13 = arith.constant 0.000000e+00 : f32
    %22 = vector.broadcast %cst_13 : f32 to vector<32x128xf32>
    %23 = arith.select %20, %21, %22 : vector<32x128xf32>
    %cst_14 = arith.constant 0.000000e+00 : f32
    %24 = vector.broadcast %cst_14 : f32 to vector<8x128xf32>
    %25 = tpu.concatenate %24, %19, %15, %23, %24 in 0 : vector<8x128xf32>, vector<32x128xf32>, vector<256x128xf32>, vector<32x128xf32>, vector<8x128xf32> -> vector<336x128xf32>
    %26 = arith.truncf %25 : vector<336x128xf32> to vector<336x128xbf16>
    %27 = tpu.iota {dimensions = array<i32: 0>} : vector<256x1xi32>
    %c32_i32 = arith.constant 32 : i32
    %c0_i32_15 = arith.constant 0 : i32
    %28 = arith.cmpi eq, %c32_i32, %c0_i32_15 : i32
    %c1_i32 = arith.constant 1 : i32
    %29 = arith.select %28, %c1_i32, %c32_i32 : i32
    %30 = vector.broadcast %29 : i32 to vector<256x1xi32>
    %31 = arith.remsi %27, %30 : vector<256x1xi32>
    %c0_i32_16 = arith.constant 0 : i32
    %32 = vector.broadcast %c0_i32_16 : i32 to vector<256x1xi32>
    %33 = arith.cmpi ne, %31, %32 : vector<256x1xi32>
    %c0_i32_17 = arith.constant 0 : i32
    %34 = vector.broadcast %c0_i32_17 : i32 to vector<256x1xi32>
    %35 = arith.cmpi slt, %31, %34 : vector<256x1xi32>
    %c0_i32_18 = arith.constant 0 : i32
    %36 = arith.cmpi slt, %29, %c0_i32_18 : i32
    %37 = vector.broadcast %36 : i1 to vector<256x1xi1>
    %38 = vector.broadcast %37 : vector<256x1xi1> to vector<256x1xi1>
    %39 = arith.xori %35, %38 : vector<256x1xi1>
    %40 = arith.andi %39, %33 : vector<256x1xi1>
    %41 = vector.broadcast %29 : i32 to vector<256x1xi32>
    %42 = arith.addi %31, %41 : vector<256x1xi32>
    %43 = arith.select %40, %42, %31 : vector<256x1xi1>, vector<256x1xi32>
    %c1_i32_19 = arith.constant 1 : i32
    %44 = vector.broadcast %c1_i32_19 : i32 to vector<256x1xi32>
    %45 = arith.cmpi sge, %43, %44 : vector<256x1xi32>
    %c30_i32 = arith.constant 30 : i32
    %46 = vector.broadcast %c30_i32 : i32 to vector<256x1xi32>
    %47 = arith.cmpi sle, %43, %46 : vector<256x1xi32>
    %48 = vector.extract_strided_slice %26 {offsets = [7, 0], sizes = [256, 128], strides = [1, 1]} : vector<336x128xbf16> to vector<256x128xbf16>
    %cst_20 = arith.constant 0.000000e+00 : bf16
    %49 = vector.shape_cast %45 : vector<256x1xi1> to vector<256x1xi1>
    %50 = vector.broadcast %49 : vector<256x1xi1> to vector<256x128xi1>
    %51 = vector.broadcast %cst_20 : bf16 to vector<256x128xbf16>
    %52 = arith.select %50, %48, %51 : vector<256x128xi1>, vector<256x128xbf16>
    %53 = vector.extract_strided_slice %26 {offsets = [8, 0], sizes = [256, 128], strides = [1, 1]} : vector<336x128xbf16> to vector<256x128xbf16>
    %54 = vector.extract_strided_slice %26 {offsets = [9, 0], sizes = [256, 128], strides = [1, 1]} : vector<336x128xbf16> to vector<256x128xbf16>
    %cst_21 = arith.constant 0.000000e+00 : bf16
    %55 = vector.shape_cast %47 : vector<256x1xi1> to vector<256x1xi1>
    %56 = vector.broadcast %55 : vector<256x1xi1> to vector<256x128xi1>
    %57 = vector.broadcast %cst_21 : bf16 to vector<256x128xbf16>
    %58 = arith.select %56, %54, %57 : vector<256x128xi1>, vector<256x128xbf16>
    %59 = vector.extract_strided_slice %26 {offsets = [39, 0], sizes = [256, 128], strides = [1, 1]} : vector<336x128xbf16> to vector<256x128xbf16>
    %cst_22 = arith.constant 0.000000e+00 : bf16
    %60 = vector.shape_cast %45 : vector<256x1xi1> to vector<256x1xi1>
    %61 = vector.broadcast %60 : vector<256x1xi1> to vector<256x128xi1>
    %62 = vector.broadcast %cst_22 : bf16 to vector<256x128xbf16>
    %63 = arith.select %61, %59, %62 : vector<256x128xi1>, vector<256x128xbf16>
    %64 = vector.extract_strided_slice %26 {offsets = [40, 0], sizes = [256, 128], strides = [1, 1]} : vector<336x128xbf16> to vector<256x128xbf16>
    %65 = vector.extract_strided_slice %26 {offsets = [41, 0], sizes = [256, 128], strides = [1, 1]} : vector<336x128xbf16> to vector<256x128xbf16>
    %cst_23 = arith.constant 0.000000e+00 : bf16
    %66 = vector.shape_cast %47 : vector<256x1xi1> to vector<256x1xi1>
    %67 = vector.broadcast %66 : vector<256x1xi1> to vector<256x128xi1>
    %68 = vector.broadcast %cst_23 : bf16 to vector<256x128xbf16>
    %69 = arith.select %67, %65, %68 : vector<256x128xi1>, vector<256x128xbf16>
    %70 = vector.extract_strided_slice %26 {offsets = [71, 0], sizes = [256, 128], strides = [1, 1]} : vector<336x128xbf16> to vector<256x128xbf16>
    %cst_24 = arith.constant 0.000000e+00 : bf16
    %71 = vector.shape_cast %45 : vector<256x1xi1> to vector<256x1xi1>
    %72 = vector.broadcast %71 : vector<256x1xi1> to vector<256x128xi1>
    %73 = vector.broadcast %cst_24 : bf16 to vector<256x128xbf16>
    %74 = arith.select %72, %70, %73 : vector<256x128xi1>, vector<256x128xbf16>
    %75 = vector.extract_strided_slice %26 {offsets = [72, 0], sizes = [256, 128], strides = [1, 1]} : vector<336x128xbf16> to vector<256x128xbf16>
    %76 = vector.extract_strided_slice %26 {offsets = [73, 0], sizes = [256, 128], strides = [1, 1]} : vector<336x128xbf16> to vector<256x128xbf16>
    %cst_25 = arith.constant 0.000000e+00 : bf16
    %77 = vector.shape_cast %47 : vector<256x1xi1> to vector<256x1xi1>
    %78 = vector.broadcast %77 : vector<256x1xi1> to vector<256x128xi1>
    %79 = vector.broadcast %cst_25 : bf16 to vector<256x128xbf16>
    %80 = arith.select %78, %76, %79 : vector<256x128xi1>, vector<256x128xbf16>
    %81 = tpu.concatenate %52, %53, %58, %63, %64, %69, %74, %75, %80 in 1 : vector<256x128xbf16>, vector<256x128xbf16>, vector<256x128xbf16>, vector<256x128xbf16>, vector<256x128xbf16>, vector<256x128xbf16>, vector<256x128xbf16>, vector<256x128xbf16>, vector<256x128xbf16> -> vector<256x1152xbf16>
    %c0_26 = arith.constant 0 : index
    %c0_27 = arith.constant 0 : index
    %82 = vector.load %arg6[%c0_26, %c0_27] : memref<1152x128xbf16, #tpu.memory_space<vmem>>, vector<1152x128xbf16>
    %cst_28 = arith.constant dense<0.000000e+00> : vector<256x128xf32>
    %83 = tpu.matmul %81, %82, %cst_28 {dimension_numbers = #tpu.dot_dimension_numbers<[1], [0], [0], [1], [0, 0, 1, 1], [], []>} : vector<256x1152xbf16>, vector<1152x128xbf16>, vector<256x128xf32> -> vector<256x128xf32>
    %c0_29 = arith.constant 0 : index
    %c0_30 = arith.constant 0 : index
    %84 = vector.load %arg7[%c0_29, %c0_30] : memref<1x128xf32, #tpu.memory_space<vmem>>, vector<1x128xf32>
    %85 = vector.broadcast %84 : vector<1x128xf32> to vector<256x128xf32>
    %86 = arith.addf %83, %85 : vector<256x128xf32>
    %cst_31 = arith.constant 0.000000e+00 : f32
    %87 = vector.broadcast %cst_31 : f32 to vector<256x128xf32>
    %88 = arith.maximumf %86, %87 : vector<256x128xf32>
    %89 = arith.truncf %88 : vector<256x128xf32> to vector<256x128xbf16>
    %c0_32 = arith.constant 0 : index
    %c0_33 = arith.constant 0 : index
    %90 = vector.load %arg8[%c0_32, %c0_33] : memref<128x512xbf16, #tpu.memory_space<vmem>>, vector<128x512xbf16>
    %cst_34 = arith.constant dense<0.000000e+00> : vector<256x512xf32>
    %91 = tpu.matmul %89, %90, %cst_34 {dimension_numbers = #tpu.dot_dimension_numbers<[1], [0], [0], [1], [0, 0, 1, 1], [], []>} : vector<256x128xbf16>, vector<128x512xbf16>, vector<256x512xf32> -> vector<256x512xf32>
    %c0_35 = arith.constant 0 : index
    %c0_36 = arith.constant 0 : index
    %92 = vector.load %arg9[%c0_35, %c0_36] : memref<1x512xf32, #tpu.memory_space<vmem>>, vector<1x512xf32>
    %93 = vector.broadcast %92 : vector<1x512xf32> to vector<256x512xf32>
    %94 = arith.addf %91, %93 : vector<256x512xf32>
    %95 = arith.addf %94, %2 : vector<256x512xf32>
    %cst_37 = arith.constant 0.000000e+00 : f32
    %96 = vector.broadcast %cst_37 : f32 to vector<256x512xf32>
    %97 = arith.maximumf %95, %96 : vector<256x512xf32>
    %98 = vector.shape_cast %97 : vector<256x512xf32> to vector<8x32x512xf32>
    %c0_38 = arith.constant 0 : index
    %c0_39 = arith.constant 0 : index
    %c0_40 = arith.constant 0 : index
    %c0_41 = arith.constant 0 : index
    %99 = vector.load %arg10[%c0_38, %c0_39, %c0_40, %c0_41] : memref<1x8x32x512xf32, #tpu.memory_space<vmem>>, vector<1x8x32x512xf32>
    %100 = vector.shape_cast %99 : vector<1x8x32x512xf32> to vector<8x32x512xf32>
    %101 = vector.shape_cast %98 : vector<8x32x512xf32> to vector<1x8x32x512xf32>
    tpu.vector_store %arg10[%c0_38, %c0_39, %c0_40, %c0_41], %101 {strides = array<i32>} : memref<1x8x32x512xf32, #tpu.memory_space<vmem>>, vector<1x8x32x512xf32>,
    return
  }
  func.func @transform_0(%arg0: i32, %arg1: i32) -> (i32, i32, i32, i32) {
    %c0_i32 = arith.constant 0 : i32
    %c0_i32_0 = arith.constant 0 : i32
    %c0_i32_1 = arith.constant 0 : i32
    return %arg0, %arg1, %c0_i32, %c0_i32_0 : i32, i32, i32, i32
  }
  func.func @transform_1(%arg0: i32, %arg1: i32) -> (i32, i32, i32, i32) {
    %c0_i32 = arith.constant 0 : i32
    %c0_i32_0 = arith.constant 0 : i32
    %c0_i32_1 = arith.constant 0 : i32
    return %arg0, %arg1, %c0_i32, %c0_i32_0 : i32, i32, i32, i32
  }
  func.func @transform_2(%arg0: i32, %arg1: i32) -> (i32, i32) {
    %c0_i32 = arith.constant 0 : i32
    %c0_i32_0 = arith.constant 0 : i32
    %c0_i32_1 = arith.constant 0 : i32
    return %c0_i32, %c0_i32_0 : i32, i32
  }
  func.func @transform_3(%arg0: i32, %arg1: i32) -> (i32, i32) {
    %c0_i32 = arith.constant 0 : i32
    %c0_i32_0 = arith.constant 0 : i32
    %c0_i32_1 = arith.constant 0 : i32
    return %c0_i32, %c0_i32_0 : i32, i32
  }
  func.func @transform_4(%arg0: i32, %arg1: i32) -> (i32, i32) {
    %c0_i32 = arith.constant 0 : i32
    %c0_i32_0 = arith.constant 0 : i32
    %c0_i32_1 = arith.constant 0 : i32
    return %c0_i32, %c0_i32_0 : i32, i32
  }
  func.func @transform_5(%arg0: i32, %arg1: i32) -> (i32, i32) {
    %c0_i32 = arith.constant 0 : i32
    %c0_i32_0 = arith.constant 0 : i32
    %c0_i32_1 = arith.constant 0 : i32
    return %c0_i32, %c0_i32_0 : i32, i32
  }
  func.func @transform_6(%arg0: i32, %arg1: i32) -> (i32, i32) {
    %c0_i32 = arith.constant 0 : i32
    %c0_i32_0 = arith.constant 0 : i32
    %c0_i32_1 = arith.constant 0 : i32
    return %c0_i32, %c0_i32_0 : i32, i32
  }
  func.func @transform_7(%arg0: i32, %arg1: i32) -> (i32, i32) {
    %c0_i32 = arith.constant 0 : i32
    %c0_i32_0 = arith.constant 0 : i32
    %c0_i32_1 = arith.constant 0 : i32
    return %c0_i32, %c0_i32_0 : i32, i32
  }
  func.func @transform_8(%arg0: i32, %arg1: i32) -> (i32, i32, i32, i32) {
    %c0_i32 = arith.constant 0 : i32
    %c0_i32_0 = arith.constant 0 : i32
    %c0_i32_1 = arith.constant 0 : i32
    return %arg0, %arg1, %c0_i32, %c0_i32_0 : i32, i32, i32, i32
  }
}

</mosaic_0001>

<bundles_post_ra>
// kernel: tpu_custom_call.1
= control target key start
LH: loop header
LB: loop body
LE: loop exit
PB: predicated region body
PF: predicated region fallthrough
CT: control target
= control target key end

     0   :  { %s11433_s0 = inlined_call_operand.hbm [shape: f32[2,32,32,512], index: 0, kind: input, shape index: {}]   ;;  %s11434_s1 = inlined_call_operand.hbm [shape: f32[2,8,32,512], index: 1, kind: input, shape index: {}]   ;;  %s11435_s2 = inlined_call_operand.hbm [shape: bf16[512,128], index: 2, kind: input, shape index: {}]   ;;  %s11436_s3 = inlined_call_operand.hbm [shape: f32[1,128], index: 3, kind: input, shape index: {}]   ;;  %s11437_s4 = inlined_call_operand.hbm [shape: bf16[1152,128], index: 4, kind: input, shape index: {}]   ;;  %s11438_s5 = inlined_call_operand.hbm [shape: f32[1,128], index: 5, kind: input, shape index: {}]   ;;  %s11439_s6 = inlined_call_operand.hbm [shape: bf16[128,512], index: 6, kind: input, shape index: {}]   ;;  %s11440_s7 = inlined_call_operand.hbm [shape: f32[1,512], index: 7, kind: input, shape index: {}]   ;;  %s11441_s8 = inlined_call_operand.hbm [shape: f32[2,32,32,512], index: 8, kind: output, shape index: {}]  }
   0x1   :  { %11554 = sst [smem:[#allocation91_spill]] %s11433_s0 }
   0x2   :  { %11555 = sst [smem:[#allocation92_spill]] %s11435_s2 }
   0x3   :  { %11556 = sst [smem:[#allocation93_spill]] %s11436_s3 }
   0x4   :  { %11557 = sst [smem:[#allocation94_spill]] %s11437_s4 }
   0x5   :  { %11558 = sst [smem:[#allocation95_spill]] %s11438_s5 }
   0x6   :  { %11559 = sst [smem:[#allocation96_spill]] %s11439_s6 }
   0x7   :  { %11560 = sst [smem:[#allocation97_spill]] %s11440_s7 }
   0x8   :  { %11561 = sst [smem:[#allocation98_spill]] %s11441_s8 }
   0x9   :  { %13 = vsyncpa [#allocation3], 0 }
   0xa   :  { %15 = vsyncpa [#allocation3 + $0x1], 0 }
   0xb   :  { %16 = vsyncpa [#allocation6], 0 }
   0xc   :  { %18 = vsyncpa [#allocation6 + $0x1], 0 }
   0xd   :  { %19 = vsyncpa [#allocation9], 0 }
   0xe   :  { %20 = vsyncpa [#allocation12], 0 }
   0xf   :  { %21 = vsyncpa [#allocation15], 0 }
  0x10   :  { %22 = vsyncpa [#allocation4], 0 }
  0x11   :  { %24 = vsyncpa [#allocation4 + $0x1], 0  ;;  %s8578_s27 = smov 0   ;;  %s8580_s28 = smov 0  }
  0x12   :  { %s8582_s29 = smov 0   ;;  %s8584_s30 = smov 0  }
  0x13   :  { %s8586_s9 = smov 0   ;;  %s8588_s10 = smov 0  }
  0x14   :  { %s8590_s11 = smov 0   ;;  %s8592_s12 = smov 0  }
  0x15 LB: > { %11562 = sst [smem:[#allocation24_spill]] %s8495_s30  ;;  %s8619_s13 = sadd.s32 4294967295, %s8511_s12   ;;  %s8511_s12 = sphi %s8592_s12, %s30_s12   ;;  %s8507_s11 = sphi %s8590_s11, %s11880_s11   ;;  %s8503_s10 = sphi %s8588_s10, %s11879_s10   ;;  %s8499_s9 = sphi %s8586_s9, %s11878_s9   ;;  %s8495_s30 = sphi %s8584_s30, %s11877_s30   ;;  %s8491_s29 = sphi %s8582_s29, %s11876_s29   ;;  %s8487_s28 = sphi %s8580_s28, %s11875_s28   ;;  %s8483_s27 = sphi %s8578_s27, %s11874_s27  }
  0x16   : > { %11563 = sst [smem:[#allocation25_spill]] %s8499_s9  ;;  %p6865_p0 = scmp.ge.s32.totalorder %s8511_s12, 1 }
  0x17   : > { %p11445_p1 = scmp.eq.s32.totalorder %s8619_s13, 0  ;;  %p257_p2 = scmp.lt.s32.totalorder %s8511_s12, 9 }
  0x18   : > { %s8513_s15 = smov [#allocation7]   ;;  %s8514_s18 = smov [#allocation8]  }
  0x19   : > { %p8624_p3 = pnand %p6865_p0, %p257_p2  ;;  %s269_s16 = sshll.u32 %s8513_s15, 4  ;;  %s8628_s16 = int_to_ptr.vmem [resolvable:$true] %s269_s16 }
  0x1a   : > { %s283_s19 = sshll.u32 %s8514_s18, 4  ;;  %s8515_s20 = smov [#allocation11]   ;;  %s8638_s19 = int_to_ptr.vmem [resolvable:$true] %s283_s19 }
  0x1b   : > { %s11564_s14 = scalar_select %p8624_p3, 1, 0 }
  0x1c   : > { %p7759_p4 = pneg %p8624_p3  ;;  %s8640_s21 = sshll.u32 %s8515_s20, 4  ;;  %s308_s21 = int_to_ptr.vmem [resolvable:$true] %s8640_s21 }
  0x1d   : > { %11565 = sst [smem:[#allocation26_spill]] %s11564_s14  ;;  %s11567_s2 = sld [smem:[#allocation92_spill]] }
  0x1e   : > { %p8634_p5 = pnand %p7759_p4, %p11445_p1 }
  0x20   : > { %p8650_p7 = pneg %p8634_p5 }
  0x23   : > { %s8165_s24 = scalar_lea.hbm %s11567_s2, 4096 }
  0x24   : > { %p8166_p6 = scmp.ne.s32.totalorder %s11567_s2, %s8165_s24  ;;  %p8172_p10 = scmp.lt.u32.totalorder %s8165_s24, %s11567_s2 }
  0x26   : > { %p8168_p8 = pnand %p8650_p7, %p8166_p6 }
  0x28   : > { %p8169_p9 = pneg %p8168_p8 }
  0x2a   : > { %p8174_p11 = pnand %p8172_p10, %p8169_p9 }
  0x2c   : > { %8177 = shalt.err (!%p8174_p11)
}
  0x2d   : > { %s8178_s22 = scalar_lea.vmem %s8628_s16, 4096  ;;  %p8186_p2 = scmp.lt.s32.totalorder %s8628_s16, %s8628_s16 }
  0x2e   : > { %p8179_p12 = scmp.ne.s32.totalorder %s8628_s16, %s8178_s22  ;;  %p8187_p4 = scmp.lt.s32.totalorder %s8178_s22, %s8178_s22 }
  0x30   : > { %p8181_p13 = pnand %p8179_p12, %p8650_p7  ;;  %p8188_p6 = por %p8187_p4, %p8186_p2 }
  0x32   : > { %p8182_p0 = pneg %p8181_p13 }
  0x34   : > { %p8189_p8 = pnand %p8188_p6, %p8182_p0 }
  0x36   : > { %8192 = shalt.err (!%p8189_p8)
}
  0x37   : > { %s11447_s23 = smov 64   ;;  %s8517_s24 = smov 4  }
  0x38   : > { %7762 = dma.hbm_to_vmem [thread:$0]  (!%p8634_p5), %s11567_s2, 4096, %s8628_s16, [#allocation6], %s11447_s23, %s11447_s23, %s8517_s24  }
  0x39   : > { %s11569_s3 = sld [smem:[#allocation93_spill]] }
  0x3f   : > { %s8193_s22 = scalar_lea.hbm %s11569_s3, 16 }
  0x40   : > { %p8194_p9 = scmp.ne.s32.totalorder %s11569_s3, %s8193_s22  ;;  %p8200_p12 = scmp.lt.u32.totalorder %s8193_s22, %s11569_s3 }
  0x42   : > { %p8196_p10 = pnand %p8194_p9, %p8650_p7 }
  0x44   : > { %p8197_p11 = pneg %p8196_p10 }
  0x46   : > { %p8202_p13 = pnand %p8200_p12, %p8197_p11 }
  0x48   : > { %8205 = shalt.err (!%p8202_p13)
}
  0x49   : > { %s8206_s16 = scalar_lea.vmem %s8638_s19, 16  ;;  %s8213_s8 = scalar_lea.vmem %s8638_s19, 32 }
  0x4a   : > { %p8207_p0 = scmp.ne.s32.totalorder %s8638_s19, %s8206_s16  ;;  %p8214_p6 = scmp.lt.s32.totalorder %s8638_s19, %s8638_s19 }
  0x4b   : > { %p8215_p8 = scmp.lt.s32.totalorder %s8213_s8, %s8206_s16 }
  0x4c   : > { %p8209_p2 = pnand %p8207_p0, %p8650_p7 }
  0x4d   : > { %p8216_p9 = por %p8215_p8, %p8214_p6 }
  0x4e   : > { %p8210_p4 = pneg %p8209_p2 }
  0x50   : > { %p8217_p10 = pnand %p8216_p9, %p8210_p4 }
  0x52   : > { %8220 = shalt.err (!%p8217_p10)
}
  0x53   : > { %7765 = dma.hbm_to_vmem [thread:$0]  (!%p8634_p5), %s11569_s3, 16, %s8638_s19, [#allocation9]  }
  0x54   : > { %s11570_s5 = sld [smem:[#allocation95_spill]] }
  0x5a   : > { %s8221_s26 = scalar_lea.hbm %s11570_s5, 16 }
  0x5b   : > { %p8222_p11 = scmp.ne.s32.totalorder %s11570_s5, %s8221_s26  ;;  %p8228_p0 = scmp.lt.u32.totalorder %s8221_s26, %s11570_s5 }
  0x5d   : > { %p8224_p12 = pnand %p8222_p11, %p8650_p7 }
  0x5f   : > { %p8225_p13 = pneg %p8224_p12 }
  0x61   : > { %p8230_p2 = pnand %p8228_p0, %p8225_p13 }
  0x63   : > { %8233 = shalt.err (!%p8230_p2)
}
  0x64   : > { %s8234_s8 = scalar_lea.vmem %s308_s21, 16  ;;  %s8241_s19 = scalar_lea.vmem %s308_s21, 32 }
  0x65   : > { %p8235_p4 = scmp.ne.s32.totalorder %s308_s21, %s8234_s8  ;;  %p8242_p9 = scmp.lt.s32.totalorder %s308_s21, %s308_s21 }
  0x66   : > { %p8243_p10 = scmp.lt.s32.totalorder %s8241_s19, %s8234_s8 }
  0x67   : > { %p8237_p6 = pnand %p8235_p4, %p8650_p7 }
  0x68   : > { %p8244_p1 = por %p8243_p10, %p8242_p9 }
  0x69   : > { %p8238_p8 = pneg %p8237_p6 }
  0x6b   : > { %p8245_p3 = pnand %p8244_p1, %p8238_p8 }
  0x6d   : > { %8248 = shalt.err (!%p8245_p3)
}
  0x6e   : > { %7771 = dma.hbm_to_vmem [thread:$0]  (!%p8634_p5), %s11570_s5, 16, %s308_s21, [#allocation12]  }
  0x6f   : > { %s8518_s14 = smov [#allocation10]   ;;  %s8519_s26 = smov [#allocation13]  }
  0x70   : > { %s293_s25 = sshll.u32 %s8518_s14, 4  ;;  %s317_s18 = sshll.u32 %s8519_s26, 4  ;;  %s294_s25 = int_to_ptr.vmem [resolvable:$true] %s293_s25  ;;  %s318_s18 = int_to_ptr.vmem [resolvable:$true] %s317_s18 }
  0x71   : > { %s11571_s4 = sld [smem:[#allocation94_spill]] }
  0x77   : > { %s8249_s16 = scalar_lea.hbm %s11571_s4, 9216 }
  0x78   : > { %p8250_p1 = scmp.ne.s32.totalorder %s11571_s4, %s8249_s16  ;;  %p8256_p12 = scmp.lt.u32.totalorder %s8249_s16, %s11571_s4 }
  0x7a   : > { %p8252_p3 = pnand %p8250_p1, %p8650_p7 }
  0x7c   : > { %p8253_p11 = pneg %p8252_p3 }
  0x7e   : > { %p8258_p13 = pnand %p8256_p12, %p8253_p11 }
  0x80   : > { %8261 = shalt.err (!%p8258_p13)
}
  0x81   : > { %s8262_s21 = scalar_lea.vmem %s294_s25, 9216  ;;  %p8270_p6 = scmp.lt.s32.totalorder %s294_s25, %s294_s25 }
  0x82   : > { %p8263_p0 = scmp.ne.s32.totalorder %s294_s25, %s8262_s21  ;;  %p8271_p8 = scmp.lt.s32.totalorder %s8262_s21, %s8262_s21 }
  0x84   : > { %p8265_p2 = pnand %p8263_p0, %p8650_p7  ;;  %p8272_p9 = por %p8271_p8, %p8270_p6 }
  0x86   : > { %p8266_p4 = pneg %p8265_p2 }
  0x88   : > { %p8273_p10 = pnand %p8272_p9, %p8266_p4 }
  0x8a   : > { %8276 = shalt.err (!%p8273_p10)
}
  0x8b   : > { %s11572_s9 = smov 64   ;;  %s11573_s6 = sld [smem:[#allocation96_spill]] }
  0x8c   : > { %7768 = dma.hbm_to_vmem [thread:$0]  (!%p8634_p5), %s11571_s4, 9216, %s294_s25, [#allocation9], %s11572_s9, %s11572_s9, %s8517_s24  }
  0x91   : > { %s8277_s22 = scalar_lea.hbm %s11573_s6, 4096 }
  0x92   : > { %p8278_p1 = scmp.ne.s32.totalorder %s11573_s6, %s8277_s22  ;;  %p8284_p12 = scmp.lt.u32.totalorder %s8277_s22, %s11573_s6 }
  0x94   : > { %p8280_p3 = pnand %p8278_p1, %p8650_p7 }
  0x96   : > { %p8281_p11 = pneg %p8280_p3 }
  0x98   : > { %p8286_p13 = pnand %p8284_p12, %p8281_p11 }
  0x9a   : > { %8289 = shalt.err (!%p8286_p13)
}
  0x9b   : > { %s8290_s21 = scalar_lea.vmem %s318_s18, 4096  ;;  %p8298_p6 = scmp.lt.s32.totalorder %s318_s18, %s318_s18 }
  0x9c   : > { %p8291_p0 = scmp.ne.s32.totalorder %s318_s18, %s8290_s21  ;;  %p8299_p8 = scmp.lt.s32.totalorder %s8290_s21, %s8290_s21 }
  0x9e   : > { %p8293_p2 = pnand %p8291_p0, %p8650_p7  ;;  %p8300_p9 = por %p8299_p8, %p8298_p6 }
  0xa0   : > { %p8294_p4 = pneg %p8293_p2 }
  0xa2   : > { %p8301_p10 = pnand %p8300_p9, %p8294_p4 }
  0xa4   : > { %8304 = shalt.err (!%p8301_p10)
}
  0xa5   : > { %s8520_s24 = smov 256   ;;  %s8521_s25 = smov 16  }
  0xa6   : > { %7774 = dma.hbm_to_vmem [thread:$0]  (!%p8634_p5), %s11573_s6, 4096, %s318_s18, [#allocation12], %s8520_s24, %s8520_s24, %s8521_s25  }
  0xa7   : > { %s8522_s14 = smov [#allocation14]   ;;  %s11574_s7 = sld [smem:[#allocation97_spill]] }
  0xa8   : > { %s331_s26 = sshll.u32 %s8522_s14, 4  ;;  %s332_s26 = int_to_ptr.vmem [resolvable:$true] %s331_s26 }
  0xad   : > { %s8305_s16 = scalar_lea.hbm %s11574_s7, 64 }
  0xae   : > { %p8306_p1 = scmp.ne.s32.totalorder %s11574_s7, %s8305_s16  ;;  %p8312_p12 = scmp.lt.u32.totalorder %s8305_s16, %s11574_s7 }
  0xb0   : > { %p8308_p3 = pnand %p8306_p1, %p8650_p7 }
  0xb2   : > { %p8309_p11 = pneg %p8308_p3 }
  0xb4   : > { %p8314_p13 = pnand %p8312_p12, %p8309_p11 }
  0xb6   : > { %8317 = shalt.err (!%p8314_p13)
}
  0xb7   : > { %s8318_s18 = scalar_lea.vmem %s332_s26, 64  ;;  %p8326_p6 = scmp.lt.s32.totalorder %s332_s26, %s332_s26 }
  0xb8   : > { %p8319_p0 = scmp.ne.s32.totalorder %s332_s26, %s8318_s18  ;;  %p8327_p8 = scmp.lt.s32.totalorder %s8318_s18, %s8318_s18 }
  0xba   : > { %p8321_p2 = pnand %p8319_p0, %p8650_p7  ;;  %p8328_p9 = por %p8327_p8, %p8326_p6 }
  0xbc   : > { %p8322_p4 = pneg %p8321_p2 }
  0xbe   : > { %p8329_p10 = pnand %p8328_p9, %p8322_p4 }
  0xc0   : > { %8332 = shalt.err (!%p8329_p10)
}
  0xc1   : > { %7777 = dma.hbm_to_vmem [thread:$0]  (!%p8634_p5), %s11574_s7, 64, %s332_s26, [#allocation15]  }
  0xc2   : > { %s6864_s15 = sadd.s32 4294967294, %s8511_s12   ;;  %s39_s9 = sadd.s32 1, %s8503_s10 }
  0xc3   : > { %p40_p7 = scmp.ge.s32.totalorder %s39_s9, 4  ;;  %s42_s17 = sadd.s32 1, %s8507_s11 }
  0xc4   : > { %s51_s23 = sadd.s32 1, %s8491_s29  ;;  %p58_p1 = scmp.ne.s32.totalorder %s8491_s29, %s8487_s28 }
  0xc5   : > { %s11882_s9 = smov (%p40_p7, %s39_s9), 0  ;;  %s11884_s17 = smov (!%p40_p7, %s42_s17), %s8507_s11 }
  0xc6   : > { %s47_s14 = ssub.s32 %s8503_s10, %s11882_s9  ;;  %p59_p3 = scmp.eq.s32.totalorder %s8511_s12, 0 }
  0xc7   : > { %p44_p11 = scmp.ge.s32.totalorder %s11884_s17, 2  ;;  %p64_p5 = scmp.ne.s32.totalorder %s8487_s28, %s8483_s27 }
  0xc8   : > { %p8788_p12 = por %p59_p3, %p58_p1  ;;  %p244_p13 = scmp.eq.s32.totalorder %s8619_s13, 7 }
  0xc9   : > { %s11886_s17 = smov (%p44_p11, %s11884_s17), 0  ;;  %p11577_p0 = scmp.eq.s32.totalorder %s8619_s13, 0 }
  0xca   : > { %11576 = sst [smem:[#allocation27_spill]] %s11886_s17  ;;  %p8801_p4 = por %p244_p13, %p58_p1 }
  0xcb   : > { %p8797_p2 = por %p11577_p0, %p64_p5  ;;  %s46_s16 = ssub.s32 %s8507_s11, %s11886_s17 }
  0xcc   : > { %s11579_s22 = scalar_select %p8801_p4, 1, 0 }
  0xcd   : > { %p250_p6 = scmp.eq.s32.totalorder %s6864_s15, 7  ;;  %s48_s8 = sor.u32 %s47_s14, %s46_s16 }
  0xce   : > { %p7795_p8 = scmp.lt.s32.totalorder %s8511_s12, 8  ;;  %p49_p9 = scmp.eq.s32.totalorder %s48_s8, 0 }
  0xcf   : > { %p8808_p10 = por %p250_p6, %p64_p5  ;;  %s8813_s30 = sand.u32 1, %s8491_s29  }
  0xd0   : > { %s7070_s21 = sshll.u32 %s8503_s10, 7  ;;  %s6873_s24 = sshll.u32 %s8813_s30, 10 }
  0xd1   : > { %s11580_s19 = scalar_select %p8808_p10, 1, 0 }
  0xd2   : > { %s8817_s18 = scalar_select %p49_p9, %s8491_s29, %s51_s23  }
  0xd3   : > { %s6876_s25 = sshll.u32 %s8507_s11, 9  ;;  %s346_s2 = scalar_lea.vmem [#allocation2], %s6873_s24 }
  0xd4   : > { %s353_s15 = sadd.s32 %s7070_s21, %s6876_s25  ;;  %s356_s3 = sshll.u32 %s346_s2, 4  ;;  %s8821_s3 = int_to_ptr.vmem [resolvable:$true] %s356_s3 }
  0xd5   : > { %s6877_s14 = sshll.u32 %s353_s15, 7  ;;  %s11581_s0 = sld [smem:[#allocation91_spill]] }
  0xd6   : > { %p8832_p7 = pnand %p7795_p8, %p8788_p12  ;;  %s343_s21 = scalar_lea.sflag [#allocation3], %s8813_s30 }
  0xd8   : > { %p8335_p3 = pneg %p8832_p7 }
  0xdb   : > { %s8826_s4 = scalar_lea.hbm %s11581_s0, %s6877_s14  ;;  %s8338_s15 = scalar_lea.hbm %s11581_s0, 131072 }
  0xdc   : > { %s8333_s24 = scalar_lea.hbm %s8826_s4, 16384  ;;  %p8339_p12 = scmp.lt.u32.totalorder %s8826_s4, %s11581_s0 }
  0xdd   : > { %p8334_p1 = scmp.ne.s32.totalorder %s8826_s4, %s8333_s24  ;;  %p8340_p13 = scmp.lt.u32.totalorder %s8338_s15, %s8333_s24 }
  0xde   : > { %p8342_p6 = scmp.lt.u32.totalorder %s8333_s24, %s8826_s4 }
  0xdf   : > { %p8336_p11 = pnand %p8335_p3, %p8334_p1  ;;  %p8341_p0 = por %p8340_p13, %p8339_p12 }
  0xe1   : > { %p8337_p5 = pneg %p8336_p11  ;;  %p8343_p8 = por %p8342_p6, %p8341_p0 }
  0xe3   : > { %p8344_p9 = pnand %p8343_p8, %p8337_p5 }
  0xe5   : > { %8347 = shalt.err (!%p8344_p9)
}
  0xe6   : > { %s8348_s8 = scalar_lea.vmem %s8821_s3, 16384  ;;  %s8523_s26 = smov [#allocation2]  }
  0xe7   : > { %p8349_p1 = scmp.ne.s32.totalorder %s8821_s3, %s8348_s8  ;;  %s8353_s25 = sshll.u32 %s8523_s26, 4  ;;  %s8354_s25 = int_to_ptr.vmem [resolvable:$false] %s8353_s25 }
  0xe8   : > { %s8355_s14 = scalar_lea.vmem %s8354_s25, 32768  ;;  %p8356_p4 = scmp.lt.s32.totalorder %s8821_s3, %s8354_s25 }
  0xe9   : > { %p8351_p11 = pnand %p8349_p1, %p8335_p3  ;;  %p8357_p12 = scmp.lt.s32.totalorder %s8355_s14, %s8348_s8 }
  0xeb   : > { %p8352_p10 = pneg %p8351_p11  ;;  %p8358_p13 = por %p8357_p12, %p8356_p4 }
  0xed   : > { %p8359_p0 = pnand %p8358_p13, %p8352_p10 }
  0xef   : > { %8362 = shalt.err (!%p8359_p0)
}
  0xf0   : > { %s8524_s24 = smov 512   ;;  %s8525_s15 = smov 32  }
  0xf1   : > { %7781 = dma.hbm_to_vmem [thread:$0]  (!%p8832_p7), %s8826_s4, 16384, %s8821_s3, %s343_s21, %s8524_s24, %s8524_s24, %s8525_s15  }
  0xf2   : > { %s6878_s16 = sshll.u32 %s8813_s30, 8  ;;  %s7071_s8 = sshll.u32 %s8503_s10, 5 }
  0xf3   : > { %s6881_s26 = sshll.u32 %s8507_s11, 7  ;;  %s370_s25 = scalar_lea.vmem [#allocation5], %s6878_s16 }
  0xf4   : > { %s380_s14 = sshll.u32 %s370_s25, 4  ;;  %s377_s2 = sadd.s32 %s7071_s8, %s6881_s26  ;;  %s8871_s14 = int_to_ptr.vmem [resolvable:$true] %s380_s14 }
  0xf5   : > { %s6882_s0 = sshll.u32 %s377_s2, 7  ;;  %s11583_s17 = sand.u32 1, %s8511_s12  }
  0xf6   : > { %s8876_s7 = scalar_lea.hbm %s11434_s1, %s6882_s0  ;;  %s8880_s3 = scalar_lea.sflag [#allocation6], %s11583_s17 }
  0xf7   : > { %s8363_s4 = scalar_lea.hbm %s8876_s7, 4096  ;;  %s8368_s21 = scalar_lea.hbm %s11434_s1, 32768 }
  0xf8   : > { %p8364_p4 = scmp.ne.s32.totalorder %s8876_s7, %s8363_s4  ;;  %p8369_p6 = scmp.lt.u32.totalorder %s8876_s7, %s11434_s1 }
  0xf9   : > { %p8370_p8 = scmp.lt.u32.totalorder %s8368_s21, %s8363_s4  ;;  %p8372_p1 = scmp.lt.u32.totalorder %s8363_s4, %s8876_s7 }
  0xfa   : > { %p8366_p10 = pnand %p8364_p4, %p8335_p3 }
  0xfb   : > { %p8371_p9 = por %p8370_p8, %p8369_p6 }
  0xfc   : > { %p8367_p5 = pneg %p8366_p10 }
  0xfd   : > { %p8373_p11 = por %p8372_p1, %p8371_p9 }
  0xff   : > { %p8374_p12 = pnand %p8373_p11, %p8367_p5 }
 0x101   : > { %8377 = shalt.err (!%p8374_p12)
}
 0x102   : > { %s8378_s6 = scalar_lea.vmem %s8871_s14, 4096  ;;  %s8526_s17 = smov [#allocation5]  }
 0x103   : > { %p8379_p13 = scmp.ne.s32.totalorder %s8871_s14, %s8378_s6  ;;  %s8383_s16 = sshll.u32 %s8526_s17, 4  ;;  %s8384_s16 = int_to_ptr.vmem [resolvable:$false] %s8383_s16 }
 0x104   : > { %s8385_s8 = scalar_lea.vmem %s8384_s16, 8192  ;;  %p8386_p10 = scmp.lt.s32.totalorder %s8871_s14, %s8384_s16 }
 0x105   : > { %p8381_p0 = pnand %p8379_p13, %p8335_p3  ;;  %p8387_p6 = scmp.lt.s32.totalorder %s8385_s8, %s8378_s6 }
 0x107   : > { %p8382_p4 = pneg %p8381_p0  ;;  %p8388_p8 = por %p8387_p6, %p8386_p10 }
 0x109   : > { %p8389_p9 = pnand %p8388_p8, %p8382_p4 }
 0x10b   : > { %8392 = shalt.err (!%p8389_p9)
}
 0x10c   : > { %7784 = dma.hbm_to_vmem [thread:$0]  (!%p8832_p7), %s8876_s7, 4096, %s8871_s14, %s8880_s3, %s8524_s24, %s8524_s24, %s8525_s15  }
 0x10d   : > { %s11584_s26 = sld [smem:[#allocation26_spill]] }
 0x113   : > { %p11585_p3 = scmp.ne.s32.totalorder %s11584_s26, 0 }
 0x115   : > { %392 = sbr.rel (%p11585_p3) target bundleno = 1877 (0x755), region = 52 }
 0x11c   : > { %s8912_s25 = sand.u32 1, %s8487_s28  }
 0x11d   : > { %s6884_s4 = sshll.u32 %s8912_s25, 10  ;;  %s395_s30 = scalar_lea.sflag [#allocation3], %s8912_s25 }
 0x11e   : > { %s8918_s23 = scalar_lea.vmem [#allocation2], %s6884_s4 }
 0x11f   : > { %8454 = dma.done.wait (%p8797_p2), %s395_s30, 16384  }
 0x120   : > { %8456 = vsyncadd (%p8797_p2), %s395_s30, 4294950912  ;;  %s403_s7 = sand.u32 1, %s8619_s13   ;;  %s6885_s24 = sshll.u32 %s8912_s25, 8 }
 0x121   : > { %s404_s15 = scalar_lea.sflag [#allocation6], %s403_s7  ;;  %s8926_s14 = scalar_lea.vmem [#allocation5], %s6885_s24 }
 0x122   : > { %8458 = dma.done.wait (%p8797_p2), %s404_s15, 4096  }
 0x123   : > { %8460 = vsyncadd (%p8797_p2), %s404_s15, 4294963200  ;;  %p11586_p7 = scmp.eq.s32.totalorder %s8619_s13, 0 }
 0x125   : > { %8462 = dma.done.wait (%p11586_p7), [#allocation6], 4096   ;;  %p11587_p5 = pmov %p11586_p7 }
 0x127   : > { %8464 = vsyncadd (%p11587_p5), [#allocation6], 4294963200  ;;  %p11588_p1 = pmov %p11587_p5 }
 0x129   : > { %8466 = dma.done.wait (%p11588_p1), [#allocation9], 9232   ;;  %p11589_p11 = pmov %p11588_p1 }
 0x12a   : > { %p11590_p12 = pmov %p11588_p1 }
 0x12b   : > { %8468 = vsyncadd (%p11589_p11), [#allocation9], 4294958064 }
 0x12c   : > { %8470 = dma.done.wait (%p11590_p12), [#allocation12], 4112   ;;  %p11591_p13 = pmov %p11588_p1 }
 0x12d   : > { %p11592_p2 = pmov %p11588_p1 }
 0x12e   : > { %8472 = vsyncadd (%p11591_p13), [#allocation12], 4294963184 }
 0x12f   : > { %8474 = dma.done.wait (%p11592_p2), [#allocation15], 64   ;;  %p11593_p0 = pmov %p11588_p1 }
 0x130   : > { %v11456_v0 = vmov 0   ;;  %v7884_v1 = vld [vmem:[#allocation7] sm:$0xff]   ;;  %v7885_v2 = vld [vmem:[#allocation7 + $0x8] sm:$0xff]   ;;  %v7886_v3 = vld [vmem:[#allocation7 + $0x10] sm:$0xff]   ;;  %vm8528_vm0 = vmmov 1   ;;  %s11637_s13 = sld [smem:[#allocation24_spill]] }
 0x131   : > { %8476 = vsyncadd (%p11593_p0), [#allocation15], 4294967232  ;;  %978 = vmatprep.subr.bf16.mxu0 %v11456_v0  ;;  %v7887_v4 = vld [vmem:[#allocation7 + $0x18] sm:$0xff]   ;;  %v7888_v5 = vld [vmem:[#allocation7 + $0x20] sm:$0xff]   ;;  %vm2098_vm8 = vsmask.f32 3328 }
 0x132   : > { %979 = vmatpush1.bf16.msra.mxu0 %v7884_v1  ;;  %v476_v6 = vld [vmem:[%s8918_s23 + $0x8] sm:$0xff]  ;;  %v7890_v10 = vld [vmem:[#allocation7 + $0x30] sm:$0xff]   ;;  %v7891_v11 = vld [vmem:[#allocation7 + $0x38] sm:$0xff]   ;;  %vm2698_vm11 = vsmask.f32 7424  ;;  %s11001_s2 = scalar_lea.vmem [#allocation16], %s6884_s4 }
 0x133   : > { %980 = vmatprep.subr.bf16.mxu0 %v11456_v0  ;;  %v480_v7 = vld [vmem:[%s8918_s23 + $0x28] sm:$0xff]  ;;  %v7892_v12 = vld [vmem:[#allocation7 + $0x40] sm:$0xff]   ;;  %v7894_v14 = vld [vmem:[#allocation7 + $0x50] sm:$0xff]   ;;  %vm2452_vm12 = vsmask.f32 4352  ;;  %s11868_s21 = sld [smem:[#allocation25_spill]] }
 0x134   : > { %v636_v8 = vpack.c.bf16 %v480_v7, %v476_v6  ;;  %v7889_v9 = vld [vmem:[#allocation7 + $0x28] sm:$0xff]   ;;  %v7895_v15 = vld [vmem:[#allocation7 + $0x58] sm:$0xff]   ;;  %v7896_v16 = vld [vmem:[#allocation7 + $0x60] sm:$0xff]   ;;  %s6690_s17 = sshll.u32 %s11001_s2, 4  ;;  %s11869_s4 = sld [smem:[#allocation98_spill]]  ;;  %s11371_s17 = int_to_ptr.vmem [resolvable:$true] %s6690_s17 }
 0x135   : > { %v7893_v13 = vld [vmem:[#allocation7 + $0x48] sm:$0xff]   ;;  %v7898_v18 = vld [vmem:[#allocation7 + $0x70] sm:$0xff]   ;;  %v7899_v19 = vld [vmem:[#allocation7 + $0x78] sm:$0xff]   ;;  %s6674_s7 = scalar_lea.sflag [#allocation4], %s8912_s25  ;;  %s8393_s24 = scalar_lea.vmem %s11371_s17, 16384 }
 0x136   : > { %981 = vmatpush1.bf16.msra.mxu0 %v7885_v2  ;;  %1010 = vmatprep.mubr.bf16.mxu0 %v636_v8  ;;  %v7897_v17 = vld [vmem:[#allocation7 + $0x68] sm:$0xff]   ;;  %v475_v20 = vld [vmem:[%s8918_s23] sm:$0xff]  ;;  %v7902_v32 = vld [vmem:[#allocation7 + $0x90] sm:$0xff]   ;;  %p1404_p4 = scmp.gt.s32.totalorder %s11637_s13, 0  ;;  %p1412_p10 = scmp.lt.s32.totalorder %s11637_s13, 3 }
 0x137   : > { %982 = vmatprep.subr.bf16.mxu0 %v11456_v0  ;;  %v479_v21 = vld [vmem:[%s8918_s23 + $0x20] sm:$0xff]  ;;  %v484_v22 = vld [vmem:[%s8918_s23 + $0x48] sm:$0xff]  ;;  %v7903_v39 = vld [vmem:[#allocation7 + $0x98] sm:$0xff]   ;;  %s7072_s5 = sshll.u32 %s11637_s13, 7  ;;  %p8394_p6 = scmp.ne.s32.totalorder %s11371_s17, %s8393_s24 }
 0x138   : > { %v488_v23 = vld [vmem:[%s8918_s23 + $0x68] sm:$0xff]  ;;  %v7900_v24 = vld [vmem:[#allocation7 + $0x80] sm:$0xff]   ;;  %v635_v25 = vpack.c.bf16 %v479_v21, %v475_v20  ;;  %v7906_v48 = vld [vmem:[#allocation7 + $0xb0] sm:$0xff]   ;;  %s9577_s20 = scalar_select %p1404_p4, 1, 0 }
 0x139   : > { %v640_v26 = vpack.c.bf16 %v488_v23, %v484_v22  ;;  %v483_v27 = vld [vmem:[%s8918_s23 + $0x40] sm:$0xff]  ;;  %v7901_v29 = vld [vmem:[#allocation7 + $0x88] sm:$0xff]   ;;  %v7907_v55 = vld [vmem:[#allocation7 + $0xb8] sm:$0xff]   ;;  %s9636_s3 = scalar_select %p1412_p10, 1, 0 }
 0x13a   : > { %983 = vmatpush1.bf16.msra.mxu0 %v7886_v3  ;;  %v487_v28 = vld [vmem:[%s8918_s23 + $0x60] sm:$0xff]  ;;  %v492_v30 = vld [vmem:[%s8918_s23 + $0x88] sm:$0xff]  ;;  %v7910_v1 = vld [vmem:[#allocation7 + $0xd0] sm:$0xff]   ;;  %s7066_s0 = sshll.u32 %s11868_s21, 9  ;;  %p11870_p8 = scmp.ne.s32.totalorder %s11579_s22, 0 }
 0x13b   : > { %984 = vmatprep.subr.bf16.mxu0 %v11456_v0  ;;  %v496_v31 = vld [vmem:[%s8918_s23 + $0xa8] sm:$0xff]  ;;  %v639_v33 = vpack.c.bf16 %v487_v28, %v483_v27  ;;  %v491_v35 = vld [vmem:[%s8918_s23 + $0x80] sm:$0xff]  ;;  %v7911_v8 = vld [vmem:[#allocation7 + $0xd8] sm:$0xff]   ;;  %s6687_s6 = sadd.s32 %s7072_s5, %s7066_s0 }
 0x13c   : > { %v644_v34 = vpack.c.bf16 %v496_v31, %v492_v30  ;;  %v495_v36 = vld [vmem:[%s8918_s23 + $0xa0] sm:$0xff]  ;;  %v500_v37 = vld [vmem:[%s8918_s23 + $0xc8] sm:$0xff]  ;;  %vm1987_vm1 = vmpackc.low %vm8528_vm0, %vm8528_vm0  ;;  %s7067_s16 = sshll.u32 %s6687_s6, 7  ;;  %p8395_p9 = pnand %p8394_p6, %p11870_p8 }
 0x13d   : > { %v504_v38 = vld [vmem:[%s8918_s23 + $0xe8] sm:$0xff]  ;;  %v7904_v40 = vld [vmem:[#allocation7 + $0xa0] sm:$0xff]   ;;  %v643_v41 = vpack.c.bf16 %v495_v36, %v491_v35  ;;  %s11377_s30 = scalar_lea.hbm %s11869_s4, %s7067_s16 }
 0x13e   : > { %985 = vmatpush1.bf16.msra.mxu0 %v7887_v4  ;;  %v648_v42 = vpack.c.bf16 %v504_v38, %v500_v37  ;;  %v499_v43 = vld [vmem:[%s8918_s23 + $0xc0] sm:$0xff]  ;;  %v508_v45 = vld [vmem:[%s8918_s23 + $0x108] sm:$0xff]  ;;  %p8396_p3 = pneg %p8395_p9 }
 0x13f   : > { %986 = vmatprep.subr.bf16.mxu0 %v11456_v0  ;;  %v503_v44 = vld [vmem:[%s8918_s23 + $0xe0] sm:$0xff]  ;;  %v512_v46 = vld [vmem:[%s8918_s23 + $0x128] sm:$0xff] }
 0x140   : > { %v7905_v47 = vld [vmem:[#allocation7 + $0xa8] sm:$0xff]   ;;  %v647_v49 = vpack.c.bf16 %v503_v44, %v499_v43  ;;  %v652_v50 = vpack.c.bf16 %v512_v46, %v508_v45  ;;  %v507_v51 = vld [vmem:[%s8918_s23 + $0x100] sm:$0xff] }
 0x141   : > { %v511_v52 = vld [vmem:[%s8918_s23 + $0x120] sm:$0xff]  ;;  %v516_v53 = vld [vmem:[%s8918_s23 + $0x148] sm:$0xff] }
 0x142   : > { %987 = vmatpush1.bf16.msra.mxu0 %v7888_v5  ;;  %v520_v54 = vld [vmem:[%s8918_s23 + $0x168] sm:$0xff]  ;;  %v7908_v56 = vld [vmem:[#allocation7 + $0xc0] sm:$0xff]   ;;  %v651_v57 = vpack.c.bf16 %v511_v52, %v507_v51 }
 0x143   : > { %988 = vmatprep.subr.bf16.mxu0 %v11456_v0  ;;  %v656_v58 = vpack.c.bf16 %v520_v54, %v516_v53  ;;  %v515_v59 = vld [vmem:[%s8918_s23 + $0x140] sm:$0xff]  ;;  %v524_v61 = vld [vmem:[%s8918_s23 + $0x188] sm:$0xff] }
 0x144   : > { %v519_v60 = vld [vmem:[%s8918_s23 + $0x160] sm:$0xff]  ;;  %v528_v62 = vld [vmem:[%s8918_s23 + $0x1a8] sm:$0xff] }
 0x145   : > { %v7909_v63 = vld [vmem:[#allocation7 + $0xc8] sm:$0xff]   ;;  %v655_v2 = vpack.c.bf16 %v519_v60, %v515_v59  ;;  %v660_v3 = vpack.c.bf16 %v528_v62, %v524_v61  ;;  %v523_v4 = vld [vmem:[%s8918_s23 + $0x180] sm:$0xff] }
 0x146   : > { %989 = vmatpush1.bf16.msra.mxu0 %v7889_v9  ;;  %v527_v5 = vld [vmem:[%s8918_s23 + $0x1a0] sm:$0xff]  ;;  %v532_v6 = vld [vmem:[%s8918_s23 + $0x1c8] sm:$0xff] }
 0x147   : > { %990 = vmatprep.subr.bf16.mxu0 %v11456_v0  ;;  %v536_v7 = vld [vmem:[%s8918_s23 + $0x1e8] sm:$0xff]  ;;  %v7912_v9 = vld [vmem:[#allocation7 + $0xe0] sm:$0xff]  }
 0x148   : > { %v539_v20 = vld [vmem:[%s8918_s23 + $0x200] sm:$0xff]  ;;  %v548_v22 = vld [vmem:[%s8918_s23 + $0x248] sm:$0xff] }
 0x149   : > { %v543_v21 = vld [vmem:[%s8918_s23 + $0x220] sm:$0xff]  ;;  %v552_v23 = vld [vmem:[%s8918_s23 + $0x268] sm:$0xff] }
 0x14a   : > { %991 = vmatpush1.bf16.msra.mxu0 %v7890_v10  ;;  %v659_v10 = vpack.c.bf16 %v527_v5, %v523_v4  ;;  %v547_v27 = vld [vmem:[%s8918_s23 + $0x240] sm:$0xff]  ;;  %v560_v30 = vld [vmem:[%s8918_s23 + $0x2a8] sm:$0xff] }
 0x14b   : > { %992 = vmatprep.subr.bf16.mxu0 %v11456_v0  ;;  %v551_v28 = vld [vmem:[%s8918_s23 + $0x260] sm:$0xff]  ;;  %v564_v35 = vld [vmem:[%s8918_s23 + $0x2c8] sm:$0xff] }
 0x14c   : > { %v671_v31 = vpack.c.bf16 %v551_v28, %v547_v27  ;;  %v568_v36 = vld [vmem:[%s8918_s23 + $0x2e8] sm:$0xff]  ;;  %v571_v45 = vld [vmem:[%s8918_s23 + $0x300] sm:$0xff]  ;;  %v482_v27 = vld [vmem:[%s8918_s23 + $0x38] sm:$0xff] }
 0x14d   : > { %v680_v38 = vpack.c.bf16 %v568_v36, %v564_v35  ;;  %v575_v46 = vld [vmem:[%s8918_s23 + $0x320] sm:$0xff]  ;;  %v588_v53 = vld [vmem:[%s8918_s23 + $0x388] sm:$0xff]  ;;  %v485_v36 = vld [vmem:[%s8918_s23 + $0x50] sm:$0xff] }
 0x14e   : > { %993 = vmatpush1.bf16.msra.mxu0 %v7891_v11  ;;  %v664_v11 = vpack.c.bf16 %v536_v7, %v532_v6  ;;  %v579_v51 = vld [vmem:[%s8918_s23 + $0x340] sm:$0xff]  ;;  %v592_v54 = vld [vmem:[%s8918_s23 + $0x3a8] sm:$0xff] }
 0x14f   : > { %994 = vmatprep.subr.bf16.mxu0 %v11456_v0  ;;  %v583_v52 = vld [vmem:[%s8918_s23 + $0x360] sm:$0xff]  ;;  %v596_v59 = vld [vmem:[%s8918_s23 + $0x3c8] sm:$0xff] }
 0x150   : > { %v600_v60 = vld [vmem:[%s8918_s23 + $0x3e8] sm:$0xff]  ;;  %v603_v6 = vld [vmem:[%s8926_s14] sm:$0xff] }
 0x151   : > { %v696_v62 = vpack.c.bf16 %v600_v60, %v596_v59  ;;  %v607_v7 = vld [vmem:[%s8926_s14 + $0x20] sm:$0xff]  ;;  %v517_v60 = vld [vmem:[%s8918_s23 + $0x150] sm:$0xff] }
 0x152   : > { %995 = vmatpush1.bf16.msra.mxu0 %v7892_v12  ;;  %v531_v12 = vld [vmem:[%s8918_s23 + $0x1c0] sm:$0xff] }
 0x153   : > { %996 = vmatprep.subr.bf16.mxu0 %v11456_v0 }
 0x156   : > { %997 = vmatpush1.bf16.msra.mxu0 %v7893_v13  ;;  %v535_v13 = vld [vmem:[%s8918_s23 + $0x1e0] sm:$0xff] }
 0x157   : > { %998 = vmatprep.subr.bf16.mxu0 %v11456_v0 }
 0x15a   : > { %999 = vmatpush1.bf16.msra.mxu0 %v7894_v14  ;;  %v540_v14 = vld [vmem:[%s8918_s23 + $0x208] sm:$0xff] }
 0x15b   : > { %1000 = vmatprep.subr.bf16.mxu0 %v11456_v0 }
 0x15e   : > { %1001 = vmatpush1.bf16.msra.mxu0 %v7895_v15  ;;  %v544_v15 = vld [vmem:[%s8918_s23 + $0x228] sm:$0xff] }
 0x15f   : > { %1002 = vmatprep.subr.bf16.mxu0 %v11456_v0 }
 0x162   : > { %1003 = vmatpush1.bf16.msra.mxu0 %v7896_v16  ;;  %v7913_v16 = vld [vmem:[#allocation7 + $0xe8] sm:$0xff]  }
 0x163   : > { %1004 = vmatprep.subr.bf16.mxu0 %v11456_v0 }
 0x166   : > { %1005 = vmatpush1.bf16.msra.mxu0 %v7897_v17  ;;  %v7914_v17 = vld [vmem:[#allocation7 + $0xf0] sm:$0xff]  }
 0x167   : > { %1006 = vmatprep.subr.bf16.mxu0 %v11456_v0 }
 0x16a   : > { %1007 = vmatpush1.bf16.msra.mxu0 %v7898_v18  ;;  %v663_v18 = vpack.c.bf16 %v535_v13, %v531_v12  ;;  %v611_v12 = vld [vmem:[%s8926_s14 + $0x40] sm:$0xff] }
 0x16b   : > { %1008 = vmatprep.subr.bf16.mxu0 %v11456_v0  ;;  %v615_v13 = vld [vmem:[%s8926_s14 + $0x60] sm:$0xff] }
 0x16e   : > { %1009 = vmatpush1.bf16.msra.mxu0 %v7899_v19  ;;  %v668_v19 = vpack.c.bf16 %v544_v15, %v540_v14  ;;  %v620_v14 = vld [vmem:[%s8926_s14 + $0x88] sm:$0xff] }
 0x16f   : > { %1171 = vmatprep.subr.bf16.mxu0 %v11456_v0  ;;  %v624_v15 = vld [vmem:[%s8926_s14 + $0xa8] sm:$0xff] }
 0x171   : > { %1011 = vmatmul.mubr.bf16.vlgmr.msra.gmra.mrb[0].mxu0 %v635_v25  ;;  %v667_v25 = vpack.c.bf16 %v543_v21, %v539_v20  ;;  %v628_v20 = vld [vmem:[%s8926_s14 + $0xc8] sm:$0xff] }
 0x172   : > { %1172 = vmatpush1.bf16.msra.mxu0 %v7900_v24  ;;  %1018 = vmatprep.mubr.bf16.mxu0 %v640_v26  ;;  %v7915_v24 = vld [vmem:[#allocation7 + $0xf8] sm:$0xff]   ;;  %v672_v26 = vpack.c.bf16 %v552_v23, %v548_v22  ;;  %v632_v21 = vld [vmem:[%s8926_s14 + $0xe8] sm:$0xff] }
 0x173   : > { %1173 = vmatprep.subr.bf16.mxu0 %v11456_v0  ;;  %v712_v23 = vpack.c.bf16 %v632_v21, %v628_v20  ;;  %v549_v21 = vld [vmem:[%s8918_s23 + $0x250] sm:$0xff] }
 0x176   : > { %1174 = vmatpush1.bf16.msra.mxu0 %v7901_v29  ;;  %v556_v29 = vld [vmem:[%s8918_s23 + $0x288] sm:$0xff] }
 0x177   : > { %1175 = vmatprep.subr.bf16.mxu0 %v11456_v0 }
 0x179   : > { %1019 = vmatmul.mubr.bf16.gmra.mrb[4].mxu0 %v639_v33  ;;  %v555_v33 = vld [vmem:[%s8918_s23 + $0x280] sm:$0xff] }
 0x17a   : > { %1026 = vmatprep.mubr.bf16.mxu0 %v644_v34  ;;  %1176 = vmatpush1.bf16.msra.mxu0 %v7902_v32  ;;  %v676_v32 = vpack.c.bf16 %v560_v30, %v556_v29  ;;  %v559_v34 = vld [vmem:[%s8918_s23 + $0x2a0] sm:$0xff]  ;;  %v477_v30 = vld [vmem:[%s8918_s23 + $0x10] sm:$0xff] }
 0x17b   : > { %1177 = vmatprep.subr.bf16.mxu0 %v11456_v0  ;;  %v675_v37 = vpack.c.bf16 %v559_v34, %v555_v33  ;;  %v490_v33 = vld [vmem:[%s8918_s23 + $0x78] sm:$0xff] }
 0x17e   : > { %1178 = vmatpush1.bf16.msra.mxu0 %v7903_v39  ;;  %v563_v39 = vld [vmem:[%s8918_s23 + $0x2c0] sm:$0xff] }
 0x17f   : > { %1179 = vmatprep.subr.bf16.mxu0 %v11456_v0 }
 0x181   : > { %1027 = vmatmul.mubr.bf16.gmra.mrb[8].mxu0 %v643_v41  ;;  %v572_v41 = vld [vmem:[%s8918_s23 + $0x308] sm:$0xff] }
 0x182   : > { %1034 = vmatprep.mubr.bf16.mxu0 %v648_v42  ;;  %1180 = vmatpush1.bf16.msra.mxu0 %v7904_v40  ;;  %v567_v40 = vld [vmem:[%s8918_s23 + $0x2e0] sm:$0xff]  ;;  %v576_v42 = vld [vmem:[%s8918_s23 + $0x328] sm:$0xff] }
 0x183   : > { %1181 = vmatprep.subr.bf16.mxu0 %v11456_v0  ;;  %v679_v43 = vpack.c.bf16 %v567_v40, %v563_v39  ;;  %v684_v44 = vpack.c.bf16 %v576_v42, %v572_v41  ;;  %v498_v39 = vld [vmem:[%s8918_s23 + $0xb8] sm:$0xff]  ;;  %v493_v42 = vld [vmem:[%s8918_s23 + $0x90] sm:$0xff] }
 0x186   : > { %1182 = vmatpush1.bf16.msra.mxu0 %v7905_v47  ;;  %v580_v47 = vld [vmem:[%s8918_s23 + $0x348] sm:$0xff] }
 0x187   : > { %1183 = vmatprep.subr.bf16.mxu0 %v11456_v0 }
 0x189   : > { %1035 = vmatmul.mubr.bf16.gmra.mrb[12].mxu0 %v647_v49  ;;  %v683_v49 = vpack.c.bf16 %v575_v46, %v571_v45  ;;  %v506_v45 = vld [vmem:[%s8918_s23 + $0xf8] sm:$0xff] }
 0x18a   : > { %1042 = vmatprep.mubr.bf16.mxu0 %v652_v50  ;;  %1184 = vmatpush1.bf16.msra.mxu0 %v7906_v48  ;;  %v584_v48 = vld [vmem:[%s8918_s23 + $0x368] sm:$0xff] }
 0x18b   : > { %1185 = vmatprep.subr.bf16.mxu0 %v11456_v0  ;;  %v688_v50 = vpack.c.bf16 %v584_v48, %v580_v47  ;;  %v501_v48 = vld [vmem:[%s8918_s23 + $0xd0] sm:$0xff] }
 0x18e   : > { %1186 = vmatpush1.bf16.msra.mxu0 %v7907_v55  ;;  %v687_v55 = vpack.c.bf16 %v583_v52, %v579_v51  ;;  %v514_v51 = vld [vmem:[%s8918_s23 + $0x138] sm:$0xff] }
 0x18f   : > { %1187 = vmatprep.subr.bf16.mxu0 %v11456_v0 }
 0x191   : > { %1043 = vmatmul.mubr.bf16.gmra.mrb[16].mxu0 %v651_v57  ;;  %v587_v57 = vld [vmem:[%s8918_s23 + $0x380] sm:$0xff] }
 0x192   : > { %1050 = vmatprep.mubr.bf16.mxu0 %v656_v58  ;;  %1188 = vmatpush1.bf16.msra.mxu0 %v7908_v56  ;;  %v692_v56 = vpack.c.bf16 %v592_v54, %v588_v53  ;;  %v591_v58 = vld [vmem:[%s8918_s23 + $0x3a0] sm:$0xff]  ;;  %v509_v54 = vld [vmem:[%s8918_s23 + $0x110] sm:$0xff] }
 0x193   : > { %1189 = vmatprep.subr.bf16.mxu0 %v11456_v0  ;;  %v691_v61 = vpack.c.bf16 %v591_v58, %v587_v57  ;;  %v522_v57 = vld [vmem:[%s8918_s23 + $0x178] sm:$0xff] }
 0x196   : > { %1190 = vmatpush1.bf16.msra.mxu0 %v7909_v63  ;;  %v595_v63 = vld [vmem:[%s8918_s23 + $0x3c0] sm:$0xff] }
 0x197   : > { %1191 = vmatprep.subr.bf16.mxu0 %v11456_v0 }
 0x199   : > { %1051 = vmatmul.mubr.bf16.gmra.mrb[20].mxu0 %v655_v2  ;;  %v604_v2 = vld [vmem:[%s8926_s14 + $0x8] sm:$0xff] }
 0x19a   : > { %1058 = vmatprep.mubr.bf16.mxu0 %v660_v3  ;;  %1192 = vmatpush1.bf16.msra.mxu0 %v7910_v1  ;;  %v599_v1 = vld [vmem:[%s8918_s23 + $0x3e0] sm:$0xff]  ;;  %v608_v3 = vld [vmem:[%s8926_s14 + $0x28] sm:$0xff] }
 0x19b   : > { %1193 = vmatprep.subr.bf16.mxu0 %v11456_v0  ;;  %v695_v4 = vpack.c.bf16 %v599_v1, %v595_v63  ;;  %v700_v5 = vpack.c.bf16 %v608_v3, %v604_v2  ;;  %v530_v63 = vld [vmem:[%s8918_s23 + $0x1b8] sm:$0xff]  ;;  %v525_v3 = vld [vmem:[%s8918_s23 + $0x190] sm:$0xff] }
 0x19e   : > { %1194 = vmatpush1.bf16.msra.mxu0 %v7911_v8  ;;  %v612_v8 = vld [vmem:[%s8926_s14 + $0x48] sm:$0xff] }
 0x19f   : > { %1195 = vmatprep.subr.bf16.mxu0 %v11456_v0 }
 0x1a1   : > { %1059 = vmatmul.mubr.bf16.gmra.mrb[24].mxu0 %v659_v10  ;;  %v699_v10 = vpack.c.bf16 %v607_v7, %v603_v6  ;;  %v538_v6 = vld [vmem:[%s8918_s23 + $0x1f8] sm:$0xff] }
 0x1a2   : > { %1066 = vmatprep.mubr.bf16.mxu0 %v664_v11  ;;  %1196 = vmatpush1.bf16.msra.mxu0 %v7912_v9  ;;  %v616_v9 = vld [vmem:[%s8926_s14 + $0x68] sm:$0xff] }
 0x1a3   : > { %1197 = vmatprep.subr.bf16.mxu0 %v11456_v0  ;;  %v704_v11 = vpack.c.bf16 %v616_v9, %v612_v8  ;;  %v533_v9 = vld [vmem:[%s8918_s23 + $0x1d0] sm:$0xff] }
 0x1a6   : > { %1198 = vmatpush1.bf16.msra.mxu0 %v7913_v16  ;;  %v703_v16 = vpack.c.bf16 %v615_v13, %v611_v12  ;;  %v546_v12 = vld [vmem:[%s8918_s23 + $0x238] sm:$0xff] }
 0x1a7   : > { %1199 = vmatprep.subr.bf16.mxu0 %v11456_v0 }
 0x1a9   : > { %1067 = vmatmul.mubr.bf16.gmra.mrb[28].mxu0 %v663_v18  ;;  %v619_v18 = vld [vmem:[%s8926_s14 + $0x80] sm:$0xff] }
 0x1aa   : > { %1074 = vmatprep.mubr.bf16.mxu0 %v668_v19  ;;  %1200 = vmatpush1.bf16.msra.mxu0 %v7914_v17  ;;  %v708_v17 = vpack.c.bf16 %v624_v15, %v620_v14  ;;  %v623_v19 = vld [vmem:[%s8926_s14 + $0xa0] sm:$0xff]  ;;  %v541_v15 = vld [vmem:[%s8918_s23 + $0x210] sm:$0xff] }
 0x1ab   : > { %1201 = vmatprep.subr.bf16.mxu0 %v11456_v0  ;;  %v707_v22 = vpack.c.bf16 %v623_v19, %v619_v18  ;;  %v554_v18 = vld [vmem:[%s8918_s23 + $0x278] sm:$0xff] }
 0x1ae   : > { %1202 = vmatpush1.bf16.msra.mxu0 %v7915_v24  ;;  %v627_v24 = vld [vmem:[%s8926_s14 + $0xc0] sm:$0xff] }
 0x1b1   : > { %1075 = vmatmul.mubr.bf16.gmra.mrb[32].mxu0 %v667_v25  ;;  %v631_v25 = vld [vmem:[%s8926_s14 + $0xe0] sm:$0xff] }
 0x1b2   : > { %1082 = vmatprep.mubr.bf16.mxu0 %v672_v26  ;;  %v478_v26 = vld [vmem:[%s8918_s23 + $0x18] sm:$0xff]  ;;  %v711_v28 = vpack.c.bf16 %v631_v25, %v627_v24 }
 0x1b3   : > { %v638_v29 = vpack.c.bf16 %v482_v27, %v478_v26  ;;  %v562_v24 = vld [vmem:[%s8918_s23 + $0x2b8] sm:$0xff]  ;;  %v557_v27 = vld [vmem:[%s8918_s23 + $0x290] sm:$0xff] }
 0x1b9   : > { %1083 = vmatmul.mubr.bf16.gmra.mrb[36].mxu0 %v671_v31  ;;  %v481_v31 = vld [vmem:[%s8918_s23 + $0x30] sm:$0xff] }
 0x1ba   : > { %1090 = vmatprep.mubr.bf16.mxu0 %v676_v32  ;;  %v486_v32 = vld [vmem:[%s8918_s23 + $0x58] sm:$0xff]  ;;  %v637_v34 = vpack.c.bf16 %v481_v31, %v477_v30 }
 0x1bb   : > { %v642_v35 = vpack.c.bf16 %v490_v33, %v486_v32  ;;  %v570_v30 = vld [vmem:[%s8918_s23 + $0x2f8] sm:$0xff]  ;;  %v565_v33 = vld [vmem:[%s8918_s23 + $0x2d0] sm:$0xff] }
 0x1c1   : > { %1091 = vmatmul.mubr.bf16.gmra.mrb[40].mxu0 %v675_v37  ;;  %v489_v37 = vld [vmem:[%s8918_s23 + $0x70] sm:$0xff] }
 0x1c2   : > { %1098 = vmatprep.mubr.bf16.mxu0 %v680_v38  ;;  %v494_v38 = vld [vmem:[%s8918_s23 + $0x98] sm:$0xff]  ;;  %v641_v40 = vpack.c.bf16 %v489_v37, %v485_v36 }
 0x1c3   : > { %v646_v41 = vpack.c.bf16 %v498_v39, %v494_v38  ;;  %v578_v36 = vld [vmem:[%s8918_s23 + $0x338] sm:$0xff]  ;;  %v9111_v39 = vsel %vm1987_vm1, 65537, %v11456_v0 }
 0x1c4   : > { %11594 = vst [vmem:[#allocation28_spill] sm:$0xff] %v9111_v39 }
 0x1c9   : > { %1099 = vmatmul.mubr.bf16.gmra.mrb[44].mxu0 %v679_v43  ;;  %v497_v43 = vld [vmem:[%s8918_s23 + $0xb0] sm:$0xff] }
 0x1ca   : > { %1106 = vmatprep.mubr.bf16.mxu0 %v684_v44  ;;  %v502_v44 = vld [vmem:[%s8918_s23 + $0xd8] sm:$0xff]  ;;  %v645_v46 = vpack.c.bf16 %v497_v43, %v493_v42  ;;  %v9117_v42 = vcombine.low %v9111_v39, %v9111_v39 }
 0x1cb   : > { %v650_v47 = vpack.c.bf16 %v506_v45, %v502_v44  ;;  %v582_v43 = vld [vmem:[%s8918_s23 + $0x358] sm:$0xff] }
 0x1cc   : > { %v586_v44 = vld [vmem:[%s8918_s23 + $0x378] sm:$0xff]  ;;  %v2108_v45 = vshrl.u32 %v9117_v42, 16 }
 0x1d1   : > { %1107 = vmatmul.mubr.bf16.gmra.mrb[48].mxu0 %v683_v49  ;;  %v505_v49 = vld [vmem:[%s8918_s23 + $0xf0] sm:$0xff] }
 0x1d2   : > { %1114 = vmatprep.mubr.bf16.mxu0 %v688_v50  ;;  %v510_v50 = vld [vmem:[%s8918_s23 + $0x118] sm:$0xff]  ;;  %v649_v52 = vpack.c.bf16 %v505_v49, %v501_v48  ;;  %v690_v48 = vpack.c.bf16 %v586_v44, %v582_v43  ;;  %v2456_v49 = vrot.slane %v2108_v45, 3  ;;  %v629_v43 = vld [vmem:[%s8926_s14 + $0xd0] sm:$0xff] }
 0x1d3   : > { %v654_v53 = vpack.c.bf16 %v514_v51, %v510_v50  ;;  %v581_v51 = vld [vmem:[%s8918_s23 + $0x350] sm:$0xff] }
 0x1d4   : > { %v633_v44 = vld [vmem:[%s8926_s14 + $0xf0] sm:$0xff] }
 0x1d9   : > { %1115 = vmatmul.mubr.bf16.gmra.mrb[52].mxu0 %v687_v55  ;;  %v513_v55 = vld [vmem:[%s8918_s23 + $0x130] sm:$0xff] }
 0x1da   : > { %1122 = vmatprep.mubr.bf16.mxu0 %v692_v56  ;;  %v518_v56 = vld [vmem:[%s8918_s23 + $0x158] sm:$0xff]  ;;  %v653_v58 = vpack.c.bf16 %v513_v55, %v509_v54 }
 0x1db   : > { %v658_v59 = vpack.c.bf16 %v522_v57, %v518_v56  ;;  %v594_v54 = vld [vmem:[%s8918_s23 + $0x3b8] sm:$0xff] }
 0x1e1   : > { %1123 = vmatmul.mubr.bf16.gmra.mrb[56].mxu0 %v691_v61  ;;  %v521_v61 = vld [vmem:[%s8918_s23 + $0x170] sm:$0xff] }
 0x1e2   : > { %1130 = vmatprep.mubr.bf16.mxu0 %v696_v62  ;;  %v526_v62 = vld [vmem:[%s8918_s23 + $0x198] sm:$0xff]  ;;  %v657_v1 = vpack.c.bf16 %v521_v61, %v517_v60  ;;  %v589_v60 = vld [vmem:[%s8918_s23 + $0x390] sm:$0xff] }
 0x1e3   : > { %v662_v2 = vpack.c.bf16 %v530_v63, %v526_v62  ;;  %v593_v61 = vld [vmem:[%s8918_s23 + $0x3b0] sm:$0xff]  ;;  %v598_v63 = vld [vmem:[%s8918_s23 + $0x3d8] sm:$0xff] }
 0x1e4   : > { %v7918_v62 = vld [vmem:[#allocation10 + $0x1c8] sm:$0xff]  }
 0x1e9   : > { %1131 = vmatmul.mubr.bf16.gmra.mrb[60].mxu0 %v695_v4  ;;  %v529_v4 = vld [vmem:[%s8918_s23 + $0x1b0] sm:$0xff] }
 0x1ea   : > { %1138 = vmatprep.mubr.bf16.mxu0 %v700_v5  ;;  %v534_v5 = vld [vmem:[%s8918_s23 + $0x1d8] sm:$0xff]  ;;  %v661_v7 = vpack.c.bf16 %v529_v4, %v525_v3  ;;  %v693_v3 = vpack.c.bf16 %v593_v61, %v589_v60  ;;  %v7933_v60 = vld [vmem:[#allocation10] sm:$0xff]  }
 0x1eb   : > { %v666_v8 = vpack.c.bf16 %v538_v6, %v534_v5  ;;  %v7920_v5 = vld [vmem:[#allocation10 + $0x1d0] sm:$0xff]  }
 0x1ec   : > { %v7921_v6 = vld [vmem:[#allocation10 + $0x190] sm:$0xff]  }
 0x1f1   : > { %1139 = vmatmul.mubr.bf16.gmra.mrb[64].mxu0 %v699_v10  ;;  %v537_v10 = vld [vmem:[%s8918_s23 + $0x1f0] sm:$0xff] }
 0x1f2   : > { %1146 = vmatprep.mubr.bf16.mxu0 %v704_v11  ;;  %v542_v11 = vld [vmem:[%s8918_s23 + $0x218] sm:$0xff]  ;;  %v665_v13 = vpack.c.bf16 %v537_v10, %v533_v9 }
 0x1f3   : > { %v670_v14 = vpack.c.bf16 %v546_v12, %v542_v11  ;;  %v7922_v9 = vld [vmem:[#allocation10 + $0x1d8] sm:$0xff]  }
 0x1f4   : > { %v606_v10 = vld [vmem:[%s8926_s14 + $0x18] sm:$0xff] }
 0x1f5   : > { %v610_v11 = vld [vmem:[%s8926_s14 + $0x38] sm:$0xff] }
 0x1f6   : > { %v7923_v12 = vld [vmem:[#allocation10 + $0x198] sm:$0xff]  }
 0x1f9   : > { %1147 = vmatmul.mubr.bf16.gmra.mrb[68].mxu0 %v703_v16  ;;  %v545_v16 = vld [vmem:[%s8918_s23 + $0x230] sm:$0xff] }
 0x1fa   : > { %1154 = vmatprep.mubr.bf16.mxu0 %v708_v17  ;;  %v550_v17 = vld [vmem:[%s8918_s23 + $0x258] sm:$0xff]  ;;  %v669_v19 = vpack.c.bf16 %v545_v16, %v541_v15  ;;  %v7924_v15 = vld [vmem:[#allocation10 + $0x1e0] sm:$0xff]  }
 0x1fb   : > { %v674_v20 = vpack.c.bf16 %v554_v18, %v550_v17  ;;  %v7925_v16 = vld [vmem:[#allocation10 + $0x1a0] sm:$0xff]   ;;  %v605_v17 = vld [vmem:[%s8926_s14 + $0x10] sm:$0xff] }
 0x1fc   : > { %v609_v18 = vld [vmem:[%s8926_s14 + $0x30] sm:$0xff] }
 0x201   : > { %1155 = vmatmul.mubr.bf16.gmra.mrb[72].mxu0 %v707_v22  ;;  %v553_v22 = vld [vmem:[%s8918_s23 + $0x270] sm:$0xff] }
 0x202   : > { %1162 = vmatprep.mubr.bf16.mxu0 %v712_v23  ;;  %v558_v23 = vld [vmem:[%s8918_s23 + $0x298] sm:$0xff]  ;;  %v673_v25 = vpack.c.bf16 %v553_v22, %v549_v21  ;;  %v7927_v22 = vld [vmem:[#allocation10 + $0x1a8] sm:$0xff]  }
 0x203   : > { %v678_v26 = vpack.c.bf16 %v562_v24, %v558_v23  ;;  %v618_v21 = vld [vmem:[%s8926_s14 + $0x78] sm:$0xff]  ;;  %v701_v23 = vpack.c.bf16 %v609_v18, %v605_v17 }
 0x209   : > { %1163 = vmatmul.mubr.bf16.gmra.mrb[76].mxu0 %v711_v28  ;;  %v561_v28 = vld [vmem:[%s8918_s23 + $0x2b0] sm:$0xff] }
 0x20a   : > { %1203 = vmatprep.mubr.bf16.mxu0 %v638_v29  ;;  %v566_v29 = vld [vmem:[%s8918_s23 + $0x2d8] sm:$0xff]  ;;  %v677_v31 = vpack.c.bf16 %v561_v28, %v557_v27  ;;  %v613_v27 = vld [vmem:[%s8926_s14 + $0x50] sm:$0xff] }
 0x20b   : > { %v682_v32 = vpack.c.bf16 %v570_v30, %v566_v29  ;;  %v617_v28 = vld [vmem:[%s8926_s14 + $0x70] sm:$0xff]  ;;  %v7930_v29 = vld [vmem:[#allocation10 + $0x1f8] sm:$0xff]  }
 0x20c   : > { %v622_v30 = vld [vmem:[%s8926_s14 + $0x98] sm:$0xff] }
 0x211   : > { %1204 = vmatmul.mubr.bf16.vlgmr.msra.gmra.mrb[0].mxu0 %v637_v34  ;;  %v569_v34 = vld [vmem:[%s8918_s23 + $0x2f0] sm:$0xff] }
 0x212   : > { %1211 = vmatprep.mubr.bf16.mxu0 %v642_v35  ;;  %v574_v35 = vld [vmem:[%s8918_s23 + $0x318] sm:$0xff]  ;;  %v681_v37 = vpack.c.bf16 %v569_v34, %v565_v33  ;;  %v705_v33 = vpack.c.bf16 %v617_v28, %v613_v27 }
 0x213   : > { %v686_v38 = vpack.c.bf16 %v578_v36, %v574_v35  ;;  %v621_v35 = vld [vmem:[%s8926_s14 + $0x90] sm:$0xff] }
 0x214   : > { %v625_v36 = vld [vmem:[%s8926_s14 + $0xb0] sm:$0xff] }
 0x219   : > { %1212 = vmatmul.mubr.bf16.gmra.mrb[4].mxu0 %v641_v40  ;;  %v573_v40 = vld [vmem:[%s8918_s23 + $0x310] sm:$0xff] }
 0x21a   : > { %1219 = vmatprep.mubr.bf16.mxu0 %v646_v41  ;;  %v577_v41 = vld [vmem:[%s8918_s23 + $0x330] sm:$0xff] }
 0x221   : > { %1220 = vmatmul.mubr.bf16.gmra.mrb[8].mxu0 %v645_v46  ;;  %v685_v46 = vpack.c.bf16 %v577_v41, %v573_v40  ;;  %v709_v40 = vpack.c.bf16 %v625_v36, %v621_v35 }
 0x222   : > { %1227 = vmatprep.mubr.bf16.mxu0 %v650_v47  ;;  %v2111_v47 = vshll.u32 %v9117_v42, 16 }
 0x224   : > { %v2459_v50 = vrot.slane %v2111_v47, 4 }
 0x226   : > { %v9131_v55 = vor.u32 %v2459_v50, %v2456_v49 }
 0x229   : > { %1228 = vmatmul.mubr.bf16.gmra.mrb[12].mxu0 %v649_v52  ;;  %v585_v52 = vld [vmem:[%s8918_s23 + $0x370] sm:$0xff] }
 0x22a   : > { %1235 = vmatprep.mubr.bf16.mxu0 %v654_v53  ;;  %v590_v53 = vld [vmem:[%s8918_s23 + $0x398] sm:$0xff]  ;;  %v689_v56 = vpack.c.bf16 %v585_v52, %v581_v51 }
 0x22b   : > { %v694_v57 = vpack.c.bf16 %v594_v54, %v590_v53 }
 0x231   : > { %1236 = vmatmul.mubr.bf16.gmra.mrb[16].mxu0 %v653_v58  ;;  %v7916_v58 = vld [vmem:[#allocation10 + $0x1c0] sm:$0xff]  }
 0x232   : > { %1243 = vmatprep.mubr.bf16.mxu0 %v658_v59  ;;  %v7917_v59 = vld [vmem:[#allocation10 + $0x180] sm:$0xff]   ;;  %7409 = vmatprep.subr.bf16.mxu0 %v7916_v58 }
 0x233   : > { %7410 = vmatpush3.bf16.msra.mxu0 %v7917_v59 }
 0x234   : > { %7411 = vmatprep.subr.bf16.mxu0 %v7918_v62 }
 0x239   : > { %1244 = vmatmul.mubr.bf16.gmra.mrb[20].mxu0 %v657_v1  ;;  %v602_v1 = vld [vmem:[%s8918_s23 + $0x3f8] sm:$0xff] }
 0x23a   : > { %1251 = vmatprep.mubr.bf16.mxu0 %v662_v2  ;;  %v7919_v2 = vld [vmem:[#allocation10 + $0x188] sm:$0xff]   ;;  %v698_v4 = vpack.c.bf16 %v602_v1, %v598_v63 }
 0x23b   : > { %7412 = vmatpush3.bf16.msra.mxu0 %v7919_v2 }
 0x23c   : > { %7413 = vmatprep.subr.bf16.mxu0 %v7920_v5 }
 0x23f   : > { %7414 = vmatpush3.bf16.msra.mxu0 %v7921_v6  ;;  %v7935_v6 = vld [vmem:[#allocation10 + $0x8] sm:$0xff]  }
 0x240   : > { %7415 = vmatprep.subr.bf16.mxu0 %v7922_v9  ;;  %v2113_v9 = vrot.slane %v2111_v47, 5 }
 0x241   : > { %1252 = vmatmul.mubr.bf16.gmra.mrb[24].mxu0 %v661_v7  ;;  %v597_v7 = vld [vmem:[%s8918_s23 + $0x3d0] sm:$0xff] }
 0x242   : > { %1259 = vmatprep.mubr.bf16.mxu0 %v666_v8  ;;  %v601_v8 = vld [vmem:[%s8918_s23 + $0x3f0] sm:$0xff] }
 0x243   : > { %7416 = vmatpush3.bf16.msra.mxu0 %v7923_v12 }
 0x244   : > { %7417 = vmatprep.subr.bf16.mxu0 %v7924_v15  ;;  %v9174_v15 = vld [vmem:[#allocation8] ss:$0 sm:$0xff] }
 0x247   : > { %7418 = vmatpush3.bf16.msra.mxu0 %v7925_v16  ;;  %v7937_v16 = vld [vmem:[#allocation10 + $0x10] sm:$0xff]  }
 0x249   : > { %1260 = vmatmul.mubr.bf16.gmra.mrb[28].mxu0 %v665_v13  ;;  %v697_v13 = vpack.c.bf16 %v601_v8, %v597_v7  ;;  %v2110_v8 = vrot.slane %v2108_v45, 4 }
 0x24a   : > { %1267 = vmatprep.mubr.bf16.mxu0 %v670_v14  ;;  %v702_v14 = vpack.c.bf16 %v610_v11, %v606_v10 }
 0x24b   : > { %v9180_v45 = vor.u32 %v2113_v9, %v2110_v8 }
 0x251   : > { %1268 = vmatmul.mubr.bf16.gmra.mrb[32].mxu0 %v669_v19  ;;  %v7926_v19 = vld [vmem:[#allocation10 + $0x1e8] sm:$0xff]  }
 0x252   : > { %1275 = vmatprep.mubr.bf16.mxu0 %v674_v20  ;;  %v614_v20 = vld [vmem:[%s8926_s14 + $0x58] sm:$0xff]  ;;  %7419 = vmatprep.subr.bf16.mxu0 %v7926_v19 }
 0x253   : > { %v706_v24 = vpack.c.bf16 %v618_v21, %v614_v20  ;;  %7420 = vmatpush3.bf16.msra.mxu0 %v7927_v22 }
 0x259   : > { %1276 = vmatmul.mubr.bf16.gmra.mrb[36].mxu0 %v673_v25  ;;  %v7928_v25 = vld [vmem:[#allocation10 + $0x1f0] sm:$0xff]  }
 0x25a   : > { %1283 = vmatprep.mubr.bf16.mxu0 %v678_v26  ;;  %v7929_v26 = vld [vmem:[#allocation10 + $0x1b0] sm:$0xff]   ;;  %7421 = vmatprep.subr.bf16.mxu0 %v7928_v25  ;;  %v7939_v25 = vld [vmem:[#allocation10 + $0x18] sm:$0xff]  }
 0x25b   : > { %7422 = vmatpush3.bf16.msra.mxu0 %v7929_v26 }
 0x25c   : > { %7423 = vmatprep.subr.bf16.mxu0 %v7930_v29 }
 0x261   : > { %1284 = vmatmul.mubr.bf16.gmra.mrb[40].mxu0 %v677_v31  ;;  %v626_v31 = vld [vmem:[%s8926_s14 + $0xb8] sm:$0xff] }
 0x262   : > { %1291 = vmatprep.mubr.bf16.mxu0 %v682_v32  ;;  %v7931_v32 = vld [vmem:[#allocation10 + $0x1b8] sm:$0xff]   ;;  %v710_v34 = vpack.c.bf16 %v626_v31, %v622_v30 }
 0x263   : > { %7424 = vmatpush3.bf16.msra.mxu0 %v7931_v32 }
 0x269   : > { %1292 = vmatmul.mubr.bf16.gmra.mrb[44].mxu0 %v681_v37  ;;  %v630_v37 = vld [vmem:[%s8926_s14 + $0xd8] sm:$0xff] }
 0x26a   : > { %1299 = vmatprep.mubr.bf16.mxu0 %v686_v38  ;;  %v634_v38 = vld [vmem:[%s8926_s14 + $0xf8] sm:$0xff] }
 0x26b   : > { %v714_v41 = vpack.c.bf16 %v634_v38, %v630_v37 }
 0x271   : > { %1300 = vmatmul.mubr.bf16.gmra.mrb[48].mxu0 %v685_v46  ;;  %v713_v46 = vpack.c.bf16 %v633_v44, %v629_v43  ;;  %v7942_v44 = vld [vmem:[#allocation10 + $0x68] sm:$0xff]  }
 0x272   : > { %1307 = vmatprep.mubr.bf16.mxu0 %v690_v48  ;;  %v1441_v48 = vlaneseq }
 0x274   : > { %v9155_v49 = vshrl.u32 %v1441_v48, 7 }
 0x276   : > { %11595 = vst [vmem:[#allocation29_spill] sm:$0xff] %v9155_v49  ;;  %v1446_v50 = vadd.s32 32, %v9155_v49  ;;  %v1450_v52 = vadd.s32 64, %v9155_v49  ;;  %v1478_v58 = vand.u32 31, %v9155_v49 }
 0x278   : > { %v1506_v51 = vand.u32 31, %v1446_v50  ;;  %v1534_v53 = vand.u32 31, %v1450_v52  ;;  %vm9166_vm6 = vcmp.ge.s32.totalorder %v1478_v58, 1  ;;  %v7943_v50 = vld [vmem:[#allocation10 + $0x28] sm:$0xff]  }
 0x279   : > { %1308 = vmatmul.mubr.bf16.gmra.mrb[52].mxu0 %v689_v56  ;;  %vm1986_vm7 = vmpackc.low %vm9166_vm6, %vm9166_vm6 }
 0x27a   : > { %1315 = vmatprep.mubr.bf16.mxu0 %v694_v57  ;;  %vm1862_vm2 = vcmp.ge.s32.totalorder %v1506_v51, 1  ;;  %vm1866_vm4 = vcmp.ge.s32.totalorder %v1534_v53, 1  ;;  %v7932_v57 = vld [vmem:[#allocation10 + $0x40] sm:$0xff]   ;;  %v2018_v20 = vsel %vm1986_vm7, 65537, %v11456_v0 }
 0x27b   : > { %vm1990_vm3 = vmpackc.low %vm1862_vm2, %vm1862_vm2  ;;  %7073 = vmatprep.subr.bf16.mxu1 %v7932_v57  ;;  %v6926_v30 = vcombine.low %v2018_v20, %v9111_v39 }
 0x27c   : > { %v2022_v54 = vsel %vm1990_vm3, 65537, %v11456_v0  ;;  %vm1994_vm5 = vmpackc.low %vm1866_vm4, %vm1866_vm4  ;;  %7074 = vmatpush3.bf16.msra.mxu1 %v7933_v60 }
 0x27d   : > { %v6928_v56 = vcombine.low %v2022_v54, %v9111_v39  ;;  %v2026_v59 = vsel %vm1994_vm5, 65537, %v11456_v0  ;;  %v2100_v37 = vshrl.u32 %v6926_v30, 16 }
 0x27e   : > { %v6930_v2 = vcombine.low %v2026_v59, %v9111_v39 }
 0x27f   : > { %v2117_v61 = vshrl.u32 %v6928_v56, 16  ;;  %v2120_v62 = vshll.u32 %v6928_v56, 16  ;;  %v2102_v59 = vrot.slane %v2100_v37, 4 }
 0x280   : > { %v2135_v12 = vshrl.u32 %v6930_v2, 16 }
 0x281   : > { %1316 = vmatmul.mubr.bf16.gmra.mrb[56].mxu0 %v693_v3  ;;  %v7934_v3 = vld [vmem:[#allocation10 + $0x48] sm:$0xff]   ;;  %v2119_v10 = vrot.slane %v2117_v61, 4  ;;  %v2122_v11 = vrot.slane %v2120_v62, 5  ;;  %v7944_v61 = vld [vmem:[#allocation10 + $0x70] sm:$0xff]  }
 0x282   : > { %1323 = vmatprep.mubr.bf16.mxu0 %v698_v4  ;;  %7075 = vmatprep.subr.bf16.mxu1 %v7934_v3  ;;  %v2137_v21 = vrot.slane %v2135_v12, 4  ;;  %v7945_v62 = vld [vmem:[#allocation10 + $0x30] sm:$0xff]  }
 0x283   : > { %7076 = vmatpush3.bf16.msra.mxu1 %v7935_v6  ;;  %v9182_v42 = vor.u32 %v2122_v11, %v2119_v10 }
 0x285   : > { %v9189_v29 = vsel %vm2098_vm8, %v9182_v42, %v9180_v45 }
 0x286   : > { %vm2245_vm9 = vcmp.ne.s16.totalorder %v9189_v29, 0 }
 0x289   : > { %1324 = vmatmul.mubr.bf16.gmra.mrb[60].mxu0 %v697_v13  ;;  %v2138_v13 = vshll.u32 %v6930_v2, 16 }
 0x28a   : > { %1331 = vmatprep.mubr.bf16.mxu0 %v702_v14  ;;  %v7936_v14 = vld [vmem:[#allocation10 + $0x50] sm:$0xff]  }
 0x28b   : > { %7077 = vmatprep.subr.bf16.mxu1 %v7936_v14  ;;  %v2140_v22 = vrot.slane %v2138_v13, 5 }
 0x28c   : > { %7078 = vmatpush3.bf16.msra.mxu1 %v7937_v16  ;;  %v7946_v16 = vld [vmem:[#allocation10 + $0x78] sm:$0xff]  }
 0x28d   : > { %v9194_v32 = vor.u32 %v2140_v22, %v2137_v21 }
 0x28f   : > { %v9202_v43 = vsel %vm2098_vm8, %v9180_v45, %v9194_v32 }
 0x290   : > { %vm2246_vm10 = vcmp.ne.s16.totalorder %v9202_v43, 0 }
 0x291   : > { %1332 = vmatmul.mubr.bf16.gmra.mrb[64].mxu0 %v701_v23  ;;  %v7938_v23 = vld [vmem:[#allocation10 + $0x58] sm:$0xff]  }
 0x292   : > { %1339 = vmatprep.mubr.bf16.mxu0 %v706_v24  ;;  %7079 = vmatprep.subr.bf16.mxu1 %v7938_v23 }
 0x293   : > { %7080 = vmatpush3.bf16.msra.mxu1 %v7939_v25 }
 0x299   : > { %1340 = vmatmul.mubr.bf16.gmra.mrb[68].mxu0 %v705_v33  ;;  %v7940_v33 = vld [vmem:[#allocation10 + $0x60] sm:$0xff]  }
 0x29a   : > { %1347 = vmatprep.mubr.bf16.mxu0 %v710_v34  ;;  %v7941_v34 = vld [vmem:[#allocation10 + $0x20] sm:$0xff]   ;;  %7081 = vmatprep.subr.bf16.mxu1 %v7940_v33 }
 0x29b   : > { %7082 = vmatpush3.bf16.msra.mxu1 %v7941_v34 }
 0x29c   : > { %7083 = vmatprep.subr.bf16.mxu1 %v7942_v44 }
 0x29f   : > { %7084 = vmatpush3.bf16.msra.mxu1 %v7943_v50 }
 0x2a0   : > { %7085 = vmatprep.subr.bf16.mxu1 %v7944_v61 }
 0x2a1   : > { %1348 = vmatmul.mubr.bf16.gmra.mrb[72].mxu0 %v709_v40 }
 0x2a2   : > { %1355 = vmatprep.mubr.bf16.mxu0 %v714_v41  ;;  %v2103_v41 = vshll.u32 %v6926_v30, 16  ;;  %v1454_v30 = vadd.s32 96, %v9155_v49 }
 0x2a3   : > { %7086 = vmatpush3.bf16.msra.mxu1 %v7945_v62 }
 0x2a4   : > { %v2105_v60 = vrot.slane %v2103_v41, 5  ;;  %7087 = vmatprep.subr.bf16.mxu1 %v7946_v16 }
 0x2a6   : > { %v9220_v14 = vor.u32 %v2105_v60, %v2102_v59 }
 0x2a8   : > { %11600 = vst [vmem:[#allocation32_spill] sm:$0xff] %v9220_v14  ;;  %vm11495_vm13 = vcmp.ne.s16.totalorder %v9220_v14, 0 }
 0x2a9   : > { %1356 = vmatmul.mubr.bf16.gmra.mrb[76].mxu0 %v713_v46 }
 0x2e4   : > { %v9163_v63 = vpop.f32.mrb[0].mxu0 }
 0x2e5   : > { %v1207_v1 = vpop.f32.mrb[1].mxu0 }
 0x2e6   : > { %v1208_v4 = vpop.f32.mrb[2].mxu0 }
 0x2e7   : > { %v1210_v7 = vpop.f32.mrb[3].mxu0  ;;  %v7610_v17 = vadd.f32 %v9174_v15, %v1208_v4 }
 0x2e9   : > { %v1365_v26 = vmax.f32 %v7610_v17, 0.0 }
 0x2ec   : > { %v1213_v47 = vpop.f32.mrb[4].mxu0 }
 0x2ed   : > { %v7611_v18 = vadd.f32 %v9174_v15, %v1213_v47  ;;  %v1215_v19 = vpop.f32.mrb[5].mxu0  ;;  %v7947_v47 = vld [vmem:[#allocation10 + $0x38] sm:$0xff]  }
 0x2ee   : > { %v1216_v24 = vpop.f32.mrb[6].mxu0  ;;  %7088 = vmatpush3.bf16.msra.mxu1 %v7947_v47 }
 0x2ef   : > { %v1366_v27 = vmax.f32 %v7611_v18, 0.0  ;;  %v1218_v28 = vpop.f32.mrb[7].mxu0  ;;  %v7612_v35 = vadd.f32 %v9174_v15, %v1216_v24 }
 0x2f0   : > { %v9233_v28 = vsel %vm2098_vm8, %v9220_v14, %v9180_v45 }
 0x2f1   : > { %v9192_v31 = vpack.c.bf16 %v1366_v27, %v1365_v26  ;;  %v1367_v52 = vmax.f32 %v7612_v35, 0.0  ;;  %11602 = vst [vmem:[#allocation34_spill] sm:$0xff] %v9233_v28  ;;  %vm11507_vm14 = vcmp.ne.s16.totalorder %v9233_v28, 0 }
 0x2f3   : > { %11598 = vst [vmem:[#allocation30_spill] sm:$0xff] %v9192_v31  ;;  %v2262_v46 = vsel %vm2245_vm9, %v9192_v31, 0  ;;  %v2723_v51 = vshll.u32 %v9192_v31, 16  ;;  %v2727_v4 = vshrl.u32 %v9192_v31, 16 }
 0x2f4   : > { %v1221_v36 = vpop.f32.mrb[8].mxu0  ;;  %v3387_v56 = vshrl.u32 %v2262_v46, 16  ;;  %v3390_v57 = vshll.u32 %v2262_v46, 16 }
 0x2f5   : > { %v7613_v38 = vadd.f32 %v9174_v15, %v1221_v36  ;;  %v1223_v40 = vpop.f32.mrb[9].mxu0  ;;  %v9211_v1 = vrot.slane %v2723_v51, 1 }
 0x2f6   : > { %v1224_v48 = vpop.f32.mrb[10].mxu0  ;;  %v3389_v7 = vrot.slane %v3387_v56, 3  ;;  %v3392_v8 = vrot.slane %v3390_v57, 4 }
 0x2f7   : > { %v1368_v53 = vmax.f32 %v7613_v38, 0.0  ;;  %v1226_v54 = vpop.f32.mrb[11].mxu0  ;;  %v7614_v2 = vadd.f32 %v9174_v15, %v1224_v48  ;;  %v2729_v18 = vor.u32 %v2727_v4, %v9211_v1 }
 0x2f8   : > { %v9224_v25 = vor.u32 %v3392_v8, %v3389_v7  ;;  %v1445_v7 = vadd.s32 24, %v9155_v49 }
 0x2f9   : > { %v9209_v58 = vpack.c.bf16 %v1368_v53, %v1367_v52  ;;  %v1369_v21 = vmax.f32 %v7614_v2, 0.0  ;;  %v1562_v53 = vand.u32 31, %v1454_v30 }
 0x2fb   : > { %11599 = vst [vmem:[#allocation31_spill] sm:$0xff] %v9209_v58  ;;  %v2731_v3 = vshll.u32 %v9209_v58, 16  ;;  %v2263_v5 = vsel %vm2246_vm10, %v9209_v58, 0  ;;  %v2735_v35 = vshrl.u32 %v9209_v58, 16  ;;  %v2664_v52 = vsel %vm11495_vm13, %v9209_v58, 0 }
 0x2fc   : > { %v1229_v6 = vpop.f32.mrb[12].mxu0  ;;  %v3450_v9 = vshrl.u32 %v2263_v5, 16  ;;  %v3453_v10 = vshll.u32 %v2263_v5, 16  ;;  %vm9262_vm15 = vcmp.ge.s32.totalorder %v1562_v53, 1 }
 0x2fd   : > { %v7615_v11 = vadd.f32 %v9174_v15, %v1229_v6  ;;  %v1231_v12 = vpop.f32.mrb[13].mxu0  ;;  %v2733_v13 = vrot.slane %v2731_v3, 1  ;;  %v7948_v3 = vld [vmem:[#allocation10 + $0xc0] sm:$0xff]   ;;  %vm1998_vm1 = vmpackc.low %vm9262_vm15, %vm9262_vm15 }
 0x2fe   : > { %v1232_v17 = vpop.f32.mrb[14].mxu0  ;;  %v3452_v19 = vrot.slane %v3450_v9, 3  ;;  %v3455_v20 = vrot.slane %v3453_v10, 4  ;;  %v9260_v10 = vsel %vm2098_vm8, %v9180_v45, %v9182_v42  ;;  %7185 = vmatprep.subr.bf16.mxu1 %v7948_v3 }
 0x2ff   : > { %v1370_v22 = vmax.f32 %v7615_v11, 0.0  ;;  %v1234_v23 = vpop.f32.mrb[15].mxu0  ;;  %v2734_v24 = vsel %vm2698_vm11, %v2729_v18, %v2733_v13  ;;  %v7616_v34 = vadd.f32 %v9174_v15, %v1232_v17  ;;  %v2737_v46 = vor.u32 %v2735_v35, %v2733_v13  ;;  %11604 = vst [vmem:[#allocation36_spill] sm:$0xff] %v9260_v10 }
 0x300   : > { %v9226_v26 = vor.u32 %v3455_v20, %v3452_v19  ;;  %v3245_v37 = vshrl.u32 %v2734_v24, 16  ;;  %v3248_v40 = vshll.u32 %v2734_v24, 16  ;;  %v3271_v17 = vshrl.u32 %v2664_v52, 16 }
 0x301   : > { %v9228_v27 = vpack.c.bf16 %v1370_v22, %v1369_v21  ;;  %v1371_v54 = vmax.f32 %v7616_v34, 0.0  ;;  %v3274_v19 = vshll.u32 %v2664_v52, 16  ;;  %vm11506_vm0 = vcmp.ne.s16.totalorder %v9260_v10, 0 }
 0x302   : > { %v9240_v33 = vsel %vm2452_vm12, %v9224_v25, %v9226_v26  ;;  %v3247_v60 = vrot.slane %v3245_v37, 3  ;;  %v3250_v4 = vrot.slane %v3248_v40, 4  ;;  %v1499_v35 = vand.u32 31, %v1445_v7 }
 0x303   : > { %11601 = vst [vmem:[#allocation33_spill] sm:$0xff] %v9228_v27  ;;  %v2739_v36 = vshll.u32 %v9228_v27, 16  ;;  %v2665_v50 = vsel %vm11507_vm14, %v9228_v27, 0  ;;  %v2743_v13 = vshrl.u32 %v9228_v27, 16 }
 0x304   : > { %v1237_v38 = vpop.f32.mrb[16].mxu0  ;;  %v3279_v2 = vshrl.u32 %v2665_v50, 16  ;;  %v3282_v6 = vshll.u32 %v2665_v50, 16  ;;  %v9269_v21 = vor.u32 %v3250_v4, %v3247_v60  ;;  %v3273_v50 = vrot.slane %v3271_v17, 3 }
 0x305   : > { %v7617_v41 = vadd.f32 %v9174_v15, %v1237_v38  ;;  %v1239_v44 = vpop.f32.mrb[17].mxu0  ;;  %v2741_v48 = vrot.slane %v2739_v36, 1  ;;  %vm9293_vm2 = vcmp.le.s32.totalorder %v1499_v35, 30 }
 0x306   : > { %v1240_v51 = vpop.f32.mrb[18].mxu0  ;;  %v3281_v20 = vrot.slane %v3279_v2, 3  ;;  %v3284_v30 = vrot.slane %v3282_v6, 4  ;;  %vm2343_vm3 = vmpackc.low %vm9293_vm2, %vm9293_vm2 }
 0x307   : > { %v1372_v56 = vmax.f32 %v7617_v41, 0.0  ;;  %v1242_v57 = vpop.f32.mrb[19].mxu0  ;;  %v2742_v59 = vsel %vm2698_vm11, %v2737_v46, %v2741_v48  ;;  %v7618_v12 = vadd.f32 %v9174_v15, %v1240_v51  ;;  %v2745_v23 = vor.u32 %v2743_v13, %v2741_v48 }
 0x308   : > { %v3288_v61 = vshrl.u32 %v2742_v59, 16  ;;  %v3291_v62 = vshll.u32 %v2742_v59, 16  ;;  %v3276_v51 = vrot.slane %v3274_v19, 4  ;;  %v9286_v53 = vor.u32 %v3284_v30, %v3281_v20 }
 0x309   : > { %v9254_v5 = vpack.c.bf16 %v1372_v56, %v1371_v54  ;;  %v1373_v37 = vmax.f32 %v7618_v12, 0.0  ;;  %v2030_v54 = vsel %vm1998_vm1, 65537, %v11456_v0 }
 0x30a   : > { %v3290_v8 = vrot.slane %v3288_v61, 3  ;;  %v3293_v9 = vrot.slane %v3291_v62, 4  ;;  %v3277_v6 = vor.u32 %v3276_v51, %v3273_v50  ;;  %v6932_v7 = vcombine.low %v2030_v54, %v9111_v39 }
 0x30b   : > { %11603 = vst [vmem:[#allocation35_spill] sm:$0xff] %v9254_v5  ;;  %v2747_v16 = vshll.u32 %v9254_v5, 16  ;;  %v2666_v44 = vsel %vm11506_vm0, %v9254_v5, 0  ;;  %v2751_v62 = vshrl.u32 %v9254_v5, 16 }
 0x30c   : > { %v1245_v47 = vpop.f32.mrb[20].mxu0  ;;  %v3294_v18 = vor.u32 %v3293_v9, %v3290_v8  ;;  %v3360_v59 = vshrl.u32 %v2666_v44, 16  ;;  %v3363_v60 = vshll.u32 %v2666_v44, 16  ;;  %v3286_v19 = vsel %vm2452_vm12, %v3277_v6, %v9286_v53 }
 0x30d   : > { %v7619_v42 = vadd.f32 %v9174_v15, %v1245_v47  ;;  %v1247_v22 = vpop.f32.mrb[21].mxu0  ;;  %v2749_v24 = vrot.slane %v2747_v16, 1  ;;  %v1458_v16 = vadd.s32 128, %v9155_v49 }
 0x30e   : > { %v1248_v34 = vpop.f32.mrb[22].mxu0  ;;  %v9278_v36 = vsel %vm2452_vm12, %v9269_v21, %v3294_v18  ;;  %v3362_v20 = vrot.slane %v3360_v59, 3 }
 0x30f   : > { %11607 = vst [vmem:[#allocation37_spill] sm:$0xff] %v9278_v36  ;;  %v1374_v38 = vmax.f32 %v7619_v42, 0.0  ;;  %v1250_v40 = vpop.f32.mrb[23].mxu0  ;;  %v2750_v41 = vsel %vm2698_vm11, %v2745_v23, %v2749_v24  ;;  %v7620_v61 = vadd.f32 %v9174_v15, %v1248_v34  ;;  %v2753_v12 = vor.u32 %v2751_v62, %v2749_v24 }
 0x310   : > { %v3296_v46 = vshrl.u32 %v2750_v41, 16  ;;  %v3299_v48 = vshll.u32 %v2750_v41, 16  ;;  %v3365_v42 = vrot.slane %v3363_v60, 4  ;;  %v1590_v40 = vand.u32 31, %v1458_v16 }
 0x311   : > { %v9284_v52 = vpack.c.bf16 %v1374_v38, %v1373_v37  ;;  %v1375_v22 = vmax.f32 %v7620_v61, 0.0  ;;  %v2153_v37 = vshrl.u32 %v6932_v7, 16  ;;  %v2156_v61 = vshll.u32 %v6932_v7, 16 }
 0x312   : > { %v3298_v56 = vrot.slane %v3296_v46, 3  ;;  %v3301_v57 = vrot.slane %v3299_v48, 4  ;;  %v3366_v51 = vor.u32 %v3365_v42, %v3362_v20  ;;  %v2375_v62 = vsel %vm2343_vm3, 65537, %v11456_v0 }
 0x313   : > { %v2755_v2 = vshll.u32 %v9284_v52, 16  ;;  %v2667_v24 = vsel %vm2245_vm9, %v9284_v52, 0  ;;  %v2759_v54 = vshrl.u32 %v9284_v52, 16  ;;  %v2155_v60 = vrot.slane %v2153_v37, 4 }
 0x314   : > { %v1253_v3 = vpop.f32.mrb[24].mxu0  ;;  %v3302_v4 = vor.u32 %v3301_v57, %v3298_v56  ;;  %v3423_v46 = vshrl.u32 %v2667_v24, 16  ;;  %v3426_v48 = vshll.u32 %v2667_v24, 16  ;;  %vm9325_vm4 = vcmp.ge.s32.totalorder %v1590_v40, 1 }
 0x315   : > { %v7621_v9 = vadd.f32 %v9174_v15, %v1253_v3  ;;  %v1255_v11 = vpop.f32.mrb[25].mxu0  ;;  %v2757_v13 = vrot.slane %v2755_v2, 1  ;;  %vm2002_vm5 = vmpackc.low %vm9325_vm4, %vm9325_vm4 }
 0x316   : > { %v1256_v17 = vpop.f32.mrb[26].mxu0  ;;  %v9300_v47 = vsel %vm2452_vm12, %v3294_v18, %v3302_v4  ;;  %v3425_v16 = vrot.slane %v3423_v46, 3 }
 0x317   : > { %11610 = vst [vmem:[#allocation38_spill] sm:$0xff] %v9300_v47  ;;  %v1376_v23 = vmax.f32 %v7621_v9, 0.0  ;;  %v1258_v30 = vpop.f32.mrb[27].mxu0  ;;  %5351 = vmatprep.mubr.bf16.mxu0 %v9300_v47  ;;  %v2758_v34 = vsel %vm2698_vm11, %v2753_v12, %v2757_v13  ;;  %v7622_v50 = vadd.f32 %v9174_v15, %v1256_v17  ;;  %v2761_v6 = vor.u32 %v2759_v54, %v2757_v13 }
 0x318   : > { %5352 = vmatmul.mubr.bf16.vlgmr.msra.gmra.mrb[80].mxu0 %v3286_v19  ;;  %v3369_v35 = vshrl.u32 %v2758_v34, 16  ;;  %v3372_v18 = vshll.u32 %v2758_v34, 16  ;;  %v3428_v17 = vrot.slane %v3426_v48, 4  ;;  %v3367_v13 = vsel %vm2452_vm12, %v9286_v53, %v3366_v51 }
 0x319   : > { %v9309_v38 = vpack.c.bf16 %v1376_v23, %v1375_v22  ;;  %v1377_v7 = vmax.f32 %v7622_v50, 0.0  ;;  %v2158_v34 = vrot.slane %v2156_v61, 5  ;;  %v9348_v50 = vsel %vm2098_vm8, %v9194_v32, %v9180_v45 }
 0x31a   : > { %v3371_v41 = vrot.slane %v3369_v35, 3  ;;  %v3374_v44 = vrot.slane %v3372_v18, 4  ;;  %v9339_v18 = vcombine.low %v9111_v39, %v2375_v62  ;;  %v3429_v53 = vor.u32 %v3428_v17, %v3425_v16 }
 0x31b   : > { %v2763_v56 = vshll.u32 %v9309_v38, 16  ;;  %v2668_v9 = vsel %vm2246_vm10, %v9309_v38, 0  ;;  %v2767_v46 = vshrl.u32 %v9309_v38, 16  ;;  %v9350_v61 = vor.u32 %v2158_v34, %v2155_v60 }
 0x31c   : > { %v1261_v57 = vpop.f32.mrb[28].mxu0  ;;  %v3375_v59 = vor.u32 %v3374_v44, %v3371_v41  ;;  %v3486_v30 = vshrl.u32 %v2668_v9, 16  ;;  %v3489_v35 = vshll.u32 %v2668_v9, 16  ;;  %v1462_v41 = vadd.s32 160, %v9155_v49 }
 0x31d   : > { %v7623_v2 = vadd.f32 %v9174_v15, %v1261_v57  ;;  %v1263_v3 = vpop.f32.mrb[29].mxu0  ;;  %v2765_v8 = vrot.slane %v2763_v56, 1  ;;  %v2034_v62 = vsel %vm2002_vm5, 65537, %v11456_v0  ;;  %v3430_v32 = vsel %vm2452_vm12, %v3366_v51, %v3429_v53 }
 0x31e   : > { %v1264_v11 = vpop.f32.mrb[30].mxu0  ;;  %v9323_v12 = vsel %vm2452_vm12, %v3302_v4, %v3375_v59  ;;  %v3488_v57 = vrot.slane %v3486_v30, 3  ;;  %vm2247_vm6 = vcmp.ne.s16.totalorder %v9348_v50, 0  ;;  %v1618_v19 = vand.u32 31, %v1462_v41 }
 0x31f   : > { %11611 = vst [vmem:[#allocation39_spill] sm:$0xff] %v9323_v12  ;;  %v1378_v20 = vmax.f32 %v7623_v2, 0.0  ;;  %v1266_v42 = vpop.f32.mrb[31].mxu0  ;;  %5359 = vmatprep.mubr.bf16.mxu0 %v9323_v12  ;;  %v2766_v22 = vsel %vm2698_vm11, %v2761_v6, %v2765_v8  ;;  %v7624_v44 = vadd.f32 %v9174_v15, %v1264_v11  ;;  %v2769_v6 = vor.u32 %v2767_v46, %v2765_v8 }
 0x320   : > { %5360 = vmatmul.mubr.bf16.gmra.mrb[84].mxu0 %v3367_v13  ;;  %v3432_v23 = vshrl.u32 %v2766_v22, 16  ;;  %v3435_v4 = vshll.u32 %v2766_v22, 16  ;;  %v3491_v11 = vrot.slane %v3489_v35, 4  ;;  %v6934_v22 = vcombine.low %v2034_v62, %v9111_v39 }
 0x321   : > { %v9333_v24 = vpack.c.bf16 %v1378_v20, %v1377_v7  ;;  %v1379_v7 = vmax.f32 %v7624_v44, 0.0  ;;  %v2462_v51 = vshrl.u32 %v9339_v18, 16  ;;  %v9373_v30 = vsel %vm2098_vm8, %v9180_v45, %v9350_v61 }
 0x322   : > { %v3434_v37 = vrot.slane %v3432_v23, 3  ;;  %v3437_v40 = vrot.slane %v3435_v4, 4  ;;  %v9368_v4 = vor.u32 %v3491_v11, %v3488_v57  ;;  %v2465_v34 = vshll.u32 %v9339_v18, 16 }
 0x323   : > { %v2771_v48 = vshll.u32 %v9333_v24, 16  ;;  %v2669_v8 = vsel %vm2247_vm6, %v9333_v24, 0  ;;  %v2775_v46 = vshrl.u32 %v9333_v24, 16  ;;  %vm9379_vm7 = vcmp.ge.s32.totalorder %v1618_v19, 1 }
 0x324   : > { %v1269_v54 = vpop.f32.mrb[32].mxu0  ;;  %v3438_v56 = vor.u32 %v3437_v40, %v3434_v37  ;;  %v3549_v40 = vshrl.u32 %v2669_v8, 16  ;;  %v3552_v41 = vshll.u32 %v2669_v8, 16  ;;  %vm2248_vm15 = vcmp.ne.s16.totalorder %v9373_v30, 0  ;;  %vm2006_vm1 = vmpackc.low %vm9379_vm7, %vm9379_vm7 }
 0x325   : > { %v7625_v2 = vadd.f32 %v9174_v15, %v1269_v54  ;;  %v1271_v3 = vpop.f32.mrb[33].mxu0  ;;  %v2773_v9 = vrot.slane %v2771_v48, 1  ;;  %v3493_v19 = vsel %vm2452_vm12, %v3429_v53, %v9368_v4 }
 0x326   : > { %v1272_v16 = vpop.f32.mrb[34].mxu0  ;;  %v9355_v17 = vsel %vm2452_vm12, %v3375_v59, %v3438_v56  ;;  %v2174_v3 = vshll.u32 %v6934_v22, 16  ;;  %v3554_v8 = vrot.slane %v3552_v41, 4 }
 0x327   : > { %11614 = vst [vmem:[#allocation40_spill] sm:$0xff] %v9355_v17  ;;  %v1380_v60 = vmax.f32 %v7625_v2, 0.0  ;;  %v1274_v20 = vpop.f32.mrb[35].mxu0  ;;  %5367 = vmatprep.mubr.bf16.mxu0 %v9355_v17  ;;  %v2774_v42 = vsel %vm2698_vm11, %v2769_v6, %v2773_v9  ;;  %v7626_v44 = vadd.f32 %v9174_v15, %v1272_v16  ;;  %v2171_v2 = vshrl.u32 %v6934_v22, 16 }
 0x328   : > { %5368 = vmatmul.mubr.bf16.gmra.mrb[88].mxu0 %v3430_v32  ;;  %v3495_v13 = vshrl.u32 %v2774_v42, 16  ;;  %v3498_v59 = vshll.u32 %v2774_v42, 16  ;;  %v2777_v32 = vor.u32 %v2775_v46, %v2773_v9  ;;  %v1466_v16 = vadd.s32 192, %v9155_v49 }
 0x329   : > { %v9366_v23 = vpack.c.bf16 %v1380_v60, %v1379_v7  ;;  %v3551_v42 = vrot.slane %v3549_v40, 3  ;;  %v2176_v40 = vrot.slane %v2174_v3, 5  ;;  %v2038_v46 = vsel %vm2006_vm1, 65537, %v11456_v0 }
 0x32a   : > { %v3497_v35 = vrot.slane %v3495_v13, 3  ;;  %v3500_v37 = vrot.slane %v3498_v59, 4  ;;  %v1381_v13 = vmax.f32 %v7626_v44, 0.0  ;;  %v9404_v44 = vsel %vm2098_vm8, %v9350_v61, %v9180_v45 }
 0x32b   : > { %11615 = vst [vmem:[#allocation41_spill] sm:$0xff] %v9366_v23  ;;  %v2779_v48 = vshll.u32 %v9366_v23, 16  ;;  %vm2249_vm2 = vcmp.ne.s16.totalorder %v9404_v44, 0 }
 0x32c   : > { %v1277_v57 = vpop.f32.mrb[36].mxu0  ;;  %v3501_v62 = vor.u32 %v3500_v37, %v3497_v35  ;;  %v2173_v37 = vrot.slane %v2171_v2, 4  ;;  %v2783_v2 = vshrl.u32 %v9366_v23, 16 }
 0x32d   : > { %v7627_v6 = vadd.f32 %v9174_v15, %v1277_v57  ;;  %v1279_v11 = vpop.f32.mrb[37].mxu0  ;;  %v2781_v7 = vrot.slane %v2779_v48, 1  ;;  %v1646_v48 = vand.u32 31, %v1466_v16 }
 0x32e   : > { %v1280_v60 = vpop.f32.mrb[38].mxu0  ;;  %v9387_v20 = vsel %vm2452_vm12, %v3438_v56, %v3501_v62  ;;  %v2670_v56 = vsel %vm2248_vm15, %v9366_v23, 0  ;;  %v2177_v61 = vor.u32 %v2176_v40, %v2173_v37 }
 0x32f   : > { %11618 = vst [vmem:[#allocation42_spill] sm:$0xff] %v9387_v20  ;;  %v1382_v59 = vmax.f32 %v7627_v6, 0.0  ;;  %v1282_v22 = vpop.f32.mrb[39].mxu0  ;;  %5375 = vmatprep.mubr.bf16.mxu0 %v9387_v20  ;;  %v2782_v9 = vsel %vm2698_vm11, %v2777_v32, %v2781_v7  ;;  %v3612_v6 = vshrl.u32 %v2670_v56, 16  ;;  %v3615_v11 = vshll.u32 %v2670_v56, 16 }
 0x330   : > { %5376 = vmatmul.mubr.bf16.gmra.mrb[92].mxu0 %v3493_v19  ;;  %v3558_v35 = vshrl.u32 %v2782_v9, 16  ;;  %v3561_v53 = vshll.u32 %v2782_v9, 16  ;;  %v7628_v32 = vadd.f32 %v9174_v15, %v1280_v60  ;;  %v3555_v19 = vor.u32 %v3554_v8, %v3551_v42 }
 0x331   : > { %v9399_v41 = vpack.c.bf16 %v1382_v59, %v1381_v13  ;;  %v9412_v22 = vcombine.low %v2038_v46, %v9111_v39  ;;  %vm9421_vm3 = vcmp.ge.s32.totalorder %v1646_v48, 1  ;;  %v9431_v48 = vrot.slane %v2462_v51, 3 }
 0x332   : > { %v3560_v54 = vrot.slane %v3558_v35, 3  ;;  %v3563_v57 = vrot.slane %v3561_v53, 4  ;;  %v2785_v35 = vor.u32 %v2783_v2, %v2781_v7  ;;  %v3614_v53 = vrot.slane %v3612_v6, 3  ;;  %vm2010_vm4 = vmpackc.low %vm9421_vm3, %vm9421_vm3 }
 0x333   : > { %11619 = vst [vmem:[#allocation43_spill] sm:$0xff] %v9399_v41  ;;  %v2787_v3 = vshll.u32 %v9399_v41, 16  ;;  %v2671_v60 = vsel %vm2249_vm2, %v9399_v41, 0  ;;  %v1383_v40 = vmax.f32 %v7628_v32, 0.0  ;;  %v3556_v7 = vsel %vm2452_vm12, %v9368_v4, %v3555_v19 }
 0x334   : > { %v1285_v13 = vpop.f32.mrb[40].mxu0  ;;  %v3564_v59 = vor.u32 %v3563_v57, %v3560_v54  ;;  %v3617_v54 = vrot.slane %v3615_v11, 4  ;;  %v3678_v11 = vshll.u32 %v2671_v60, 16  ;;  %v9437_v32 = vsel %vm2098_vm8, %v9180_v45, %v2177_v61 }
 0x335   : > { %v7629_v16 = vadd.f32 %v9174_v15, %v1285_v13  ;;  %v1287_v9 = vpop.f32.mrb[41].mxu0  ;;  %v2789_v56 = vrot.slane %v2787_v3, 1  ;;  %v3675_v13 = vshrl.u32 %v2671_v60, 16  ;;  %v9441_v4 = vrot.slane %v2465_v34, 4 }
 0x336   : > { %v1288_v42 = vpop.f32.mrb[42].mxu0  ;;  %v9419_v8 = vsel %vm2452_vm12, %v3501_v62, %v3564_v59  ;;  %v1470_v51 = vadd.s32 224, %v9155_v49  ;;  %v2791_v60 = vshrl.u32 %v9399_v41, 16  ;;  %v2192_v37 = vshll.u32 %v9412_v22, 16 }
 0x337   : > { %11620 = vst [vmem:[#allocation44_spill] sm:$0xff] %v9419_v8  ;;  %v1384_v46 = vmax.f32 %v7629_v16, 0.0  ;;  %v1290_v57 = vpop.f32.mrb[43].mxu0  ;;  %5383 = vmatprep.mubr.bf16.mxu0 %v9419_v8  ;;  %v2790_v2 = vsel %vm2698_vm11, %v2785_v35, %v2789_v56  ;;  %v3618_v35 = vor.u32 %v3617_v54, %v3614_v53  ;;  %v3680_v58 = vrot.slane %v3678_v11, 4 }
 0x338   : > { %5384 = vmatmul.mubr.bf16.gmra.mrb[96].mxu0 %v3556_v7  ;;  %v3621_v3 = vshrl.u32 %v2790_v2, 16  ;;  %v3624_v62 = vshll.u32 %v2790_v2, 16  ;;  %v2189_v57 = vshrl.u32 %v9412_v22, 16  ;;  %v3677_v7 = vrot.slane %v3675_v13, 3 }
 0x339   : > { %v9433_v6 = vpack.c.bf16 %v1384_v46, %v1383_v40  ;;  %v7630_v40 = vadd.f32 %v9174_v15, %v1288_v42  ;;  %v2042_v2 = vsel %vm2010_vm4, 65537, %v11456_v0  ;;  %v2793_v54 = vor.u32 %v2791_v60, %v2789_v56 }
 0x33a   : > { %v3623_v16 = vrot.slane %v3621_v3, 3  ;;  %v3626_v9 = vrot.slane %v3624_v62, 4  ;;  %v3619_v49 = vsel %vm2452_vm12, %v3555_v19, %v3618_v35  ;;  %vm2250_vm5 = vcmp.ne.s16.totalorder %v9437_v32, 0 }
 0x33b   : > { %11623 = vst [vmem:[#allocation45_spill] sm:$0xff] %v9433_v6  ;;  %v2795_v46 = vshll.u32 %v9433_v6, 16  ;;  %v1385_v13 = vmax.f32 %v7630_v40, 0.0  ;;  %v2672_v56 = vsel %vm2250_vm5, %v9433_v6, 0  ;;  %v9466_v19 = vsel %vm2098_vm8, %v2177_v61, %v9180_v45 }
 0x33c   : > { %v1293_v18 = vpop.f32.mrb[44].mxu0  ;;  %v3627_v34 = vor.u32 %v3626_v9, %v3623_v16  ;;  %v1674_v16 = vand.u32 31, %v1470_v51  ;;  %v6938_v51 = vcombine.low %v2042_v2, %v9111_v39  ;;  %v9471_v60 = vor.u32 %v3680_v58, %v3677_v7 }
 0x33d   : > { %v7631_v3 = vadd.f32 %v9174_v15, %v1293_v18  ;;  %v1295_v53 = vpop.f32.mrb[45].mxu0  ;;  %v2797_v62 = vrot.slane %v2795_v46, 1  ;;  %v2191_v46 = vrot.slane %v2189_v57, 4  ;;  %v3741_v0 = vshll.u32 %v2672_v56, 16 }
 0x33e   : > { %v1296_v42 = vpop.f32.mrb[46].mxu0  ;;  %v9455_v31 = vsel %vm2452_vm12, %v3564_v59, %v3627_v34  ;;  %vm9476_vm7 = vcmp.ge.s32.totalorder %v1674_v16, 1  ;;  %vm2251_vm1 = vcmp.ne.s16.totalorder %v9466_v19, 0  ;;  %v2207_v58 = vshrl.u32 %v6938_v51, 16 }
 0x33f   : > { %11624 = vst [vmem:[#allocation46_spill] sm:$0xff] %v9455_v31  ;;  %v1386_v9 = vmax.f32 %v7631_v3, 0.0  ;;  %v1298_v22 = vpop.f32.mrb[47].mxu0  ;;  %5391 = vmatprep.mubr.bf16.mxu0 %v9455_v31  ;;  %v2798_v18 = vsel %vm2698_vm11, %v2793_v54, %v2797_v62  ;;  %v2194_v3 = vrot.slane %v2192_v37, 5  ;;  %v2210_v57 = vshll.u32 %v6938_v51, 16  ;;  %vm2014_vm3 = vmpackc.low %vm9476_vm7, %vm9476_vm7 }
 0x340   : > { %5392 = vmatmul.mubr.bf16.gmra.mrb[100].mxu0 %v3619_v49  ;;  %v3684_v11 = vshrl.u32 %v2798_v18, 16  ;;  %v3687_v59 = vshll.u32 %v2798_v18, 16  ;;  %v3738_v22 = vshrl.u32 %v2672_v56, 16  ;;  %v7632_v49 = vadd.f32 %v9174_v15, %v1296_v42 }
 0x341   : > { %v9469_v40 = vpack.c.bf16 %v1386_v9, %v1385_v13  ;;  %v2799_v18 = vshrl.u32 %v9433_v6, 16  ;;  %v2195_v42 = vor.u32 %v2194_v3, %v2191_v46  ;;  %v3682_v16 = vsel %vm2452_vm12, %v3618_v35, %v9471_v60 }
 0x342   : > { %v3686_v53 = vrot.slane %v3684_v11, 3  ;;  %v3689_v54 = vrot.slane %v3687_v59, 4  ;;  %v3740_v6 = vrot.slane %v3738_v22, 3  ;;  %v3743_v41 = vrot.slane %v3741_v0, 4 }
 0x343   : > { %11625 = vst [vmem:[#allocation47_spill] sm:$0xff] %v9469_v40  ;;  %v2803_v31 = vshll.u32 %v9469_v40, 16  ;;  %v2801_v9 = vor.u32 %v2799_v18, %v2797_v62  ;;  %v1387_v51 = vmax.f32 %v7632_v49, 0.0  ;;  %v2209_v46 = vrot.slane %v2207_v58, 4 }
 0x344   : > { %v1301_v2 = vpop.f32.mrb[48].mxu0  ;;  %v3690_v13 = vor.u32 %v3689_v54, %v3686_v53  ;;  %v2212_v0 = vrot.slane %v2210_v57, 5  ;;  %v9499_v22 = vsel %vm2098_vm8, %v9180_v45, %v2195_v42  ;;  %v9503_v49 = vor.u32 %v9441_v4, %v9431_v48 }
 0x345   : > { %v7633_v7 = vadd.f32 %v9174_v15, %v1301_v2  ;;  %v1303_v37 = vpop.f32.mrb[49].mxu0  ;;  %v2805_v56 = vrot.slane %v2803_v31, 1  ;;  %11630 = vst [vmem:[#allocation50_spill] sm:$0xff] %v9499_v22  ;;  %v11631_v18 = vmov 0   ;;  %v2807_v57 = vshrl.u32 %v9469_v40, 16 }
 0x346   : > { %v1304_v11 = vpop.f32.mrb[50].mxu0  ;;  %v9483_v59 = vsel %vm2452_vm12, %v3627_v34, %v3690_v13  ;;  %v2673_v34 = vsel %vm2251_vm1, %v9469_v40, 0  ;;  %v2046_v61 = vsel %vm2014_vm3, 65537, %v11631_v18  ;;  %v9506_v37 = vor.u32 %v3743_v41, %v3740_v6 }
 0x347   : > { %11628 = vst [vmem:[#allocation48_spill] sm:$0xff] %v9483_v59  ;;  %v1388_v53 = vmax.f32 %v7633_v7, 0.0  ;;  %v1306_v54 = vpop.f32.mrb[51].mxu0  ;;  %5399 = vmatprep.mubr.bf16.mxu0 %v9483_v59  ;;  %v2806_v31 = vsel %vm2698_vm11, %v2801_v9, %v2805_v56  ;;  %v3801_v9 = vshrl.u32 %v2673_v34, 16  ;;  %v7634_v58 = vadd.f32 %v9174_v15, %v1304_v11 }
 0x348   : > { %5400 = vmatmul.mubr.bf16.gmra.mrb[104].mxu0 %v3682_v16  ;;  %v3747_v62 = vshrl.u32 %v2806_v31, 16  ;;  %v3750_v35 = vshll.u32 %v2806_v31, 16  ;;  %vm2252_vm4 = vcmp.ne.s16.totalorder %v9499_v22, 0  ;;  %v9514_v48 = vsel %vm2098_vm8, %v2195_v42, %v9180_v45 }
 0x349   : > { %v9495_v3 = vpack.c.bf16 %v1388_v53, %v1387_v51  ;;  %v3804_v51 = vshll.u32 %v2673_v34, 16  ;;  %11632 = vst [vmem:[#allocation51_spill] sm:$0xff] %v9514_v48  ;;  %v2213_v4 = vor.u32 %v2212_v0, %v2209_v46  ;;  %v2809_v31 = vor.u32 %v2807_v57, %v2805_v56 }
 0x34a   : > { %v3749_v2 = vrot.slane %v3747_v62, 3  ;;  %v3752_v7 = vrot.slane %v3750_v35, 4  ;;  %v3803_v42 = vrot.slane %v3801_v9, 3  ;;  %v9527_v46 = vcombine.low %v2046_v61, %v9111_v39 }
 0x34b   : > { %11629 = vst [vmem:[#allocation49_spill] sm:$0xff] %v9495_v3  ;;  %v2811_v16 = vshll.u32 %v9495_v3, 16  ;;  %v2674_v11 = vsel %vm2252_vm4, %v9495_v3, 0  ;;  %v1389_v0 = vmax.f32 %v7634_v58, 0.0  ;;  %vm2253_vm7 = vcmp.ne.s16.totalorder %v9514_v48, 0 }
 0x34c   : > { %v1309_v53 = vpop.f32.mrb[52].mxu0  ;;  %v3753_v54 = vor.u32 %v3752_v7, %v3749_v2  ;;  %v3745_v2 = vsel %vm2452_vm12, %v9471_v60, %v9506_v37  ;;  %v3867_v40 = vshll.u32 %v2674_v11, 16  ;;  %v9536_v60 = vsel %vm2098_vm8, %v9180_v45, %v2213_v4 }
 0x34d   : > { %v7635_v41 = vadd.f32 %v9174_v15, %v1309_v53  ;;  %v1311_v6 = vpop.f32.mrb[53].mxu0  ;;  %v2813_v62 = vrot.slane %v2811_v16, 1  ;;  %v3806_v16 = vrot.slane %v3804_v51, 4  ;;  %11635 = vst [vmem:[#allocation54_spill] sm:$0xff] %v9536_v60  ;;  %v9540_v61 = vsel %vm2098_vm8, %v2213_v4, %v9180_v45 }
 0x34e   : > { %v1312_v35 = vpop.f32.mrb[54].mxu0  ;;  %v9521_v34 = vsel %vm2452_vm12, %v3690_v13, %v3753_v54  ;;  %v3864_v6 = vshrl.u32 %v2674_v11, 16  ;;  %11636 = vst [vmem:[#allocation55_spill] sm:$0xff] %v9540_v61  ;;  %v2633_v51 = vsel %vm2245_vm9, %v9228_v27, 0  ;;  %vm2254_vm9 = vcmp.ne.s16.totalorder %v9536_v60, 0 }
 0x34f   : > { %11633 = vst [vmem:[#allocation52_spill] sm:$0xff] %v9521_v34  ;;  %v1390_v7 = vmax.f32 %v7635_v41, 0.0  ;;  %v1314_v56 = vpop.f32.mrb[55].mxu0  ;;  %5407 = vmatprep.mubr.bf16.mxu0 %v9521_v34  ;;  %v2814_v57 = vsel %vm2698_vm11, %v2809_v31, %v2813_v62  ;;  %v2634_v41 = vsel %vm2246_vm10, %v9254_v5, 0  ;;  %v7636_v31 = vadd.f32 %v9174_v15, %v1312_v35 }
 0x350   : > { %5408 = vmatmul.mubr.bf16.gmra.mrb[108].mxu0 %v3745_v2  ;;  %v3810_v53 = vshrl.u32 %v2814_v57, 16  ;;  %v3813_v13 = vshll.u32 %v2814_v57, 16  ;;  %v3807_v11 = vor.u32 %v3806_v16, %v3803_v42  ;;  %v2815_v2 = vshrl.u32 %v9495_v3, 16 }
 0x351   : > { %v9531_v59 = vpack.c.bf16 %v1390_v7, %v1389_v0  ;;  %v3866_v56 = vrot.slane %v3864_v6, 3  ;;  %v3869_v57 = vrot.slane %v3867_v40, 4  ;;  %v3405_v43 = vshrl.u32 %v2633_v51, 16 }
 0x352   : > { %v3812_v9 = vrot.slane %v3810_v53, 3  ;;  %v3815_v58 = vrot.slane %v3813_v13, 4  ;;  %v2225_v53 = vshrl.u32 %v9527_v46, 16  ;;  %v2817_v39 = vor.u32 %v2815_v2, %v2813_v62 }
 0x353   : > { %11634 = vst [vmem:[#allocation53_spill] sm:$0xff] %v9531_v59  ;;  %v2819_v0 = vshll.u32 %v9531_v59, 16  ;;  %v2675_v42 = vsel %vm2253_vm7, %v9531_v59, 0  ;;  %v3408_v40 = vshll.u32 %v2633_v51, 16  ;;  %v3468_v16 = vshrl.u32 %v2634_v41, 16 }
 0x354   : > { %v1317_v7 = vpop.f32.mrb[56].mxu0  ;;  %v3816_v4 = vor.u32 %v3815_v58, %v3812_v9  ;;  %v1391_v6 = vmax.f32 %v7636_v31, 0.0  ;;  %v3808_v62 = vsel %vm2452_vm12, %v9506_v37, %v3807_v11  ;;  %v3927_v31 = vshrl.u32 %v2675_v42, 16 }
 0x355   : > { %v7637_v29 = vadd.f32 %v9174_v15, %v1317_v7  ;;  %v1319_v13 = vpop.f32.mrb[57].mxu0  ;;  %v2821_v34 = vrot.slane %v2819_v0, 1  ;;  %v9564_v7 = vor.u32 %v3869_v57, %v3866_v56  ;;  %v3930_v48 = vshll.u32 %v2675_v42, 16 }
 0x356   : > { %v1320_v8 = vpop.f32.mrb[58].mxu0  ;;  %v9554_v35 = vsel %vm2452_vm12, %v3753_v54, %v3816_v4  ;;  %v3471_v13 = vshll.u32 %v2634_v41, 16  ;;  %v3407_v56 = vrot.slane %v3405_v43, 3  ;;  %v3410_v57 = vrot.slane %v3408_v40, 4 }
 0x357   : > { %11638 = vst [vmem:[#allocation56_spill] sm:$0xff] %v9554_v35  ;;  %v1392_v9 = vmax.f32 %v7637_v29, 0.0  ;;  %v1322_v58 = vpop.f32.mrb[59].mxu0  ;;  %5415 = vmatprep.mubr.bf16.mxu0 %v9554_v35  ;;  %v2822_v2 = vsel %vm2698_vm11, %v2817_v39, %v2821_v34  ;;  %v2227_v29 = vrot.slane %v2225_v53, 4  ;;  %v7638_v35 = vadd.f32 %v9174_v15, %v1320_v8  ;;  %v9579_v15 = vld [vmem:[#allocation8] ss:$0 sm:$0xff] }
 0x358   : > { %5416 = vmatmul.mubr.bf16.gmra.mrb[112].mxu0 %v3808_v62  ;;  %v3873_v54 = vshrl.u32 %v2822_v2, 16  ;;  %v3876_v0 = vshll.u32 %v2822_v2, 16  ;;  %v2228_v58 = vshll.u32 %v9527_v46, 16  ;;  %v2823_v39 = vshrl.u32 %v9531_v59, 16 }
 0x359   : > { %v9567_v51 = vpack.c.bf16 %v1392_v9, %v1391_v6  ;;  %v3871_v6 = vsel %vm2452_vm12, %v3807_v11, %v9564_v7  ;;  %v3470_v46 = vrot.slane %v3468_v16, 3  ;;  %v3473_v53 = vrot.slane %v3471_v13, 4 }
 0x35a   : > { %v3875_v3 = vrot.slane %v3873_v54, 3  ;;  %v3878_v37 = vrot.slane %v3876_v0, 4  ;;  %v2825_v9 = vor.u32 %v2823_v39, %v2821_v34  ;;  %v1393_v40 = vmax.f32 %v7638_v35, 0.0 }
 0x35b   : > { %11639 = vst [vmem:[#allocation57_spill] sm:$0xff] %v9567_v51  ;;  %v2827_v62 = vshll.u32 %v9567_v51, 16  ;;  %v2831_v43 = vshrl.u32 %v9567_v51, 16  ;;  %v3929_v0 = vrot.slane %v3927_v31, 3  ;;  %vm11511_vm10 = vcmp.ne.s16.totalorder %v9540_v61, 0  ;;  %v7949_v61 = vld [vmem:[#allocation10 + $0x80] sm:$0xff]  }
 0x35c   : > { %v1325_v2 = vpop.f32.mrb[60].mxu0  ;;  %v3879_v41 = vor.u32 %v3878_v37, %v3875_v3  ;;  %v3932_v37 = vrot.slane %v3930_v48, 4  ;;  %v2676_v35 = vsel %vm2254_vm9, %v9567_v51, 0 }
 0x35d   : > { %v7639_v8 = vadd.f32 %v9579_v15, %v1325_v2  ;;  %v1327_v42 = vpop.f32.mrb[61].mxu0  ;;  %v2829_v54 = vrot.slane %v2827_v62, 1  ;;  %v1406_v62 = vstv %s9577_s20  ;;  %v3993_v60 = vshll.u32 %v2676_v35, 16 }
 0x35e   : > { %v9583_v3 = vpop.f32.mrb[62].mxu0  ;;  %v9586_v11 = vsel %vm2452_vm12, %v3816_v4, %v3879_v41  ;;  %v2230_v42 = vrot.slane %v2228_v58, 5  ;;  %vm9602_vm3 = vcmp.eq.s32.totalorder %v1406_v62, 1 }
 0x35f   : > { %11640 = vst [vmem:[#allocation58_spill] sm:$0xff] %v9586_v11  ;;  %v1394_v16 = vmax.f32 %v7639_v8, 0.0  ;;  %v1330_v13 = vpop.f32.mrb[63].mxu0  ;;  %5423 = vmatprep.mubr.bf16.mxu0 %v9586_v11  ;;  %v2830_v34 = vsel %vm2698_vm11, %v2825_v9, %v2829_v54  ;;  %v2833_v39 = vor.u32 %v2831_v43, %v2829_v54  ;;  %v9597_v8 = vor.u32 %v3473_v53, %v3470_v46 }
 0x360   : > { %5424 = vmatmul.mubr.bf16.gmra.mrb[116].mxu0 %v3871_v6  ;;  %v3936_v2 = vshrl.u32 %v2830_v34, 16  ;;  %v3939_v4 = vshll.u32 %v2830_v34, 16  ;;  %v3933_v9 = vor.u32 %v3932_v37, %v3929_v0  ;;  %v3990_v54 = vshrl.u32 %v2676_v35, 16 }
 0x361   : > { %v9595_v31 = vpack.c.bf16 %v1394_v16, %v1393_v40  ;;  %v4215_v48 = vshrl.u32 %v2833_v39, 16  ;;  %v4218_v59 = vshll.u32 %v2833_v39, 16  ;;  %11642 = vst [vmem:[#allocation60_spill] sm:$0xff] %v9597_v8  ;;  %v9600_v6 = vor.u32 %v3410_v57, %v3407_v56 }
 0x362   : > { %v3938_v13 = vrot.slane %v3936_v2, 3  ;;  %v3941_v11 = vrot.slane %v3939_v4, 4  ;;  %v9606_v16 = vor.u32 %v2230_v42, %v2227_v29  ;;  %v3934_v29 = vsel %vm2452_vm12, %v9564_v7, %v3933_v9 }
 0x363   : > { %11641 = vst [vmem:[#allocation59_spill] sm:$0xff] %v9595_v31  ;;  %v2886_v43 = vshll.u32 %v9595_v31, 16  ;;  %v4217_v51 = vrot.slane %v4215_v48, 3  ;;  %11643 = vst [vmem:[#allocation61_spill] sm:$0xff] %v9600_v6  ;;  %v4220_v46 = vrot.slane %v4218_v59, 4  ;;  %v9615_v56 = vsel %vm2452_vm12, %v9600_v6, %v9597_v8 }
 0x364   : > { %v1333_v22 = vpop.f32.mrb[64].mxu0  ;;  %v3942_v40 = vor.u32 %v3941_v11, %v3938_v13  ;;  %11646 = vst [vmem:[#allocation62_spill] sm:$0xff] %v9615_v56  ;;  %v3992_v59 = vrot.slane %v3990_v54, 3  ;;  %v3995_v2 = vrot.slane %v3993_v60, 4  ;;  %v2677_v4 = vsel %vm11511_vm10, %v9595_v31, 0 }
 0x365   : > { %v7641_v53 = vadd.f32 %v9579_v15, %v1333_v22  ;;  %v1335_v34 = vpop.f32.mrb[65].mxu0  ;;  %v9609_v0 = vrot.slane %v2886_v43, 1  ;;  %v4221_v11 = vor.u32 %v4220_v46, %v4217_v51  ;;  %v9644_v43 = vsel %vm2452_vm12, %v9131_v55, %v9503_v49 }
 0x366   : > { %v1336_v57 = vpop.f32.mrb[66].mxu0  ;;  %v9618_v37 = vsel %vm2452_vm12, %v3879_v41, %v3942_v40  ;;  %11649 = vst [vmem:[#allocation65_spill] sm:$0xff] %v9644_v43  ;;  %v9646_v46 = vor.u32 %v3995_v2, %v3992_v59  ;;  %v9651_v34 = vsel %vm2098_vm8, %v9180_v45, %v9606_v16  ;;  %v1414_v2 = vstv %s9636_s3 }
 0x367   : > { %11647 = vst [vmem:[#allocation63_spill] sm:$0xff] %v9618_v37  ;;  %v1396_v22 = vmax.f32 %v7641_v53, 0.0  ;;  %v1338_v35 = vpop.f32.mrb[67].mxu0  ;;  %5431 = vmatprep.mubr.bf16.mxu0 %v9618_v37  ;;  %v2889_v62 = vsel %vm2698_vm11, %v2833_v39, %v9609_v0  ;;  %v7642_v41 = vadd.f32 %v9579_v15, %v1336_v57  ;;  %v9630_v7 = vsel %vm2452_vm12, %v3942_v40, %v4221_v11 }
 0x368   : > { %5432 = vmatmul.mubr.bf16.gmra.mrb[120].mxu0 %v3934_v29  ;;  %v3999_v42 = vshrl.u32 %v2889_v62, 16  ;;  %v4002_v48 = vshll.u32 %v2889_v62, 16  ;;  %11648 = vst [vmem:[#allocation64_spill] sm:$0xff] %v9630_v7  ;;  %v11490_v39 = vmov 0.0   ;;  %v4053_v53 = vshrl.u32 %v2677_v4, 16 }
 0x369   : > { %v1408_v51 = vsel %vm9602_vm3, %v1396_v22, 0.0  ;;  %v1397_v29 = vmax.f32 %v7642_v41, 0.0  ;;  %v4056_v35 = vshll.u32 %v2677_v4, 16  ;;  %v7609_v62 = vadd.f32 %v9579_v15, %v9163_v63 }
 0x36a   : > { %v9639_v60 = vpack.c.bf16 %v1408_v51, %v11490_v39  ;;  %v4001_v13 = vrot.slane %v3999_v42, 3  ;;  %v4004_v54 = vrot.slane %v4002_v48, 4  ;;  %v7640_v51 = vadd.f32 %v9579_v15, %v9583_v3 }
 0x36b   : > { %v2890_v8 = vshrl.u32 %v9595_v31, 16  ;;  %v1409_v3 = vsel %vm9602_vm3, %v1397_v29, 0.0  ;;  %v4058_v6 = vrot.slane %v4056_v35, 4  ;;  %v1364_v7 = vmax.f32 %v7609_v62, 0.0 }
 0x36c   : > { %v2702_v57 = vshll.u32 %v9639_v60, 16  ;;  %v1341_v11 = vpop.f32.mrb[68].mxu0  ;;  %v9654_v22 = vor.u32 %v4004_v54, %v4001_v13  ;;  %v2259_v48 = vsel %vm11495_vm13, %v9639_v60, 0  ;;  %vm9688_vm13 = vcmp.eq.s32.totalorder %v1414_v2, 1 }
 0x36d   : > { %v7643_v42 = vadd.f32 %v9579_v15, %v1341_v11  ;;  %v1343_v59 = vpop.f32.mrb[69].mxu0  ;;  %v3169_v4 = vshrl.u32 %v2259_v48, 16  ;;  %v3172_v13 = vshll.u32 %v2259_v48, 16  ;;  %v2892_v35 = vor.u32 %v2890_v8, %v9609_v0 }
 0x36e   : > { %v1344_v39 = vpop.f32.mrb[70].mxu0  ;;  %v9667_v41 = vsel %vm2452_vm12, %v3942_v40, %v9654_v22  ;;  %v3997_v59 = vsel %vm2452_vm12, %v3933_v9, %v9646_v46  ;;  %v2704_v56 = vrot.slane %v2702_v57, 1  ;;  %v4055_v40 = vrot.slane %v4053_v53, 3 }
 0x36f   : > { %11650 = vst [vmem:[#allocation66_spill] sm:$0xff] %v9667_v41  ;;  %v1398_v54 = vmax.f32 %v7643_v42, 0.0  ;;  %v7644_v63 = vadd.f32 %v9579_v15, %v1344_v39  ;;  %v1346_v11 = vpop.f32.mrb[71].mxu0  ;;  %5439 = vmatprep.mubr.bf16.mxu0 %v9667_v41  ;;  %v3171_v39 = vrot.slane %v3169_v4, 3  ;;  %v2700_v41 = vshrl.u32 %v9639_v60, 16 }
 0x370   : > { %5440 = vmatmul.mubr.bf16.gmra.mrb[124].mxu0 %v3997_v59  ;;  %v3174_v11 = vrot.slane %v3172_v13, 4  ;;  %v9684_v9 = vsel %vm2098_vm8, %v9606_v16, %v9180_v45  ;;  %v1395_v57 = vmax.f32 %v7640_v51, 0.0  ;;  %vm11508_vm8 = vcmp.ne.s16.totalorder %v9644_v43, 0  ;;  %v7974_v43 = vld [vmem:[#allocation10 + $0x168] sm:$0xff]  }
 0x371   : > { %v1410_v42 = vsel %vm9602_vm3, %v1398_v54, 0.0  ;;  %v1399_v48 = vmax.f32 %v7644_v63, 0.0  ;;  %v2705_v54 = vor.u32 %v2704_v56, %v2700_v41  ;;  %v9696_v63 = vor.u32 %v4058_v6, %v4055_v40 }
 0x372   : > { %v9679_v14 = vpack.c.bf16 %v1410_v42, %v1409_v3  ;;  %v3175_v59 = vor.u32 %v3174_v11, %v3171_v39 }
 0x373   : > { %v1411_v53 = vsel %vm9602_vm3, %v1399_v48, 0.0  ;;  %vm11509_vm3 = vcmp.ne.s16.totalorder %v9131_v55, 0 }
 0x374   : > { %v2707_v62 = vshll.u32 %v9679_v14, 16  ;;  %v9694_v4 = vpack.c.bf16 %v1364_v7, %v1411_v53  ;;  %v1349_v13 = vpop.f32.mrb[72].mxu0  ;;  %v2711_v16 = vshrl.u32 %v9679_v14, 16  ;;  %v2260_v2 = vsel %vm11507_vm14, %v9679_v14, 0 }
 0x375   : > { %v7645_v51 = vadd.f32 %v9579_v15, %v1349_v13  ;;  %v1351_v58 = vpop.f32.mrb[73].mxu0  ;;  %v3177_v7 = vshrl.u32 %v2260_v2, 16  ;;  %v3180_v42 = vshll.u32 %v2260_v2, 16  ;;  %vm11520_vm14 = vcmp.ne.s16.totalorder %v9180_v45, 0 }
 0x376   : > { %v1352_v3 = vpop.f32.mrb[74].mxu0  ;;  %v2709_v8 = vrot.slane %v2707_v62, 1  ;;  %v2715_v0 = vshll.u32 %v9694_v4, 16  ;;  %v2719_v41 = vshrl.u32 %v9694_v4, 16  ;;  %v2261_v40 = vsel %vm11506_vm0, %v9694_v4, 0 }
 0x377   : > { %v1400_v48 = vmax.f32 %v7645_v51, 0.0  ;;  %v7646_v6 = vadd.f32 %v9579_v15, %v1352_v3  ;;  %v1354_v56 = vpop.f32.mrb[75].mxu0  ;;  %v3179_v11 = vrot.slane %v3177_v7, 3  ;;  %vm11526_vm0 = vcmp.ne.s16.totalorder %v9684_v9, 0 }
 0x378   : > { %v2710_v53 = vsel %vm2698_vm11, %v2705_v54, %v2709_v8  ;;  %v2713_v13 = vor.u32 %v2711_v16, %v2709_v8  ;;  %v2717_v39 = vrot.slane %v2715_v0, 1  ;;  %v3182_v56 = vrot.slane %v3180_v42, 4 }
 0x379   : > { %v1416_v62 = vsel %vm9688_vm13, %v1400_v48, 0.0  ;;  %v1401_v58 = vmax.f32 %v7646_v6, 0.0  ;;  %v3186_v2 = vshrl.u32 %v2710_v53, 16  ;;  %v3189_v51 = vshll.u32 %v2710_v53, 16 }
 0x37a   : > { %v9712_v31 = vpack.c.bf16 %v1416_v62, %v1395_v57  ;;  %v2718_v3 = vsel %vm2698_vm11, %v2713_v13, %v2717_v39  ;;  %v2721_v28 = vor.u32 %v2719_v41, %v2717_v39  ;;  %v9717_v7 = vor.u32 %v3182_v56, %v3179_v11 }
 0x37b   : > { %v1417_v10 = vsel %vm9688_vm13, %v1401_v58, 0.0  ;;  %v3188_v37 = vrot.slane %v3186_v2, 3  ;;  %v3191_v54 = vrot.slane %v3189_v51, 4  ;;  %v3194_v16 = vshrl.u32 %v2718_v3, 16 }
 0x37c   : > { %v1357_v8 = vpop.f32.mrb[76].mxu0  ;;  %v3197_v0 = vshll.u32 %v2718_v3, 16  ;;  %v2726_v48 = vsel %vm2698_vm11, %v2721_v28, %v9211_v1  ;;  %v2894_v57 = vshll.u32 %v9712_v31, 16  ;;  %v3184_v58 = vsel %vm2452_vm12, %v3175_v59, %v9717_v7 }
 0x37d   : > { %v7647_v6 = vadd.f32 %v9579_v15, %v1357_v8  ;;  %v1359_v53 = vpop.f32.mrb[77].mxu0  ;;  %v3192_v42 = vor.u32 %v3191_v54, %v3188_v37  ;;  %v3196_v41 = vrot.slane %v3194_v16, 3  ;;  %v3237_v13 = vshrl.u32 %v2726_v48, 16 }
 0x37e   : > { %v1360_v39 = vpop.f32.mrb[78].mxu0  ;;  %v3199_v62 = vrot.slane %v3197_v0, 4  ;;  %v3240_v11 = vshll.u32 %v2726_v48, 16  ;;  %v2896_v2 = vrot.slane %v2894_v57, 1  ;;  %v3322_v56 = vshrl.u32 %v2261_v40, 16 }
 0x37f   : > { %v1402_v51 = vmax.f32 %v7647_v6, 0.0  ;;  %v7648_v1 = vadd.f32 %v9579_v15, %v1360_v39  ;;  %v1362_v28 = vpop.f32.mrb[79].mxu0  ;;  %v3239_v3 = vrot.slane %v3237_v13, 3  ;;  %v3325_v54 = vshll.u32 %v2261_v40, 16  ;;  %v7950_v13 = vld [vmem:[#allocation10 + $0xc8] sm:$0xff]  }
 0x380   : > { %v3200_v8 = vor.u32 %v3199_v62, %v3196_v41  ;;  %v3242_v53 = vrot.slane %v3240_v11, 4  ;;  %v2897_v37 = vsel %vm2698_vm11, %v2892_v35, %v2896_v2  ;;  %v3324_v6 = vrot.slane %v3322_v56, 3 }
 0x381   : > { %v1418_v16 = vsel %vm9688_vm13, %v1402_v51, 0.0  ;;  %v1403_v0 = vmax.f32 %v7648_v1, 0.0  ;;  %v4062_v23 = vshrl.u32 %v2897_v37, 16  ;;  %v4065_v59 = vshll.u32 %v2897_v37, 16 }
 0x382   : > { %v9730_v48 = vpack.c.bf16 %v1418_v16, %v1417_v10  ;;  %v3201_v57 = vsel %vm2452_vm12, %v3192_v42, %v3200_v8  ;;  %v3243_v15 = vor.u32 %v3242_v53, %v3239_v3  ;;  %v3327_v39 = vrot.slane %v3325_v54, 4 }
 0x383   : > { %v1419_v41 = vsel %vm9688_vm13, %v1403_v0, 0.0  ;;  %4868 = vmatprep.mubr.bf16.mxu1 %v3201_v57  ;;  %v4064_v35 = vrot.slane %v4062_v23, 3  ;;  %v4067_v40 = vrot.slane %v4065_v59, 4  ;;  %v11653_v11 = vmov 0.0   ;;  %v7951_v23 = vld [vmem:[#allocation10 + $0x88] sm:$0xff]   ;;  %v7953_v59 = vld [vmem:[#allocation10 + $0x90] sm:$0xff]  }
 0x384   : > { %v2952_v62 = vshll.u32 %v9730_v48, 16  ;;  %v9738_v51 = vpack.c.bf16 %v11653_v11, %v1419_v41  ;;  %4869 = vmatmul.mubr.bf16.vlgmr.msra.gmra.mrb[0].mxu1 %v3184_v58  ;;  %v9743_v10 = vsel %vm2452_vm12, %v9503_v49, %v9131_v55  ;;  %v3330_v29 = vsel %vm2452_vm12, %v3200_v8, %v3243_v15 }
 0x385   : > { %11654 = vst [vmem:[#allocation67_spill] sm:$0xff] %v9743_v10  ;;  %7186 = vmatpush3.bf16.msra.mxu1 %v7949_v61  ;;  %v9746_v42 = vor.u32 %v4067_v40, %v4064_v35  ;;  %vm2256_vm13 = vcmp.ne.s16.totalorder %v9651_v34, 0  ;;  %v2956_v28 = vshrl.u32 %v9730_v48, 16  ;;  %4876 = vmatprep.mubr.bf16.mxu1 %v3330_v29  ;;  %v4060_v49 = vsel %vm2452_vm12, %v9646_v46, %v9696_v63  ;;  %v7952_v61 = vld [vmem:[#allocation10 + $0xd0] sm:$0xff]   ;;  %v7954_v35 = vld [vmem:[#allocation10 + $0xd8] sm:$0xff]  }
 0x386   : > { %v2954_v1 = vrot.slane %v2952_v62, 1  ;;  %v2960_v58 = vshll.u32 %v9738_v51, 16  ;;  %7187 = vmatprep.subr.bf16.mxu1 %v7950_v13  ;;  %v9759_v3 = vsel %vm11509_vm3, %v9639_v60, 0  ;;  %v9764_v56 = vsel %vm11508_vm8, %v9679_v14, 0 }
 0x387   : > { %11655 = vst [vmem:[#allocation68_spill] sm:$0xff] %v9746_v42  ;;  %v9769_v8 = vsel %vm2452_vm12, %v9654_v22, %v9746_v42  ;;  %v3328_v46 = vor.u32 %v3327_v39, %v3324_v6  ;;  %v2898_v54 = vshrl.u32 %v9712_v31, 16  ;;  %v2678_v60 = vsel %vm2256_vm13, %v9712_v31, 0 }
 0x388   : > { %11656 = vst [vmem:[#allocation69_spill] sm:$0xff] %v9769_v8  ;;  %v2958_v53 = vor.u32 %v2956_v28, %v2954_v1  ;;  %v2962_v37 = vrot.slane %v2960_v58, 1  ;;  %5447 = vmatprep.mubr.bf16.mxu0 %v9769_v8  ;;  %v2964_v16 = vshrl.u32 %v9738_v51, 16  ;;  %v4116_v14 = vshrl.u32 %v2678_v60, 16 }
 0x389   : > { %5448 = vmatmul.mubr.bf16.gmra.mrb[128].mxu0 %v4060_v49  ;;  %v4119_v0 = vshll.u32 %v2678_v60, 16  ;;  %7188 = vmatpush3.bf16.msra.mxu1 %v7951_v23  ;;  %v2679_v22 = vsel %vm11526_vm0, %v9730_v48, 0  ;;  %vm11510_vm8 = vcmp.ne.s16.totalorder %v9743_v10, 0  ;;  %v9781_v57 = vor.u32 %v2898_v54, %v2896_v2 }
 0x38a   : > { %v2963_v6 = vsel %vm2698_vm11, %v2958_v53, %v2962_v37  ;;  %v4179_v13 = vshrl.u32 %v2679_v22, 16  ;;  %v4182_v41 = vshll.u32 %v2679_v22, 16  ;;  %7189 = vmatprep.subr.bf16.mxu1 %v7952_v61  ;;  %v3329_v40 = vsel %vm2452_vm12, %v9717_v7, %v3328_v46  ;;  %v7955_v53 = vld [vmem:[#allocation10 + $0x98] sm:$0xff]   ;;  %v7956_v22 = vld [vmem:[#allocation10 + $0xe0] sm:$0xff]  }
 0x38b   : > { %11657 = vst [vmem:[#allocation70_spill] sm:$0xff] %v9781_v57  ;;  %v9788_v39 = vsel %vm2452_vm12, %v3243_v15, %v9269_v21  ;;  %v4188_v62 = vshrl.u32 %v2963_v6, 16  ;;  %v4191_v11 = vshll.u32 %v2963_v6, 16  ;;  %vm2851_vm3 = vcmask 1046528  }
 0x38c   : > { %11658 = vst [vmem:[#allocation71_spill] sm:$0xff] %v9788_v39  ;;  %4877 = vmatmul.mubr.bf16.gmra.mrb[4].mxu1 %v3329_v40  ;;  %v2955_v2 = vsel %vm2698_vm11, %v9781_v57, %v2954_v1  ;;  %v4118_v29 = vrot.slane %v4116_v14, 3  ;;  %v4121_v23 = vrot.slane %v4119_v0, 4  ;;  %v2966_v28 = vor.u32 %v2964_v16, %v2962_v37 }
 0x38d   : > { %4884 = vmatprep.mubr.bf16.mxu1 %v9788_v39  ;;  %v4125_v58 = vshrl.u32 %v2955_v2, 16  ;;  %v4128_v49 = vshll.u32 %v2955_v2, 16  ;;  %v4190_v61 = vrot.slane %v4188_v62, 3  ;;  %v4181_v7 = vrot.slane %v4179_v13, 3  ;;  %7190 = vmatpush3.bf16.msra.mxu1 %v7953_v59  ;;  %v11690_v39 = vld [vmem:[#allocation36_spill] sm:$0xff] }
 0x38e   : > { %v4193_v21 = vrot.slane %v4191_v11, 4  ;;  %v4184_v15 = vrot.slane %v4182_v41, 4  ;;  %v4269_v54 = vshrl.u32 %v2966_v28, 16  ;;  %v4272_v60 = vshll.u32 %v2966_v28, 16  ;;  %7191 = vmatprep.subr.bf16.mxu1 %v7954_v35  ;;  %v7957_v28 = vld [vmem:[#allocation10 + $0xa0] sm:$0xff]  }
 0x38f   : > { %v2853_v6 = vrot.slane %v9764_v56, 1  ;;  %v4127_v1 = vrot.slane %v4125_v58, 3  ;;  %v4130_v14 = vrot.slane %v4128_v49, 4  ;;  %v2680_v37 = vsel %vm11520_vm14, %v9738_v51, 0 }
 0x390   : > { %v4122_v16 = vor.u32 %v4121_v23, %v4118_v29  ;;  %v4194_v0 = vor.u32 %v4193_v21, %v4190_v61  ;;  %v4271_v40 = vrot.slane %v4269_v54, 3  ;;  %v4274_v13 = vrot.slane %v4272_v60, 4  ;;  %v7958_v61 = vld [vmem:[#allocation10 + $0xe8] sm:$0xff]  }
 0x391   : > { %v2852_v59 = vrot.slane %v9759_v3, 1  ;;  %v4131_v62 = vor.u32 %v4130_v14, %v4127_v1  ;;  %v4260_v41 = vshrl.u32 %v2680_v37, 16  ;;  %v4263_v11 = vshll.u32 %v2680_v37, 16  ;;  %7192 = vmatpush3.bf16.msra.mxu1 %v7955_v53  ;;  %v7960_v37 = vld [vmem:[#allocation10 + $0xf0] sm:$0xff]  }
 0x392   : > { %v3394_v35 = vsel %vm2452_vm12, %v3328_v46, %v9224_v25  ;;  %v4185_v56 = vor.u32 %v4184_v15, %v4181_v7  ;;  %v4275_v2 = vor.u32 %v4274_v13, %v4271_v40  ;;  %7193 = vmatprep.subr.bf16.mxu1 %v7956_v22  ;;  %v9803_v29 = vsel %vm11510_vm8, %v9694_v4, 0 }
 0x393   : > { %v4132_v23 = vsel %vm2452_vm12, %v9746_v42, %v4131_v62  ;;  %v4195_v3 = vsel %vm2452_vm12, %v4131_v62, %v4194_v0  ;;  %v4262_v58 = vrot.slane %v4260_v41, 3  ;;  %v4265_v49 = vrot.slane %v4263_v11, 4  ;;  %v7961_v41 = vld [vmem:[#allocation10 + $0xb0] sm:$0xff]  }
 0x394   : > { %5455 = vmatprep.mubr.bf16.mxu0 %v4132_v23  ;;  %v4123_v25 = vsel %vm2452_vm12, %v9696_v63, %v4122_v16  ;;  %4885 = vmatmul.mubr.bf16.gmra.mrb[8].mxu1 %v3394_v35  ;;  %v4276_v46 = vsel %vm2452_vm12, %v4194_v0, %v4275_v2  ;;  %v2264_v7 = vsel %vm2247_vm6, %v9228_v27, 0  ;;  %v2854_v53 = vsel %vm2851_vm3, %v2852_v59, %v2853_v6  ;;  %v7959_v63 = vld [vmem:[#allocation10 + $0xa8] sm:$0xff]   ;;  %v7962_v23 = vld [vmem:[#allocation10 + $0xf8] sm:$0xff]  }
 0x395   : > { %5456 = vmatmul.mubr.bf16.gmra.mrb[132].mxu0 %v4123_v25  ;;  %4892 = vmatprep.mubr.bf16.mxu1 %v9278_v36  ;;  %v4266_v21 = vor.u32 %v4265_v49, %v4262_v58  ;;  %v11512_v15 = vrot.slane %v9803_v29, 1  ;;  %v3203_v54 = vshrl.u32 %v2854_v53, 16  ;;  %v3206_v60 = vshll.u32 %v2854_v53, 16  ;;  %v11675_v42 = vld [vmem:[#allocation53_spill] sm:$0xff] }
 0x396   : > { %5463 = vmatprep.mubr.bf16.mxu0 %v4195_v3  ;;  %7194 = vmatpush3.bf16.msra.mxu1 %v7957_v28  ;;  %v3513_v1 = vshrl.u32 %v2264_v7, 16  ;;  %v3516_v14 = vshll.u32 %v2264_v7, 16  ;;  %v4186_v3 = vsel %vm2452_vm12, %v4122_v16, %v4185_v56  ;;  %v7964_v7 = vld [vmem:[#allocation10 + $0x140] sm:$0xff]   ;;  %v2274_v8 = vsel %vm11526_vm0, %v11675_v42, 0 }
 0x397   : > { %v4267_v22 = vsel %vm2452_vm12, %v4185_v56, %v4266_v21  ;;  %7195 = vmatprep.subr.bf16.mxu1 %v7958_v61  ;;  %v2856_v0 = vsel %vm2851_vm3, %v2853_v6, %v11512_v15  ;;  %v3205_v40 = vrot.slane %v3203_v54, 3  ;;  %v3208_v13 = vrot.slane %v3206_v60, 4  ;;  %v7963_v61 = vld [vmem:[#allocation10 + $0xb8] sm:$0xff]  }
 0x398   : > { %v3211_v59 = vshrl.u32 %v2856_v0, 16  ;;  %v3214_v62 = vshll.u32 %v2856_v0, 16  ;;  %v3515_v2 = vrot.slane %v3513_v1, 3  ;;  %v3518_v28 = vrot.slane %v3516_v14, 4 }
 0x399   : > { %v2265_v6 = vsel %vm2248_vm15, %v9254_v5, 0  ;;  %v3209_v58 = vor.u32 %v3208_v13, %v3205_v40  ;;  %v2267_v0 = vsel %vm2250_vm5, %v9309_v38, 0  ;;  %v4143_v57 = vshrl.u32 %v2274_v8, 16 }
 0x39a   : > { %7196 = vmatpush3.bf16.msra.mxu1 %v7959_v63  ;;  %v3213_v11 = vrot.slane %v3211_v59, 3  ;;  %v3216_v35 = vrot.slane %v3214_v62, 4  ;;  %v3519_v16 = vor.u32 %v3518_v28, %v3515_v2  ;;  %v3576_v56 = vshrl.u32 %v2265_v6, 16 }
 0x39b   : > { %7197 = vmatprep.subr.bf16.mxu1 %v7960_v37  ;;  %v3705_v13 = vshll.u32 %v2267_v0, 16 }
 0x39c   : > { %4893 = vmatmul.mubr.bf16.gmra.mrb[12].mxu1 %v9240_v33  ;;  %v9826_v49 = vor.u32 %v3216_v35, %v3213_v11  ;;  %v3579_v33 = vshll.u32 %v2265_v6, 16  ;;  %v3520_v53 = vsel %vm2452_vm12, %v9226_v26, %v3519_v16  ;;  %v3578_v21 = vrot.slane %v3576_v56, 3  ;;  %v11661_v56 = vld [vmem:[#allocation44_spill] sm:$0xff] }
 0x39d   : > { %5464 = vmatmul.mubr.bf16.gmra.mrb[136].mxu0 %v4186_v3  ;;  %4900 = vmatprep.mubr.bf16.mxu1 %v9300_v47  ;;  %v2268_v11 = vsel %vm2251_vm1, %v9333_v24, 0 }
 0x39e   : > { %5471 = vmatprep.mubr.bf16.mxu0 %v4276_v46  ;;  %7198 = vmatpush3.bf16.msra.mxu1 %v7961_v41  ;;  %v9831_v25 = vsel %vm2452_vm12, %v3209_v58, %v9826_v49  ;;  %v3581_v54 = vrot.slane %v3579_v33, 4  ;;  %v2266_v46 = vsel %vm2249_vm2, %v9284_v52, 0  ;;  %v3707_v41 = vrot.slane %v3705_v13, 4  ;;  %v11659_v58 = vld [vmem:[#allocation41_spill] sm:$0xff] }
 0x39f   : > { %7199 = vmatprep.subr.bf16.mxu1 %v7962_v23  ;;  %v3639_v63 = vshrl.u32 %v2266_v46, 16  ;;  %v3642_v1 = vshll.u32 %v2266_v46, 16  ;;  %v3765_v2 = vshrl.u32 %v2268_v11, 16  ;;  %v3768_v28 = vshll.u32 %v2268_v11, 16  ;;  %v11667_v11 = vld [vmem:[#allocation48_spill] sm:$0xff] }
 0x3a0   : > { %v3582_v60 = vor.u32 %v3581_v54, %v3578_v21 }
 0x3a1   : > { %v3641_v37 = vrot.slane %v3639_v63, 3  ;;  %v3644_v26 = vrot.slane %v3642_v1, 4  ;;  %v3767_v3 = vrot.slane %v3765_v2, 3  ;;  %v3770_v6 = vrot.slane %v3768_v28, 4 }
 0x3a2   : > { %7200 = vmatpush3.bf16.msra.mxu1 %v7963_v61  ;;  %v3583_v14 = vsel %vm2452_vm12, %v3519_v16, %v3582_v60  ;;  %v2269_v16 = vsel %vm2252_vm4, %v11659_v58, 0 }
 0x3a3   : > { %7297 = vmatprep.subr.bf16.mxu1 %v7964_v7  ;;  %v3645_v40 = vor.u32 %v3644_v26, %v3641_v37  ;;  %v3771_v33 = vor.u32 %v3770_v6, %v3767_v3  ;;  %v3828_v7 = vshrl.u32 %v2269_v16, 16 }
 0x3a4   : > { %4901 = vmatmul.mubr.bf16.gmra.mrb[16].mxu1 %v3520_v53  ;;  %v3831_v53 = vshll.u32 %v2269_v16, 16 }
 0x3a5   : > { %5472 = vmatmul.mubr.bf16.gmra.mrb[140].mxu0 %v4267_v22  ;;  %4908 = vmatprep.mubr.bf16.mxu1 %v9323_v12  ;;  %v3702_v22 = vshrl.u32 %v2267_v0, 16  ;;  %v3646_v59 = vsel %vm2452_vm12, %v3582_v60, %v3645_v40  ;;  %v3830_v54 = vrot.slane %v3828_v7, 3  ;;  %v11662_v60 = vld [vmem:[#allocation43_spill] sm:$0xff] }
 0x3a6   : > { %6128 = vmatprep.mubr.bf16.mxu0 %v11631_v18  ;;  %v3833_v46 = vrot.slane %v3831_v53, 4  ;;  %v2270_v1 = vsel %vm2253_vm7, %v11662_v60, 0 }
 0x3a7   : > { %v3704_v62 = vrot.slane %v3702_v22, 3  ;;  %v3891_v26 = vshrl.u32 %v2270_v1, 16  ;;  %v3894_v0 = vshll.u32 %v2270_v1, 16 }
 0x3a8   : > { %v3834_v37 = vor.u32 %v3833_v46, %v3830_v54  ;;  %v11671_v46 = vld [vmem:[#allocation52_spill] sm:$0xff] }
 0x3a9   : > { %v3708_v35 = vor.u32 %v3707_v41, %v3704_v62  ;;  %v3893_v22 = vrot.slane %v3891_v26, 3  ;;  %v3896_v13 = vrot.slane %v3894_v0, 4 }
 0x3ab   : > { %v3709_v23 = vsel %vm2452_vm12, %v3645_v40, %v3708_v35  ;;  %v3772_v21 = vsel %vm2452_vm12, %v3708_v35, %v3771_v33  ;;  %v3835_v40 = vsel %vm2452_vm12, %v3771_v33, %v3834_v37  ;;  %v3897_v35 = vor.u32 %v3896_v13, %v3893_v22  ;;  %v11669_v33 = vld [vmem:[#allocation47_spill] sm:$0xff] }
 0x3ac   : > { %4909 = vmatmul.mubr.bf16.gmra.mrb[20].mxu1 %v3583_v14  ;;  %v11664_v14 = vld [vmem:[#allocation46_spill] sm:$0xff]  ;;  %v2272_v54 = vsel %vm11511_vm10, %v11669_v33, 0 }
 0x3ad   : > { %4916 = vmatprep.mubr.bf16.mxu1 %v9355_v17  ;;  %v3898_v6 = vsel %vm2452_vm12, %v3834_v37, %v3897_v35  ;;  %v4017_v0 = vshrl.u32 %v2272_v54, 16 }
 0x3af   : > { %v4019_v13 = vrot.slane %v4017_v0, 3 }
 0x3b4   : > { %4917 = vmatmul.mubr.bf16.gmra.mrb[24].mxu1 %v3646_v59  ;;  %v11665_v59 = vld [vmem:[#allocation45_spill] sm:$0xff] }
 0x3b5   : > { %4924 = vmatprep.mubr.bf16.mxu1 %v9387_v20  ;;  %v2271_v41 = vsel %vm2254_vm9, %v11665_v59, 0 }
 0x3b6   : > { %v3954_v2 = vshrl.u32 %v2271_v41, 16  ;;  %v3957_v28 = vshll.u32 %v2271_v41, 16 }
 0x3b8   : > { %v3956_v16 = vrot.slane %v3954_v2, 3  ;;  %v3959_v7 = vrot.slane %v3957_v28, 4  ;;  %v11672_v2 = vld [vmem:[#allocation49_spill] sm:$0xff] }
 0x3b9   : > { %v2273_v28 = vsel %vm2256_vm13, %v11672_v2, 0 }
 0x3ba   : > { %v3960_v26 = vor.u32 %v3959_v7, %v3956_v16  ;;  %v4080_v7 = vshrl.u32 %v2273_v28, 16 }
 0x3bc   : > { %4925 = vmatmul.mubr.bf16.gmra.mrb[28].mxu1 %v3709_v23  ;;  %v11668_v23 = vld [vmem:[#allocation29_spill] sm:$0xff]  ;;  %v3961_v37 = vsel %vm2452_vm12, %v3897_v35, %v3960_v26  ;;  %v4082_v0 = vrot.slane %v4080_v7, 3 }
 0x3bd   : > { %4932 = vmatprep.mubr.bf16.mxu1 %v11661_v56  ;;  %v1449_v3 = vadd.s32 56, %v11668_v23  ;;  %v1453_v1 = vadd.s32 88, %v11668_v23  ;;  %v1473_v15 = vadd.s32 248, %v11668_v23  ;;  %v4145_v56 = vrot.slane %v4143_v57, 3  ;;  %v11682_v57 = vld [vmem:[#allocation32_spill] sm:$0xff] }
 0x3bf   : > { %v1527_v53 = vand.u32 31, %v1449_v3  ;;  %v1555_v22 = vand.u32 31, %v1453_v1  ;;  %v11673_v3 = vld [vmem:[#allocation56_spill] sm:$0xff]  ;;  %v1695_v7 = vand.u32 31, %v1473_v15 }
 0x3c1   : > { %vm1897_vm11 = vcmp.le.s32.totalorder %v1527_v53, 30  ;;  %vm1901_vm10 = vcmp.le.s32.totalorder %v1555_v22, 30  ;;  %v11674_v53 = vld [vmem:[#allocation28_spill] sm:$0xff] }
 0x3c2   : > { %vm2347_vm8 = vmpackc.low %vm1897_vm11, %vm1897_vm11 }
 0x3c3   : > { %vm2351_vm11 = vmpackc.low %vm1901_vm10, %vm1901_vm10  ;;  %vm9888_vm10 = vcmp.le.s32.totalorder %v1695_v7, 30  ;;  %v11685_v7 = vld [vmem:[#allocation34_spill] sm:$0xff] }
 0x3c4   : > { %4933 = vmatmul.mubr.bf16.gmra.mrb[32].mxu1 %v3772_v21  ;;  %v11670_v21 = vld [vmem:[#allocation55_spill] sm:$0xff] }
 0x3c5   : > { %4940 = vmatprep.mubr.bf16.mxu1 %v11664_v14 }
 0x3cc   : > { %4941 = vmatmul.mubr.bf16.gmra.mrb[36].mxu1 %v3835_v40  ;;  %v4020_v40 = vshll.u32 %v2272_v54, 16  ;;  %v4083_v54 = vshll.u32 %v2273_v28, 16 }
 0x3cd   : > { %4948 = vmatprep.mubr.bf16.mxu1 %v11667_v11 }
 0x3ce   : > { %v4022_v41 = vrot.slane %v4020_v40, 4  ;;  %v4085_v40 = vrot.slane %v4083_v54, 4 }
 0x3d0   : > { %v4023_v16 = vor.u32 %v4022_v41, %v4019_v13  ;;  %v11676_v41 = vld [vmem:[#allocation58_spill] sm:$0xff] }
 0x3d2   : > { %v4024_v35 = vsel %vm2452_vm12, %v3960_v26, %v4023_v16  ;;  %v4146_v26 = vshll.u32 %v2274_v8, 16 }
 0x3d4   : > { %4949 = vmatmul.mubr.bf16.gmra.mrb[40].mxu1 %v3898_v6  ;;  %v2379_v6 = vsel %vm2347_vm8, 65537, %v11631_v18  ;;  %v4148_v20 = vrot.slane %v4146_v26, 4  ;;  %vm11683_vm8 = vcmp.ne.s16.totalorder %v11682_v57, 0  ;;  %v11684_v26 = vld [vmem:[#allocation30_spill] sm:$0xff] }
 0x3d5   : > { %4956 = vmatprep.mubr.bf16.mxu1 %v11671_v46  ;;  %v6945_v1 = vcombine.low %v11674_v53, %v2379_v6  ;;  %v4086_v6 = vor.u32 %v4085_v40, %v4082_v0  ;;  %v1457_v0 = vadd.s32 120, %v11668_v23  ;;  %v11680_v40 = vld [vmem:[#allocation63_spill] sm:$0xff] }
 0x3d7   : > { %v2480_v22 = vshrl.u32 %v6945_v1, 16  ;;  %v2483_v13 = vshll.u32 %v6945_v1, 16  ;;  %v1583_v47 = vand.u32 31, %v1457_v0 }
 0x3d9   : > { %v2482_v54 = vrot.slane %v2480_v22, 3 }
 0x3dc   : > { %4957 = vmatmul.mubr.bf16.gmra.mrb[44].mxu1 %v3961_v37  ;;  %v2383_v37 = vsel %vm2351_vm11, 65537, %v11631_v18  ;;  %vm11686_vm11 = vcmp.ne.s16.totalorder %v11685_v7, 0 }
 0x3dd   : > { %4964 = vmatprep.mubr.bf16.mxu1 %v11673_v3  ;;  %v6947_v28 = vcombine.low %v11674_v53, %v2383_v37  ;;  %v2485_v3 = vrot.slane %v2483_v13, 4  ;;  %v11679_v37 = vld [vmem:[#allocation57_spill] sm:$0xff]  ;;  %v2630_v13 = vsel %vm11683_vm8, %v9694_v4, 0  ;;  %vm11691_vm8 = vcmp.ne.s16.totalorder %v11690_v39, 0 }
 0x3de   : > { %v2275_v8 = vsel %vm11520_vm14, %v11679_v37, 0  ;;  %vm2371_vm14 = vmpackc.low %vm9888_vm10, %vm9888_vm10 }
 0x3df   : > { %v2498_v46 = vshrl.u32 %v6947_v28, 16  ;;  %v2501_v11 = vshll.u32 %v6947_v28, 16  ;;  %v2486_v15 = vor.u32 %v2485_v3, %v2482_v54  ;;  %v4206_v54 = vshrl.u32 %v2275_v8, 16 }
 0x3e0   : > { %v2403_v7 = vsel %vm2371_vm14, 65537, %v11631_v18  ;;  %vm9922_vm14 = vcmp.le.s32.totalorder %v1583_v47, 30 }
 0x3e1   : > { %v2503_v12 = vrot.slane %v2501_v11, 4  ;;  %v9912_v57 = vsel %vm2452_vm12, %v9131_v55, %v2486_v15 }
 0x3e2   : > { %11688 = vst [vmem:[#allocation43_spill] sm:$0xff] %v9912_v57  ;;  %vm11538_vm10 = vcmp.ne.s16.totalorder %v9912_v57, 0 }
 0x3e4   : > { %4965 = vmatmul.mubr.bf16.gmra.mrb[48].mxu1 %v4024_v35  ;;  %v4087_v35 = vsel %vm2452_vm12, %v4023_v16, %v4086_v6 }
 0x3e5   : > { %4972 = vmatprep.mubr.bf16.mxu1 %v11676_v41  ;;  %v2500_v41 = vrot.slane %v2498_v46, 3 }
 0x3e7   : > { %v9915_v36 = vor.u32 %v2503_v12, %v2500_v41  ;;  %v6957_v12 = vcombine.low %v11674_v53, %v2403_v7  ;;  %v11694_v41 = vld [vmem:[#allocation64_spill] sm:$0xff] }
 0x3e9   : > { %v9937_v47 = vsel %vm2452_vm12, %v9131_v55, %v9915_v36 }
 0x3ea   : > { %11697 = vst [vmem:[#allocation54_spill] sm:$0xff] %v9937_v47  ;;  %vm11534_vm0 = vcmp.ne.s16.totalorder %v9937_v47, 0  ;;  %v9974_v47 = vsel %vm2452_vm12, %v9915_v36, %v9131_v55 }
 0x3eb   : > { %v7425_v14 = vpop.f32.mrb[80].mxu0  ;;  %11702 = vst [vmem:[#allocation28_spill] sm:$0xff] %v9974_v47 }
 0x3ec   : > { %4973 = vmatmul.mubr.bf16.gmra.mrb[52].mxu1 %v4087_v35  ;;  %v7426_v1 = vpop.f32.mrb[81].mxu0  ;;  %v2631_v35 = vsel %vm11686_vm11, %v11684_v26, 0  ;;  %vm2355_vm11 = vmpackc.low %vm9922_vm14, %vm9922_vm14 }
 0x3ed   : > { %4980 = vmatprep.mubr.bf16.mxu1 %v11680_v40  ;;  %v9897_v22 = vadd.f32 %v7426_v1, %v7425_v14  ;;  %v7428_v16 = vpop.f32.mrb[82].mxu0  ;;  %v4149_v14 = vor.u32 %v4148_v20, %v4145_v56  ;;  %v4209_v1 = vshll.u32 %v2275_v8, 16  ;;  %v3223_v40 = vshll.u32 %v2630_v13, 16 }
 0x3ee   : > { %v7429_v28 = vpop.f32.mrb[83].mxu0  ;;  %v3228_v46 = vshrl.u32 %v2631_v35, 16  ;;  %v3231_v11 = vshll.u32 %v2631_v35, 16 }
 0x3ef   : > { %11681 = vst [vmem:[#allocation41_spill] sm:$0xff] %v9897_v22  ;;  %v9908_v3 = vadd.f32 %v7429_v28, %v7428_v16  ;;  %v3220_v22 = vshrl.u32 %v2630_v13, 16  ;;  %v4150_v17 = vsel %vm2452_vm12, %v4086_v6, %v4149_v14  ;;  %v4208_v28 = vrot.slane %v4206_v54, 3 }
 0x3f0   : > { %v4211_v20 = vrot.slane %v4209_v1, 4  ;;  %v3225_v13 = vrot.slane %v3223_v40, 4  ;;  %v9932_v54 = vsel %vm2452_vm12, %v2486_v15, %v9131_v55  ;;  %v3233_v1 = vrot.slane %v3231_v11, 4 }
 0x3f1   : > { %11687 = vst [vmem:[#allocation50_spill] sm:$0xff] %v9908_v3  ;;  %v3222_v8 = vrot.slane %v3220_v22, 3  ;;  %v11689_v3 = vld [vmem:[#allocation31_spill] sm:$0xff]  ;;  %11696 = vst [vmem:[#allocation45_spill] sm:$0xff] %v9932_v54  ;;  %v3230_v22 = vrot.slane %v3228_v46, 3  ;;  %v2588_v11 = vshrl.u32 %v6957_v12, 16 }
 0x3f2   : > { %v2632_v0 = vsel %vm11691_vm8, %v11689_v3, 0  ;;  %v4212_v7 = vor.u32 %v4211_v20, %v4208_v28  ;;  %vm11535_vm8 = vcmp.ne.s16.totalorder %v9932_v54, 0  ;;  %v2387_v28 = vsel %vm2355_vm11, 65537, %v11631_v18 }
 0x3f3   : > { %v7431_v16 = vpop.f32.mrb[84].mxu0  ;;  %v3226_v15 = vor.u32 %v3225_v13, %v3222_v8  ;;  %v3344_v46 = vshll.u32 %v2632_v0, 16  ;;  %v2591_v20 = vshll.u32 %v6957_v12, 16  ;;  %v2617_v8 = vsel %vm11535_vm8, %v11689_v3, 0 }
 0x3f4   : > { %4981 = vmatmul.mubr.bf16.gmra.mrb[56].mxu1 %v4150_v17  ;;  %v7432_v56 = vpop.f32.mrb[85].mxu0  ;;  %v3341_v17 = vshrl.u32 %v2632_v0, 16  ;;  %v2859_v57 = vrot.slane %v2617_v8, 1  ;;  %vm2602_vm11 = vcmp.ne.s16.totalorder %v9974_v47, 0 }
 0x3f5   : > { %4988 = vmatprep.mubr.bf16.mxu1 %v11694_v41  ;;  %v9928_v6 = vadd.f32 %v7432_v56, %v7431_v16  ;;  %v7434_v35 = vpop.f32.mrb[86].mxu0  ;;  %v2616_v16 = vsel %vm11538_vm10, %v11684_v26, 0  ;;  %v1469_v56 = vadd.s32 216, %v11668_v23  ;;  %v3234_v41 = vor.u32 %v3233_v1, %v3230_v22 }
 0x3f6   : > { %v7435_v40 = vpop.f32.mrb[87].mxu0  ;;  %v3343_v10 = vrot.slane %v3341_v17, 3  ;;  %v11699_v22 = vrot.slane %v9803_v29, 1  ;;  %v6949_v17 = vcombine.low %v11674_v53, %v2387_v28  ;;  %v2593_v3 = vrot.slane %v2591_v20, 4 }
 0x3f7   : > { %11695 = vst [vmem:[#allocation51_spill] sm:$0xff] %v9928_v6  ;;  %v9939_v39 = vadd.f32 %v7435_v40, %v7434_v35  ;;  %v2857_v35 = vrot.slane %v2616_v16, 1  ;;  %v4213_v40 = vsel %vm2452_vm12, %v4149_v14, %v4212_v7  ;;  %v3235_v13 = vsel %vm2452_vm12, %v3226_v15, %v3234_v41 }
 0x3f8   : > { %v3346_v6 = vrot.slane %v3344_v46, 4  ;;  %v1461_v16 = vadd.s32 152, %v11668_v23  ;;  %v9965_v7 = vsel %vm11534_vm0, %v9228_v27, 0  ;;  %v1667_v15 = vand.u32 31, %v1469_v56 }
 0x3f9   : > { %11698 = vst [vmem:[#allocation47_spill] sm:$0xff] %v9939_v39  ;;  %v2858_v1 = vsel %vm2851_vm3, %v11699_v22, %v2857_v35  ;;  %v2516_v28 = vshrl.u32 %v6949_v17, 16  ;;  %v2519_v56 = vshll.u32 %v6949_v17, 16 }
 0x3fa   : > { %v3332_v29 = vshrl.u32 %v2858_v1, 16  ;;  %v3335_v22 = vshll.u32 %v2858_v1, 16  ;;  %vm9976_vm14 = vcmp.le.s32.totalorder %v1667_v15, 30  ;;  %v7967_v15 = vld [vmem:[#allocation10 + $0x108] sm:$0xff]  }
 0x3fb   : > { %v7437_v39 = vpop.f32.mrb[88].mxu0  ;;  %vm2367_vm8 = vmpackc.low %vm9976_vm14, %vm9976_vm14 }
 0x3fc   : > { %4989 = vmatmul.mubr.bf16.gmra.mrb[60].mxu1 %v4213_v40  ;;  %v7438_v0 = vpop.f32.mrb[89].mxu0  ;;  %v2590_v40 = vrot.slane %v2588_v11, 3  ;;  %v3334_v8 = vrot.slane %v3332_v29, 3  ;;  %v3337_v20 = vrot.slane %v3335_v22, 4  ;;  %v2636_v11 = vsel %vm2248_vm15, %v9309_v38, 0 }
 0x3fd   : > { %5029 = vmatprep.mubr.bf16.mxu1 %v3235_v13  ;;  %v9960_v12 = vadd.f32 %v7438_v0, %v7437_v39  ;;  %v7440_v14 = vpop.f32.mrb[90].mxu0  ;;  %v3347_v13 = vor.u32 %v3346_v6, %v3343_v10  ;;  %v11539_v39 = vrot.slane %v9965_v7, 1  ;;  %v1611_v0 = vand.u32 31, %v1461_v16 }
 0x3fe   : > { %v7441_v46 = vpop.f32.mrb[91].mxu0  ;;  %v2860_v6 = vsel %vm2851_vm3, %v2857_v35, %v2859_v57  ;;  %v9981_v10 = vor.u32 %v2593_v3, %v2590_v40  ;;  %v2521_v40 = vrot.slane %v2519_v56, 4  ;;  %v10000_v27 = vor.u32 %v3337_v20, %v3334_v8  ;;  %v7969_v8 = vld [vmem:[#allocation10 + $0x110] sm:$0xff]  }
 0x3ff   : > { %11700 = vst [vmem:[#allocation55_spill] sm:$0xff] %v9960_v12  ;;  %v9968_v54 = vadd.f32 %v7441_v46, %v7440_v14  ;;  %v7965_v12 = vld [vmem:[#allocation10 + $0x100] sm:$0xff]   ;;  %v7966_v14 = vld [vmem:[#allocation10 + $0x148] sm:$0xff]   ;;  %v3348_v16 = vsel %vm2452_vm12, %v3234_v41, %v3347_v13  ;;  %vm9986_vm0 = vcmp.le.s32.totalorder %v1611_v0, 30  ;;  %v2518_v41 = vrot.slane %v2516_v28, 3  ;;  %v7968_v0 = vld [vmem:[#allocation10 + $0x150] sm:$0xff]  }
 0x400   : > { %v3396_v29 = vshrl.u32 %v2860_v6, 16  ;;  %v3399_v22 = vshll.u32 %v2860_v6, 16  ;;  %vm2359_vm10 = vmpackc.low %vm9986_vm0, %vm9986_vm0  ;;  %v3339_v50 = vsel %vm2452_vm12, %v9826_v49, %v10000_v27 }
 0x401   : > { %11701 = vst [vmem:[#allocation49_spill] sm:$0xff] %v9968_v54  ;;  %v10024_v20 = vor.u32 %v2521_v40, %v2518_v41 }
 0x402   : > { %v3398_v41 = vrot.slane %v3396_v29, 3  ;;  %v3401_v40 = vrot.slane %v3399_v22, 4 }
 0x403   : > { %v7443_v1 = vpop.f32.mrb[92].mxu0  ;;  %v10042_v49 = vsel %vm2452_vm12, %v9131_v55, %v10024_v20 }
 0x404   : > { %5030 = vmatmul.mubr.bf16.vlgmr.msra.gmra.mrb[64].mxu1 %v9831_v25  ;;  %v7444_v36 = vpop.f32.mrb[93].mxu0  ;;  %v2862_v25 = vsel %vm2851_vm3, %v2859_v57, %v11539_v39  ;;  %v2399_v57 = vsel %vm2367_vm8, 65537, %v11631_v18  ;;  %vm2603_vm15 = vcmp.ne.s16.totalorder %v10042_v49, 0 }
 0x405   : > { %5037 = vmatprep.mubr.bf16.mxu1 %v3348_v16  ;;  %7298 = vmatpush3.bf16.msra.mxu1 %v7965_v12  ;;  %v9993_v35 = vadd.f32 %v7444_v36, %v7443_v1  ;;  %v7446_v3 = vpop.f32.mrb[94].mxu0  ;;  %v10005_v12 = vsel %vm2602_vm11, %v9254_v5, 0  ;;  %v3459_v28 = vshrl.u32 %v2862_v25, 16  ;;  %v3462_v56 = vshll.u32 %v2862_v25, 16  ;;  %v7970_v16 = vld [vmem:[#allocation10 + $0x158] sm:$0xff]  }
 0x406   : > { %v7447_v46 = vpop.f32.mrb[95].mxu0  ;;  %7299 = vmatprep.subr.bf16.mxu1 %v7966_v14  ;;  %v10019_v14 = vsel %vm2452_vm12, %v9131_v55, %v9981_v10  ;;  %v2635_v1 = vsel %vm2247_vm6, %v9284_v52, 0  ;;  %v2391_v36 = vsel %vm2359_vm10, 65537, %v11631_v18  ;;  %v6955_v17 = vcombine.low %v11674_v53, %v2399_v57 }
 0x407   : > { %11707 = vst [vmem:[#allocation53_spill] sm:$0xff] %v9993_v35  ;;  %v9998_v54 = vadd.f32 %v7447_v46, %v7446_v3  ;;  %v3464_v30 = vrot.slane %v3462_v56, 4  ;;  %v3531_v39 = vshrl.u32 %v2635_v1, 16  ;;  %v3534_v6 = vshll.u32 %v2635_v1, 16 }
 0x408   : > { %v3594_v35 = vshrl.u32 %v2636_v11, 16  ;;  %v6951_v29 = vcombine.low %v11674_v53, %v2391_v36  ;;  %v11712_v56 = vrot.slane %v9965_v7, 1  ;;  %vm2611_vm0 = vcmp.ne.s16.totalorder %v10019_v14, 0 }
 0x409   : > { %11708 = vst [vmem:[#allocation57_spill] sm:$0xff] %v9998_v54  ;;  %7300 = vmatpush3.bf16.msra.mxu1 %v7967_v15  ;;  %v11709_v15 = vld [vmem:[#allocation61_spill] sm:$0xff]  ;;  %vm2612_vm6 = vcmp.ne.s16.totalorder %v9981_v10, 0  ;;  %v3597_v36 = vshll.u32 %v2636_v11, 16  ;;  %v3536_v47 = vrot.slane %v3534_v6, 4  ;;  %v11797_v10 = vld [vmem:[#allocation58_spill] sm:$0xff] }
 0x40a   : > { %7301 = vmatprep.subr.bf16.mxu1 %v7968_v0  ;;  %v3412_v25 = vsel %vm2452_vm12, %v3347_v13, %v11709_v15  ;;  %v3461_v0 = vrot.slane %v3459_v28, 3  ;;  %v7971_v13 = vld [vmem:[#allocation10 + $0x118] sm:$0xff]   ;;  %v11711_v28 = vrot.slane %v10005_v12, 1  ;;  %v2573_v15 = vshll.u32 %v6955_v17, 16 }
 0x40b   : > { %v7449_v3 = vpop.f32.mrb[96].mxu0 }
 0x40c   : > { %5038 = vmatmul.mubr.bf16.gmra.mrb[68].mxu1 %v3339_v50  ;;  %v7450_v46 = vpop.f32.mrb[97].mxu0  ;;  %v2864_v1 = vsel %vm2851_vm3, %v11712_v56, %v11711_v28  ;;  %v7972_v50 = vld [vmem:[#allocation10 + $0x160] sm:$0xff]   ;;  %v10056_v7 = vor.u32 %v3464_v30, %v3461_v0  ;;  %v3596_v28 = vrot.slane %v3594_v35, 3  ;;  %v2534_v56 = vshrl.u32 %v6951_v29, 16 }
 0x40d   : > { %5045 = vmatprep.mubr.bf16.mxu1 %v3412_v25  ;;  %v10037_v54 = vadd.f32 %v7450_v46, %v7449_v3  ;;  %v7452_v57 = vpop.f32.mrb[98].mxu0  ;;  %7302 = vmatpush3.bf16.msra.mxu1 %v7969_v8  ;;  %v1465_v3 = vadd.s32 184, %v11668_v23  ;;  %v2570_v8 = vshrl.u32 %v6955_v17, 16  ;;  %v3402_v46 = vor.u32 %v3401_v40, %v3398_v41  ;;  %v7973_v23 = vld [vmem:[#allocation10 + $0x120] sm:$0xff]  }
 0x40e   : > { %v7453_v22 = vpop.f32.mrb[99].mxu0  ;;  %7303 = vmatprep.subr.bf16.mxu1 %v7970_v16  ;;  %v3522_v16 = vshrl.u32 %v2864_v1, 16  ;;  %v2537_v17 = vshll.u32 %v6951_v29, 16  ;;  %v3525_v6 = vshll.u32 %v2864_v1, 16  ;;  %v3599_v41 = vrot.slane %v3597_v36, 4  ;;  %v11714_v29 = vld [vmem:[#allocation62_spill] sm:$0xff] }
 0x40f   : > { %11710 = vst [vmem:[#allocation32_spill] sm:$0xff] %v10037_v54  ;;  %v10053_v25 = vadd.f32 %v7453_v22, %v7452_v57  ;;  %v3533_v54 = vrot.slane %v3531_v39, 3  ;;  %v1639_v5 = vand.u32 31, %v1465_v3  ;;  %v2572_v26 = vrot.slane %v2570_v8, 3  ;;  %v7976_v36 = vld [vmem:[#allocation10 + $0x170] sm:$0xff]  }
 0x410   : > { %v2575_v57 = vrot.slane %v2573_v15, 4  ;;  %v3403_v11 = vsel %vm2452_vm12, %v10000_v27, %v3402_v46  ;;  %v10063_v40 = vsel %vm2603_vm15, %v9284_v52, 0  ;;  %v10068_v35 = vsel %vm2611_vm0, %v9730_v48, 0 }
 0x411   : > { %11713 = vst [vmem:[#allocation34_spill] sm:$0xff] %v10053_v25  ;;  %7304 = vmatpush3.bf16.msra.mxu1 %v7971_v13  ;;  %v2697_v0 = vsel %vm2612_vm6, %v9738_v51, 0  ;;  %v3537_v27 = vor.u32 %v3536_v47, %v3533_v54  ;;  %v10076_v13 = vsel %vm2452_vm12, %v10024_v20, %v9131_v55  ;;  %v2637_v48 = vsel %vm2249_vm2, %v9333_v24, 0  ;;  %v7975_v51 = vld [vmem:[#allocation10 + $0x128] sm:$0xff]   ;;  %v7979_v20 = vld [vmem:[#allocation10 + $0x138] sm:$0xff]  }
 0x412   : > { %7305 = vmatprep.subr.bf16.mxu1 %v7972_v50  ;;  %v3524_v50 = vrot.slane %v3522_v16, 3  ;;  %v2536_v3 = vrot.slane %v2534_v56, 3  ;;  %v2865_v54 = vrot.slane %v10063_v40, 1  ;;  %v2539_v47 = vrot.slane %v2537_v17, 4  ;;  %v7977_v17 = vld [vmem:[#allocation10 + $0x130] sm:$0xff]   ;;  %v7978_v40 = vld [vmem:[#allocation10 + $0x178] sm:$0xff]  }
 0x413   : > { %v7455_v39 = vpop.f32.mrb[100].mxu0  ;;  %vm10085_vm10 = vcmp.le.s32.totalorder %v1639_v5, 30  ;;  %v10089_v15 = vor.u32 %v2575_v57, %v2572_v26  ;;  %v10093_v44 = vor.u32 %v3599_v41, %v3596_v28  ;;  %vm2604_vm2 = vcmp.ne.s16.totalorder %v10076_v13, 0  ;;  %v11719_v57 = vld [vmem:[#allocation60_spill] sm:$0xff] }
 0x414   : > { %5046 = vmatmul.mubr.bf16.gmra.mrb[72].mxu1 %v3403_v11  ;;  %v7456_v30 = vpop.f32.mrb[101].mxu0  ;;  %v3527_v11 = vrot.slane %v3525_v6, 4  ;;  %v3013_v56 = vrot.slane %v10068_v35, 1  ;;  %v3657_v26 = vshrl.u32 %v2637_v48, 16  ;;  %v10109_v28 = vsel %vm2250_vm5, %v11659_v58, 0  ;;  %vm2363_vm8 = vmpackc.low %vm10085_vm10, %vm10085_vm10 }
 0x415   : > { %5053 = vmatprep.mubr.bf16.mxu1 %v11714_v29  ;;  %v10079_v22 = vadd.f32 %v7456_v30, %v7455_v39  ;;  %v7458_v1 = vpop.f32.mrb[102].mxu0  ;;  %7306 = vmatpush3.bf16.msra.mxu1 %v7973_v23  ;;  %v10096_v23 = vrot.slane %v2697_v0, 1  ;;  %v10101_v5 = vsel %vm2452_vm12, %v10089_v15, %v9131_v55  ;;  %v3538_v39 = vsel %vm2452_vm12, %v11719_v57, %v3537_v27 }
 0x416   : > { %v7459_v8 = vpop.f32.mrb[103].mxu0  ;;  %7307 = vmatprep.subr.bf16.mxu1 %v7974_v43  ;;  %v3466_v43 = vsel %vm2452_vm12, %v3402_v46, %v10056_v7  ;;  %v11720_v6 = vrot.slane %v10005_v12, 1  ;;  %v10122_v46 = vsel %vm2604_vm2, %v9309_v38, 0  ;;  %v10124_v32 = vor.u32 %v2539_v47, %v2536_v3 }
 0x417   : > { %11715 = vst [vmem:[#allocation36_spill] sm:$0xff] %v10079_v22  ;;  %v10091_v16 = vadd.f32 %v7459_v8, %v7458_v1  ;;  %v10126_v0 = vor.u32 %v3527_v11, %v3524_v50  ;;  %v3601_v30 = vsel %vm2452_vm12, %v3537_v27, %v10093_v44  ;;  %v3660_v29 = vshll.u32 %v2637_v48, 16 }
 0x418   : > { %v2866_v41 = vsel %vm2851_vm3, %v11720_v6, %v2865_v54  ;;  %vm2610_vm5 = vcmp.ne.s16.totalorder %v10101_v5, 0  ;;  %v2395_v3 = vsel %vm2363_vm8, 65537, %v11631_v18  ;;  %v3016_v27 = vsel %vm2851_vm3, %v3013_v56, %v10096_v23  ;;  %v10153_v6 = vld [vmem:[#allocation10 + $0x200] sm:$0xff]  }
 0x419   : > { %11718 = vst [vmem:[#allocation64_spill] sm:$0xff] %v10091_v16  ;;  %7308 = vmatpush3.bf16.msra.mxu1 %v7975_v51  ;;  %v10141_v50 = vsel %vm2610_vm5, %v9712_v31, 0  ;;  %v3585_v8 = vshrl.u32 %v2866_v41, 16  ;;  %v3659_v47 = vrot.slane %v3657_v26, 3  ;;  %v10151_v57 = vsel %vm2452_vm12, %v9131_v55, %v10124_v32 }
 0x41a   : > { %7309 = vmatprep.subr.bf16.mxu1 %v7976_v36  ;;  %11721 = vst [vmem:[#allocation61_spill] sm:$0xff] %v10141_v50  ;;  %v6953_v26 = vcombine.low %v11674_v53, %v2395_v3  ;;  %v4200_v1 = vshll.u32 %v3016_v27, 16  ;;  %v3662_v36 = vrot.slane %v3660_v29, 4  ;;  %v11724_v22 = vrot.slane %v10122_v46, 1 }
 0x41b   : > { %v7461_v35 = vpop.f32.mrb[104].mxu0  ;;  %v3587_v16 = vrot.slane %v3585_v8, 3  ;;  %vm2605_vm14 = vcmp.ne.s16.totalorder %v10151_v57, 0  ;;  %v4281_v29 = vshll.u32 %v10096_v23, 16 }
 0x41c   : > { %5054 = vmatmul.mubr.bf16.gmra.mrb[76].mxu1 %v3466_v43  ;;  %v7462_v12 = vpop.f32.mrb[105].mxu0  ;;  %v3588_v43 = vshll.u32 %v2866_v41, 16  ;;  %v3529_v41 = vsel %vm2452_vm12, %v10056_v7, %v10126_v0 }
 0x41d   : > { %5061 = vmatprep.mubr.bf16.mxu1 %v3538_v39  ;;  %v10145_v48 = vadd.f32 %v7462_v12, %v7461_v35  ;;  %v7464_v51 = vpop.f32.mrb[106].mxu0  ;;  %7310 = vmatpush3.bf16.msra.mxu1 %v7977_v17  ;;  %v11548_v39 = vrot.slane %v10141_v50, 1  ;;  %v4197_v35 = vshrl.u32 %v3016_v27, 16  ;;  %v4278_v17 = vshrl.u32 %v10096_v23, 16 }
 0x41e   : > { %v7465_v11 = vpop.f32.mrb[107].mxu0  ;;  %7311 = vmatprep.subr.bf16.mxu1 %v7978_v40  ;;  %v4202_v27 = vrot.slane %v4200_v1, 4  ;;  %v3663_v1 = vor.u32 %v3662_v36, %v3659_v47  ;;  %v2622_v23 = vsel %vm2605_vm14, %v9333_v24, 0 }
 0x41f   : > { %11722 = vst [vmem:[#allocation62_spill] sm:$0xff] %v10145_v48  ;;  %v10156_v12 = vadd.f32 %v7465_v11, %v7464_v51  ;;  %v3014_v40 = vsel %vm2851_vm3, %v11548_v39, %v3013_v56  ;;  %v4199_v48 = vrot.slane %v4197_v35, 3  ;;  %v2868_v51 = vsel %vm2851_vm3, %v2865_v54, %v11724_v22 }
 0x420   : > { %v4134_v53 = vshrl.u32 %v3014_v40, 16  ;;  %v4137_v3 = vshll.u32 %v3014_v40, 16  ;;  %v4280_v7 = vrot.slane %v4278_v17, 3  ;;  %v2552_v56 = vshrl.u32 %v6953_v26, 16 }
 0x421   : > { %11723 = vst [vmem:[#allocation60_spill] sm:$0xff] %v10156_v12  ;;  %7312 = vmatpush3.bf16.msra.mxu1 %v7979_v20  ;;  %v3590_v12 = vrot.slane %v3588_v43, 4  ;;  %v2555_v35 = vshll.u32 %v6953_v26, 16  ;;  %v3723_v22 = vshll.u32 %v10109_v28, 16  ;;  %v4203_v25 = vor.u32 %v4202_v27, %v4199_v48 }
 0x422   : > { %7545 = vmatprep.subr.bf16.mxu1 %v10153_v6  ;;  %v4136_v8 = vrot.slane %v4134_v53, 3  ;;  %v4139_v54 = vrot.slane %v4137_v3, 4  ;;  %v4283_v20 = vrot.slane %v4281_v29, 4  ;;  %v10181_v43 = vsel %vm2452_vm12, %v10124_v32, %v9131_v55 }
 0x423   : > { %v7467_v11 = vpop.f32.mrb[108].mxu0  ;;  %v3648_v17 = vshrl.u32 %v2868_v51, 16  ;;  %v2554_v3 = vrot.slane %v2552_v56, 3  ;;  %v2557_v47 = vrot.slane %v2555_v35, 4  ;;  %v2869_v36 = vrot.slane %v2622_v23, 1 }
 0x424   : > { %5062 = vmatmul.mubr.bf16.gmra.mrb[80].mxu1 %v3529_v41  ;;  %v7468_v39 = vpop.f32.mrb[109].mxu0  ;;  %v3651_v41 = vshll.u32 %v2868_v51, 16  ;;  %v10183_v53 = vor.u32 %v4139_v54, %v4136_v8  ;;  %v4284_v48 = vor.u32 %v4283_v20, %v4280_v7  ;;  %vm2606_vm10 = vcmp.ne.s16.totalorder %v10181_v43, 0 }
 0x425   : > { %5069 = vmatprep.mubr.bf16.mxu1 %v3601_v30  ;;  %v10173_v18 = vadd.f32 %v7468_v39, %v7467_v11  ;;  %v7470_v40 = vpop.f32.mrb[110].mxu0  ;;  %v3591_v39 = vor.u32 %v3590_v12, %v3587_v16  ;;  %v3650_v29 = vrot.slane %v3648_v17, 3  ;;  %v2623_v16 = vsel %vm2606_vm10, %v11659_v58, 0 }
 0x426   : > { %v7471_v26 = vpop.f32.mrb[111].mxu0  ;;  %11726 = vst [vmem:[#allocation73_spill] sm:$0xff] %v10183_v53  ;;  %v10190_v27 = vsel %vm2452_vm12, %v10183_v53, %v4203_v25  ;;  %v10193_v32 = vsel %vm2452_vm12, %v4203_v25, %v4284_v48  ;;  %v3653_v51 = vrot.slane %v3651_v41, 4  ;;  %v2558_v12 = vor.u32 %v2557_v47, %v2554_v3 }
 0x427   : > { %11725 = vst [vmem:[#allocation72_spill] sm:$0xff] %v10173_v18  ;;  %v10185_v30 = vadd.f32 %v7471_v26, %v7470_v40  ;;  %11728 = vst [vmem:[#allocation75_spill] sm:$0xff] %v10190_v27  ;;  %v3592_v7 = vsel %vm2452_vm12, %v10126_v0, %v3591_v39  ;;  %v3664_v56 = vsel %vm2452_vm12, %v10093_v44, %v3663_v1  ;;  %v11730_v8 = vshrl.u32 %v10109_v28, 16 }
 0x428   : > { %11729 = vst [vmem:[#allocation76_spill] sm:$0xff] %v10193_v32  ;;  %v3725_v54 = vrot.slane %v3723_v22, 4  ;;  %v11731_v20 = vrot.slane %v10122_v46, 1  ;;  %v2639_v26 = vsel %vm2251_vm1, %v11662_v60, 0  ;;  %v3654_v41 = vor.u32 %v3653_v51, %v3650_v29 }
 0x429   : > { %11727 = vst [vmem:[#allocation74_spill] sm:$0xff] %v10185_v30  ;;  %v3722_v25 = vrot.slane %v11730_v8, 3  ;;  %v2871_v44 = vrot.slane %v2623_v16, 1  ;;  %v10216_v46 = vsel %vm2452_vm12, %v9131_v55, %v2558_v12  ;;  %v3783_v47 = vshrl.u32 %v2639_v26, 16 }
 0x42a   : > { %v2870_v40 = vsel %vm2851_vm3, %v11731_v20, %v2869_v36  ;;  %vm2607_vm8 = vcmp.ne.s16.totalorder %v10216_v46, 0 }
 0x42b   : > { %v7473_v11 = vpop.f32.mrb[112].mxu0  ;;  %v3711_v28 = vshrl.u32 %v2870_v40, 16  ;;  %v3714_v3 = vshll.u32 %v2870_v40, 16  ;;  %v3726_v22 = vor.u32 %v3725_v54, %v3722_v25  ;;  %v2872_v29 = vsel %vm2851_vm3, %v2869_v36, %v2871_v44 }
 0x42c   : > { %5070 = vmatmul.mubr.bf16.gmra.mrb[84].mxu1 %v3592_v7  ;;  %v7474_v35 = vpop.f32.mrb[113].mxu0  ;;  %v3786_v7 = vshll.u32 %v2639_v26, 16  ;;  %v3785_v8 = vrot.slane %v3783_v47, 3  ;;  %v2640_v54 = vsel %vm2252_vm4, %v11665_v59, 0  ;;  %v3774_v36 = vshrl.u32 %v2872_v29, 16 }
 0x42d   : > { %5077 = vmatprep.mubr.bf16.mxu1 %v3664_v56  ;;  %v10207_v0 = vadd.f32 %v7474_v35, %v7473_v11  ;;  %v7476_v23 = vpop.f32.mrb[114].mxu0  ;;  %v3655_v11 = vsel %vm2452_vm12, %v3591_v39, %v3654_v41  ;;  %v3713_v56 = vrot.slane %v3711_v28, 3  ;;  %v3716_v35 = vrot.slane %v3714_v3, 4 }
 0x42e   : > { %v7477_v17 = vpop.f32.mrb[115].mxu0  ;;  %v3727_v51 = vsel %vm2452_vm12, %v3663_v1, %v3726_v22  ;;  %v3788_v20 = vrot.slane %v3786_v7, 4  ;;  %v2624_v39 = vsel %vm2607_vm8, %v11662_v60, 0  ;;  %v3777_v26 = vshll.u32 %v2872_v29, 16 }
 0x42f   : > { %11732 = vst [vmem:[#allocation77_spill] sm:$0xff] %v10207_v0  ;;  %v10212_v48 = vadd.f32 %v7477_v17, %v7476_v23  ;;  %v3717_v1 = vor.u32 %v3716_v35, %v3713_v56  ;;  %v10234_v28 = vsel %vm2452_vm12, %v2558_v12, %v9131_v55  ;;  %v3846_v47 = vshrl.u32 %v2640_v54, 16 }
 0x430   : > { %v3789_v3 = vor.u32 %v3788_v20, %v3785_v8  ;;  %v3849_v7 = vshll.u32 %v2640_v54, 16  ;;  %v3776_v61 = vrot.slane %v3774_v36, 3  ;;  %vm2608_vm1 = vcmp.ne.s16.totalorder %v10234_v28, 0 }
 0x431   : > { %11733 = vst [vmem:[#allocation78_spill] sm:$0xff] %v10212_v48  ;;  %v3848_v56 = vrot.slane %v3846_v47, 3  ;;  %v2641_v54 = vsel %vm2253_vm7, %v11669_v33, 0  ;;  %vm11740_vm7 = vcmp.ne.s16.totalorder %v11670_v21, 0 }
 0x432   : > { %v3790_v29 = vsel %vm2452_vm12, %v3726_v22, %v3789_v3  ;;  %v3851_v35 = vrot.slane %v3849_v7, 4  ;;  %v3909_v7 = vshrl.u32 %v2641_v54, 16 }
 0x433   : > { %v7479_v19 = vpop.f32.mrb[116].mxu0 }
 0x434   : > { %5078 = vmatmul.mubr.bf16.gmra.mrb[88].mxu1 %v3655_v11  ;;  %v7480_v16 = vpop.f32.mrb[117].mxu0  ;;  %v2873_v11 = vrot.slane %v2624_v39, 1  ;;  %v3852_v47 = vor.u32 %v3851_v35, %v3848_v56 }
 0x435   : > { %5085 = vmatprep.mubr.bf16.mxu1 %v3727_v51  ;;  %v10222_v40 = vadd.f32 %v7480_v16, %v7479_v19  ;;  %v7482_v25 = vpop.f32.mrb[118].mxu0  ;;  %v3779_v19 = vrot.slane %v3777_v26, 4  ;;  %v3718_v51 = vsel %vm2452_vm12, %v3654_v41, %v3717_v1  ;;  %v2625_v41 = vsel %vm2608_vm1, %v11665_v59, 0 }
 0x436   : > { %v7483_v23 = vpop.f32.mrb[119].mxu0  ;;  %v2874_v12 = vsel %vm2851_vm3, %v2871_v44, %v2873_v11  ;;  %v10253_v44 = vsel %vm2452_vm12, %v9131_v55, %v10089_v15  ;;  %v2875_v63 = vrot.slane %v2625_v41, 1 }
 0x437   : > { %11734 = vst [vmem:[#allocation79_spill] sm:$0xff] %v10222_v40  ;;  %v10230_v17 = vadd.f32 %v7483_v23, %v7482_v25  ;;  %v3780_v23 = vor.u32 %v3779_v19, %v3776_v61  ;;  %v3837_v36 = vshrl.u32 %v2874_v12, 16  ;;  %v3840_v26 = vshll.u32 %v2874_v12, 16 }
 0x438   : > { %vm2609_vm4 = vcmp.ne.s16.totalorder %v10253_v44, 0  ;;  %v3853_v19 = vsel %vm2452_vm12, %v3789_v3, %v3852_v47  ;;  %v2876_v15 = vsel %vm2851_vm3, %v2873_v11, %v2875_v63 }
 0x439   : > { %11735 = vst [vmem:[#allocation80_spill] sm:$0xff] %v10230_v17  ;;  %v3842_v61 = vrot.slane %v3840_v26, 4  ;;  %v3900_v26 = vshrl.u32 %v2876_v15, 16 }
 0x43b   : > { %v7485_v16 = vpop.f32.mrb[120].mxu0 }
 0x43c   : > { %5086 = vmatmul.mubr.bf16.gmra.mrb[92].mxu1 %v3718_v51  ;;  %v7486_v25 = vpop.f32.mrb[121].mxu0  ;;  %v3912_v51 = vshll.u32 %v2641_v54, 16  ;;  %v2642_v54 = vsel %vm2254_vm9, %v11672_v2, 0  ;;  %vm11742_vm9 = vcmp.ne.s16.totalorder %v9684_v9, 0 }
 0x43d   : > { %5093 = vmatprep.mubr.bf16.mxu1 %v3790_v29  ;;  %v10240_v8 = vadd.f32 %v7486_v25, %v7485_v16  ;;  %v7488_v20 = vpop.f32.mrb[122].mxu0  ;;  %v3781_v16 = vsel %vm2452_vm12, %v3717_v1, %v3780_v23  ;;  %v3839_v25 = vrot.slane %v3837_v36, 3  ;;  %v2626_v1 = vsel %vm2609_vm4, %v11669_v33, 0 }
 0x43e   : > { %v7489_v39 = vpop.f32.mrb[123].mxu0  ;;  %v3972_v11 = vshrl.u32 %v2642_v54, 16 }
 0x43f   : > { %11736 = vst [vmem:[#allocation81_spill] sm:$0xff] %v10240_v8  ;;  %v10248_v22 = vadd.f32 %v7489_v39, %v7488_v20  ;;  %v3911_v20 = vrot.slane %v3909_v7, 3  ;;  %v3914_v39 = vrot.slane %v3912_v51, 4  ;;  %v3843_v3 = vor.u32 %v3842_v61, %v3839_v25 }
 0x440   : > { %v3903_v7 = vshll.u32 %v2876_v15, 16  ;;  %v2643_v25 = vsel %vm11740_vm7, %v11675_v42, 0  ;;  %v2627_v61 = vsel %vm2610_vm5, %v11672_v2, 0  ;;  %vm11746_vm7 = vcmp.ne.s16.totalorder %v9131_v55, 0 }
 0x441   : > { %11737 = vst [vmem:[#allocation82_spill] sm:$0xff] %v10248_v22  ;;  %v3915_v51 = vor.u32 %v3914_v39, %v3911_v20  ;;  %v3974_v22 = vrot.slane %v3972_v11, 3 }
 0x443   : > { %v7491_v29 = vpop.f32.mrb[124].mxu0  ;;  %v3916_v62 = vsel %vm2452_vm12, %v3852_v47, %v3915_v51  ;;  %v2879_v47 = vrot.slane %v2627_v61, 1 }
 0x444   : > { %5094 = vmatmul.mubr.bf16.gmra.mrb[96].mxu1 %v3781_v16  ;;  %v7492_v12 = vpop.f32.mrb[125].mxu0  ;;  %v3975_v16 = vshll.u32 %v2642_v54, 16  ;;  %v4038_v54 = vshll.u32 %v2643_v25, 16 }
 0x445   : > { %5101 = vmatprep.mubr.bf16.mxu1 %v3853_v19  ;;  %v10259_v56 = vadd.f32 %v7492_v12, %v7491_v29  ;;  %v7494_v35 = vpop.f32.mrb[126].mxu0  ;;  %v2877_v29 = vrot.slane %v2626_v1, 1  ;;  %v3844_v19 = vsel %vm2452_vm12, %v3780_v23, %v3843_v3  ;;  %v3902_v12 = vrot.slane %v3900_v26, 3 }
 0x446   : > { %v7495_v41 = vpop.f32.mrb[127].mxu0  ;;  %v3977_v8 = vrot.slane %v3975_v16, 4 }
 0x447   : > { %11738 = vst [vmem:[#allocation83_spill] sm:$0xff] %v10259_v56  ;;  %v10267_v36 = vadd.f32 %v7495_v41, %v7494_v35  ;;  %v3905_v56 = vrot.slane %v3903_v7, 4  ;;  %v2878_v17 = vsel %vm2851_vm3, %v2875_v63, %v2877_v29  ;;  %v4035_v35 = vshrl.u32 %v2643_v25, 16 }
 0x448   : > { %v3963_v23 = vshrl.u32 %v2878_v17, 16  ;;  %v3966_v39 = vshll.u32 %v2878_v17, 16  ;;  %v3978_v15 = vor.u32 %v3977_v8, %v3974_v22  ;;  %v4040_v7 = vrot.slane %v4038_v54, 4 }
 0x449   : > { %11739 = vst [vmem:[#allocation84_spill] sm:$0xff] %v10267_v36  ;;  %v3906_v20 = vor.u32 %v3905_v56, %v3902_v12  ;;  %v4037_v21 = vrot.slane %v4035_v35, 3  ;;  %v2880_v11 = vsel %vm2851_vm3, %v2877_v29, %v2879_v47  ;;  %v2644_v17 = vsel %vm2256_vm13, %v11679_v37, 0 }
 0x44a   : > { %v3965_v41 = vrot.slane %v3963_v23, 3  ;;  %v3968_v63 = vrot.slane %v3966_v39, 4  ;;  %v3979_v26 = vsel %vm2452_vm12, %v3915_v51, %v3978_v15  ;;  %v2628_v8 = vsel %vm2611_vm0, %v11675_v42, 0  ;;  %v11741_v39 = vld [vmem:[#allocation59_spill] sm:$0xff] }
 0x44b   : > { %v3907_v1 = vsel %vm2452_vm12, %v3843_v3, %v3906_v20  ;;  %v4026_v3 = vshrl.u32 %v2880_v11, 16  ;;  %v4029_v16 = vshll.u32 %v2880_v11, 16  ;;  %v4041_v12 = vor.u32 %v4040_v7, %v4037_v21 }
 0x44c   : > { %5102 = vmatmul.mubr.bf16.gmra.mrb[100].mxu1 %v3844_v19  ;;  %v3969_v56 = vor.u32 %v3968_v63, %v3965_v41  ;;  %v4098_v51 = vshrl.u32 %v2644_v17, 16  ;;  %v2881_v25 = vrot.slane %v2628_v8, 1  ;;  %v2645_v34 = vsel %vm11742_vm9, %v11741_v39, 0 }
 0x44d   : > { %5109 = vmatprep.mubr.bf16.mxu1 %v3916_v62  ;;  %v4101_v62 = vshll.u32 %v2644_v17, 16  ;;  %v2629_v35 = vsel %vm2612_vm6, %v11679_v37, 0  ;;  %v4028_v41 = vrot.slane %v4026_v3, 3  ;;  %v4031_v63 = vrot.slane %v4029_v16, 4 }
 0x44e   : > { %v4100_v7 = vrot.slane %v4098_v51, 3  ;;  %v2882_v17 = vsel %vm2851_vm3, %v2879_v47, %v2881_v25  ;;  %vm11745_vm13 = vcmp.ne.s16.totalorder %v9180_v45, 0  ;;  %v11751_v45 = vld [vmem:[#allocation67_spill] sm:$0xff] }
 0x44f   : > { %v4103_v11 = vrot.slane %v4101_v62, 4  ;;  %v4032_v16 = vor.u32 %v4031_v63, %v4028_v41  ;;  %v4092_v36 = vshll.u32 %v2882_v17, 16 }
 0x451   : > { %v4104_v51 = vor.u32 %v4103_v11, %v4100_v7  ;;  %v4094_v63 = vrot.slane %v4092_v36, 4  ;;  %v2646_v7 = vsel %vm11745_vm13, %v9712_v31, 0  ;;  %vm11752_vm13 = vcmp.ne.s16.totalorder %v11751_v45, 0 }
 0x452   : > { %v4233_v36 = vshrl.u32 %v2646_v7, 16 }
 0x454   : > { %5110 = vmatmul.mubr.bf16.gmra.mrb[104].mxu1 %v3907_v1  ;;  %v3970_v1 = vsel %vm2452_vm12, %v3906_v20, %v3969_v56 }
 0x455   : > { %5117 = vmatprep.mubr.bf16.mxu1 %v3979_v26  ;;  %v4042_v26 = vsel %vm2452_vm12, %v3978_v15, %v4041_v12 }
 0x457   : > { %v7089_v22 = vpop.f32.mrb[0].mxu1 }
 0x458   : > { %v7090_v19 = vpop.f32.mrb[1].mxu1 }
 0x459   : > { %v10287_v61 = vadd.f32 %v7090_v19, %v7089_v22  ;;  %v7092_v29 = vpop.f32.mrb[2].mxu1  ;;  %v4161_v19 = vshrl.u32 %v2645_v34, 16 }
 0x45a   : > { %v7093_v23 = vpop.f32.mrb[3].mxu1 }
 0x45b   : > { %v10295_v54 = vadd.f32 %v7093_v23, %v7092_v29  ;;  %v4164_v29 = vshll.u32 %v2645_v34, 16  ;;  %v10302_v23 = vrot.slane %v2629_v35, 1 }
 0x45c   : > { %5118 = vmatmul.mubr.bf16.gmra.mrb[108].mxu1 %v3970_v1  ;;  %v7497_v21 = vpop.f32.mrb[128].mxu0  ;;  %v4089_v1 = vshrl.u32 %v2882_v17, 16  ;;  %v4105_v17 = vsel %vm2452_vm12, %v4041_v12, %v4104_v51  ;;  %v11748_v12 = vld [vmem:[#allocation65_spill] sm:$0xff] }
 0x45d   : > { %5125 = vmatprep.mubr.bf16.mxu1 %v4042_v26  ;;  %v7498_v9 = vpop.f32.mrb[129].mxu0  ;;  %v2884_v34 = vsel %vm2851_vm3, %v2881_v25, %v10302_v23  ;;  %v2647_v25 = vsel %vm11746_vm7, %v9694_v4, 0  ;;  %vm11749_vm9 = vcmp.ne.s16.totalorder %v11748_v12, 0 }
 0x45e   : > { %v10300_v8 = vadd.f32 %v7498_v9, %v7497_v21  ;;  %v7500_v22 = vpop.f32.mrb[130].mxu0  ;;  %v4163_v21 = vrot.slane %v4161_v19, 3  ;;  %v4166_v9 = vrot.slane %v4164_v29, 4  ;;  %v4091_v41 = vrot.slane %v4089_v1, 3  ;;  %v11747_v1 = vld [vmem:[#allocation30_spill] sm:$0xff] }
 0x45f   : > { %v7095_v20 = vpop.f32.mrb[4].mxu1  ;;  %v7501_v3 = vpop.f32.mrb[131].mxu0  ;;  %v4152_v11 = vshrl.u32 %v2884_v34, 16  ;;  %v2918_v4 = vrot.slane %v2647_v25, 1 }
 0x460   : > { %11743 = vst [vmem:[#allocation59_spill] sm:$0xff] %v10300_v8  ;;  %v7096_v15 = vpop.f32.mrb[5].mxu1  ;;  %v10304_v40 = vadd.f32 %v7501_v3, %v7500_v22  ;;  %v4033_v8 = vsel %vm2452_vm12, %v3969_v56, %v4032_v16  ;;  %v4155_v22 = vshll.u32 %v2884_v34, 16  ;;  %v4095_v29 = vor.u32 %v4094_v63, %v4091_v41 }
 0x461   : > { %v10306_v62 = vadd.f32 %v7096_v15, %v7095_v20  ;;  %v7098_v47 = vpop.f32.mrb[6].mxu1  ;;  %v4167_v20 = vor.u32 %v4166_v9, %v4163_v21  ;;  %v2648_v15 = vsel %vm11749_vm9, %v11747_v1, 0  ;;  %v4154_v41 = vrot.slane %v4152_v11, 3  ;;  %v11756_v11 = vld [vmem:[#allocation43_spill] sm:$0xff] }
 0x462   : > { %11744 = vst [vmem:[#allocation85_spill] sm:$0xff] %v10304_v40  ;;  %v7099_v26 = vpop.f32.mrb[7].mxu1  ;;  %v4157_v63 = vrot.slane %v4155_v22, 4  ;;  %v4096_v1 = vsel %vm2452_vm12, %v4032_v16, %v4095_v29  ;;  %v2919_v30 = vrot.slane %v2648_v15, 1  ;;  %vm11757_vm7 = vcmp.ne.s16.totalorder %v11756_v11, 0 }
 0x463   : > { %v10310_v35 = vadd.f32 %v7099_v26, %v7098_v47  ;;  %v11750_v47 = vld [vmem:[#allocation31_spill] sm:$0xff]  ;;  %v4224_v16 = vshrl.u32 %v10302_v23, 16  ;;  %v4227_v15 = vshll.u32 %v10302_v23, 16 }
 0x464   : > { %5126 = vmatmul.mubr.bf16.gmra.mrb[112].mxu1 %v4033_v8  ;;  %v4236_v8 = vshll.u32 %v2646_v7, 16  ;;  %v2649_v26 = vsel %vm11752_vm13, %v11750_v47, 0 }
 0x465   : > { %5133 = vmatprep.mubr.bf16.mxu1 %v4105_v17  ;;  %v2921_v18 = vrot.slane %v2649_v26, 1  ;;  %v4226_v11 = vrot.slane %v4224_v16, 3 }
 0x466   : > { %v4238_v25 = vrot.slane %v4236_v8, 4 }
 0x467   : > { %v7101_v19 = vpop.f32.mrb[8].mxu1  ;;  %v2922_v26 = vsel %vm2851_vm3, %v2919_v30, %v2921_v18 }
 0x468   : > { %v7503_v56 = vpop.f32.mrb[132].mxu0  ;;  %v7102_v3 = vpop.f32.mrb[9].mxu1  ;;  %v3265_v53 = vshll.u32 %v2922_v26, 16 }
 0x469   : > { %v7504_v34 = vpop.f32.mrb[133].mxu0  ;;  %v10326_v17 = vadd.f32 %v7102_v3, %v7101_v19  ;;  %v7104_v40 = vpop.f32.mrb[10].mxu1  ;;  %v4168_v19 = vsel %vm2452_vm12, %v4104_v51, %v4167_v20  ;;  %v4235_v3 = vrot.slane %v4233_v36, 3 }
 0x46a   : > { %v10328_v48 = vadd.f32 %v7504_v34, %v7503_v56  ;;  %v7506_v21 = vpop.f32.mrb[134].mxu0  ;;  %v7105_v9 = vpop.f32.mrb[11].mxu1  ;;  %v2920_v56 = vsel %vm2851_vm3, %v2918_v4, %v2919_v30  ;;  %v11755_v34 = vld [vmem:[#allocation33_spill] sm:$0xff] }
 0x46b   : > { %v7507_v7 = vpop.f32.mrb[135].mxu0  ;;  %v10330_v0 = vadd.f32 %v7105_v9, %v7104_v40  ;;  %v2650_v22 = vsel %vm11757_vm7, %v11755_v34, 0  ;;  %v4158_v9 = vor.u32 %v4157_v63, %v4154_v41  ;;  %v4239_v51 = vor.u32 %v4238_v25, %v4235_v3 }
 0x46c   : > { %11753 = vst [vmem:[#allocation30_spill] sm:$0xff] %v10328_v48  ;;  %v10333_v32 = vadd.f32 %v7507_v7, %v7506_v21  ;;  %5134 = vmatmul.mubr.bf16.gmra.mrb[116].mxu1 %v4096_v1  ;;  %v3254_v36 = vshrl.u32 %v2920_v56, 16  ;;  %v3257_v8 = vshll.u32 %v2920_v56, 16  ;;  %v3262_v63 = vshrl.u32 %v2922_v26, 16  ;;  %v11761_v26 = vld [vmem:[#allocation35_spill] sm:$0xff] }
 0x46d   : > { %5141 = vmatprep.mubr.bf16.mxu1 %v4168_v19  ;;  %v4159_v30 = vsel %vm2452_vm12, %v4095_v29, %v4158_v9  ;;  %v4229_v3 = vrot.slane %v4227_v15, 4  ;;  %v4240_v56 = vsel %vm2452_vm12, %v4167_v20, %v4239_v51 }
 0x46e   : > { %11754 = vst [vmem:[#allocation65_spill] sm:$0xff] %v10333_v32  ;;  %v2923_v32 = vrot.slane %v2650_v22, 1  ;;  %v3259_v22 = vrot.slane %v3257_v8, 4 }
 0x46f   : > { %v7107_v40 = vpop.f32.mrb[12].mxu1  ;;  %v4230_v29 = vor.u32 %v4229_v3, %v4226_v11 }
 0x470   : > { %v7509_v21 = vpop.f32.mrb[136].mxu0  ;;  %v7108_v7 = vpop.f32.mrb[13].mxu1 }
 0x471   : > { %v7510_v1 = vpop.f32.mrb[137].mxu0  ;;  %v10343_v19 = vadd.f32 %v7108_v7, %v7107_v40  ;;  %v7110_v4 = vpop.f32.mrb[14].mxu1  ;;  %v3256_v40 = vrot.slane %v3254_v36, 3  ;;  %v3264_v7 = vrot.slane %v3262_v63, 3  ;;  %v4231_v11 = vsel %vm2452_vm12, %v4158_v9, %v4230_v29 }
 0x472   : > { %v10345_v48 = vadd.f32 %v7510_v1, %v7509_v21  ;;  %v7512_v27 = vpop.f32.mrb[138].mxu0  ;;  %v7111_v41 = vpop.f32.mrb[15].mxu1  ;;  %v2924_v21 = vsel %vm2851_vm3, %v2921_v18, %v2923_v32  ;;  %v3267_v1 = vrot.slane %v3265_v53, 4 }
 0x473   : > { %v7513_v50 = vpop.f32.mrb[139].mxu0  ;;  %v10347_v23 = vadd.f32 %v7111_v41, %v7110_v4 }
 0x474   : > { %11758 = vst [vmem:[#allocation31_spill] sm:$0xff] %v10345_v48  ;;  %v10350_v25 = vadd.f32 %v7513_v50, %v7512_v27  ;;  %5142 = vmatmul.mubr.bf16.gmra.mrb[120].mxu1 %v4159_v30  ;;  %v11762_v48 = vld [vmem:[#allocation45_spill] sm:$0xff]  ;;  %v3260_v50 = vor.u32 %v3259_v22, %v3256_v40  ;;  %v3351_v27 = vshrl.u32 %v2924_v21, 16  ;;  %v3354_v30 = vshll.u32 %v2924_v21, 16 }
 0x475   : > { %11759 = vst [vmem:[#allocation67_spill] sm:$0xff] %v10347_v23  ;;  %5149 = vmatprep.mubr.bf16.mxu1 %v4240_v56  ;;  %vm11763_vm9 = vcmp.ne.s16.totalorder %v11762_v48, 0  ;;  %v3268_v63 = vor.u32 %v3267_v1, %v3264_v7 }
 0x476   : > { %11760 = vst [vmem:[#allocation33_spill] sm:$0xff] %v10350_v25  ;;  %v2651_v4 = vsel %vm11763_vm9, %v11761_v26, 0  ;;  %v3353_v22 = vrot.slane %v3351_v27, 3  ;;  %v3356_v21 = vrot.slane %v3354_v30, 4  ;;  %v11769_v30 = vld [vmem:[#allocation71_spill] sm:$0xff] }
 0x477   : > { %v7113_v41 = vpop.f32.mrb[16].mxu1  ;;  %v2925_v36 = vrot.slane %v2651_v4, 1  ;;  %v3269_v40 = vsel %vm2452_vm12, %v3260_v50, %v3268_v63  ;;  %v7981_v50 = vld [vmem:[#allocation10 + $0x208] sm:$0xff]  }
 0x478   : > { %v7515_v16 = vpop.f32.mrb[140].mxu0  ;;  %v7114_v15 = vpop.f32.mrb[17].mxu1 }
 0x479   : > { %v7516_v25 = vpop.f32.mrb[141].mxu0  ;;  %v10357_v20 = vadd.f32 %v7114_v15, %v7113_v41  ;;  %v7116_v51 = vpop.f32.mrb[18].mxu1  ;;  %v2926_v4 = vsel %vm2851_vm3, %v2923_v32, %v2925_v36 }
 0x47a   : > { %v10359_v8 = vadd.f32 %v7516_v25, %v7515_v16  ;;  %v7518_v18 = vpop.f32.mrb[142].mxu0  ;;  %v7117_v53 = vpop.f32.mrb[19].mxu1  ;;  %v11766_v25 = vld [vmem:[#allocation54_spill] sm:$0xff]  ;;  %v3357_v16 = vor.u32 %v3356_v21, %v3353_v22  ;;  %v3414_v15 = vshrl.u32 %v2926_v4, 16  ;;  %v2653_v21 = vsel %vm2602_vm11, %v9309_v38, 0 }
 0x47b   : > { %v7519_v56 = vpop.f32.mrb[143].mxu0  ;;  %v10361_v23 = vadd.f32 %v7117_v53, %v7116_v51  ;;  %vm11767_vm13 = vcmp.ne.s16.totalorder %v11766_v25, 0  ;;  %v3417_v51 = vshll.u32 %v2926_v4, 16  ;;  %v7982_v4 = vld [vmem:[#allocation10 + $0x210] sm:$0xff]  }
 0x47c   : > { %11764 = vst [vmem:[#allocation35_spill] sm:$0xff] %v10359_v8  ;;  %v10364_v3 = vadd.f32 %v7519_v56, %v7518_v18  ;;  %5150 = vmatmul.mubr.bf16.gmra.mrb[124].mxu1 %v4231_v11  ;;  %v2652_v41 = vsel %vm11767_vm13, %v9284_v52, 0  ;;  %v3358_v32 = vsel %vm2452_vm12, %v3268_v63, %v3357_v16  ;;  %v3416_v56 = vrot.slane %v3414_v15, 3 }
 0x47d   : > { %5190 = vmatprep.mubr.bf16.mxu1 %v3269_v40  ;;  %v2927_v18 = vrot.slane %v2652_v41, 1  ;;  %v3419_v11 = vrot.slane %v3417_v51, 4  ;;  %v2929_v15 = vrot.slane %v2653_v21, 1 }
 0x47e   : > { %11765 = vst [vmem:[#allocation45_spill] sm:$0xff] %v10364_v3 }
 0x47f   : > { %v7119_v7 = vpop.f32.mrb[20].mxu1  ;;  %v2928_v40 = vsel %vm2851_vm3, %v2925_v36, %v2927_v18 }
 0x480   : > { %v7120_v1 = vpop.f32.mrb[21].mxu1 }
 0x481   : > { %v10371_v9 = vadd.f32 %v7120_v1, %v7119_v7  ;;  %v7122_v29 = vpop.f32.mrb[22].mxu1  ;;  %v3420_v1 = vor.u32 %v3419_v11, %v3416_v56  ;;  %v2930_v56 = vsel %vm2851_vm3, %v2927_v18, %v2929_v15  ;;  %v7984_v11 = vld [vmem:[#allocation10 + $0x220] sm:$0xff]   ;;  %v7985_v18 = vld [vmem:[#allocation10 + $0x228] sm:$0xff]  }
 0x482   : > { %v7123_v53 = vpop.f32.mrb[23].mxu1 }
 0x483   : > { %v10373_v27 = vadd.f32 %v7123_v53, %v7122_v29  ;;  %v3477_v29 = vshrl.u32 %v2928_v40, 16  ;;  %v3480_v53 = vshll.u32 %v2928_v40, 16  ;;  %v3421_v3 = vsel %vm2452_vm12, %v3357_v16, %v3420_v1 }
 0x484   : > { %5191 = vmatmul.mubr.bf16.vlgmr.msra.gmra.mrb[128].mxu1 %v11769_v30 }
 0x485   : > { %11768 = vst [vmem:[#allocation54_spill] sm:$0xff] %v10373_v27  ;;  %5198 = vmatprep.mubr.bf16.mxu1 %v3358_v32  ;;  %7546 = vmatpush3.bf16.msra.mxu1 %v10153_v6  ;;  %v7983_v6 = vld [vmem:[#allocation10 + $0x218] sm:$0xff]   ;;  %v11773_v32 = vld [vmem:[#allocation37_spill] sm:$0xff]  ;;  %v3479_v8 = vrot.slane %v3477_v29, 3  ;;  %v3482_v27 = vrot.slane %v3480_v53, 4 }
 0x486   : > { %7547 = vmatprep.subr.bf16.mxu1 %v7981_v50  ;;  %v11776_v53 = vld [vmem:[#allocation38_spill] sm:$0xff] }
 0x487   : > { %v7125_v41 = vpop.f32.mrb[24].mxu1 }
 0x488   : > { %v7126_v7 = vpop.f32.mrb[25].mxu1 }
 0x489   : > { %v10382_v30 = vadd.f32 %v7126_v7, %v7125_v41  ;;  %v7128_v63 = vpop.f32.mrb[26].mxu1  ;;  %7548 = vmatpush3.bf16.msra.mxu1 %v7981_v50  ;;  %v2654_v50 = vsel %vm2603_vm15, %v9333_v24, 0  ;;  %v3483_v41 = vor.u32 %v3482_v27, %v3479_v8  ;;  %v3540_v7 = vshrl.u32 %v2930_v56, 16 }
 0x48a   : > { %v7129_v51 = vpop.f32.mrb[27].mxu1  ;;  %7549 = vmatprep.subr.bf16.mxu1 %v7982_v4  ;;  %v2931_v29 = vrot.slane %v2654_v50, 1  ;;  %v2655_v27 = vsel %vm2604_vm2, %v11659_v58, 0 }
 0x48b   : > { %11771 = vst [vmem:[#allocation71_spill] sm:$0xff] %v10382_v30  ;;  %v10384_v36 = vadd.f32 %v7129_v51, %v7128_v63  ;;  %v3543_v63 = vshll.u32 %v2930_v56, 16 }
 0x48c   : > { %5199 = vmatmul.mubr.bf16.gmra.mrb[132].mxu1 %v11773_v32  ;;  %v3484_v32 = vsel %vm2452_vm12, %v3420_v1, %v3483_v41  ;;  %v2932_v8 = vsel %vm2851_vm3, %v2929_v15, %v2931_v29  ;;  %v7987_v15 = vld [vmem:[#allocation10 + $0x238] sm:$0xff]  }
 0x48d   : > { %11772 = vst [vmem:[#allocation28_spill] sm:$0xff] %v10384_v36  ;;  %5206 = vmatprep.mubr.bf16.mxu1 %v3421_v3  ;;  %7550 = vmatpush3.bf16.msra.mxu1 %v7982_v4  ;;  %v3542_v36 = vrot.slane %v3540_v7, 3  ;;  %v3545_v30 = vrot.slane %v3543_v63, 4  ;;  %v2933_v7 = vrot.slane %v2655_v27, 1 }
 0x48e   : > { %7551 = vmatprep.subr.bf16.mxu1 %v7983_v6 }
 0x48f   : > { %v7131_v40 = vpop.f32.mrb[28].mxu1 }
 0x490   : > { %v7132_v21 = vpop.f32.mrb[29].mxu1 }
 0x491   : > { %v10392_v51 = vadd.f32 %v7132_v21, %v7131_v40  ;;  %v7134_v16 = vpop.f32.mrb[30].mxu1  ;;  %7552 = vmatpush3.bf16.msra.mxu1 %v7983_v6  ;;  %v7986_v6 = vld [vmem:[#allocation10 + $0x230] sm:$0xff]   ;;  %v3546_v40 = vor.u32 %v3545_v30, %v3542_v36  ;;  %v3603_v21 = vshrl.u32 %v2932_v8, 16  ;;  %v2934_v30 = vsel %vm2851_vm3, %v2931_v29, %v2933_v7  ;;  %v11780_v29 = vld [vmem:[#allocation40_spill] sm:$0xff] }
 0x492   : > { %v7135_v3 = vpop.f32.mrb[31].mxu1  ;;  %7553 = vmatprep.subr.bf16.mxu1 %v7984_v11  ;;  %v2656_v36 = vsel %vm2605_vm14, %v11662_v60, 0 }
 0x493   : > { %11774 = vst [vmem:[#allocation37_spill] sm:$0xff] %v10392_v51  ;;  %v10394_v4 = vadd.f32 %v7135_v3, %v7134_v16  ;;  %v3606_v16 = vshll.u32 %v2932_v8, 16 }
 0x494   : > { %5207 = vmatmul.mubr.bf16.gmra.mrb[136].mxu1 %v11776_v53  ;;  %v11778_v53 = vld [vmem:[#allocation39_spill] sm:$0xff] }
 0x495   : > { %11775 = vst [vmem:[#allocation86_spill] sm:$0xff] %v10394_v4  ;;  %5214 = vmatprep.mubr.bf16.mxu1 %v3484_v32  ;;  %7554 = vmatpush3.bf16.msra.mxu1 %v7984_v11  ;;  %v3547_v32 = vsel %vm2452_vm12, %v3483_v41, %v3546_v40  ;;  %v3605_v4 = vrot.slane %v3603_v21, 3  ;;  %v3608_v51 = vrot.slane %v3606_v16, 4  ;;  %v2935_v41 = vrot.slane %v2656_v36, 1 }
 0x496   : > { %7555 = vmatprep.subr.bf16.mxu1 %v7985_v18 }
 0x497   : > { %v7137_v56 = vpop.f32.mrb[32].mxu1  ;;  %v3609_v27 = vor.u32 %v3608_v51, %v3605_v4  ;;  %v2657_v51 = vsel %vm2606_vm10, %v11665_v59, 0 }
 0x498   : > { %v7138_v50 = vpop.f32.mrb[33].mxu1 }
 0x499   : > { %v10402_v3 = vadd.f32 %v7138_v50, %v7137_v56  ;;  %v7140_v1 = vpop.f32.mrb[34].mxu1  ;;  %7556 = vmatpush3.bf16.msra.mxu1 %v7985_v18  ;;  %v3666_v56 = vshrl.u32 %v2934_v30, 16  ;;  %v3669_v50 = vshll.u32 %v2934_v30, 16 }
 0x49a   : > { %v7141_v63 = vpop.f32.mrb[35].mxu1  ;;  %7557 = vmatprep.subr.bf16.mxu1 %v7986_v6 }
 0x49b   : > { %v10404_v11 = vadd.f32 %v7141_v63, %v7140_v1 }
 0x49c   : > { %5215 = vmatmul.mubr.bf16.gmra.mrb[140].mxu1 %v11778_v53  ;;  %v3668_v53 = vrot.slane %v3666_v56, 3  ;;  %v11783_v56 = vld [vmem:[#allocation42_spill] sm:$0xff] }
 0x49d   : > { %11777 = vst [vmem:[#allocation38_spill] sm:$0xff] %v10404_v11  ;;  %5222 = vmatprep.mubr.bf16.mxu1 %v3547_v32  ;;  %7558 = vmatpush3.bf16.msra.mxu1 %v7986_v6  ;;  %v3610_v6 = vsel %vm2452_vm12, %v3546_v40, %v3609_v27  ;;  %v3671_v32 = vrot.slane %v3669_v50, 4  ;;  %v2936_v11 = vsel %vm2851_vm3, %v2933_v7, %v2935_v41 }
 0x49e   : > { %7559 = vmatprep.subr.bf16.mxu1 %v7987_v15 }
 0x49f   : > { %v7143_v18 = vpop.f32.mrb[36].mxu1  ;;  %v3672_v36 = vor.u32 %v3671_v32, %v3668_v53 }
 0x4a0   : > { %v7144_v8 = vpop.f32.mrb[37].mxu1 }
 0x4a1   : > { %v10412_v1 = vadd.f32 %v7144_v8, %v7143_v18  ;;  %v7146_v63 = vpop.f32.mrb[38].mxu1  ;;  %7560 = vmatpush3.bf16.msra.mxu1 %v7987_v15  ;;  %v3729_v15 = vshrl.u32 %v2936_v11, 16  ;;  %v3732_v18 = vshll.u32 %v2936_v11, 16  ;;  %v3673_v7 = vsel %vm2452_vm12, %v3609_v27, %v3672_v36 }
 0x4a2   : > { %v7147_v21 = vpop.f32.mrb[39].mxu1  ;;  %v2658_v11 = vsel %vm2607_vm8, %v11669_v33, 0 }
 0x4a3   : > { %v10414_v16 = vadd.f32 %v7147_v21, %v7146_v63  ;;  %v2937_v21 = vrot.slane %v2657_v51, 1  ;;  %v3731_v50 = vrot.slane %v3729_v15, 3  ;;  %v11786_v15 = vld [vmem:[#allocation44_spill] sm:$0xff] }
 0x4a4   : > { %5223 = vmatmul.mubr.bf16.gmra.mrb[144].mxu1 %v11780_v29 }
 0x4a5   : > { %11779 = vst [vmem:[#allocation39_spill] sm:$0xff] %v10414_v16  ;;  %5230 = vmatprep.mubr.bf16.mxu1 %v3610_v6  ;;  %v3734_v6 = vrot.slane %v3732_v18, 4  ;;  %v2938_v16 = vsel %vm2851_vm3, %v2935_v41, %v2937_v21 }
 0x4a6   : > { %v3792_v51 = vshrl.u32 %v2938_v16, 16 }
 0x4a7   : > { %v7149_v4 = vpop.f32.mrb[40].mxu1 }
 0x4a8   : > { %v7150_v30 = vpop.f32.mrb[41].mxu1  ;;  %v3794_v18 = vrot.slane %v3792_v51, 3  ;;  %v11789_v51 = vld [vmem:[#allocation46_spill] sm:$0xff] }
 0x4a9   : > { %v10422_v8 = vadd.f32 %v7150_v30, %v7149_v4  ;;  %v7152_v63 = vpop.f32.mrb[42].mxu1  ;;  %v3735_v4 = vor.u32 %v3734_v6, %v3731_v50  ;;  %v3795_v30 = vshll.u32 %v2938_v16, 16  ;;  %v2659_v16 = vsel %vm2608_vm1, %v11672_v2, 0 }
 0x4aa   : > { %v7153_v29 = vpop.f32.mrb[43].mxu1 }
 0x4ab   : > { %11781 = vst [vmem:[#allocation40_spill] sm:$0xff] %v10422_v8  ;;  %v10424_v40 = vadd.f32 %v7153_v29, %v7152_v63  ;;  %v3736_v41 = vsel %vm2452_vm12, %v3672_v36, %v3735_v4 }
 0x4ac   : > { %5231 = vmatmul.mubr.bf16.gmra.mrb[148].mxu1 %v11783_v56  ;;  %v2939_v56 = vrot.slane %v2658_v11, 1 }
 0x4ad   : > { %11782 = vst [vmem:[#allocation87_spill] sm:$0xff] %v10424_v40  ;;  %5238 = vmatprep.mubr.bf16.mxu1 %v3673_v7  ;;  %v3797_v7 = vrot.slane %v3795_v30, 4 }
 0x4ae   : > { %v2940_v8 = vsel %vm2851_vm3, %v2937_v21, %v2939_v56 }
 0x4af   : > { %v7155_v53 = vpop.f32.mrb[44].mxu1  ;;  %v3855_v11 = vshrl.u32 %v2940_v8, 16 }
 0x4b0   : > { %v7156_v32 = vpop.f32.mrb[45].mxu1 }
 0x4b1   : > { %v10432_v63 = vadd.f32 %v7156_v32, %v7155_v53  ;;  %v7158_v29 = vpop.f32.mrb[46].mxu1  ;;  %v3798_v53 = vor.u32 %v3797_v7, %v3794_v18  ;;  %v3858_v32 = vshll.u32 %v2940_v8, 16  ;;  %v3857_v30 = vrot.slane %v3855_v11, 3  ;;  %v11791_v11 = vld [vmem:[#allocation48_spill] sm:$0xff] }
 0x4b2   : > { %v7159_v40 = vpop.f32.mrb[47].mxu1  ;;  %v2660_v8 = vsel %vm2609_vm4, %v11675_v42, 0 }
 0x4b3   : > { %11784 = vst [vmem:[#allocation42_spill] sm:$0xff] %v10432_v63  ;;  %v10434_v27 = vadd.f32 %v7159_v40, %v7158_v29  ;;  %v3799_v21 = vsel %vm2452_vm12, %v3735_v4, %v3798_v53 }
 0x4b4   : > { %5239 = vmatmul.mubr.bf16.gmra.mrb[152].mxu1 %v11786_v15  ;;  %v2941_v15 = vrot.slane %v2659_v16, 1 }
 0x4b5   : > { %11785 = vst [vmem:[#allocation88_spill] sm:$0xff] %v10434_v27  ;;  %5246 = vmatprep.mubr.bf16.mxu1 %v3736_v41  ;;  %v3860_v41 = vrot.slane %v3858_v32, 4 }
 0x4b6   : > { %v2942_v63 = vsel %vm2851_vm3, %v2939_v56, %v2941_v15 }
 0x4b7   : > { %v7161_v50 = vpop.f32.mrb[48].mxu1  ;;  %v3918_v16 = vshrl.u32 %v2942_v63, 16 }
 0x4b8   : > { %v7162_v6 = vpop.f32.mrb[49].mxu1 }
 0x4b9   : > { %v10442_v40 = vadd.f32 %v7162_v6, %v7161_v50  ;;  %v7164_v29 = vpop.f32.mrb[50].mxu1  ;;  %v3861_v50 = vor.u32 %v3860_v41, %v3857_v30  ;;  %v3921_v6 = vshll.u32 %v2942_v63, 16  ;;  %v3920_v32 = vrot.slane %v3918_v16, 3  ;;  %v11794_v16 = vld [vmem:[#allocation52_spill] sm:$0xff] }
 0x4ba   : > { %v7165_v27 = vpop.f32.mrb[51].mxu1  ;;  %v2661_v63 = vsel %vm2610_vm5, %v11679_v37, 0  ;;  %vm11801_vm5 = vcmp.ne.s16.totalorder %v9131_v55, 0 }
 0x4bb   : > { %11787 = vst [vmem:[#allocation44_spill] sm:$0xff] %v10442_v40  ;;  %v10444_v36 = vadd.f32 %v7165_v27, %v7164_v29  ;;  %v3862_v56 = vsel %vm2452_vm12, %v3798_v53, %v3861_v50 }
 0x4bc   : > { %5247 = vmatmul.mubr.bf16.gmra.mrb[156].mxu1 %v11789_v51  ;;  %v2943_v51 = vrot.slane %v2660_v8, 1 }
 0x4bd   : > { %11788 = vst [vmem:[#allocation89_spill] sm:$0xff] %v10444_v36  ;;  %5254 = vmatprep.mubr.bf16.mxu1 %v3799_v21  ;;  %v3923_v21 = vrot.slane %v3921_v6, 4 }
 0x4be   : > { %v2944_v40 = vsel %vm2851_vm3, %v2941_v15, %v2943_v51 }
 0x4bf   : > { %v7167_v18 = vpop.f32.mrb[52].mxu1  ;;  %v3981_v8 = vshrl.u32 %v2944_v40, 16 }
 0x4c0   : > { %v7168_v7 = vpop.f32.mrb[53].mxu1 }
 0x4c1   : > { %v10452_v27 = vadd.f32 %v7168_v7, %v7167_v18  ;;  %v7170_v29 = vpop.f32.mrb[54].mxu1  ;;  %v3924_v18 = vor.u32 %v3923_v21, %v3920_v32  ;;  %v3984_v7 = vshll.u32 %v2944_v40, 16  ;;  %v3983_v6 = vrot.slane %v3981_v8, 3  ;;  %v11795_v8 = vld [vmem:[#allocation56_spill] sm:$0xff] }
 0x4c2   : > { %v7171_v36 = vpop.f32.mrb[55].mxu1  ;;  %v2662_v40 = vsel %vm2611_vm0, %v11741_v39, 0  ;;  %vm11799_vm0 = vcmp.ne.s16.totalorder %v11751_v45, 0  ;;  %v2681_v45 = vsel %vm11801_vm5, %v11750_v47, 0 }
 0x4c3   : > { %v10454_v4 = vadd.f32 %v7171_v36, %v7170_v29  ;;  %v3925_v15 = vsel %vm2452_vm12, %v3861_v50, %v3924_v18 }
 0x4c4   : > { %5255 = vmatmul.mubr.bf16.gmra.mrb[160].mxu1 %v11791_v11  ;;  %v2945_v11 = vrot.slane %v2661_v63, 1 }
 0x4c5   : > { %11790 = vst [vmem:[#allocation46_spill] sm:$0xff] %v10454_v4  ;;  %5262 = vmatprep.mubr.bf16.mxu1 %v3862_v56  ;;  %v3986_v56 = vrot.slane %v3984_v7, 4 }
 0x4c6   : > { %v2946_v5 = vsel %vm2851_vm3, %v2943_v51, %v2945_v11 }
 0x4c7   : > { %v7173_v30 = vpop.f32.mrb[56].mxu1  ;;  %v4044_v63 = vshrl.u32 %v2946_v5, 16 }
 0x4c8   : > { %v7174_v41 = vpop.f32.mrb[57].mxu1 }
 0x4c9   : > { %v10462_v36 = vadd.f32 %v7174_v41, %v7173_v30  ;;  %v7176_v29 = vpop.f32.mrb[58].mxu1  ;;  %v3987_v30 = vor.u32 %v3986_v56, %v3983_v6  ;;  %v4047_v41 = vshll.u32 %v2946_v5, 16  ;;  %v4046_v7 = vrot.slane %v4044_v63, 3 }
 0x4ca   : > { %v7177_v4 = vpop.f32.mrb[59].mxu1  ;;  %v2663_v6 = vsel %vm2612_vm6, %v9712_v31, 0  ;;  %vm11800_vm6 = vcmp.ne.s16.totalorder %v11748_v12, 0 }
 0x4cb   : > { %11792 = vst [vmem:[#allocation48_spill] sm:$0xff] %v10462_v36  ;;  %v10464_v53 = vadd.f32 %v7177_v4, %v7176_v29  ;;  %v3988_v51 = vsel %vm2452_vm12, %v3924_v18, %v3987_v30  ;;  %v10479_v36 = vld [vmem:[#allocation11] ss:$0 sm:$0xff] }
 0x4cc   : > { %5263 = vmatmul.mubr.bf16.gmra.mrb[164].mxu1 %v11794_v16  ;;  %v2947_v16 = vrot.slane %v2662_v40, 1  ;;  %v4935_v44 = vadd.f32 %v10402_v3, %v10479_v36 }
 0x4cd   : > { %11793 = vst [vmem:[#allocation90_spill] sm:$0xff] %v10464_v53  ;;  %5270 = vmatprep.mubr.bf16.mxu1 %v3925_v15  ;;  %v4049_v15 = vrot.slane %v4047_v41, 4  ;;  %v2949_v41 = vrot.slane %v2663_v6, 1 }
 0x4ce   : > { %v2948_v14 = vsel %vm2851_vm3, %v2945_v11, %v2947_v16  ;;  %v4874_v11 = vadd.f32 %v10295_v54, %v10479_v36  ;;  %v4879_v54 = vadd.f32 %v10306_v62, %v10479_v36  ;;  %v2683_v62 = vsel %vm11799_vm0, %v11761_v26, 0 }
 0x4cf   : > { %v7179_v32 = vpop.f32.mrb[60].mxu1  ;;  %v4050_v40 = vor.u32 %v4049_v15, %v4046_v7 }
 0x4d0   : > { %v7180_v21 = vpop.f32.mrb[61].mxu1 }
 0x4d1   : > { %v10472_v4 = vadd.f32 %v7180_v21, %v7179_v32  ;;  %v7182_v29 = vpop.f32.mrb[62].mxu1  ;;  %v4110_v32 = vshll.u32 %v2948_v14, 16  ;;  %v4871_v21 = vadd.f32 %v10287_v61, %v10479_v36  ;;  %v4051_v31 = vsel %vm2452_vm12, %v3987_v30, %v4050_v40 }
 0x4d2   : > { %v7183_v53 = vpop.f32.mrb[63].mxu1  ;;  %v2950_v61 = vsel %vm2851_vm3, %v2947_v16, %v2949_v41  ;;  %v4882_v30 = vadd.f32 %v10310_v35, %v10479_v36  ;;  %v2682_v35 = vsel %vm11800_vm6, %v11755_v34, 0  ;;  %v11802_v34 = vld [vmem:[#allocation66_spill] sm:$0xff] }
 0x4d3   : > { %v10474_v50 = vadd.f32 %v7183_v53, %v7182_v29  ;;  %v4107_v53 = vshrl.u32 %v2948_v14, 16  ;;  %v4112_v15 = vrot.slane %v4110_v32, 4  ;;  %v11798_v32 = vld [vmem:[#allocation63_spill] sm:$0xff]  ;;  %v2985_v12 = vrot.slane %v2682_v35, 1 }
 0x4d4   : > { %5271 = vmatmul.mubr.bf16.gmra.mrb[168].mxu1 %v11795_v8 }
 0x4d5   : > { %5278 = vmatprep.mubr.bf16.mxu1 %v3988_v51  ;;  %v4109_v7 = vrot.slane %v4107_v53, 3 }
 0x4d7   : > { %v7201_v56 = vpop.f32.mrb[64].mxu1 }
 0x4d8   : > { %v7202_v5 = vpop.f32.mrb[65].mxu1 }
 0x4d9   : > { %v7203_v18 = vadd.f32 %v7202_v5, %v7201_v56  ;;  %v7204_v63 = vpop.f32.mrb[66].mxu1  ;;  %v4113_v5 = vor.u32 %v4112_v15, %v4109_v7  ;;  %v4251_v7 = vshrl.u32 %v2949_v41, 16 }
 0x4da   : > { %v7205_v29 = vpop.f32.mrb[67].mxu1 }
 0x4db   : > { %v10486_v8 = vadd.f32 %v7203_v18, %v4871_v21  ;;  %v7206_v51 = vadd.f32 %v7205_v29, %v7204_v63  ;;  %v4170_v21 = vshrl.u32 %v2950_v61, 16  ;;  %v4173_v18 = vshll.u32 %v2950_v61, 16 }
 0x4dc   : > { %5279 = vmatmul.mubr.bf16.gmra.mrb[172].mxu1 %v11797_v10  ;;  %v4114_v16 = vsel %vm2452_vm12, %v4050_v40, %v4113_v5  ;;  %v4887_v40 = vadd.f32 %v10326_v17, %v10479_v36 }
 0x4dd   : > { %11796 = vst [vmem:[#allocation52_spill] sm:$0xff] %v10486_v8  ;;  %v10492_v14 = vadd.f32 %v7206_v51, %v4874_v11  ;;  %5286 = vmatprep.mubr.bf16.mxu1 %v4051_v31  ;;  %v4172_v11 = vrot.slane %v4170_v21, 3  ;;  %v4175_v51 = vrot.slane %v4173_v18, 4 }
 0x4df   : > { %v7207_v56 = vpop.f32.mrb[68].mxu1 }
 0x4e0   : > { %v7208_v6 = vpop.f32.mrb[69].mxu1 }
 0x4e1   : > { %v7209_v63 = vadd.f32 %v7208_v6, %v7207_v56  ;;  %v7210_v29 = vpop.f32.mrb[70].mxu1  ;;  %v4176_v56 = vor.u32 %v4175_v51, %v4172_v11  ;;  %v4254_v6 = vshll.u32 %v2949_v41, 16  ;;  %v4890_v41 = vadd.f32 %v10330_v0, %v10479_v36 }
 0x4e2   : > { %v7211_v10 = vpop.f32.mrb[71].mxu1  ;;  %v2684_v11 = vsel %vm11757_vm7, %v9284_v52, 0  ;;  %v2984_v51 = vrot.slane %v2681_v45, 1 }
 0x4e3   : > { %v10497_v8 = vadd.f32 %v7209_v63, %v4879_v54  ;;  %v7212_v53 = vadd.f32 %v7211_v10, %v7210_v29  ;;  %v2987_v54 = vrot.slane %v2683_v62, 1  ;;  %v4253_v29 = vrot.slane %v4251_v7, 3 }
 0x4e4   : > { %5287 = vmatmul.mubr.bf16.gmra.mrb[176].mxu1 %v11798_v32  ;;  %v4177_v17 = vsel %vm2452_vm12, %v4113_v5, %v4176_v56  ;;  %v2685_v7 = vsel %vm11763_vm9, %v9309_v38, 0  ;;  %v2986_v62 = vsel %vm2851_vm3, %v2984_v51, %v2985_v12 }
 0x4e5   : > { %v10503_v31 = vadd.f32 %v7212_v53, %v4882_v30  ;;  %5294 = vmatprep.mubr.bf16.mxu1 %v4114_v16  ;;  %v4256_v30 = vrot.slane %v4254_v6, 4  ;;  %v11803_v53 = vld [vmem:[#allocation70_spill] sm:$0xff]  ;;  %v2988_v0 = vsel %vm2851_vm3, %v2985_v12, %v2987_v54  ;;  %v3308_v48 = vshll.u32 %v2986_v62, 16  ;;  %v11805_v12 = vld [vmem:[#allocation67_spill] sm:$0xff] }
 0x4e6   : > { %v4242_v32 = vshrl.u32 %v11803_v53, 16  ;;  %v4245_v47 = vshll.u32 %v11803_v53, 16  ;;  %v3313_v52 = vshrl.u32 %v2988_v0, 16 }
 0x4e7   : > { %v7213_v15 = vpop.f32.mrb[72].mxu1  ;;  %v4257_v6 = vor.u32 %v4256_v30, %v4253_v29  ;;  %v11806_v30 = vld [vmem:[#allocation69_spill] sm:$0xff] }
 0x4e8   : > { %v7214_v61 = vpop.f32.mrb[73].mxu1  ;;  %v4244_v35 = vrot.slane %v4242_v32, 3  ;;  %v4247_v45 = vrot.slane %v4245_v47, 4 }
 0x4e9   : > { %v7215_v21 = vadd.f32 %v7214_v61, %v7213_v15  ;;  %v7216_v18 = vpop.f32.mrb[74].mxu1  ;;  %v2989_v15 = vrot.slane %v2684_v11, 1  ;;  %v4258_v32 = vsel %vm2452_vm12, %v4176_v56, %v4257_v6  ;;  %v2686_v11 = vsel %vm11767_vm13, %v9333_v24, 0 }
 0x4ea   : > { %v7217_v63 = vpop.f32.mrb[75].mxu1  ;;  %v4248_v51 = vor.u32 %v4247_v45, %v4244_v35  ;;  %v2993_v6 = vrot.slane %v2686_v11, 1  ;;  %v11807_v45 = vld [vmem:[#allocation68_spill] sm:$0xff] }
 0x4eb   : > { %v10516_v26 = vadd.f32 %v7215_v21, %v4887_v40  ;;  %v7218_v10 = vadd.f32 %v7217_v63, %v7216_v18  ;;  %v3316_v40 = vshll.u32 %v2988_v0, 16  ;;  %v4895_v21 = vadd.f32 %v10343_v19, %v10479_v36 }
 0x4ec   : > { %5295 = vmatmul.mubr.bf16.gmra.mrb[180].mxu1 %v11802_v34  ;;  %v3305_v34 = vshrl.u32 %v2986_v62, 16  ;;  %v2990_v29 = vsel %vm2851_vm3, %v2987_v54, %v2989_v15  ;;  %v3315_v19 = vrot.slane %v3313_v52, 3  ;;  %v2687_v54 = vsel %vm2602_vm11, %v11659_v58, 0 }
 0x4ed   : > { %v10526_v55 = vadd.f32 %v7218_v10, %v4890_v41  ;;  %5302 = vmatprep.mubr.bf16.mxu1 %v4177_v17  ;;  %v2991_v41 = vrot.slane %v2685_v7, 1  ;;  %v4898_v17 = vadd.f32 %v11805_v12, %v10479_v36  ;;  %v3318_v16 = vrot.slane %v3316_v40, 4 }
 0x4ee   : > { %v3307_v7 = vrot.slane %v3305_v34, 3  ;;  %v3378_v62 = vshrl.u32 %v2990_v29, 16  ;;  %v3381_v56 = vshll.u32 %v2990_v29, 16  ;;  %v4249_v58 = vsel %vm2452_vm12, %v11807_v45, %v4248_v51  ;;  %v10579_v45 = vld [vmem:[#allocation13 + $0x8] ss:$16 sps:$4 sm:$0xff]  }
 0x4ef   : > { %v7219_v5 = vpop.f32.mrb[76].mxu1  ;;  %v2992_v0 = vsel %vm2851_vm3, %v2989_v15, %v2991_v41  ;;  %v3319_v40 = vor.u32 %v3318_v16, %v3315_v19  ;;  %v2995_v15 = vrot.slane %v2687_v54, 1  ;;  %v4906_v12 = vadd.f32 %v10361_v23, %v10479_v36 }
 0x4f0   : > { %v7220_v61 = vpop.f32.mrb[77].mxu1  ;;  %v3441_v25 = vshrl.u32 %v2992_v0, 16  ;;  %v3444_v24 = vshll.u32 %v2992_v0, 16  ;;  %v3383_v34 = vrot.slane %v3381_v56, 4 }
 0x4f1   : > { %v7221_v18 = vadd.f32 %v7220_v61, %v7219_v5  ;;  %v7222_v63 = vpop.f32.mrb[78].mxu1  ;;  %v3310_v5 = vrot.slane %v3308_v48, 4  ;;  %v2996_v16 = vsel %vm2851_vm3, %v2993_v6, %v2995_v15 }
 0x4f2   : > { %v7223_v10 = vpop.f32.mrb[79].mxu1  ;;  %v3443_v29 = vrot.slane %v3441_v25, 3  ;;  %v3570_v56 = vshll.u32 %v2996_v16, 16 }
 0x4f3   : > { %v10536_v38 = vadd.f32 %v7221_v18, %v4895_v21  ;;  %v7224_v53 = vadd.f32 %v7223_v10, %v7222_v63  ;;  %v4903_v21 = vadd.f32 %v10357_v20, %v10479_v36  ;;  %v3311_v22 = vor.u32 %v3310_v5, %v3307_v7 }
 0x4f4   : > { %5303 = vmatmul.mubr.bf16.gmra.mrb[184].mxu1 %v11806_v30  ;;  %v3380_v10 = vrot.slane %v3378_v62, 3  ;;  %v3446_v30 = vrot.slane %v3444_v24, 4  ;;  %v3567_v62 = vshrl.u32 %v2996_v16, 16 }
 0x4f5   : > { %v10546_v47 = vadd.f32 %v7224_v53, %v4898_v17  ;;  %5310 = vmatprep.mubr.bf16.mxu1 %v4258_v32  ;;  %v2994_v53 = vsel %vm2851_vm3, %v2991_v41, %v2993_v6  ;;  %v3320_v20 = vsel %vm2452_vm12, %v3311_v22, %v3319_v40  ;;  %v2688_v32 = vsel %vm2603_vm15, %v11662_v60, 0 }
 0x4f6   : > { %v3384_v11 = vor.u32 %v3383_v34, %v3380_v10  ;;  %v3504_v51 = vshrl.u32 %v2994_v53, 16  ;;  %v3507_v23 = vshll.u32 %v2994_v53, 16  ;;  %v2689_v41 = vsel %vm2604_vm2, %v11665_v59, 0  ;;  %v11808_v59 = vld [vmem:[#allocation54_spill] sm:$0xff] }
 0x4f7   : > { %v7225_v61 = vpop.f32.mrb[80].mxu1  ;;  %v2997_v54 = vrot.slane %v2688_v32, 1  ;;  %v3447_v5 = vor.u32 %v3446_v30, %v3443_v29  ;;  %v4911_v60 = vadd.f32 %v10371_v9, %v10479_v36  ;;  %v4914_v13 = vadd.f32 %v11808_v59, %v10479_v36 }
 0x4f8   : > { %v7226_v52 = vpop.f32.mrb[81].mxu1  ;;  %v3385_v25 = vsel %vm2452_vm12, %v3319_v40, %v3384_v11  ;;  %v3506_v24 = vrot.slane %v3504_v51, 3  ;;  %v3569_v22 = vrot.slane %v3567_v62, 3  ;;  %v3572_v10 = vrot.slane %v3570_v56, 4  ;;  %v11810_v56 = vld [vmem:[#allocation28_spill] sm:$0xff] }
 0x4f9   : > { %v7227_v35 = vadd.f32 %v7226_v52, %v7225_v61  ;;  %v7228_v18 = vpop.f32.mrb[82].mxu1  ;;  %v2999_v52 = vrot.slane %v2689_v41, 1  ;;  %v3448_v9 = vsel %vm2452_vm12, %v3384_v11, %v3447_v5  ;;  %v2690_v40 = vsel %vm2605_vm14, %v11669_v33, 0  ;;  %v11809_v11 = vld [vmem:[#allocation71_spill] sm:$0xff] }
 0x4fa   : > { %v7229_v63 = vpop.f32.mrb[83].mxu1  ;;  %v3001_v30 = vrot.slane %v2690_v40, 1  ;;  %v3573_v33 = vor.u32 %v3572_v10, %v3569_v22  ;;  %v4919_v51 = vadd.f32 %v11809_v11, %v10479_v36 }
 0x4fb   : > { %v10556_v48 = vadd.f32 %v7227_v35, %v4903_v21  ;;  %v7230_v17 = vadd.f32 %v7229_v63, %v7228_v18  ;;  %v3509_v21 = vrot.slane %v3507_v23, 4  ;;  %v2998_v63 = vsel %vm2851_vm3, %v2995_v15, %v2997_v54 }
 0x4fc   : > { %5311 = vmatmul.mubr.bf16.gmra.mrb[188].mxu1 %v4249_v58  ;;  %v10581_v58 = vld [vmem:[#allocation13 + $0xc] ss:$16 sps:$4 sm:$0xff]   ;;  %v3633_v53 = vshll.u32 %v2998_v63, 16 }
 0x4fd   : > { %v10565_v19 = vadd.f32 %v7230_v17, %v4906_v12  ;;  %7561 = vmatprep.mubr.bf16.mxu1 %v3320_v20  ;;  %v3000_v12 = vsel %vm2851_vm3, %v2997_v54, %v2999_v52  ;;  %6096 = vmatprep.subr.bf16.mxu0 %v10581_v58  ;;  %v3510_v15 = vor.u32 %v3509_v21, %v3506_v24  ;;  %v3630_v17 = vshrl.u32 %v2998_v63, 16 }
 0x4fe   : > { %v2691_v20 = vsel %vm2606_vm10, %v11672_v2, 0  ;;  %6097 = vmatpush1.bf16.msra.mxu0 %v10579_v45  ;;  %v3693_v32 = vshrl.u32 %v3000_v12, 16  ;;  %v3696_v16 = vshll.u32 %v3000_v12, 16  ;;  %v3635_v43 = vrot.slane %v3633_v53, 4 }
 0x4ff   : > { %v7231_v0 = vpop.f32.mrb[84].mxu1  ;;  %v3632_v62 = vrot.slane %v3630_v17, 3  ;;  %v2692_v21 = vsel %vm2607_vm8, %v11675_v42, 0  ;;  %v11811_v42 = vld [vmem:[#allocation37_spill] sm:$0xff] }
 0x500   : > { %v7232_v7 = vpop.f32.mrb[85].mxu1  ;;  %v3698_v24 = vrot.slane %v3696_v16, 4  ;;  %v3005_v22 = vrot.slane %v2692_v21, 1  ;;  %v4927_v46 = vadd.f32 %v11811_v42, %v10479_v36 }
 0x501   : > { %v7233_v49 = vadd.f32 %v7232_v7, %v7231_v0  ;;  %v7234_v61 = vpop.f32.mrb[86].mxu1  ;;  %v3003_v0 = vrot.slane %v2691_v20, 1  ;;  %v3511_v7 = vsel %vm2452_vm12, %v3447_v5, %v3510_v15 }
 0x502   : > { %v7235_v6 = vpop.f32.mrb[87].mxu1 }
 0x503   : > { %v10574_v35 = vadd.f32 %v7233_v49, %v4911_v60  ;;  %v7236_v18 = vadd.f32 %v7235_v6, %v7234_v61  ;;  %v4922_v60 = vadd.f32 %v11810_v56, %v10479_v36  ;;  %v3002_v61 = vsel %vm2851_vm3, %v2999_v52, %v3001_v30 }
 0x504   : > { %7562 = vmatmul.mubr.bf16.vlgmr.msra.gmra.mrb[192].mxu1 %v3385_v25  ;;  %v3574_v6 = vsel %vm2452_vm12, %v3510_v15, %v3573_v33  ;;  %v3695_v25 = vrot.slane %v3693_v32, 3  ;;  %v3004_v59 = vsel %vm2851_vm3, %v3001_v30, %v3003_v0  ;;  %v3759_v63 = vshll.u32 %v3002_v61, 16 }
 0x505   : > { %v10587_v34 = vadd.f32 %v7236_v18, %v4914_v13  ;;  %7565 = vmatprep.mubr.bf16.mxu1 %v3448_v9  ;;  %v3636_v13 = vor.u32 %v3635_v43, %v3632_v62  ;;  %v3756_v18 = vshrl.u32 %v3002_v61, 16  ;;  %v2693_v52 = vsel %vm2608_vm1, %v11679_v37, 0  ;;  %v11812_v37 = vld [vmem:[#allocation86_spill] sm:$0xff] }
 0x506   : > { %v3699_v40 = vor.u32 %v3698_v24, %v3695_v25  ;;  %v3819_v12 = vshrl.u32 %v3004_v59, 16  ;;  %v3822_v15 = vshll.u32 %v3004_v59, 16  ;;  %v3007_v20 = vrot.slane %v2693_v52, 1 }
 0x507   : > { %v7237_v29 = vpop.f32.mrb[88].mxu1  ;;  %v3637_v30 = vsel %vm2452_vm12, %v3573_v33, %v3636_v13  ;;  %v3761_v32 = vrot.slane %v3759_v63, 4  ;;  %v4930_v28 = vadd.f32 %v11812_v37, %v10479_v36  ;;  %v2694_v33 = vsel %vm2609_vm4, %v11741_v39, 0 }
 0x508   : > { %v7238_v57 = vpop.f32.mrb[89].mxu1  ;;  %v3824_v62 = vrot.slane %v3822_v15, 4  ;;  %v3008_v56 = vsel %vm2851_vm3, %v3005_v22, %v3007_v20 }
 0x509   : > { %v7239_v23 = vadd.f32 %v7238_v57, %v7237_v29  ;;  %v7240_v41 = vpop.f32.mrb[90].mxu1  ;;  %v3758_v57 = vrot.slane %v3756_v18, 3  ;;  %v3945_v21 = vshrl.u32 %v3008_v56, 16  ;;  %v3948_v59 = vshll.u32 %v3008_v56, 16 }
 0x50a   : > { %v7241_v54 = vpop.f32.mrb[91].mxu1 }
 0x50b   : > { %v10598_v2 = vadd.f32 %v7239_v23, %v4919_v51  ;;  %v7242_v49 = vadd.f32 %v7241_v54, %v7240_v41  ;;  %v3006_v51 = vsel %vm2851_vm3, %v3003_v0, %v3005_v22  ;;  %v10621_v23 = vld [vmem:[#allocation13 + $0x28] ss:$16 sps:$4 sm:$0xff]   ;;  %v10623_v41 = vld [vmem:[#allocation13 + $0x2c] ss:$16 sps:$4 sm:$0xff]   ;;  %v3700_v54 = vsel %vm2452_vm12, %v3636_v13, %v3699_v40 }
 0x50c   : > { %7566 = vmatmul.mubr.bf16.gmra.mrb[196].mxu1 %v3511_v7  ;;  %v3821_v7 = vrot.slane %v3819_v12, 3  ;;  %6098 = vmatprep.subr.bf16.mxu0 %v10623_v41  ;;  %v3762_v0 = vor.u32 %v3761_v32, %v3758_v57  ;;  %v3950_v3 = vrot.slane %v3948_v59, 4  ;;  %v7994_v59 = vld [vmem:[#allocation13] ss:$16 sps:$4 sm:$0xff]  }
 0x50d   : > { %v10607_v5 = vadd.f32 %v7242_v49, %v4922_v60  ;;  %7569 = vmatprep.mubr.bf16.mxu1 %v3574_v6  ;;  %v3882_v60 = vshrl.u32 %v3006_v51, 16  ;;  %v3885_v49 = vshll.u32 %v3006_v51, 16  ;;  %6099 = vmatpush1.bf16.msra.mxu0 %v10621_v23  ;;  %v3009_v6 = vrot.slane %v2694_v33, 1 }
 0x50e   : > { %v3825_v24 = vor.u32 %v3824_v62, %v3821_v7  ;;  %v3763_v63 = vsel %vm2452_vm12, %v3699_v40, %v3762_v0  ;;  %v4943_v7 = vadd.f32 %v10412_v1, %v10479_v36 }
 0x50f   : > { %v7243_v9 = vpop.f32.mrb[92].mxu1  ;;  %v3884_v52 = vrot.slane %v3882_v60, 3  ;;  %v3010_v42 = vsel %vm2851_vm3, %v3007_v20, %v3009_v6 }
 0x510   : > { %v7244_v10 = vpop.f32.mrb[93].mxu1  ;;  %v4008_v57 = vshrl.u32 %v3010_v42, 16  ;;  %v4011_v32 = vshll.u32 %v3010_v42, 16 }
 0x511   : > { %v7245_v17 = vadd.f32 %v7244_v10, %v7243_v9  ;;  %v7246_v53 = vpop.f32.mrb[94].mxu1  ;;  %v3887_v9 = vrot.slane %v3885_v49, 4  ;;  %v11813_v10 = vld [vmem:[#allocation38_spill] sm:$0xff] }
 0x512   : > { %v7247_v29 = vpop.f32.mrb[95].mxu1  ;;  %v4938_v12 = vadd.f32 %v11813_v10, %v10479_v36  ;;  %v4013_v60 = vrot.slane %v4011_v32, 4 }
 0x513   : > { %v10616_v16 = vadd.f32 %v7245_v17, %v4927_v46  ;;  %v7248_v11 = vadd.f32 %v7247_v29, %v7246_v53  ;;  %v3826_v46 = vsel %vm2452_vm12, %v3762_v0, %v3825_v24  ;;  %v3947_v17 = vrot.slane %v3945_v21, 3  ;;  %v11814_v29 = vld [vmem:[#allocation61_spill] sm:$0xff] }
 0x514   : > { %7570 = vmatmul.mubr.bf16.gmra.mrb[200].mxu1 %v3637_v30  ;;  %v11815_v40 = vrot.slane %v11814_v29, 1  ;;  %v4010_v0 = vrot.slane %v4008_v57, 3  ;;  %v11818_v29 = vld [vmem:[#allocation87_spill] sm:$0xff] }
 0x515   : > { %v10629_v43 = vadd.f32 %v7248_v11, %v4930_v28  ;;  %7573 = vmatprep.mubr.bf16.mxu1 %v3700_v54  ;;  %v3888_v28 = vor.u32 %v3887_v9, %v3884_v52  ;;  %v3951_v51 = vor.u32 %v3950_v3, %v3947_v17 }
 0x516   : > { %v3012_v30 = vsel %vm2851_vm3, %v3009_v6, %v11815_v40  ;;  %v4954_v40 = vadd.f32 %v11818_v29, %v10479_v36  ;;  %v11824_v29 = vld [vmem:[#allocation89_spill] sm:$0xff] }
 0x517   : > { %v7249_v61 = vpop.f32.mrb[96].mxu1  ;;  %v4071_v54 = vshrl.u32 %v3012_v30, 16  ;;  %v4074_v20 = vshll.u32 %v3012_v30, 16  ;;  %v3889_v21 = vsel %vm2452_vm12, %v3825_v24, %v3888_v28  ;;  %v3952_v1 = vsel %vm2452_vm12, %v3888_v28, %v3951_v51  ;;  %v8002_v28 = vld [vmem:[#allocation13 + $0x24] ss:$16 sps:$4 sm:$0xff]  }
 0x518   : > { %v7250_v25 = vpop.f32.mrb[97].mxu1  ;;  %v4014_v24 = vor.u32 %v4013_v60, %v4010_v0 }
 0x519   : > { %v7251_v39 = vadd.f32 %v7250_v25, %v7249_v61  ;;  %v7252_v13 = vpop.f32.mrb[98].mxu1  ;;  %v11816_v61 = vld [vmem:[#allocation39_spill] sm:$0xff] }
 0x51a   : > { %v7253_v18 = vpop.f32.mrb[99].mxu1  ;;  %v4946_v6 = vadd.f32 %v11816_v61, %v10479_v36  ;;  %v4015_v32 = vsel %vm2452_vm12, %v3951_v51, %v4014_v24  ;;  %v11820_v51 = vld [vmem:[#allocation88_spill] sm:$0xff] }
 0x51b   : > { %v10637_v22 = vadd.f32 %v7251_v39, %v4935_v44  ;;  %v7254_v15 = vadd.f32 %v7253_v18, %v7252_v13  ;;  %v7996_v44 = vld [vmem:[#allocation13 + $0x4] ss:$16 sps:$4 sm:$0xff]   ;;  %v10655_v39 = vld [vmem:[#allocation13 + $0x48] ss:$16 sps:$4 sm:$0xff]   ;;  %v4073_v13 = vrot.slane %v4071_v54, 3  ;;  %v4076_v18 = vrot.slane %v4074_v20, 4 }
 0x51c   : > { %7574 = vmatmul.mubr.bf16.gmra.mrb[204].mxu1 %v3763_v63  ;;  %v10658_v63 = vld [vmem:[#allocation13 + $0x4c] ss:$16 sps:$4 sm:$0xff]   ;;  %5903 = vmatprep.subr.bf16.mxu1 %v7996_v44  ;;  %v4962_v61 = vadd.f32 %v11820_v51, %v10479_v36  ;;  %v8003_v44 = vld [vmem:[#allocation13 + $0x40] ss:$16 sps:$4 sm:$0xff]  }
 0x51d   : > { %v10643_v53 = vadd.f32 %v7254_v15, %v4938_v12  ;;  %7577 = vmatprep.mubr.bf16.mxu1 %v3826_v46  ;;  %6100 = vmatprep.subr.bf16.mxu0 %v10658_v63  ;;  %v4077_v12 = vor.u32 %v4076_v18, %v4073_v13  ;;  %v11817_v15 = vld [vmem:[#allocation40_spill] sm:$0xff]  ;;  %v10684_v18 = vld [vmem:[#allocation13 + $0x6c] ss:$16 sps:$4 sm:$0xff]  }
 0x51e   : > { %5904 = vmatpush1.bf16.msra.mxu1 %v7994_v59  ;;  %6101 = vmatpush1.bf16.msra.mxu0 %v10655_v39  ;;  %v4951_v42 = vadd.f32 %v11817_v15, %v10479_v36  ;;  %v10682_v13 = vld [vmem:[#allocation13 + $0x68] ss:$16 sps:$4 sm:$0xff]  }
 0x51f   : > { %v7255_v37 = vpop.f32.mrb[100].mxu1  ;;  %5905 = vmatprep.subr.bf16.mxu1 %v8002_v28  ;;  %6102 = vmatprep.subr.bf16.mxu0 %v10684_v18  ;;  %v8011_v28 = vld [vmem:[#allocation13 + $0x64] ss:$16 sps:$4 sm:$0xff]  }
 0x520   : > { %v7256_v11 = vpop.f32.mrb[101].mxu1 }
 0x521   : > { %v7257_v62 = vadd.f32 %v7256_v11, %v7255_v37  ;;  %v7258_v33 = vpop.f32.mrb[102].mxu1  ;;  %v8000_v37 = vld [vmem:[#allocation13 + $0x20] ss:$16 sps:$4 sm:$0xff]   ;;  %v4078_v11 = vsel %vm2452_vm12, %v4014_v24, %v4077_v12 }
 0x522   : > { %v7259_v56 = vpop.f32.mrb[103].mxu1  ;;  %5906 = vmatpush1.bf16.msra.mxu1 %v8000_v37  ;;  %v11822_v24 = vld [vmem:[#allocation75_spill] sm:$0xff]  ;;  %6103 = vmatpush1.bf16.msra.mxu0 %v10682_v13 }
 0x523   : > { %v10650_v49 = vadd.f32 %v7257_v62, %v4943_v7  ;;  %v7260_v25 = vadd.f32 %v7259_v56, %v7258_v33  ;;  %v11819_v62 = vld [vmem:[#allocation42_spill] sm:$0xff]  ;;  %v8009_v37 = vld [vmem:[#allocation13 + $0x60] ss:$16 sps:$4 sm:$0xff]  }
 0x524   : > { %7578 = vmatmul.mubr.bf16.gmra.mrb[208].mxu1 %v3889_v21  ;;  %v4959_v33 = vadd.f32 %v11819_v62, %v10479_v36  ;;  %v11821_v21 = vld [vmem:[#allocation73_spill] sm:$0xff] }
 0x525   : > { %v10660_v52 = vadd.f32 %v7260_v25, %v4946_v6  ;;  %7581 = vmatprep.mubr.bf16.mxu1 %v3952_v1  ;;  %v4141_v59 = vsel %vm2452_vm12, %v4077_v12, %v11821_v21  ;;  %v8005_v1 = vld [vmem:[#allocation13 + $0x44] ss:$16 sps:$4 sm:$0xff]  }
 0x526   : > { %5907 = vmatprep.subr.bf16.mxu1 %v8005_v1  ;;  %v11823_v12 = vld [vmem:[#allocation44_spill] sm:$0xff] }
 0x527   : > { %v7261_v9 = vpop.f32.mrb[104].mxu1  ;;  %5908 = vmatpush1.bf16.msra.mxu1 %v8003_v44  ;;  %v8012_v44 = vld [vmem:[#allocation13 + $0x80] ss:$16 sps:$4 sm:$0xff]   ;;  %v8014_v1 = vld [vmem:[#allocation13 + $0x84] ss:$16 sps:$4 sm:$0xff]  }
 0x528   : > { %v7262_v10 = vpop.f32.mrb[105].mxu1  ;;  %5909 = vmatprep.subr.bf16.mxu1 %v8011_v28 }
 0x529   : > { %v7263_v46 = vadd.f32 %v7262_v10, %v7261_v9  ;;  %v7264_v17 = vpop.f32.mrb[106].mxu1 }
 0x52a   : > { %v7265_v3 = vpop.f32.mrb[107].mxu1 }
 0x52b   : > { %v10668_v30 = vadd.f32 %v7263_v46, %v4951_v42  ;;  %v7266_v57 = vadd.f32 %v7265_v3, %v7264_v17  ;;  %v4967_v42 = vadd.f32 %v11823_v12, %v10479_v36  ;;  %5910 = vmatpush1.bf16.msra.mxu1 %v8009_v37 }
 0x52c   : > { %7582 = vmatmul.mubr.bf16.gmra.mrb[212].mxu1 %v4015_v32  ;;  %5911 = vmatprep.subr.bf16.mxu1 %v8014_v1 }
 0x52d   : > { %v10672_v54 = vadd.f32 %v7266_v57, %v4954_v40  ;;  %7585 = vmatprep.mubr.bf16.mxu1 %v4078_v11  ;;  %v4970_v40 = vadd.f32 %v11824_v29, %v10479_v36  ;;  %v11825_v11 = vld [vmem:[#allocation76_spill] sm:$0xff] }
 0x52f   : > { %v7267_v20 = vpop.f32.mrb[108].mxu1  ;;  %5912 = vmatpush1.bf16.msra.mxu1 %v8012_v44 }
 0x530   : > { %v7268_v7 = vpop.f32.mrb[109].mxu1 }
 0x531   : > { %v7269_v56 = vadd.f32 %v7268_v7, %v7267_v20  ;;  %v7270_v0 = vpop.f32.mrb[110].mxu1  ;;  %v11826_v7 = vmov 0  }
 0x532   : > { %v7271_v60 = vpop.f32.mrb[111].mxu1 }
 0x533   : > { %v10678_v6 = vadd.f32 %v7269_v56, %v4959_v33  ;;  %v7272_v25 = vadd.f32 %v7271_v60, %v7270_v0  ;;  %v4975_v56 = vadd.f32 %v10452_v27, %v10479_v36 }
 0x534   : > { %7586 = vmatmul.mubr.bf16.gmra.mrb[216].mxu1 %v4141_v59 }
 0x535   : > { %v10686_v9 = vadd.f32 %v7272_v25, %v4962_v61  ;;  %7589 = vmatprep.mubr.bf16.mxu1 %v11822_v24  ;;  %v11827_v61 = vld [vmem:[#allocation46_spill] sm:$0xff] }
 0x536   : > { %v4978_v25 = vadd.f32 %v11827_v61, %v10479_v36  ;;  %v10707_v24 = vld [vmem:[#allocation13 + $0x88] ss:$16 sps:$4 sm:$0xff]  }
 0x537   : > { %v7273_v10 = vpop.f32.mrb[112].mxu1 }
 0x538   : > { %v7274_v15 = vpop.f32.mrb[113].mxu1 }
 0x539   : > { %v7275_v46 = vadd.f32 %v7274_v15, %v7273_v10  ;;  %v7276_v17 = vpop.f32.mrb[114].mxu1  ;;  %v10709_v10 = vld [vmem:[#allocation13 + $0x8c] ss:$16 sps:$4 sm:$0xff]  }
 0x53a   : > { %v7277_v3 = vpop.f32.mrb[115].mxu1  ;;  %6104 = vmatprep.subr.bf16.mxu0 %v10709_v10 }
 0x53b   : > { %v10695_v57 = vadd.f32 %v7275_v46, %v4967_v42  ;;  %v7278_v32 = vadd.f32 %v7277_v3, %v7276_v17  ;;  %6105 = vmatpush1.bf16.msra.mxu0 %v10707_v24  ;;  %v11828_v42 = vld [vmem:[#allocation48_spill] sm:$0xff] }
 0x53c   : > { %7590 = vmatmul.mubr.bf16.gmra.mrb[220].mxu1 %v11825_v11  ;;  %v4983_v46 = vadd.f32 %v11828_v42, %v10479_v36  ;;  %v8018_v11 = vld [vmem:[#allocation13 + $0xa0] ss:$16 sps:$4 sm:$0xff]   ;;  %v10729_v42 = vld [vmem:[#allocation13 + $0xa8] ss:$16 sps:$4 sm:$0xff]  }
 0x53d   : > { %v10698_v20 = vadd.f32 %v7278_v32, %v4970_v40  ;;  %5935 = vmatprep.mubr.bf16.mxu1 %v11826_v7  ;;  %v11829_v40 = vld [vmem:[#allocation90_spill] sm:$0xff] }
 0x53e   : > { %v4986_v32 = vadd.f32 %v11829_v40, %v10479_v36  ;;  %v11830_v40 = vld [vmem:[#allocation52_spill] sm:$0xff] }
 0x53f   : > { %v7279_v62 = vpop.f32.mrb[116].mxu1 }
 0x540   : > { %v7280_v33 = vpop.f32.mrb[117].mxu1 }
 0x541   : > { %v7281_v0 = vadd.f32 %v7280_v33, %v7279_v62  ;;  %v7282_v60 = vpop.f32.mrb[118].mxu1  ;;  %v8020_v62 = vld [vmem:[#allocation13 + $0xa4] ss:$16 sps:$4 sm:$0xff]  }
 0x542   : > { %v7283_v51 = vpop.f32.mrb[119].mxu1  ;;  %5913 = vmatprep.subr.bf16.mxu1 %v8020_v62  ;;  %v11831_v62 = vld [vmem:[#allocation41_spill] sm:$0xff] }
 0x543   : > { %v10705_v21 = vadd.f32 %v7281_v0, %v4975_v56  ;;  %v7284_v59 = vadd.f32 %v7283_v51, %v7282_v60  ;;  %5914 = vmatpush1.bf16.msra.mxu1 %v8018_v11  ;;  %v4991_v60 = vadd.f32 %v10472_v4, %v10479_v36 }
 0x545   : > { %v10711_v15 = vadd.f32 %v7284_v59, %v4978_v25  ;;  %v4994_v59 = vadd.f32 %v10474_v50, %v10479_v36 }
 0x547   : > { %v7285_v27 = vpop.f32.mrb[120].mxu1 }
 0x548   : > { %v7286_v12 = vpop.f32.mrb[121].mxu1 }
 0x549   : > { %v7287_v17 = vadd.f32 %v7286_v12, %v7285_v27  ;;  %v7288_v3 = vpop.f32.mrb[122].mxu1  ;;  %v8021_v27 = vld [vmem:[#allocation13 + $0xc0] ss:$16 sps:$4 sm:$0xff]   ;;  %v8023_v12 = vld [vmem:[#allocation13 + $0xc4] ss:$16 sps:$4 sm:$0xff]  }
 0x54a   : > { %v7289_v29 = vpop.f32.mrb[123].mxu1  ;;  %5915 = vmatprep.subr.bf16.mxu1 %v8023_v12  ;;  %v10749_v12 = vld [vmem:[#allocation13 + $0xec] ss:$16 sps:$4 sm:$0xff]  }
 0x54b   : > { %v10719_v37 = vadd.f32 %v7287_v17, %v4983_v46  ;;  %v7290_v28 = vadd.f32 %v7289_v29, %v7288_v3  ;;  %v10731_v46 = vld [vmem:[#allocation13 + $0xac] ss:$16 sps:$4 sm:$0xff]   ;;  %5916 = vmatpush1.bf16.msra.mxu1 %v8021_v27  ;;  %11833 = vst [vmem:[#allocation56_spill] sm:$0xff] %v10749_v12 }
 0x54c   : > { %6106 = vmatprep.subr.bf16.mxu0 %v10731_v46 }
 0x54d   : > { %v10721_v33 = vadd.f32 %v7290_v28, %v4986_v32  ;;  %6107 = vmatpush1.bf16.msra.mxu0 %v10729_v42 }
 0x54f   : > { %v7291_v56 = vpop.f32.mrb[124].mxu1 }
 0x550   : > { %v7292_v0 = vpop.f32.mrb[125].mxu1 }
 0x551   : > { %v7293_v51 = vadd.f32 %v7292_v0, %v7291_v56  ;;  %v7294_v61 = vpop.f32.mrb[126].mxu1  ;;  %v8027_v0 = vld [vmem:[#allocation13 + $0xe0] ss:$16 sps:$4 sm:$0xff]  }
 0x552   : > { %v7295_v25 = vpop.f32.mrb[127].mxu1 }
 0x553   : > { %v10727_v44 = vadd.f32 %v7293_v51, %v4991_v60  ;;  %v7296_v1 = vadd.f32 %v7295_v25, %v7294_v61  ;;  %v8029_v60 = vld [vmem:[#allocation13 + $0xe4] ss:$16 sps:$4 sm:$0xff]   ;;  %v10742_v51 = vld [vmem:[#allocation13 + $0xc8] ss:$16 sps:$4 sm:$0xff]   ;;  %v10744_v25 = vld [vmem:[#allocation13 + $0xcc] ss:$16 sps:$4 sm:$0xff]  }
 0x554   : > { %5917 = vmatprep.subr.bf16.mxu1 %v8029_v60  ;;  %6108 = vmatprep.subr.bf16.mxu0 %v10744_v25 }
 0x555   : > { %v10733_v17 = vadd.f32 %v7296_v1, %v4994_v59  ;;  %v11832_v59 = vld [vmem:[#allocation50_spill] sm:$0xff]  ;;  %5918 = vmatpush1.bf16.msra.mxu1 %v8027_v0  ;;  %6109 = vmatpush1.bf16.msra.mxu0 %v10742_v51 }
 0x556   : > { %7593 = vmatprep.subr.bf16.mxu1 %v10581_v58  ;;  %6110 = vmatprep.subr.bf16.mxu0 %v10749_v12 }
 0x557   : > { %v7313_v4 = vpop.f32.mrb[128].mxu1 }
 0x558   : > { %v7314_v3 = vpop.f32.mrb[129].mxu1 }
 0x559   : > { %v7315_v36 = vadd.f32 %v7314_v3, %v7313_v4  ;;  %v7316_v50 = vpop.f32.mrb[130].mxu1 }
 0x55a   : > { %v7317_v29 = vpop.f32.mrb[131].mxu1 }
 0x55b   : > { %v5193_v32 = vadd.f32 %v7315_v36, %v11830_v40  ;;  %v7318_v28 = vadd.f32 %v7317_v29, %v7316_v50  ;;  %v10753_v36 = vld [vmem:[#allocation13 + $0xe8] ss:$16 sps:$4 sm:$0xff]  }
 0x55c   : > { %11834 = vst [vmem:[#allocation58_spill] sm:$0xff] %v10753_v36  ;;  %6111 = vmatpush1.bf16.msra.mxu0 %v10753_v36 }
 0x55d   : > { %v5196_v11 = vadd.f32 %v7318_v28, %v10492_v14  ;;  %v10740_v56 = vadd.f32 %v11831_v62, %v5193_v32  ;;  %v11835_v32 = vld [vmem:[#allocation51_spill] sm:$0xff] }
 0x55e   : > { %v11836_v62 = vld [vmem:[#allocation47_spill] sm:$0xff] }
 0x55f   : > { %v7319_v61 = vpop.f32.mrb[132].mxu1  ;;  %v10747_v1 = vadd.f32 %v11832_v59, %v5196_v11 }
 0x560   : > { %v7320_v27 = vpop.f32.mrb[133].mxu1 }
 0x561   : > { %v7321_v4 = vadd.f32 %v7320_v27, %v7319_v61  ;;  %v7322_v3 = vpop.f32.mrb[134].mxu1 }
 0x562   : > { %v7323_v14 = vpop.f32.mrb[135].mxu1 }
 0x563   : > { %v5201_v50 = vadd.f32 %v7321_v4, %v10497_v8  ;;  %v7324_v29 = vadd.f32 %v7323_v14, %v7322_v3  ;;  %v11837_v3 = vld [vmem:[#allocation55_spill] sm:$0xff] }
 0x565   : > { %v5204_v40 = vadd.f32 %v7324_v29, %v10503_v31  ;;  %v10760_v28 = vadd.f32 %v11835_v32, %v5201_v50  ;;  %v11838_v50 = vld [vmem:[#allocation49_spill] sm:$0xff] }
 0x567   : > { %v7325_v11 = vpop.f32.mrb[136].mxu1  ;;  %v10764_v0 = vadd.f32 %v11836_v62, %v5204_v40 }
 0x568   : > { %v7326_v60 = vpop.f32.mrb[137].mxu1 }
 0x569   : > { %v7327_v61 = vadd.f32 %v7326_v60, %v7325_v11  ;;  %v7328_v59 = vpop.f32.mrb[138].mxu1 }
 0x56a   : > { %v7329_v58 = vpop.f32.mrb[139].mxu1 }
 0x56b   : > { %v5209_v8 = vadd.f32 %v7327_v61, %v10516_v26  ;;  %v7330_v27 = vadd.f32 %v7329_v58, %v7328_v59  ;;  %v11839_v26 = vld [vmem:[#allocation53_spill] sm:$0xff] }
 0x56c   : > { %v11840_v59 = vld [vmem:[#allocation57_spill] sm:$0xff] }
 0x56d   : > { %v5212_v4 = vadd.f32 %v7330_v27, %v10526_v55  ;;  %v10769_v31 = vadd.f32 %v11837_v3, %v5209_v8 }
 0x56f   : > { %v7331_v14 = vpop.f32.mrb[140].mxu1  ;;  %v10772_v29 = vadd.f32 %v11838_v50, %v5212_v4 }
 0x570   : > { %v7332_v32 = vpop.f32.mrb[141].mxu1 }
 0x571   : > { %v7333_v36 = vadd.f32 %v7332_v32, %v7331_v14  ;;  %v7334_v40 = vpop.f32.mrb[142].mxu1 }
 0x572   : > { %v7335_v62 = vpop.f32.mrb[143].mxu1 }
 0x573   : > { %v5217_v11 = vadd.f32 %v7333_v36, %v10536_v38  ;;  %v7336_v60 = vadd.f32 %v7335_v62, %v7334_v40  ;;  %v11841_v38 = vld [vmem:[#allocation32_spill] sm:$0xff]  ;;  %v11842_v40 = vld [vmem:[#allocation34_spill] sm:$0xff] }
 0x575   : > { %v5220_v12 = vadd.f32 %v7336_v60, %v10546_v47  ;;  %v10777_v61 = vadd.f32 %v11839_v26, %v5217_v11 }
 0x577   : > { %v7337_v55 = vpop.f32.mrb[144].mxu1  ;;  %v10780_v58 = vadd.f32 %v11840_v59, %v5220_v12 }
 0x578   : > { %v7338_v8 = vpop.f32.mrb[145].mxu1 }
 0x579   : > { %v7339_v27 = vadd.f32 %v7338_v8, %v7337_v55  ;;  %v7340_v4 = vpop.f32.mrb[146].mxu1 }
 0x57a   : > { %v7341_v3 = vpop.f32.mrb[147].mxu1 }
 0x57b   : > { %v5225_v14 = vadd.f32 %v7339_v27, %v10556_v48  ;;  %v7342_v50 = vadd.f32 %v7341_v3, %v7340_v4  ;;  %v11843_v48 = vld [vmem:[#allocation36_spill] sm:$0xff] }
 0x57c   : > { %v11844_v4 = vld [vmem:[#allocation64_spill] sm:$0xff] }
 0x57d   : > { %v5228_v32 = vadd.f32 %v7342_v50, %v10565_v19  ;;  %v10785_v36 = vadd.f32 %v11841_v38, %v5225_v14 }
 0x57f   : > { %v7343_v47 = vpop.f32.mrb[148].mxu1  ;;  %v10788_v62 = vadd.f32 %v11842_v40, %v5228_v32 }
 0x580   : > { %v7344_v11 = vpop.f32.mrb[149].mxu1 }
 0x581   : > { %v7345_v60 = vadd.f32 %v7344_v11, %v7343_v47  ;;  %v7346_v12 = vpop.f32.mrb[150].mxu1 }
 0x582   : > { %v7347_v26 = vpop.f32.mrb[151].mxu1 }
 0x583   : > { %v5233_v55 = vadd.f32 %v7345_v60, %v10574_v35  ;;  %v7348_v59 = vadd.f32 %v7347_v26, %v7346_v12  ;;  %v11845_v35 = vld [vmem:[#allocation62_spill] sm:$0xff]  ;;  %v11846_v12 = vld [vmem:[#allocation60_spill] sm:$0xff] }
 0x585   : > { %v5236_v8 = vadd.f32 %v7348_v59, %v10587_v34  ;;  %v10793_v27 = vadd.f32 %v11843_v48, %v5233_v55 }
 0x587   : > { %v7349_v19 = vpop.f32.mrb[152].mxu1  ;;  %v10796_v3 = vadd.f32 %v11844_v4, %v5236_v8 }
 0x588   : > { %v7350_v14 = vpop.f32.mrb[153].mxu1 }
 0x589   : > { %v7351_v50 = vadd.f32 %v7350_v14, %v7349_v19  ;;  %v7352_v32 = vpop.f32.mrb[154].mxu1 }
 0x58a   : > { %v7353_v38 = vpop.f32.mrb[155].mxu1 }
 0x58b   : > { %v5241_v47 = vadd.f32 %v7351_v50, %v10598_v2  ;;  %v7354_v40 = vadd.f32 %v7353_v38, %v7352_v32  ;;  %v11847_v2 = vld [vmem:[#allocation72_spill] sm:$0xff]  ;;  %v11848_v32 = vld [vmem:[#allocation74_spill] sm:$0xff] }
 0x58d   : > { %v5244_v11 = vadd.f32 %v7354_v40, %v10607_v5  ;;  %v10801_v60 = vadd.f32 %v11845_v35, %v5241_v47 }
 0x58f   : > { %v7355_v34 = vpop.f32.mrb[156].mxu1  ;;  %v10804_v26 = vadd.f32 %v11846_v12, %v5244_v11 }
 0x590   : > { %v7356_v55 = vpop.f32.mrb[157].mxu1 }
 0x591   : > { %v7357_v59 = vadd.f32 %v7356_v55, %v7355_v34  ;;  %v7358_v8 = vpop.f32.mrb[158].mxu1 }
 0x592   : > { %v7359_v48 = vpop.f32.mrb[159].mxu1 }
 0x593   : > { %v5249_v19 = vadd.f32 %v7357_v59, %v10616_v16  ;;  %v7360_v4 = vadd.f32 %v7359_v48, %v7358_v8  ;;  %v11849_v16 = vld [vmem:[#allocation77_spill] sm:$0xff]  ;;  %v11850_v8 = vld [vmem:[#allocation78_spill] sm:$0xff] }
 0x595   : > { %v5252_v14 = vadd.f32 %v7360_v4, %v10629_v43  ;;  %v10809_v50 = vadd.f32 %v11847_v2, %v5249_v19 }
 0x597   : > { %v7361_v5 = vpop.f32.mrb[160].mxu1  ;;  %v10812_v38 = vadd.f32 %v11848_v32, %v5252_v14 }
 0x598   : > { %v7362_v47 = vpop.f32.mrb[161].mxu1 }
 0x599   : > { %v7363_v40 = vadd.f32 %v7362_v47, %v7361_v5  ;;  %v7364_v11 = vpop.f32.mrb[162].mxu1 }
 0x59a   : > { %v7365_v35 = vpop.f32.mrb[163].mxu1 }
 0x59b   : > { %v5257_v34 = vadd.f32 %v7363_v40, %v10637_v22  ;;  %v7366_v12 = vadd.f32 %v7365_v35, %v7364_v11  ;;  %v11851_v22 = vld [vmem:[#allocation79_spill] sm:$0xff]  ;;  %v11852_v11 = vld [vmem:[#allocation80_spill] sm:$0xff] }
 0x59d   : > { %v5260_v55 = vadd.f32 %v7366_v12, %v10643_v53  ;;  %v10817_v59 = vadd.f32 %v11849_v16, %v5257_v34 }
 0x59f   : > { %v7367_v43 = vpop.f32.mrb[164].mxu1  ;;  %v10820_v48 = vadd.f32 %v11850_v8, %v5260_v55 }
 0x5a0   : > { %v7368_v19 = vpop.f32.mrb[165].mxu1 }
 0x5a1   : > { %v7369_v4 = vadd.f32 %v7368_v19, %v7367_v43  ;;  %v7370_v14 = vpop.f32.mrb[166].mxu1 }
 0x5a2   : > { %v7371_v2 = vpop.f32.mrb[167].mxu1 }
 0x5a3   : > { %v5265_v5 = vadd.f32 %v7369_v4, %v10650_v49  ;;  %v7372_v32 = vadd.f32 %v7371_v2, %v7370_v14  ;;  %v11853_v49 = vld [vmem:[#allocation81_spill] sm:$0xff]  ;;  %v11854_v14 = vld [vmem:[#allocation82_spill] sm:$0xff] }
 0x5a5   : > { %v5268_v47 = vadd.f32 %v7372_v32, %v10660_v52  ;;  %v10825_v40 = vadd.f32 %v11851_v22, %v5265_v5 }
 0x5a7   : > { %v7373_v53 = vpop.f32.mrb[168].mxu1  ;;  %v10828_v35 = vadd.f32 %v11852_v11, %v5268_v47 }
 0x5a8   : > { %v7374_v34 = vpop.f32.mrb[169].mxu1 }
 0x5a9   : > { %v7375_v12 = vadd.f32 %v7374_v34, %v7373_v53  ;;  %v7376_v55 = vpop.f32.mrb[170].mxu1 }
 0x5aa   : > { %v7377_v16 = vpop.f32.mrb[171].mxu1 }
 0x5ab   : > { %v5273_v43 = vadd.f32 %v7375_v12, %v10668_v30  ;;  %v7378_v8 = vadd.f32 %v7377_v16, %v7376_v55  ;;  %v11855_v30 = vld [vmem:[#allocation83_spill] sm:$0xff]  ;;  %v11856_v55 = vld [vmem:[#allocation84_spill] sm:$0xff] }
 0x5ad   : > { %v5276_v19 = vadd.f32 %v7378_v8, %v10672_v54  ;;  %v10833_v4 = vadd.f32 %v11853_v49, %v5273_v43 }
 0x5af   : > { %v7379_v52 = vpop.f32.mrb[172].mxu1  ;;  %v10836_v2 = vadd.f32 %v11854_v14, %v5276_v19 }
 0x5b0   : > { %v7380_v5 = vpop.f32.mrb[173].mxu1 }
 0x5b1   : > { %v7381_v32 = vadd.f32 %v7380_v5, %v7379_v52  ;;  %v7382_v47 = vpop.f32.mrb[174].mxu1 }
 0x5b2   : > { %v7383_v22 = vpop.f32.mrb[175].mxu1 }
 0x5b3   : > { %v5281_v53 = vadd.f32 %v7381_v32, %v10678_v6  ;;  %v7384_v11 = vadd.f32 %v7383_v22, %v7382_v47  ;;  %v11857_v6 = vld [vmem:[#allocation59_spill] sm:$0xff]  ;;  %v11858_v47 = vld [vmem:[#allocation85_spill] sm:$0xff] }
 0x5b5   : > { %v5284_v34 = vadd.f32 %v7384_v11, %v10686_v9  ;;  %v10841_v12 = vadd.f32 %v11855_v30, %v5281_v53 }
 0x5b7   : > { %v7385_v54 = vpop.f32.mrb[176].mxu1  ;;  %v10844_v16 = vadd.f32 %v11856_v55, %v5284_v34 }
 0x5b8   : > { %v7386_v43 = vpop.f32.mrb[177].mxu1 }
 0x5b9   : > { %v7387_v8 = vadd.f32 %v7386_v43, %v7385_v54  ;;  %v7388_v19 = vpop.f32.mrb[178].mxu1 }
 0x5ba   : > { %v7389_v49 = vpop.f32.mrb[179].mxu1 }
 0x5bb   : > { %v5289_v52 = vadd.f32 %v7387_v8, %v10695_v57  ;;  %v7390_v14 = vadd.f32 %v7389_v49, %v7388_v19  ;;  %v11859_v57 = vld [vmem:[#allocation30_spill] sm:$0xff]  ;;  %v11860_v19 = vld [vmem:[#allocation65_spill] sm:$0xff] }
 0x5bd   : > { %v5292_v5 = vadd.f32 %v7390_v14, %v10698_v20  ;;  %v10849_v32 = vadd.f32 %v11857_v6, %v5289_v52 }
 0x5bf   : > { %v7391_v9 = vpop.f32.mrb[180].mxu1  ;;  %v10852_v22 = vadd.f32 %v11858_v47, %v5292_v5 }
 0x5c0   : > { %v7392_v53 = vpop.f32.mrb[181].mxu1 }
 0x5c1   : > { %v7393_v11 = vadd.f32 %v7392_v53, %v7391_v9  ;;  %v7394_v34 = vpop.f32.mrb[182].mxu1 }
 0x5c2   : > { %v7395_v30 = vpop.f32.mrb[183].mxu1 }
 0x5c3   : > { %v5297_v54 = vadd.f32 %v7393_v11, %v10705_v21  ;;  %v7396_v55 = vadd.f32 %v7395_v30, %v7394_v34  ;;  %v11861_v21 = vld [vmem:[#allocation31_spill] sm:$0xff]  ;;  %v11862_v34 = vld [vmem:[#allocation33_spill] sm:$0xff] }
 0x5c5   : > { %v5300_v43 = vadd.f32 %v7396_v55, %v10711_v15  ;;  %v10857_v8 = vadd.f32 %v11859_v57, %v5297_v54 }
 0x5c7   : > { %v7397_v20 = vpop.f32.mrb[184].mxu1  ;;  %v10860_v49 = vadd.f32 %v11860_v19, %v5300_v43 }
 0x5c8   : > { %v7398_v52 = vpop.f32.mrb[185].mxu1 }
 0x5c9   : > { %v7399_v14 = vadd.f32 %v7398_v52, %v7397_v20  ;;  %v7400_v5 = vpop.f32.mrb[186].mxu1 }
 0x5ca   : > { %v7401_v6 = vpop.f32.mrb[187].mxu1 }
 0x5cb   : > { %v5305_v9 = vadd.f32 %v7399_v14, %v10719_v37  ;;  %v7402_v47 = vadd.f32 %v7401_v6, %v7400_v5  ;;  %v11863_v37 = vld [vmem:[#allocation35_spill] sm:$0xff]  ;;  %v11864_v5 = vld [vmem:[#allocation45_spill] sm:$0xff] }
 0x5cd   : > { %v5308_v53 = vadd.f32 %v7402_v47, %v10721_v33  ;;  %v10865_v11 = vadd.f32 %v11861_v21, %v5305_v9 }
 0x5cf   : > { %v7403_v15 = vpop.f32.mrb[188].mxu1  ;;  %v10868_v30 = vadd.f32 %v11862_v34, %v5308_v53 }
 0x5d0   : > { %v7404_v54 = vpop.f32.mrb[189].mxu1 }
 0x5d1   : > { %v7405_v55 = vadd.f32 %v7404_v54, %v7403_v15  ;;  %v7406_v43 = vpop.f32.mrb[190].mxu1 }
 0x5d2   : > { %v7407_v57 = vpop.f32.mrb[191].mxu1 }
 0x5d3   : > { %v5313_v20 = vadd.f32 %v7405_v55, %v10727_v44  ;;  %v7408_v19 = vadd.f32 %v7407_v57, %v7406_v43 }
 0x5d5   : > { %v5316_v52 = vadd.f32 %v7408_v19, %v10733_v17  ;;  %v10873_v14 = vadd.f32 %v11863_v37, %v5313_v20 }
 0x5d7   : > { %v7563_v33 = vpop.f32.mrb[192].mxu1  ;;  %v10876_v6 = vadd.f32 %v11864_v5, %v5316_v52 }
 0x5d8   : > { %v5523_v9 = vadd.f32 %v7563_v33, %v10760_v28  ;;  %v5514_v47 = vpop.f32.mrb[193].mxu1 }
 0x5d9   : > { %v5515_v53 = vadd.f32 %v5514_v47, %v10740_v56  ;;  %v7564_v21 = vpop.f32.mrb[194].mxu1 }
 0x5da   : > { %v5526_v15 = vadd.f32 %v7564_v21, %v10764_v0  ;;  %v5517_v34 = vpop.f32.mrb[195].mxu1  ;;  %v5643_v54 = vmax.f32 %v5523_v9, 0.0 }
 0x5db   : > { %v5518_v44 = vadd.f32 %v5517_v34, %v10747_v1  ;;  %v5641_v55 = vmax.f32 %v5515_v53, 0.0 }
 0x5dc   : > { %v5644_v17 = vmax.f32 %v5526_v15, 0.0 }
 0x5dd   : > { %v5642_v43 = vmax.f32 %v5518_v44, 0.0 }
 0x5de   : > { %v5674_v57 = vpack.c.bf16 %v5644_v17, %v5643_v54 }
 0x5df   : > { %v5673_v20 = vpack.c.bf16 %v5642_v43, %v5641_v55  ;;  %v7567_v19 = vpop.f32.mrb[196].mxu1 }
 0x5e0   : > { %v5539_v52 = vadd.f32 %v7567_v19, %v10777_v61  ;;  %v5530_v37 = vpop.f32.mrb[197].mxu1 }
 0x5e1   : > { %v5531_v28 = vadd.f32 %v5530_v37, %v10769_v31  ;;  %v7568_v33 = vpop.f32.mrb[198].mxu1  ;;  %5936 = vmatmul.mubr.bf16.vlgmr.msra.gmra.mrb[224].mxu1 %v5673_v20  ;;  %6129 = vmatmul.mubr.bf16.vlgmr.msra.gmra.mrb[144].mxu0 %v5673_v20 }
 0x5e2   : > { %v5542_v56 = vadd.f32 %v7568_v33, %v10780_v58  ;;  %v5533_v0 = vpop.f32.mrb[199].mxu1  ;;  %7601 = vmatpush1.bf16.msra.mxu1 %v10579_v45  ;;  %5945 = vmatprep.mubr.bf16.mxu1 %v11826_v7  ;;  %v5647_v61 = vmax.f32 %v5539_v52, 0.0 }
 0x5e3   : > { %v5534_v1 = vadd.f32 %v5533_v0, %v10772_v29  ;;  %6138 = vmatprep.mubr.bf16.mxu0 %v11826_v7  ;;  %7594 = vmatprep.subr.bf16.mxu1 %v10623_v41  ;;  %v5645_v9 = vmax.f32 %v5531_v28, 0.0  ;;  %v11865_v0 = vld [vmem:[#allocation56_spill] sm:$0xff] }
 0x5e4   : > { %v5648_v5 = vmax.f32 %v5542_v56, 0.0 }
 0x5e5   : > { %v5646_v31 = vmax.f32 %v5534_v1, 0.0 }
 0x5e6   : > { %v5676_v47 = vpack.c.bf16 %v5648_v5, %v5647_v61  ;;  %7602 = vmatpush1.bf16.msra.mxu1 %v10621_v23 }
 0x5e7   : > { %v5675_v53 = vpack.c.bf16 %v5646_v31, %v5645_v9  ;;  %v7571_v58 = vpop.f32.mrb[200].mxu1  ;;  %7595 = vmatprep.subr.bf16.mxu1 %v10658_v63 }
 0x5e8   : > { %v5555_v45 = vadd.f32 %v7571_v58, %v10793_v27  ;;  %v5546_v21 = vpop.f32.mrb[201].mxu1 }
 0x5e9   : > { %v5547_v29 = vadd.f32 %v5546_v21, %v10785_v36  ;;  %v7572_v15 = vpop.f32.mrb[202].mxu1  ;;  %5946 = vmatmul.mubr.bf16.gmra.mrb[228].mxu1 %v5674_v57  ;;  %6139 = vmatmul.mubr.bf16.gmra.mrb[148].mxu0 %v5674_v57 }
 0x5ea   : > { %v5558_v41 = vadd.f32 %v7572_v15, %v10796_v3  ;;  %v5549_v34 = vpop.f32.mrb[203].mxu1  ;;  %5955 = vmatprep.mubr.bf16.mxu1 %v11826_v7  ;;  %6148 = vmatprep.mubr.bf16.mxu0 %v11826_v7  ;;  %v5651_v63 = vmax.f32 %v5555_v45, 0.0 }
 0x5eb   : > { %v5550_v23 = vadd.f32 %v5549_v34, %v10788_v62  ;;  %7603 = vmatpush1.bf16.msra.mxu1 %v10655_v39  ;;  %v5649_v27 = vmax.f32 %v5547_v29, 0.0 }
 0x5ec   : > { %v5652_v44 = vmax.f32 %v5558_v41, 0.0  ;;  %7596 = vmatprep.subr.bf16.mxu1 %v10684_v18 }
 0x5ed   : > { %v5650_v36 = vmax.f32 %v5550_v23, 0.0 }
 0x5ee   : > { %v10900_v54 = vpack.c.bf16 %v5652_v44, %v5651_v63 }
 0x5ef   : > { %v5677_v17 = vpack.c.bf16 %v5650_v36, %v5649_v27  ;;  %v7575_v55 = vpop.f32.mrb[204].mxu1  ;;  %7604 = vmatpush1.bf16.msra.mxu1 %v10682_v13 }
 0x5f0   : > { %v5571_v3 = vadd.f32 %v7575_v55, %v10809_v50  ;;  %v5562_v43 = vpop.f32.mrb[205].mxu1  ;;  %7597 = vmatprep.subr.bf16.mxu1 %v10709_v10 }
 0x5f1   : > { %v5563_v62 = vadd.f32 %v5562_v43, %v10801_v60  ;;  %v7576_v39 = vpop.f32.mrb[206].mxu1  ;;  %5956 = vmatmul.mubr.bf16.gmra.mrb[232].mxu1 %v5675_v53  ;;  %6149 = vmatmul.mubr.bf16.gmra.mrb[152].mxu0 %v5675_v53 }
 0x5f2   : > { %v5574_v18 = vadd.f32 %v7576_v39, %v10812_v38  ;;  %v5565_v57 = vpop.f32.mrb[207].mxu1  ;;  %5965 = vmatprep.mubr.bf16.mxu1 %v11826_v7  ;;  %6158 = vmatprep.mubr.bf16.mxu0 %v11826_v7  ;;  %v5655_v13 = vmax.f32 %v5571_v3, 0.0 }
 0x5f3   : > { %v5566_v20 = vadd.f32 %v5565_v57, %v10804_v26  ;;  %7605 = vmatpush1.bf16.msra.mxu1 %v10707_v24  ;;  %v5653_v10 = vmax.f32 %v5563_v62, 0.0 }
 0x5f4   : > { %v5656_v50 = vmax.f32 %v5574_v18, 0.0  ;;  %7598 = vmatprep.subr.bf16.mxu1 %v10731_v46 }
 0x5f5   : > { %v5654_v60 = vmax.f32 %v5566_v20, 0.0 }
 0x5f6   : > { %v10912_v19 = vpack.c.bf16 %v5656_v50, %v5655_v13 }
 0x5f7   : > { %v10914_v52 = vpack.c.bf16 %v5654_v60, %v5653_v10  ;;  %v7579_v38 = vpop.f32.mrb[208].mxu1  ;;  %7606 = vmatpush1.bf16.msra.mxu1 %v10729_v42 }
 0x5f8   : > { %v5587_v37 = vadd.f32 %v7579_v38, %v10825_v40  ;;  %v5578_v28 = vpop.f32.mrb[209].mxu1  ;;  %7599 = vmatprep.subr.bf16.mxu1 %v10744_v25 }
 0x5f9   : > { %v5579_v24 = vadd.f32 %v5578_v28, %v10817_v59  ;;  %v7580_v26 = vpop.f32.mrb[210].mxu1  ;;  %5966 = vmatmul.mubr.bf16.gmra.mrb[236].mxu1 %v5676_v47  ;;  %6159 = vmatmul.mubr.bf16.gmra.mrb[156].mxu0 %v5676_v47 }
 0x5fa   : > { %v5590_v46 = vadd.f32 %v7580_v26, %v10828_v35  ;;  %v5581_v33 = vpop.f32.mrb[211].mxu1  ;;  %5975 = vmatprep.mubr.bf16.mxu1 %v11826_v7  ;;  %6168 = vmatprep.mubr.bf16.mxu0 %v11826_v7  ;;  %v5659_v42 = vmax.f32 %v5587_v37, 0.0  ;;  %v11866_v35 = vld [vmem:[#allocation58_spill] sm:$0xff] }
 0x5fb   : > { %v5582_v56 = vadd.f32 %v5581_v33, %v10820_v48  ;;  %7607 = vmatpush1.bf16.msra.mxu1 %v10742_v51  ;;  %v5657_v25 = vmax.f32 %v5579_v24, 0.0 }
 0x5fc   : > { %v5660_v40 = vmax.f32 %v5590_v46, 0.0  ;;  %7600 = vmatprep.subr.bf16.mxu1 %v11865_v0 }
 0x5fd   : > { %v5658_v59 = vmax.f32 %v5582_v56, 0.0 }
 0x5fe   : > { %v10926_v1 = vpack.c.bf16 %v5660_v40, %v5659_v42 }
 0x5ff   : > { %v5681_v61 = vpack.c.bf16 %v5658_v59, %v5657_v25  ;;  %v7583_v5 = vpop.f32.mrb[212].mxu1  ;;  %7608 = vmatpush1.bf16.msra.mxu1 %v11866_v35  ;;  %v8038_v35 = vld [vmem:[%s8918_s23 + $0x10] sm:$0xff] }
 0x600   : > { %v5603_v9 = vadd.f32 %v7583_v5, %v10841_v12  ;;  %v5594_v31 = vpop.f32.mrb[213].mxu1 }
 0x601   : > { %v5595_v47 = vadd.f32 %v5594_v31, %v10833_v4  ;;  %v7584_v48 = vpop.f32.mrb[214].mxu1  ;;  %5976 = vmatmul.mubr.bf16.gmra.mrb[240].mxu1 %v5677_v17  ;;  %6169 = vmatmul.mubr.bf16.gmra.mrb[160].mxu0 %v5677_v17 }
 0x602   : > { %v5606_v51 = vadd.f32 %v7584_v48, %v10844_v16  ;;  %v5597_v53 = vpop.f32.mrb[215].mxu1  ;;  %5985 = vmatprep.mubr.bf16.mxu1 %v11826_v7  ;;  %6178 = vmatprep.mubr.bf16.mxu0 %v11826_v7  ;;  %v5663_v45 = vmax.f32 %v5603_v9, 0.0 }
 0x603   : > { %v5598_v58 = vadd.f32 %v5597_v53, %v10836_v2  ;;  %v5661_v29 = vmax.f32 %v5595_v47, 0.0  ;;  %v8039_v53 = vld [vmem:[%s8918_s23 + $0x8] sm:$0xff] }
 0x604   : > { %v5664_v21 = vmax.f32 %v5606_v51, 0.0 }
 0x605   : > { %v5662_v15 = vmax.f32 %v5598_v58, 0.0 }
 0x606   : > { %v5684_v12 = vpack.c.bf16 %v5664_v21, %v5663_v45  ;;  %v8040_v45 = vld [vmem:[%s8918_s23 + $0x18] sm:$0xff] }
 0x607   : > { %v5683_v41 = vpack.c.bf16 %v5662_v15, %v5661_v29  ;;  %v7587_v34 = vpop.f32.mrb[216].mxu1 }
 0x608   : > { %v5619_v4 = vadd.f32 %v7587_v34, %v10857_v8  ;;  %v5610_v23 = vpop.f32.mrb[217].mxu1  ;;  %v8041_v34 = vld [vmem:[%s8918_s23 + $0x20] sm:$0xff] }
 0x609   : > { %v5611_v63 = vadd.f32 %v5610_v23, %v10849_v32  ;;  %v7588_v16 = vpop.f32.mrb[218].mxu1  ;;  %5986 = vmatmul.mubr.bf16.gmra.mrb[244].mxu1 %v10900_v54  ;;  %6179 = vmatmul.mubr.bf16.gmra.mrb[164].mxu0 %v10900_v54  ;;  %v8042_v23 = vld [vmem:[%s8918_s23 + $0x30] sm:$0xff] }
 0x60a   : > { %v5622_v44 = vadd.f32 %v7588_v16, %v10860_v49  ;;  %v5613_v2 = vpop.f32.mrb[219].mxu1  ;;  %5995 = vmatprep.mubr.bf16.mxu1 %v11826_v7  ;;  %6188 = vmatprep.mubr.bf16.mxu0 %v11826_v7  ;;  %v5667_v36 = vmax.f32 %v5619_v4, 0.0 }
 0x60b   : > { %v5614_v27 = vadd.f32 %v5613_v2, %v10852_v22  ;;  %v5665_v8 = vmax.f32 %v5611_v63, 0.0  ;;  %v8043_v2 = vld [vmem:[%s8918_s23 + $0x28] sm:$0xff] }
 0x60c   : > { %v5668_v17 = vmax.f32 %v5622_v44, 0.0 }
 0x60d   : > { %v5666_v55 = vmax.f32 %v5614_v27, 0.0 }
 0x60e   : > { %v5686_v3 = vpack.c.bf16 %v5668_v17, %v5667_v36  ;;  %v8044_v36 = vld [vmem:[%s8918_s23 + $0x38] sm:$0xff] }
 0x60f   : > { %v5685_v32 = vpack.c.bf16 %v5666_v55, %v5665_v8  ;;  %v7591_v43 = vpop.f32.mrb[220].mxu1 }
 0x610   : > { %v5635_v62 = vadd.f32 %v7591_v43, %v10873_v14  ;;  %v5626_v39 = vpop.f32.mrb[221].mxu1 }
 0x611   : > { %v5627_v54 = vadd.f32 %v5626_v39, %v10865_v11  ;;  %v7592_v49 = vpop.f32.mrb[222].mxu1  ;;  %5996 = vmatmul.mubr.bf16.gmra.mrb[248].mxu1 %v10914_v52  ;;  %6189 = vmatmul.mubr.bf16.gmra.mrb[168].mxu0 %v10914_v52 }
 0x612   : > { %v5638_v18 = vadd.f32 %v7592_v49, %v10876_v6  ;;  %v5629_v22 = vpop.f32.mrb[223].mxu1  ;;  %6005 = vmatprep.mubr.bf16.mxu1 %v11826_v7  ;;  %6198 = vmatprep.mubr.bf16.mxu0 %v11826_v7  ;;  %v5671_v20 = vmax.f32 %v5635_v62, 0.0 }
 0x613   : > { %v5630_v57 = vadd.f32 %v5629_v22, %v10868_v30  ;;  %v5669_v14 = vmax.f32 %v5627_v54, 0.0  ;;  %v11867_v30 = vld [vmem:[#allocation29_spill] sm:$0xff] }
 0x614   : > { %v5672_v13 = vmax.f32 %v5638_v18, 0.0  ;;  %v5725_v6 = vsub.s32 0, %v11867_v30  ;;  %v5733_v60 = vsub.s32 2, %v11867_v30  ;;  %v5729_v52 = vsub.s32 1, %v11867_v30 }
 0x615   : > { %v5670_v50 = vmax.f32 %v5630_v57, 0.0  ;;  %v5737_v38 = vsub.s32 3, %v11867_v30 }
 0x616   : > { %v5688_v10 = vpack.c.bf16 %v5672_v13, %v5671_v20 }
 0x617   : > { %v5687_v11 = vpack.c.bf16 %v5670_v50, %v5669_v14  ;;  %v8045_v14 = vld [vmem:[%s8918_s23 + $0x40] sm:$0xff] }
 0x619   : > { %6006 = vmatmul.mubr.bf16.gmra.mrb[252].mxu1 %v10912_v19  ;;  %6199 = vmatmul.mubr.bf16.gmra.mrb[172].mxu0 %v10912_v19  ;;  %v5721_v19 = vld [vmem:[#allocation14] sm:$0xf] }
 0x61a   : > { %6015 = vmatprep.mubr.bf16.mxu1 %v11826_v7  ;;  %6208 = vmatprep.mubr.bf16.mxu0 %v11826_v7  ;;  %v10975_v37 = vrot.slane %v5721_v19, %v5725_v6  ;;  %v10977_v28 = vrot.slane %v5721_v19, %v5733_v60  ;;  %v10979_v24 = vrot.slane %v5721_v19, %v5729_v52  ;;  %v8047_v52 = vld [vmem:[%s8918_s23 + $0x48] sm:$0xff] }
 0x61b   : > { %v10981_v26 = vrot.slane %v5721_v19, %v5737_v38 }
 0x621   : > { %6016 = vmatmul.mubr.bf16.gmra.mrb[0].mxu1 %v5681_v61  ;;  %6209 = vmatmul.mubr.bf16.gmra.mrb[176].mxu0 %v5681_v61  ;;  %v8037_v61 = vld [vmem:[%s8918_s23] sm:$0xff] }
 0x622   : > { %6025 = vmatprep.mubr.bf16.mxu1 %v11826_v7  ;;  %6218 = vmatprep.mubr.bf16.mxu0 %v11826_v7 }
 0x629   : > { %6026 = vmatmul.mubr.bf16.gmra.mrb[4].mxu1 %v10926_v1  ;;  %6219 = vmatmul.mubr.bf16.gmra.mrb[180].mxu0 %v10926_v1 }
 0x62a   : > { %6035 = vmatprep.mubr.bf16.mxu1 %v11826_v7  ;;  %6228 = vmatprep.mubr.bf16.mxu0 %v11826_v7 }
 0x631   : > { %6036 = vmatmul.mubr.bf16.gmra.mrb[8].mxu1 %v5683_v41  ;;  %6229 = vmatmul.mubr.bf16.gmra.mrb[184].mxu0 %v5683_v41 }
 0x632   : > { %6045 = vmatprep.mubr.bf16.mxu1 %v11826_v7  ;;  %6238 = vmatprep.mubr.bf16.mxu0 %v11826_v7 }
 0x639   : > { %6046 = vmatmul.mubr.bf16.gmra.mrb[12].mxu1 %v5684_v12  ;;  %6239 = vmatmul.mubr.bf16.gmra.mrb[188].mxu0 %v5684_v12 }
 0x63a   : > { %6055 = vmatprep.mubr.bf16.mxu1 %v11826_v7  ;;  %6248 = vmatprep.mubr.bf16.mxu0 %v11826_v7 }
 0x641   : > { %6056 = vmatmul.mubr.bf16.gmra.mrb[16].mxu1 %v5685_v32  ;;  %6249 = vmatmul.mubr.bf16.gmra.mrb[192].mxu0 %v5685_v32 }
 0x642   : > { %6065 = vmatprep.mubr.bf16.mxu1 %v11826_v7  ;;  %6258 = vmatprep.mubr.bf16.mxu0 %v11826_v7 }
 0x649   : > { %6066 = vmatmul.mubr.bf16.gmra.mrb[20].mxu1 %v5686_v3  ;;  %6259 = vmatmul.mubr.bf16.gmra.mrb[196].mxu0 %v5686_v3 }
 0x64a   : > { %6075 = vmatprep.mubr.bf16.mxu1 %v11826_v7 }
 0x651   : > { %6076 = vmatmul.mubr.bf16.gmra.mrb[24].mxu1 %v5687_v11 }
 0x652   : > { %6085 = vmatprep.mubr.bf16.mxu1 %v11826_v7 }
 0x659   : > { %6086 = vmatmul.mubr.bf16.gmra.mrb[28].mxu1 %v5688_v10 }
 0x65a   : > { %6268 = vmatprep.mubr.bf16.mxu1 %v11826_v7 }
 0x661   : > { %6269 = vmatmul.mubr.bf16.vlgmr.msra.gmra.mrb[32].mxu1 %v5687_v11 }
 0x662   : > { %6278 = vmatprep.mubr.bf16.mxu1 %v11826_v7 }
 0x669   : > { %6279 = vmatmul.mubr.bf16.gmra.mrb[36].mxu1 %v5688_v10  ;;  %v8046_v10 = vld [vmem:[%s8918_s23 + $0x50] sm:$0xff] }
 0x6b4   : > { %v5937_v7 = vpop.f32.mrb[224].mxu1  ;;  %v6130_v46 = vpop.f32.mrb[144].mxu0 }
 0x6b5   : > { %v5938_v33 = vadd.f32 %v5937_v7, %v10975_v37  ;;  %v6131_v56 = vadd.f32 %v6130_v46, %v10977_v28  ;;  %v5939_v42 = vpop.f32.mrb[225].mxu1  ;;  %v6132_v40 = vpop.f32.mrb[145].mxu0  ;;  %v8048_v7 = vld [vmem:[%s8918_s23 + $0x58] sm:$0xff] }
 0x6b6   : > { %v5940_v0 = vadd.f32 %v5939_v42, %v10979_v24  ;;  %v6133_v25 = vadd.f32 %v6132_v40, %v10981_v26  ;;  %v5941_v59 = vpop.f32.mrb[226].mxu1  ;;  %v6134_v1 = vpop.f32.mrb[146].mxu0 }
 0x6b7   : > { %v6289_v5 = vadd.f32 %v8037_v61, %v5938_v33  ;;  %v6291_v9 = vadd.f32 %v8038_v35, %v6131_v56  ;;  %v5942_v31 = vadd.f32 %v5941_v59, %v10975_v37  ;;  %v6135_v47 = vadd.f32 %v6134_v1, %v10977_v28  ;;  %v5943_v48 = vpop.f32.mrb[227].mxu1  ;;  %v6136_v51 = vpop.f32.mrb[147].mxu0  ;;  %v8050_v59 = vld [vmem:[%s8918_s23 + $0x70] sm:$0xff]  ;;  %v8051_v35 = vld [vmem:[%s8918_s23 + $0x68] sm:$0xff] }
 0x6b8   : > { %v6290_v58 = vadd.f32 %v8039_v53, %v5940_v0  ;;  %v6292_v21 = vadd.f32 %v8040_v45, %v6133_v25  ;;  %v5944_v29 = vadd.f32 %v5943_v48, %v10979_v24  ;;  %v6137_v15 = vadd.f32 %v6136_v51, %v10981_v26  ;;  %v8049_v0 = vld [vmem:[%s8918_s23 + $0x60] sm:$0xff] }
 0x6b9   : > { %v6417_v12 = vmax.f32 %v6289_v5, 0.0  ;;  %v6419_v41 = vmax.f32 %v6291_v9, 0.0  ;;  %v6293_v4 = vadd.f32 %v8041_v34, %v5942_v31  ;;  %v6295_v63 = vadd.f32 %v8042_v23, %v6135_v47  ;;  %v8052_v31 = vld [vmem:[%s8918_s23 + $0x78] sm:$0xff] }
 0x6ba   : > { %v6418_v16 = vmax.f32 %v6290_v58, 0.0  ;;  %v6420_v44 = vmax.f32 %v6292_v21, 0.0  ;;  %v6294_v27 = vadd.f32 %v8043_v2, %v5944_v29  ;;  %v6296_v17 = vadd.f32 %v8044_v36, %v6137_v15  ;;  %v8054_v2 = vld [vmem:[%s8918_s23 + $0x90] sm:$0xff] }
 0x6bb   : > { %6545 = vst [vmem:[%s11001_s2] sm:$0xff] %v6417_v12  ;;  %6547 = vst [vmem:[%s11001_s2 + $0x10] sm:$0xff] %v6419_v41  ;;  %v6421_v8 = vmax.f32 %v6293_v4, 0.0  ;;  %v6423_v55 = vmax.f32 %v6295_v63, 0.0 }
 0x6bc   : > { %6546 = vst [vmem:[%s11001_s2 + $0x8] sm:$0xff] %v6418_v16  ;;  %6548 = vst [vmem:[%s11001_s2 + $0x18] sm:$0xff] %v6420_v44  ;;  %v6422_v3 = vmax.f32 %v6294_v27, 0.0  ;;  %v6424_v32 = vmax.f32 %v6296_v17, 0.0  ;;  %v5947_v43 = vpop.f32.mrb[228].mxu1  ;;  %v6140_v62 = vpop.f32.mrb[148].mxu0 }
 0x6bd   : > { %6549 = vst [vmem:[%s11001_s2 + $0x20] sm:$0xff] %v6421_v8  ;;  %6551 = vst [vmem:[%s11001_s2 + $0x30] sm:$0xff] %v6423_v55  ;;  %v5948_v39 = vadd.f32 %v5947_v43, %v10975_v37  ;;  %v6141_v54 = vadd.f32 %v6140_v62, %v10977_v28  ;;  %v5949_v49 = vpop.f32.mrb[229].mxu1  ;;  %v6142_v18 = vpop.f32.mrb[149].mxu0  ;;  %v8053_v16 = vld [vmem:[%s8918_s23 + $0x80] sm:$0xff]  ;;  %v8056_v43 = vld [vmem:[%s8918_s23 + $0x98] sm:$0xff] }
 0x6be   : > { %6550 = vst [vmem:[%s11001_s2 + $0x28] sm:$0xff] %v6422_v3  ;;  %6552 = vst [vmem:[%s11001_s2 + $0x38] sm:$0xff] %v6424_v32  ;;  %v5950_v22 = vadd.f32 %v5949_v49, %v10979_v24  ;;  %v6143_v57 = vadd.f32 %v6142_v18, %v10981_v26  ;;  %v5951_v20 = vpop.f32.mrb[230].mxu1  ;;  %v6144_v13 = vpop.f32.mrb[150].mxu0  ;;  %v8055_v3 = vld [vmem:[%s8918_s23 + $0x88] sm:$0xff] }
 0x6bf   : > { %v6297_v50 = vadd.f32 %v8045_v14, %v5948_v39  ;;  %v6299_v11 = vadd.f32 %v8046_v10, %v6141_v54  ;;  %v5952_v30 = vadd.f32 %v5951_v20, %v10975_v37  ;;  %v6145_v6 = vadd.f32 %v6144_v13, %v10977_v28  ;;  %v5953_v60 = vpop.f32.mrb[231].mxu1  ;;  %v6146_v19 = vpop.f32.mrb[151].mxu0  ;;  %v8058_v20 = vld [vmem:[%s8918_s23 + $0xb0] sm:$0xff]  ;;  %v8059_v10 = vld [vmem:[%s8918_s23 + $0xa8] sm:$0xff] }
 0x6c0   : > { %v6298_v38 = vadd.f32 %v8047_v52, %v5950_v22  ;;  %v6300_v46 = vadd.f32 %v8048_v7, %v6143_v57  ;;  %v5954_v33 = vadd.f32 %v5953_v60, %v10979_v24  ;;  %v6147_v56 = vadd.f32 %v6146_v19, %v10981_v26  ;;  %v8057_v22 = vld [vmem:[%s8918_s23 + $0xa0] sm:$0xff] }
 0x6c1   : > { %v6425_v42 = vmax.f32 %v6297_v50, 0.0  ;;  %v6427_v40 = vmax.f32 %v6299_v11, 0.0  ;;  %v6301_v25 = vadd.f32 %v8049_v0, %v5952_v30  ;;  %v6303_v1 = vadd.f32 %v8050_v59, %v6145_v6  ;;  %v8060_v30 = vld [vmem:[%s8918_s23 + $0xb8] sm:$0xff] }
 0x6c2   : > { %v6426_v61 = vmax.f32 %v6298_v38, 0.0  ;;  %v6428_v5 = vmax.f32 %v6300_v46, 0.0  ;;  %v6302_v9 = vadd.f32 %v8051_v35, %v5954_v33  ;;  %v6304_v47 = vadd.f32 %v8052_v31, %v6147_v56  ;;  %v8062_v35 = vld [vmem:[%s8918_s23 + $0xd0] sm:$0xff] }
 0x6c3   : > { %6553 = vst [vmem:[%s11001_s2 + $0x40] sm:$0xff] %v6425_v42  ;;  %6555 = vst [vmem:[%s11001_s2 + $0x50] sm:$0xff] %v6427_v40  ;;  %v6429_v48 = vmax.f32 %v6301_v25, 0.0  ;;  %v6431_v51 = vmax.f32 %v6303_v1, 0.0 }
 0x6c4   : > { %6554 = vst [vmem:[%s11001_s2 + $0x48] sm:$0xff] %v6426_v61  ;;  %6556 = vst [vmem:[%s11001_s2 + $0x58] sm:$0xff] %v6428_v5  ;;  %v6430_v53 = vmax.f32 %v6302_v9, 0.0  ;;  %v6432_v58 = vmax.f32 %v6304_v47, 0.0  ;;  %v5957_v45 = vpop.f32.mrb[232].mxu1  ;;  %v6150_v21 = vpop.f32.mrb[152].mxu0 }
 0x6c5   : > { %6557 = vst [vmem:[%s11001_s2 + $0x60] sm:$0xff] %v6429_v48  ;;  %6559 = vst [vmem:[%s11001_s2 + $0x70] sm:$0xff] %v6431_v51  ;;  %v5958_v29 = vadd.f32 %v5957_v45, %v10975_v37  ;;  %v6151_v15 = vadd.f32 %v6150_v21, %v10977_v28  ;;  %v5959_v12 = vpop.f32.mrb[233].mxu1  ;;  %v6152_v41 = vpop.f32.mrb[153].mxu0  ;;  %v8061_v61 = vld [vmem:[%s8918_s23 + $0xc0] sm:$0xff]  ;;  %v8064_v45 = vld [vmem:[%s8918_s23 + $0xd8] sm:$0xff] }
 0x6c6   : > { %6558 = vst [vmem:[%s11001_s2 + $0x68] sm:$0xff] %v6430_v53  ;;  %6560 = vst [vmem:[%s11001_s2 + $0x78] sm:$0xff] %v6432_v58  ;;  %v5960_v34 = vadd.f32 %v5959_v12, %v10979_v24  ;;  %v6153_v4 = vadd.f32 %v6152_v41, %v10981_v26  ;;  %v5961_v23 = vpop.f32.mrb[234].mxu1  ;;  %v6154_v63 = vpop.f32.mrb[154].mxu0  ;;  %v8063_v53 = vld [vmem:[%s8918_s23 + $0xc8] sm:$0xff] }
 0x6c7   : > { %v6305_v44 = vadd.f32 %v8053_v16, %v5958_v29  ;;  %v6307_v27 = vadd.f32 %v8054_v2, %v6151_v15  ;;  %v5962_v36 = vadd.f32 %v5961_v23, %v10975_v37  ;;  %v6155_v17 = vadd.f32 %v6154_v63, %v10977_v28  ;;  %v5963_v8 = vpop.f32.mrb[235].mxu1  ;;  %v6156_v55 = vpop.f32.mrb[155].mxu0  ;;  %v8066_v23 = vld [vmem:[%s8918_s23 + $0xf0] sm:$0xff]  ;;  %v8067_v2 = vld [vmem:[%s8918_s23 + $0xe8] sm:$0xff] }
 0x6c8   : > { %v6306_v32 = vadd.f32 %v8055_v3, %v5960_v34  ;;  %v6308_v62 = vadd.f32 %v8056_v43, %v6153_v4  ;;  %v5964_v39 = vadd.f32 %v5963_v8, %v10979_v24  ;;  %v6157_v54 = vadd.f32 %v6156_v55, %v10981_v26  ;;  %v8065_v34 = vld [vmem:[%s8918_s23 + $0xe0] sm:$0xff] }
 0x6c9   : > { %v6433_v49 = vmax.f32 %v6305_v44, 0.0  ;;  %v6435_v18 = vmax.f32 %v6307_v27, 0.0  ;;  %v6309_v57 = vadd.f32 %v8057_v22, %v5962_v36  ;;  %v6311_v13 = vadd.f32 %v8058_v20, %v6155_v17  ;;  %v8068_v36 = vld [vmem:[%s8918_s23 + $0xf8] sm:$0xff] }
 0x6ca   : > { %v6434_v14 = vmax.f32 %v6306_v32, 0.0  ;;  %v6436_v50 = vmax.f32 %v6308_v62, 0.0  ;;  %v6310_v11 = vadd.f32 %v8059_v10, %v5964_v39  ;;  %v6312_v6 = vadd.f32 %v8060_v30, %v6157_v54  ;;  %v8070_v10 = vld [vmem:[%s8918_s23 + $0x110] sm:$0xff] }
 0x6cb   : > { %6561 = vst [vmem:[%s11001_s2 + $0x80] sm:$0xff] %v6433_v49  ;;  %6563 = vst [vmem:[%s11001_s2 + $0x90] sm:$0xff] %v6435_v18  ;;  %v6437_v60 = vmax.f32 %v6309_v57, 0.0  ;;  %v6439_v19 = vmax.f32 %v6311_v13, 0.0 }
 0x6cc   : > { %6562 = vst [vmem:[%s11001_s2 + $0x88] sm:$0xff] %v6434_v14  ;;  %6564 = vst [vmem:[%s11001_s2 + $0x98] sm:$0xff] %v6436_v50  ;;  %v6438_v52 = vmax.f32 %v6310_v11, 0.0  ;;  %v6440_v38 = vmax.f32 %v6312_v6, 0.0  ;;  %v5967_v7 = vpop.f32.mrb[236].mxu1  ;;  %v6160_v46 = vpop.f32.mrb[156].mxu0 }
 0x6cd   : > { %6565 = vst [vmem:[%s11001_s2 + $0xa0] sm:$0xff] %v6437_v60  ;;  %6567 = vst [vmem:[%s11001_s2 + $0xb0] sm:$0xff] %v6439_v19  ;;  %v5968_v33 = vadd.f32 %v5967_v7, %v10975_v37  ;;  %v6161_v56 = vadd.f32 %v6160_v46, %v10977_v28  ;;  %v5969_v42 = vpop.f32.mrb[237].mxu1  ;;  %v6162_v40 = vpop.f32.mrb[157].mxu0  ;;  %v8069_v14 = vld [vmem:[%s8918_s23 + $0x100] sm:$0xff]  ;;  %v8072_v7 = vld [vmem:[%s8918_s23 + $0x118] sm:$0xff] }
 0x6ce   : > { %6566 = vst [vmem:[%s11001_s2 + $0xa8] sm:$0xff] %v6438_v52  ;;  %6568 = vst [vmem:[%s11001_s2 + $0xb8] sm:$0xff] %v6440_v38  ;;  %v5970_v0 = vadd.f32 %v5969_v42, %v10979_v24  ;;  %v6163_v25 = vadd.f32 %v6162_v40, %v10981_v26  ;;  %v5971_v59 = vpop.f32.mrb[238].mxu1  ;;  %v6164_v1 = vpop.f32.mrb[158].mxu0  ;;  %v8071_v52 = vld [vmem:[%s8918_s23 + $0x108] sm:$0xff] }
 0x6cf   : > { %v6313_v5 = vadd.f32 %v8061_v61, %v5968_v33  ;;  %v6315_v9 = vadd.f32 %v8062_v35, %v6161_v56  ;;  %v5972_v31 = vadd.f32 %v5971_v59, %v10975_v37  ;;  %v6165_v47 = vadd.f32 %v6164_v1, %v10977_v28  ;;  %v5973_v48 = vpop.f32.mrb[239].mxu1  ;;  %v6166_v51 = vpop.f32.mrb[159].mxu0  ;;  %v8074_v59 = vld [vmem:[%s8918_s23 + $0x130] sm:$0xff]  ;;  %v8075_v35 = vld [vmem:[%s8918_s23 + $0x128] sm:$0xff] }
 0x6d0   : > { %v6314_v58 = vadd.f32 %v8063_v53, %v5970_v0  ;;  %v6316_v21 = vadd.f32 %v8064_v45, %v6163_v25  ;;  %v5974_v29 = vadd.f32 %v5973_v48, %v10979_v24  ;;  %v6167_v15 = vadd.f32 %v6166_v51, %v10981_v26  ;;  %v8073_v0 = vld [vmem:[%s8918_s23 + $0x120] sm:$0xff] }
 0x6d1   : > { %v6441_v12 = vmax.f32 %v6313_v5, 0.0  ;;  %v6443_v41 = vmax.f32 %v6315_v9, 0.0  ;;  %v6317_v4 = vadd.f32 %v8065_v34, %v5972_v31  ;;  %v6319_v63 = vadd.f32 %v8066_v23, %v6165_v47  ;;  %v8076_v31 = vld [vmem:[%s8918_s23 + $0x138] sm:$0xff] }
 0x6d2   : > { %v6442_v16 = vmax.f32 %v6314_v58, 0.0  ;;  %v6444_v44 = vmax.f32 %v6316_v21, 0.0  ;;  %v6318_v27 = vadd.f32 %v8067_v2, %v5974_v29  ;;  %v6320_v17 = vadd.f32 %v8068_v36, %v6167_v15  ;;  %v8078_v2 = vld [vmem:[%s8918_s23 + $0x150] sm:$0xff] }
 0x6d3   : > { %6569 = vst [vmem:[%s11001_s2 + $0xc0] sm:$0xff] %v6441_v12  ;;  %6571 = vst [vmem:[%s11001_s2 + $0xd0] sm:$0xff] %v6443_v41  ;;  %v6445_v8 = vmax.f32 %v6317_v4, 0.0  ;;  %v6447_v55 = vmax.f32 %v6319_v63, 0.0 }
 0x6d4   : > { %6570 = vst [vmem:[%s11001_s2 + $0xc8] sm:$0xff] %v6442_v16  ;;  %6572 = vst [vmem:[%s11001_s2 + $0xd8] sm:$0xff] %v6444_v44  ;;  %v6446_v3 = vmax.f32 %v6318_v27, 0.0  ;;  %v6448_v32 = vmax.f32 %v6320_v17, 0.0  ;;  %v5977_v43 = vpop.f32.mrb[240].mxu1  ;;  %v6170_v62 = vpop.f32.mrb[160].mxu0 }
 0x6d5   : > { %6573 = vst [vmem:[%s11001_s2 + $0xe0] sm:$0xff] %v6445_v8  ;;  %6575 = vst [vmem:[%s11001_s2 + $0xf0] sm:$0xff] %v6447_v55  ;;  %v5978_v39 = vadd.f32 %v5977_v43, %v10975_v37  ;;  %v6171_v54 = vadd.f32 %v6170_v62, %v10977_v28  ;;  %v5979_v49 = vpop.f32.mrb[241].mxu1  ;;  %v6172_v18 = vpop.f32.mrb[161].mxu0  ;;  %v8077_v16 = vld [vmem:[%s8918_s23 + $0x140] sm:$0xff]  ;;  %v8080_v43 = vld [vmem:[%s8918_s23 + $0x158] sm:$0xff] }
 0x6d6   : > { %6574 = vst [vmem:[%s11001_s2 + $0xe8] sm:$0xff] %v6446_v3  ;;  %6576 = vst [vmem:[%s11001_s2 + $0xf8] sm:$0xff] %v6448_v32  ;;  %v5980_v22 = vadd.f32 %v5979_v49, %v10979_v24  ;;  %v6173_v57 = vadd.f32 %v6172_v18, %v10981_v26  ;;  %v5981_v20 = vpop.f32.mrb[242].mxu1  ;;  %v6174_v13 = vpop.f32.mrb[162].mxu0  ;;  %v8079_v3 = vld [vmem:[%s8918_s23 + $0x148] sm:$0xff] }
 0x6d7   : > { %v6321_v50 = vadd.f32 %v8069_v14, %v5978_v39  ;;  %v6323_v11 = vadd.f32 %v8070_v10, %v6171_v54  ;;  %v5982_v30 = vadd.f32 %v5981_v20, %v10975_v37  ;;  %v6175_v6 = vadd.f32 %v6174_v13, %v10977_v28  ;;  %v5983_v60 = vpop.f32.mrb[243].mxu1  ;;  %v6176_v19 = vpop.f32.mrb[163].mxu0  ;;  %v8082_v20 = vld [vmem:[%s8918_s23 + $0x170] sm:$0xff]  ;;  %v8083_v10 = vld [vmem:[%s8918_s23 + $0x168] sm:$0xff] }
 0x6d8   : > { %v6322_v38 = vadd.f32 %v8071_v52, %v5980_v22  ;;  %v6324_v46 = vadd.f32 %v8072_v7, %v6173_v57  ;;  %v5984_v33 = vadd.f32 %v5983_v60, %v10979_v24  ;;  %v6177_v56 = vadd.f32 %v6176_v19, %v10981_v26  ;;  %v8081_v22 = vld [vmem:[%s8918_s23 + $0x160] sm:$0xff] }
 0x6d9   : > { %v6449_v42 = vmax.f32 %v6321_v50, 0.0  ;;  %v6451_v40 = vmax.f32 %v6323_v11, 0.0  ;;  %v6325_v25 = vadd.f32 %v8073_v0, %v5982_v30  ;;  %v6327_v1 = vadd.f32 %v8074_v59, %v6175_v6  ;;  %v8084_v30 = vld [vmem:[%s8918_s23 + $0x178] sm:$0xff] }
 0x6da   : > { %v6450_v61 = vmax.f32 %v6322_v38, 0.0  ;;  %v6452_v5 = vmax.f32 %v6324_v46, 0.0  ;;  %v6326_v9 = vadd.f32 %v8075_v35, %v5984_v33  ;;  %v6328_v47 = vadd.f32 %v8076_v31, %v6177_v56  ;;  %v8086_v35 = vld [vmem:[%s8918_s23 + $0x190] sm:$0xff] }
 0x6db   : > { %6577 = vst [vmem:[%s11001_s2 + $0x100] sm:$0xff] %v6449_v42  ;;  %6579 = vst [vmem:[%s11001_s2 + $0x110] sm:$0xff] %v6451_v40  ;;  %v6453_v48 = vmax.f32 %v6325_v25, 0.0  ;;  %v6455_v51 = vmax.f32 %v6327_v1, 0.0 }
 0x6dc   : > { %6578 = vst [vmem:[%s11001_s2 + $0x108] sm:$0xff] %v6450_v61  ;;  %6580 = vst [vmem:[%s11001_s2 + $0x118] sm:$0xff] %v6452_v5  ;;  %v6454_v53 = vmax.f32 %v6326_v9, 0.0  ;;  %v6456_v58 = vmax.f32 %v6328_v47, 0.0  ;;  %v5987_v45 = vpop.f32.mrb[244].mxu1  ;;  %v6180_v21 = vpop.f32.mrb[164].mxu0 }
 0x6dd   : > { %6581 = vst [vmem:[%s11001_s2 + $0x120] sm:$0xff] %v6453_v48  ;;  %6583 = vst [vmem:[%s11001_s2 + $0x130] sm:$0xff] %v6455_v51  ;;  %v5988_v29 = vadd.f32 %v5987_v45, %v10975_v37  ;;  %v6181_v15 = vadd.f32 %v6180_v21, %v10977_v28  ;;  %v5989_v12 = vpop.f32.mrb[245].mxu1  ;;  %v6182_v41 = vpop.f32.mrb[165].mxu0  ;;  %v8085_v61 = vld [vmem:[%s8918_s23 + $0x180] sm:$0xff]  ;;  %v8088_v45 = vld [vmem:[%s8918_s23 + $0x198] sm:$0xff] }
 0x6de   : > { %6582 = vst [vmem:[%s11001_s2 + $0x128] sm:$0xff] %v6454_v53  ;;  %6584 = vst [vmem:[%s11001_s2 + $0x138] sm:$0xff] %v6456_v58  ;;  %v5990_v34 = vadd.f32 %v5989_v12, %v10979_v24  ;;  %v6183_v4 = vadd.f32 %v6182_v41, %v10981_v26  ;;  %v5991_v23 = vpop.f32.mrb[246].mxu1  ;;  %v6184_v63 = vpop.f32.mrb[166].mxu0  ;;  %v8087_v53 = vld [vmem:[%s8918_s23 + $0x188] sm:$0xff] }
 0x6df   : > { %v6329_v44 = vadd.f32 %v8077_v16, %v5988_v29  ;;  %v6331_v27 = vadd.f32 %v8078_v2, %v6181_v15  ;;  %v5992_v36 = vadd.f32 %v5991_v23, %v10975_v37  ;;  %v6185_v17 = vadd.f32 %v6184_v63, %v10977_v28  ;;  %v5993_v8 = vpop.f32.mrb[247].mxu1  ;;  %v6186_v55 = vpop.f32.mrb[167].mxu0  ;;  %v8090_v23 = vld [vmem:[%s8918_s23 + $0x1b0] sm:$0xff]  ;;  %v8091_v2 = vld [vmem:[%s8918_s23 + $0x1a8] sm:$0xff] }
 0x6e0   : > { %v6330_v32 = vadd.f32 %v8079_v3, %v5990_v34  ;;  %v6332_v62 = vadd.f32 %v8080_v43, %v6183_v4  ;;  %v5994_v39 = vadd.f32 %v5993_v8, %v10979_v24  ;;  %v6187_v54 = vadd.f32 %v6186_v55, %v10981_v26  ;;  %v8089_v34 = vld [vmem:[%s8918_s23 + $0x1a0] sm:$0xff] }
 0x6e1   : > { %v6457_v49 = vmax.f32 %v6329_v44, 0.0  ;;  %v6459_v18 = vmax.f32 %v6331_v27, 0.0  ;;  %v6333_v57 = vadd.f32 %v8081_v22, %v5992_v36  ;;  %v6335_v13 = vadd.f32 %v8082_v20, %v6185_v17  ;;  %v8092_v36 = vld [vmem:[%s8918_s23 + $0x1b8] sm:$0xff] }
 0x6e2   : > { %v6458_v14 = vmax.f32 %v6330_v32, 0.0  ;;  %v6460_v50 = vmax.f32 %v6332_v62, 0.0  ;;  %v6334_v11 = vadd.f32 %v8083_v10, %v5994_v39  ;;  %v6336_v6 = vadd.f32 %v8084_v30, %v6187_v54  ;;  %v8094_v10 = vld [vmem:[%s8918_s23 + $0x1d0] sm:$0xff] }
 0x6e3   : > { %6585 = vst [vmem:[%s11001_s2 + $0x140] sm:$0xff] %v6457_v49  ;;  %6587 = vst [vmem:[%s11001_s2 + $0x150] sm:$0xff] %v6459_v18  ;;  %v6461_v60 = vmax.f32 %v6333_v57, 0.0  ;;  %v6463_v19 = vmax.f32 %v6335_v13, 0.0 }
 0x6e4   : > { %6586 = vst [vmem:[%s11001_s2 + $0x148] sm:$0xff] %v6458_v14  ;;  %6588 = vst [vmem:[%s11001_s2 + $0x158] sm:$0xff] %v6460_v50  ;;  %v6462_v52 = vmax.f32 %v6334_v11, 0.0  ;;  %v6464_v38 = vmax.f32 %v6336_v6, 0.0  ;;  %v5997_v7 = vpop.f32.mrb[248].mxu1  ;;  %v6190_v46 = vpop.f32.mrb[168].mxu0 }
 0x6e5   : > { %6589 = vst [vmem:[%s11001_s2 + $0x160] sm:$0xff] %v6461_v60  ;;  %6591 = vst [vmem:[%s11001_s2 + $0x170] sm:$0xff] %v6463_v19  ;;  %v5998_v33 = vadd.f32 %v5997_v7, %v10975_v37  ;;  %v6191_v56 = vadd.f32 %v6190_v46, %v10977_v28  ;;  %v5999_v42 = vpop.f32.mrb[249].mxu1  ;;  %v6192_v40 = vpop.f32.mrb[169].mxu0  ;;  %v8093_v14 = vld [vmem:[%s8918_s23 + $0x1c0] sm:$0xff]  ;;  %v8096_v7 = vld [vmem:[%s8918_s23 + $0x1d8] sm:$0xff] }
 0x6e6   : > { %6590 = vst [vmem:[%s11001_s2 + $0x168] sm:$0xff] %v6462_v52  ;;  %6592 = vst [vmem:[%s11001_s2 + $0x178] sm:$0xff] %v6464_v38  ;;  %v6000_v0 = vadd.f32 %v5999_v42, %v10979_v24  ;;  %v6193_v25 = vadd.f32 %v6192_v40, %v10981_v26  ;;  %v6001_v59 = vpop.f32.mrb[250].mxu1  ;;  %v6194_v1 = vpop.f32.mrb[170].mxu0  ;;  %v8095_v52 = vld [vmem:[%s8918_s23 + $0x1c8] sm:$0xff] }
 0x6e7   : > { %v6337_v5 = vadd.f32 %v8085_v61, %v5998_v33  ;;  %v6339_v9 = vadd.f32 %v8086_v35, %v6191_v56  ;;  %v6002_v31 = vadd.f32 %v6001_v59, %v10975_v37  ;;  %v6195_v47 = vadd.f32 %v6194_v1, %v10977_v28  ;;  %v6003_v48 = vpop.f32.mrb[251].mxu1  ;;  %v6196_v51 = vpop.f32.mrb[171].mxu0  ;;  %v8098_v59 = vld [vmem:[%s8918_s23 + $0x1f0] sm:$0xff]  ;;  %v8099_v35 = vld [vmem:[%s8918_s23 + $0x1e8] sm:$0xff] }
 0x6e8   : > { %v6338_v58 = vadd.f32 %v8087_v53, %v6000_v0  ;;  %v6340_v21 = vadd.f32 %v8088_v45, %v6193_v25  ;;  %v6004_v29 = vadd.f32 %v6003_v48, %v10979_v24  ;;  %v6197_v15 = vadd.f32 %v6196_v51, %v10981_v26  ;;  %v8097_v0 = vld [vmem:[%s8918_s23 + $0x1e0] sm:$0xff] }
 0x6e9   : > { %v6465_v12 = vmax.f32 %v6337_v5, 0.0  ;;  %v6467_v41 = vmax.f32 %v6339_v9, 0.0  ;;  %v6341_v4 = vadd.f32 %v8089_v34, %v6002_v31  ;;  %v6343_v63 = vadd.f32 %v8090_v23, %v6195_v47  ;;  %v8100_v31 = vld [vmem:[%s8918_s23 + $0x1f8] sm:$0xff] }
 0x6ea   : > { %v6466_v16 = vmax.f32 %v6338_v58, 0.0  ;;  %v6468_v44 = vmax.f32 %v6340_v21, 0.0  ;;  %v6342_v27 = vadd.f32 %v8091_v2, %v6004_v29  ;;  %v6344_v17 = vadd.f32 %v8092_v36, %v6197_v15  ;;  %v8102_v2 = vld [vmem:[%s8918_s23 + $0x210] sm:$0xff] }
 0x6eb   : > { %6593 = vst [vmem:[%s11001_s2 + $0x180] sm:$0xff] %v6465_v12  ;;  %6595 = vst [vmem:[%s11001_s2 + $0x190] sm:$0xff] %v6467_v41  ;;  %v6469_v8 = vmax.f32 %v6341_v4, 0.0  ;;  %v6471_v55 = vmax.f32 %v6343_v63, 0.0 }
 0x6ec   : > { %6594 = vst [vmem:[%s11001_s2 + $0x188] sm:$0xff] %v6466_v16  ;;  %6596 = vst [vmem:[%s11001_s2 + $0x198] sm:$0xff] %v6468_v44  ;;  %v6470_v3 = vmax.f32 %v6342_v27, 0.0  ;;  %v6472_v32 = vmax.f32 %v6344_v17, 0.0  ;;  %v6007_v43 = vpop.f32.mrb[252].mxu1  ;;  %v6200_v62 = vpop.f32.mrb[172].mxu0 }
 0x6ed   : > { %6597 = vst [vmem:[%s11001_s2 + $0x1a0] sm:$0xff] %v6469_v8  ;;  %6599 = vst [vmem:[%s11001_s2 + $0x1b0] sm:$0xff] %v6471_v55  ;;  %v6008_v39 = vadd.f32 %v6007_v43, %v10975_v37  ;;  %v6201_v54 = vadd.f32 %v6200_v62, %v10977_v28  ;;  %v6009_v49 = vpop.f32.mrb[253].mxu1  ;;  %v6202_v18 = vpop.f32.mrb[173].mxu0  ;;  %v8101_v16 = vld [vmem:[%s8918_s23 + $0x200] sm:$0xff]  ;;  %v8104_v43 = vld [vmem:[%s8918_s23 + $0x218] sm:$0xff] }
 0x6ee   : > { %6598 = vst [vmem:[%s11001_s2 + $0x1a8] sm:$0xff] %v6470_v3  ;;  %6600 = vst [vmem:[%s11001_s2 + $0x1b8] sm:$0xff] %v6472_v32  ;;  %v6010_v22 = vadd.f32 %v6009_v49, %v10979_v24  ;;  %v6203_v57 = vadd.f32 %v6202_v18, %v10981_v26  ;;  %v6011_v20 = vpop.f32.mrb[254].mxu1  ;;  %v6204_v13 = vpop.f32.mrb[174].mxu0  ;;  %v8103_v3 = vld [vmem:[%s8918_s23 + $0x208] sm:$0xff] }
 0x6ef   : > { %v6345_v50 = vadd.f32 %v8093_v14, %v6008_v39  ;;  %v6347_v11 = vadd.f32 %v8094_v10, %v6201_v54  ;;  %v6012_v30 = vadd.f32 %v6011_v20, %v10975_v37  ;;  %v6205_v6 = vadd.f32 %v6204_v13, %v10977_v28  ;;  %v6013_v60 = vpop.f32.mrb[255].mxu1  ;;  %v6206_v19 = vpop.f32.mrb[175].mxu0  ;;  %v8106_v20 = vld [vmem:[%s8918_s23 + $0x230] sm:$0xff]  ;;  %v8107_v10 = vld [vmem:[%s8918_s23 + $0x228] sm:$0xff] }
 0x6f0   : > { %v6346_v38 = vadd.f32 %v8095_v52, %v6010_v22  ;;  %v6348_v46 = vadd.f32 %v8096_v7, %v6203_v57  ;;  %v6014_v33 = vadd.f32 %v6013_v60, %v10979_v24  ;;  %v6207_v56 = vadd.f32 %v6206_v19, %v10981_v26  ;;  %v8105_v22 = vld [vmem:[%s8918_s23 + $0x220] sm:$0xff] }
 0x6f1   : > { %v6473_v42 = vmax.f32 %v6345_v50, 0.0  ;;  %v6475_v40 = vmax.f32 %v6347_v11, 0.0  ;;  %v6349_v25 = vadd.f32 %v8097_v0, %v6012_v30  ;;  %v6351_v1 = vadd.f32 %v8098_v59, %v6205_v6  ;;  %v8108_v30 = vld [vmem:[%s8918_s23 + $0x238] sm:$0xff] }
 0x6f2   : > { %v6474_v61 = vmax.f32 %v6346_v38, 0.0  ;;  %v6476_v5 = vmax.f32 %v6348_v46, 0.0  ;;  %v6350_v9 = vadd.f32 %v8099_v35, %v6014_v33  ;;  %v6352_v47 = vadd.f32 %v8100_v31, %v6207_v56  ;;  %v8110_v35 = vld [vmem:[%s8918_s23 + $0x250] sm:$0xff] }
 0x6f3   : > { %6601 = vst [vmem:[%s11001_s2 + $0x1c0] sm:$0xff] %v6473_v42  ;;  %6603 = vst [vmem:[%s11001_s2 + $0x1d0] sm:$0xff] %v6475_v40  ;;  %v6477_v48 = vmax.f32 %v6349_v25, 0.0  ;;  %v6479_v51 = vmax.f32 %v6351_v1, 0.0 }
 0x6f4   : > { %6602 = vst [vmem:[%s11001_s2 + $0x1c8] sm:$0xff] %v6474_v61  ;;  %6604 = vst [vmem:[%s11001_s2 + $0x1d8] sm:$0xff] %v6476_v5  ;;  %v6478_v53 = vmax.f32 %v6350_v9, 0.0  ;;  %v6480_v58 = vmax.f32 %v6352_v47, 0.0  ;;  %v6017_v45 = vpop.f32.mrb[0].mxu1  ;;  %v6210_v21 = vpop.f32.mrb[176].mxu0 }
 0x6f5   : > { %6605 = vst [vmem:[%s11001_s2 + $0x1e0] sm:$0xff] %v6477_v48  ;;  %6607 = vst [vmem:[%s11001_s2 + $0x1f0] sm:$0xff] %v6479_v51  ;;  %v6018_v29 = vadd.f32 %v6017_v45, %v10975_v37  ;;  %v6211_v15 = vadd.f32 %v6210_v21, %v10977_v28  ;;  %v6019_v12 = vpop.f32.mrb[1].mxu1  ;;  %v6212_v41 = vpop.f32.mrb[177].mxu0  ;;  %v8109_v61 = vld [vmem:[%s8918_s23 + $0x240] sm:$0xff]  ;;  %v8112_v45 = vld [vmem:[%s8918_s23 + $0x258] sm:$0xff] }
 0x6f6   : > { %6606 = vst [vmem:[%s11001_s2 + $0x1e8] sm:$0xff] %v6478_v53  ;;  %6608 = vst [vmem:[%s11001_s2 + $0x1f8] sm:$0xff] %v6480_v58  ;;  %v6020_v34 = vadd.f32 %v6019_v12, %v10979_v24  ;;  %v6213_v4 = vadd.f32 %v6212_v41, %v10981_v26  ;;  %v6021_v23 = vpop.f32.mrb[2].mxu1  ;;  %v6214_v63 = vpop.f32.mrb[178].mxu0  ;;  %v8111_v53 = vld [vmem:[%s8918_s23 + $0x248] sm:$0xff] }
 0x6f7   : > { %v6353_v44 = vadd.f32 %v8101_v16, %v6018_v29  ;;  %v6355_v27 = vadd.f32 %v8102_v2, %v6211_v15  ;;  %v6022_v36 = vadd.f32 %v6021_v23, %v10975_v37  ;;  %v6215_v17 = vadd.f32 %v6214_v63, %v10977_v28  ;;  %v6023_v8 = vpop.f32.mrb[3].mxu1  ;;  %v6216_v55 = vpop.f32.mrb[179].mxu0  ;;  %v8114_v23 = vld [vmem:[%s8918_s23 + $0x270] sm:$0xff]  ;;  %v8115_v2 = vld [vmem:[%s8918_s23 + $0x268] sm:$0xff] }
 0x6f8   : > { %v6354_v32 = vadd.f32 %v8103_v3, %v6020_v34  ;;  %v6356_v62 = vadd.f32 %v8104_v43, %v6213_v4  ;;  %v6024_v39 = vadd.f32 %v6023_v8, %v10979_v24  ;;  %v6217_v54 = vadd.f32 %v6216_v55, %v10981_v26  ;;  %v8113_v34 = vld [vmem:[%s8918_s23 + $0x260] sm:$0xff] }
 0x6f9   : > { %v6481_v49 = vmax.f32 %v6353_v44, 0.0  ;;  %v6483_v18 = vmax.f32 %v6355_v27, 0.0  ;;  %v6357_v57 = vadd.f32 %v8105_v22, %v6022_v36  ;;  %v6359_v13 = vadd.f32 %v8106_v20, %v6215_v17  ;;  %v8116_v36 = vld [vmem:[%s8918_s23 + $0x278] sm:$0xff] }
 0x6fa   : > { %v6482_v14 = vmax.f32 %v6354_v32, 0.0  ;;  %v6484_v50 = vmax.f32 %v6356_v62, 0.0  ;;  %v6358_v11 = vadd.f32 %v8107_v10, %v6024_v39  ;;  %v6360_v6 = vadd.f32 %v8108_v30, %v6217_v54  ;;  %v8118_v10 = vld [vmem:[%s8918_s23 + $0x290] sm:$0xff] }
 0x6fb   : > { %6609 = vst [vmem:[%s11001_s2 + $0x200] sm:$0xff] %v6481_v49  ;;  %6611 = vst [vmem:[%s11001_s2 + $0x210] sm:$0xff] %v6483_v18  ;;  %v6485_v60 = vmax.f32 %v6357_v57, 0.0  ;;  %v6487_v19 = vmax.f32 %v6359_v13, 0.0 }
 0x6fc   : > { %6610 = vst [vmem:[%s11001_s2 + $0x208] sm:$0xff] %v6482_v14  ;;  %6612 = vst [vmem:[%s11001_s2 + $0x218] sm:$0xff] %v6484_v50  ;;  %v6486_v52 = vmax.f32 %v6358_v11, 0.0  ;;  %v6488_v38 = vmax.f32 %v6360_v6, 0.0  ;;  %v6027_v7 = vpop.f32.mrb[4].mxu1  ;;  %v6220_v46 = vpop.f32.mrb[180].mxu0 }
 0x6fd   : > { %6613 = vst [vmem:[%s11001_s2 + $0x220] sm:$0xff] %v6485_v60  ;;  %6615 = vst [vmem:[%s11001_s2 + $0x230] sm:$0xff] %v6487_v19  ;;  %v6028_v33 = vadd.f32 %v6027_v7, %v10975_v37  ;;  %v6221_v56 = vadd.f32 %v6220_v46, %v10977_v28  ;;  %v6029_v42 = vpop.f32.mrb[5].mxu1  ;;  %v6222_v40 = vpop.f32.mrb[181].mxu0  ;;  %v8117_v14 = vld [vmem:[%s8918_s23 + $0x280] sm:$0xff]  ;;  %v8120_v7 = vld [vmem:[%s8918_s23 + $0x298] sm:$0xff] }
 0x6fe   : > { %6614 = vst [vmem:[%s11001_s2 + $0x228] sm:$0xff] %v6486_v52  ;;  %6616 = vst [vmem:[%s11001_s2 + $0x238] sm:$0xff] %v6488_v38  ;;  %v6030_v0 = vadd.f32 %v6029_v42, %v10979_v24  ;;  %v6223_v25 = vadd.f32 %v6222_v40, %v10981_v26  ;;  %v6031_v59 = vpop.f32.mrb[6].mxu1  ;;  %v6224_v1 = vpop.f32.mrb[182].mxu0  ;;  %v8119_v52 = vld [vmem:[%s8918_s23 + $0x288] sm:$0xff] }
 0x6ff   : > { %v6361_v5 = vadd.f32 %v8109_v61, %v6028_v33  ;;  %v6363_v9 = vadd.f32 %v8110_v35, %v6221_v56  ;;  %v6032_v31 = vadd.f32 %v6031_v59, %v10975_v37  ;;  %v6225_v47 = vadd.f32 %v6224_v1, %v10977_v28  ;;  %v6033_v48 = vpop.f32.mrb[7].mxu1  ;;  %v6226_v51 = vpop.f32.mrb[183].mxu0  ;;  %v8122_v59 = vld [vmem:[%s8918_s23 + $0x2b0] sm:$0xff]  ;;  %v8123_v35 = vld [vmem:[%s8918_s23 + $0x2a8] sm:$0xff] }
 0x700   : > { %v6362_v58 = vadd.f32 %v8111_v53, %v6030_v0  ;;  %v6364_v21 = vadd.f32 %v8112_v45, %v6223_v25  ;;  %v6034_v29 = vadd.f32 %v6033_v48, %v10979_v24  ;;  %v6227_v15 = vadd.f32 %v6226_v51, %v10981_v26  ;;  %v8121_v0 = vld [vmem:[%s8918_s23 + $0x2a0] sm:$0xff] }
 0x701   : > { %v6489_v12 = vmax.f32 %v6361_v5, 0.0  ;;  %v6491_v41 = vmax.f32 %v6363_v9, 0.0  ;;  %v6365_v4 = vadd.f32 %v8113_v34, %v6032_v31  ;;  %v6367_v63 = vadd.f32 %v8114_v23, %v6225_v47  ;;  %v8124_v31 = vld [vmem:[%s8918_s23 + $0x2b8] sm:$0xff] }
 0x702   : > { %v6490_v16 = vmax.f32 %v6362_v58, 0.0  ;;  %v6492_v44 = vmax.f32 %v6364_v21, 0.0  ;;  %v6366_v27 = vadd.f32 %v8115_v2, %v6034_v29  ;;  %v6368_v17 = vadd.f32 %v8116_v36, %v6227_v15  ;;  %v8126_v2 = vld [vmem:[%s8918_s23 + $0x2d0] sm:$0xff] }
 0x703   : > { %6617 = vst [vmem:[%s11001_s2 + $0x240] sm:$0xff] %v6489_v12  ;;  %6619 = vst [vmem:[%s11001_s2 + $0x250] sm:$0xff] %v6491_v41  ;;  %v6493_v8 = vmax.f32 %v6365_v4, 0.0  ;;  %v6495_v55 = vmax.f32 %v6367_v63, 0.0 }
 0x704   : > { %6618 = vst [vmem:[%s11001_s2 + $0x248] sm:$0xff] %v6490_v16  ;;  %6620 = vst [vmem:[%s11001_s2 + $0x258] sm:$0xff] %v6492_v44  ;;  %v6494_v3 = vmax.f32 %v6366_v27, 0.0  ;;  %v6496_v32 = vmax.f32 %v6368_v17, 0.0  ;;  %v6037_v43 = vpop.f32.mrb[8].mxu1  ;;  %v6230_v62 = vpop.f32.mrb[184].mxu0 }
 0x705   : > { %6621 = vst [vmem:[%s11001_s2 + $0x260] sm:$0xff] %v6493_v8  ;;  %6623 = vst [vmem:[%s11001_s2 + $0x270] sm:$0xff] %v6495_v55  ;;  %v6038_v39 = vadd.f32 %v6037_v43, %v10975_v37  ;;  %v6231_v54 = vadd.f32 %v6230_v62, %v10977_v28  ;;  %v6039_v49 = vpop.f32.mrb[9].mxu1  ;;  %v6232_v18 = vpop.f32.mrb[185].mxu0  ;;  %v8125_v16 = vld [vmem:[%s8918_s23 + $0x2c0] sm:$0xff]  ;;  %v8128_v43 = vld [vmem:[%s8918_s23 + $0x2d8] sm:$0xff] }
 0x706   : > { %6622 = vst [vmem:[%s11001_s2 + $0x268] sm:$0xff] %v6494_v3  ;;  %6624 = vst [vmem:[%s11001_s2 + $0x278] sm:$0xff] %v6496_v32  ;;  %v6040_v22 = vadd.f32 %v6039_v49, %v10979_v24  ;;  %v6233_v57 = vadd.f32 %v6232_v18, %v10981_v26  ;;  %v6041_v20 = vpop.f32.mrb[10].mxu1  ;;  %v6234_v13 = vpop.f32.mrb[186].mxu0  ;;  %v8127_v3 = vld [vmem:[%s8918_s23 + $0x2c8] sm:$0xff] }
 0x707   : > { %v6369_v50 = vadd.f32 %v8117_v14, %v6038_v39  ;;  %v6371_v11 = vadd.f32 %v8118_v10, %v6231_v54  ;;  %v6042_v30 = vadd.f32 %v6041_v20, %v10975_v37  ;;  %v6235_v6 = vadd.f32 %v6234_v13, %v10977_v28  ;;  %v6043_v60 = vpop.f32.mrb[11].mxu1  ;;  %v6236_v19 = vpop.f32.mrb[187].mxu0  ;;  %v8130_v20 = vld [vmem:[%s8918_s23 + $0x2f0] sm:$0xff]  ;;  %v8131_v10 = vld [vmem:[%s8918_s23 + $0x2e8] sm:$0xff] }
 0x708   : > { %v6370_v38 = vadd.f32 %v8119_v52, %v6040_v22  ;;  %v6372_v46 = vadd.f32 %v8120_v7, %v6233_v57  ;;  %v6044_v33 = vadd.f32 %v6043_v60, %v10979_v24  ;;  %v6237_v56 = vadd.f32 %v6236_v19, %v10981_v26  ;;  %v8129_v22 = vld [vmem:[%s8918_s23 + $0x2e0] sm:$0xff] }
 0x709   : > { %v6497_v42 = vmax.f32 %v6369_v50, 0.0  ;;  %v6499_v40 = vmax.f32 %v6371_v11, 0.0  ;;  %v6373_v25 = vadd.f32 %v8121_v0, %v6042_v30  ;;  %v6375_v1 = vadd.f32 %v8122_v59, %v6235_v6  ;;  %v8132_v30 = vld [vmem:[%s8918_s23 + $0x2f8] sm:$0xff] }
 0x70a   : > { %v6498_v61 = vmax.f32 %v6370_v38, 0.0  ;;  %v6500_v5 = vmax.f32 %v6372_v46, 0.0  ;;  %v6374_v9 = vadd.f32 %v8123_v35, %v6044_v33  ;;  %v6376_v47 = vadd.f32 %v8124_v31, %v6237_v56  ;;  %v8134_v35 = vld [vmem:[%s8918_s23 + $0x310] sm:$0xff] }
 0x70b   : > { %6625 = vst [vmem:[%s11001_s2 + $0x280] sm:$0xff] %v6497_v42  ;;  %6627 = vst [vmem:[%s11001_s2 + $0x290] sm:$0xff] %v6499_v40  ;;  %v6501_v48 = vmax.f32 %v6373_v25, 0.0  ;;  %v6503_v51 = vmax.f32 %v6375_v1, 0.0 }
 0x70c   : > { %6626 = vst [vmem:[%s11001_s2 + $0x288] sm:$0xff] %v6498_v61  ;;  %6628 = vst [vmem:[%s11001_s2 + $0x298] sm:$0xff] %v6500_v5  ;;  %v6502_v53 = vmax.f32 %v6374_v9, 0.0  ;;  %v6504_v58 = vmax.f32 %v6376_v47, 0.0  ;;  %v6047_v45 = vpop.f32.mrb[12].mxu1  ;;  %v6240_v21 = vpop.f32.mrb[188].mxu0 }
 0x70d   : > { %6629 = vst [vmem:[%s11001_s2 + $0x2a0] sm:$0xff] %v6501_v48  ;;  %6631 = vst [vmem:[%s11001_s2 + $0x2b0] sm:$0xff] %v6503_v51  ;;  %v6048_v29 = vadd.f32 %v6047_v45, %v10975_v37  ;;  %v6241_v15 = vadd.f32 %v6240_v21, %v10977_v28  ;;  %v6049_v12 = vpop.f32.mrb[13].mxu1  ;;  %v6242_v41 = vpop.f32.mrb[189].mxu0  ;;  %v8133_v61 = vld [vmem:[%s8918_s23 + $0x300] sm:$0xff]  ;;  %v8136_v45 = vld [vmem:[%s8918_s23 + $0x318] sm:$0xff] }
 0x70e   : > { %6630 = vst [vmem:[%s11001_s2 + $0x2a8] sm:$0xff] %v6502_v53  ;;  %6632 = vst [vmem:[%s11001_s2 + $0x2b8] sm:$0xff] %v6504_v58  ;;  %v6050_v34 = vadd.f32 %v6049_v12, %v10979_v24  ;;  %v6243_v4 = vadd.f32 %v6242_v41, %v10981_v26  ;;  %v6051_v23 = vpop.f32.mrb[14].mxu1  ;;  %v6244_v63 = vpop.f32.mrb[190].mxu0  ;;  %v8135_v53 = vld [vmem:[%s8918_s23 + $0x308] sm:$0xff] }
 0x70f   : > { %v6377_v44 = vadd.f32 %v8125_v16, %v6048_v29  ;;  %v6379_v27 = vadd.f32 %v8126_v2, %v6241_v15  ;;  %v6052_v36 = vadd.f32 %v6051_v23, %v10975_v37  ;;  %v6245_v17 = vadd.f32 %v6244_v63, %v10977_v28  ;;  %v6053_v8 = vpop.f32.mrb[15].mxu1  ;;  %v6246_v55 = vpop.f32.mrb[191].mxu0  ;;  %v8138_v23 = vld [vmem:[%s8918_s23 + $0x330] sm:$0xff]  ;;  %v8139_v2 = vld [vmem:[%s8918_s23 + $0x328] sm:$0xff] }
 0x710   : > { %v6378_v32 = vadd.f32 %v8127_v3, %v6050_v34  ;;  %v6380_v62 = vadd.f32 %v8128_v43, %v6243_v4  ;;  %v6054_v39 = vadd.f32 %v6053_v8, %v10979_v24  ;;  %v6247_v54 = vadd.f32 %v6246_v55, %v10981_v26  ;;  %v8137_v34 = vld [vmem:[%s8918_s23 + $0x320] sm:$0xff] }
 0x711   : > { %v6505_v49 = vmax.f32 %v6377_v44, 0.0  ;;  %v6507_v18 = vmax.f32 %v6379_v27, 0.0  ;;  %v6381_v57 = vadd.f32 %v8129_v22, %v6052_v36  ;;  %v6383_v13 = vadd.f32 %v8130_v20, %v6245_v17  ;;  %v8140_v36 = vld [vmem:[%s8918_s23 + $0x338] sm:$0xff] }
 0x712   : > { %v6506_v14 = vmax.f32 %v6378_v32, 0.0  ;;  %v6508_v50 = vmax.f32 %v6380_v62, 0.0  ;;  %v6382_v11 = vadd.f32 %v8131_v10, %v6054_v39  ;;  %v6384_v6 = vadd.f32 %v8132_v30, %v6247_v54  ;;  %v8142_v10 = vld [vmem:[%s8918_s23 + $0x350] sm:$0xff] }
 0x713   : > { %6633 = vst [vmem:[%s11001_s2 + $0x2c0] sm:$0xff] %v6505_v49  ;;  %6635 = vst [vmem:[%s11001_s2 + $0x2d0] sm:$0xff] %v6507_v18  ;;  %v6509_v60 = vmax.f32 %v6381_v57, 0.0  ;;  %v6511_v19 = vmax.f32 %v6383_v13, 0.0 }
 0x714   : > { %6634 = vst [vmem:[%s11001_s2 + $0x2c8] sm:$0xff] %v6506_v14  ;;  %6636 = vst [vmem:[%s11001_s2 + $0x2d8] sm:$0xff] %v6508_v50  ;;  %v6510_v52 = vmax.f32 %v6382_v11, 0.0  ;;  %v6512_v38 = vmax.f32 %v6384_v6, 0.0  ;;  %v6057_v7 = vpop.f32.mrb[16].mxu1  ;;  %v6250_v46 = vpop.f32.mrb[192].mxu0 }
 0x715   : > { %6637 = vst [vmem:[%s11001_s2 + $0x2e0] sm:$0xff] %v6509_v60  ;;  %6639 = vst [vmem:[%s11001_s2 + $0x2f0] sm:$0xff] %v6511_v19  ;;  %v6058_v33 = vadd.f32 %v6057_v7, %v10975_v37  ;;  %v6251_v56 = vadd.f32 %v6250_v46, %v10977_v28  ;;  %v6059_v42 = vpop.f32.mrb[17].mxu1  ;;  %v6252_v40 = vpop.f32.mrb[193].mxu0  ;;  %v8141_v14 = vld [vmem:[%s8918_s23 + $0x340] sm:$0xff]  ;;  %v8144_v7 = vld [vmem:[%s8918_s23 + $0x358] sm:$0xff] }
 0x716   : > { %6638 = vst [vmem:[%s11001_s2 + $0x2e8] sm:$0xff] %v6510_v52  ;;  %6640 = vst [vmem:[%s11001_s2 + $0x2f8] sm:$0xff] %v6512_v38  ;;  %v6060_v0 = vadd.f32 %v6059_v42, %v10979_v24  ;;  %v6253_v25 = vadd.f32 %v6252_v40, %v10981_v26  ;;  %v6061_v59 = vpop.f32.mrb[18].mxu1  ;;  %v6254_v1 = vpop.f32.mrb[194].mxu0  ;;  %v8143_v52 = vld [vmem:[%s8918_s23 + $0x348] sm:$0xff] }
 0x717   : > { %v6385_v5 = vadd.f32 %v8133_v61, %v6058_v33  ;;  %v6387_v9 = vadd.f32 %v8134_v35, %v6251_v56  ;;  %v6062_v31 = vadd.f32 %v6061_v59, %v10975_v37  ;;  %v6255_v47 = vadd.f32 %v6254_v1, %v10977_v28  ;;  %v6063_v48 = vpop.f32.mrb[19].mxu1  ;;  %v6256_v51 = vpop.f32.mrb[195].mxu0  ;;  %v8146_v59 = vld [vmem:[%s8918_s23 + $0x370] sm:$0xff]  ;;  %v8147_v35 = vld [vmem:[%s8918_s23 + $0x368] sm:$0xff] }
 0x718   : > { %v6386_v58 = vadd.f32 %v8135_v53, %v6060_v0  ;;  %v6388_v21 = vadd.f32 %v8136_v45, %v6253_v25  ;;  %v6064_v29 = vadd.f32 %v6063_v48, %v10979_v24  ;;  %v6257_v15 = vadd.f32 %v6256_v51, %v10981_v26  ;;  %v8145_v0 = vld [vmem:[%s8918_s23 + $0x360] sm:$0xff] }
 0x719   : > { %v6513_v12 = vmax.f32 %v6385_v5, 0.0  ;;  %v6515_v41 = vmax.f32 %v6387_v9, 0.0  ;;  %v6389_v4 = vadd.f32 %v8137_v34, %v6062_v31  ;;  %v6391_v63 = vadd.f32 %v8138_v23, %v6255_v47  ;;  %v8148_v31 = vld [vmem:[%s8918_s23 + $0x378] sm:$0xff] }
 0x71a   : > { %v6514_v16 = vmax.f32 %v6386_v58, 0.0  ;;  %v6516_v44 = vmax.f32 %v6388_v21, 0.0  ;;  %v6390_v27 = vadd.f32 %v8139_v2, %v6064_v29  ;;  %v6392_v17 = vadd.f32 %v8140_v36, %v6257_v15 }
 0x71b   : > { %6641 = vst [vmem:[%s11001_s2 + $0x300] sm:$0xff] %v6513_v12  ;;  %6643 = vst [vmem:[%s11001_s2 + $0x310] sm:$0xff] %v6515_v41  ;;  %v6517_v8 = vmax.f32 %v6389_v4, 0.0  ;;  %v6519_v55 = vmax.f32 %v6391_v63, 0.0  ;;  %v8149_v41 = vld [vmem:[%s8918_s23 + $0x380] sm:$0xff]  ;;  %v8150_v63 = vld [vmem:[%s8918_s23 + $0x388] sm:$0xff] }
 0x71c   : > { %6642 = vst [vmem:[%s11001_s2 + $0x308] sm:$0xff] %v6514_v16  ;;  %6644 = vst [vmem:[%s11001_s2 + $0x318] sm:$0xff] %v6516_v44  ;;  %v6518_v3 = vmax.f32 %v6390_v27, 0.0  ;;  %v6520_v32 = vmax.f32 %v6392_v17, 0.0  ;;  %v6067_v43 = vpop.f32.mrb[20].mxu1  ;;  %v6260_v62 = vpop.f32.mrb[196].mxu0 }
 0x71d   : > { %6645 = vst [vmem:[%s11001_s2 + $0x320] sm:$0xff] %v6517_v8  ;;  %6647 = vst [vmem:[%s11001_s2 + $0x330] sm:$0xff] %v6519_v55  ;;  %v6068_v39 = vadd.f32 %v6067_v43, %v10975_v37  ;;  %v6261_v54 = vadd.f32 %v6260_v62, %v10977_v28  ;;  %v6069_v49 = vpop.f32.mrb[21].mxu1  ;;  %v6262_v18 = vpop.f32.mrb[197].mxu0  ;;  %v8151_v27 = vld [vmem:[%s8918_s23 + $0x3a0] sm:$0xff]  ;;  %v8152_v8 = vld [vmem:[%s8918_s23 + $0x3a8] sm:$0xff] }
 0x71e   : > { %6646 = vst [vmem:[%s11001_s2 + $0x328] sm:$0xff] %v6518_v3  ;;  %6648 = vst [vmem:[%s11001_s2 + $0x338] sm:$0xff] %v6520_v32  ;;  %v6070_v22 = vadd.f32 %v6069_v49, %v10979_v24  ;;  %v6263_v57 = vadd.f32 %v6262_v18, %v10981_v26  ;;  %v6071_v20 = vpop.f32.mrb[22].mxu1  ;;  %v6264_v13 = vpop.f32.mrb[198].mxu0  ;;  %v8153_v18 = vld [vmem:[%s8918_s23 + $0x3c0] sm:$0xff] }
 0x71f   : > { %v6393_v50 = vadd.f32 %v8141_v14, %v6068_v39  ;;  %v6395_v11 = vadd.f32 %v8142_v10, %v6261_v54  ;;  %v6072_v30 = vadd.f32 %v6071_v20, %v10975_v37  ;;  %v6265_v6 = vadd.f32 %v6264_v13, %v10977_v28  ;;  %v6073_v60 = vpop.f32.mrb[23].mxu1  ;;  %v6266_v19 = vpop.f32.mrb[199].mxu0  ;;  %v8154_v13 = vld [vmem:[%s8918_s23 + $0x3c8] sm:$0xff] }
 0x720   : > { %v6394_v38 = vadd.f32 %v8143_v52, %v6070_v22  ;;  %v6396_v46 = vadd.f32 %v8144_v7, %v6263_v57  ;;  %v6074_v33 = vadd.f32 %v6073_v60, %v10979_v24  ;;  %v6267_v56 = vadd.f32 %v6266_v19, %v10981_v26  ;;  %v8156_v60 = vld [vmem:[%s8918_s23 + $0x3e8] sm:$0xff] }
 0x721   : > { %v6521_v42 = vmax.f32 %v6393_v50, 0.0  ;;  %v6523_v40 = vmax.f32 %v6395_v11, 0.0  ;;  %v6397_v25 = vadd.f32 %v8145_v0, %v6072_v30  ;;  %v6399_v1 = vadd.f32 %v8146_v59, %v6265_v6  ;;  %v8155_v11 = vld [vmem:[%s8918_s23 + $0x3e0] sm:$0xff] }
 0x722   : > { %v6522_v61 = vmax.f32 %v6394_v38, 0.0  ;;  %v6524_v5 = vmax.f32 %v6396_v46, 0.0  ;;  %v6398_v9 = vadd.f32 %v8147_v35, %v6074_v33  ;;  %v6400_v47 = vadd.f32 %v8148_v31, %v6267_v56  ;;  %v8157_v56 = vld [vmem:[%s8918_s23 + $0x390] sm:$0xff]  ;;  %v8160_v31 = vld [vmem:[%s8918_s23 + $0x3b8] sm:$0xff] }
 0x723   : > { %6649 = vst [vmem:[%s11001_s2 + $0x340] sm:$0xff] %v6521_v42  ;;  %6651 = vst [vmem:[%s11001_s2 + $0x350] sm:$0xff] %v6523_v40  ;;  %v6525_v48 = vmax.f32 %v6397_v25, 0.0  ;;  %v6527_v51 = vmax.f32 %v6399_v1, 0.0  ;;  %v8158_v25 = vld [vmem:[%s8918_s23 + $0x398] sm:$0xff] }
 0x724   : > { %6650 = vst [vmem:[%s11001_s2 + $0x348] sm:$0xff] %v6522_v61  ;;  %6652 = vst [vmem:[%s11001_s2 + $0x358] sm:$0xff] %v6524_v5  ;;  %v6526_v53 = vmax.f32 %v6398_v9, 0.0  ;;  %v6528_v58 = vmax.f32 %v6400_v47, 0.0  ;;  %v6077_v45 = vpop.f32.mrb[24].mxu1  ;;  %v8159_v5 = vld [vmem:[%s8918_s23 + $0x3b0] sm:$0xff] }
 0x725   : > { %6653 = vst [vmem:[%s11001_s2 + $0x360] sm:$0xff] %v6525_v48  ;;  %6655 = vst [vmem:[%s11001_s2 + $0x370] sm:$0xff] %v6527_v51  ;;  %v6078_v21 = vadd.f32 %v6077_v45, %v10975_v37  ;;  %v6079_v29 = vpop.f32.mrb[25].mxu1 }
 0x726   : > { %6654 = vst [vmem:[%s11001_s2 + $0x368] sm:$0xff] %v6526_v53  ;;  %6656 = vst [vmem:[%s11001_s2 + $0x378] sm:$0xff] %v6528_v58  ;;  %v6080_v15 = vadd.f32 %v6079_v29, %v10979_v24  ;;  %v6081_v12 = vpop.f32.mrb[26].mxu1 }
 0x727   : > { %v6401_v34 = vadd.f32 %v8149_v41, %v6078_v21  ;;  %v6082_v4 = vadd.f32 %v6081_v12, %v10975_v37  ;;  %v6083_v23 = vpop.f32.mrb[27].mxu1 }
 0x728   : > { %v6402_v16 = vadd.f32 %v8150_v63, %v6080_v15  ;;  %v6084_v44 = vadd.f32 %v6083_v23, %v10979_v24  ;;  %v8161_v15 = vld [vmem:[%s8918_s23 + $0x3d0] sm:$0xff] }
 0x729   : > { %v6529_v2 = vmax.f32 %v6401_v34, 0.0  ;;  %v6405_v36 = vadd.f32 %v8151_v27, %v6082_v4  ;;  %v8162_v4 = vld [vmem:[%s8918_s23 + $0x3d8] sm:$0xff] }
 0x72a   : > { %v6530_v17 = vmax.f32 %v6402_v16, 0.0  ;;  %v6406_v55 = vadd.f32 %v8152_v8, %v6084_v44  ;;  %v8163_v44 = vld [vmem:[%s8918_s23 + $0x3f0] sm:$0xff] }
 0x72b   : > { %6657 = vst [vmem:[%s11001_s2 + $0x380] sm:$0xff] %v6529_v2  ;;  %v6533_v3 = vmax.f32 %v6405_v36, 0.0  ;;  %v8164_v36 = vld [vmem:[%s8918_s23 + $0x3f8] sm:$0xff]  ;;  %s8530_s23 = smov [#allocation16]  }
 0x72c   : > { %6658 = vst [vmem:[%s11001_s2 + $0x388] sm:$0xff] %v6530_v17  ;;  %v6534_v32 = vmax.f32 %v6406_v55, 0.0  ;;  %v6087_v43 = vpop.f32.mrb[28].mxu1  ;;  %s8397_s15 = sshll.u32 %s8530_s23, 4  ;;  %s8398_s15 = int_to_ptr.vmem [resolvable:$false] %s8397_s15 }
 0x72d   : > { %6661 = vst [vmem:[%s11001_s2 + $0x3a0] sm:$0xff] %v6533_v3  ;;  %v6088_v62 = vadd.f32 %v6087_v43, %v10975_v37  ;;  %v6089_v39 = vpop.f32.mrb[29].mxu1  ;;  %s8399_s14 = scalar_lea.vmem %s8398_s15, 32768  ;;  %p8400_p7 = scmp.lt.s32.totalorder %s11371_s17, %s8398_s15 }
 0x72e   : > { %6662 = vst [vmem:[%s11001_s2 + $0x3a8] sm:$0xff] %v6534_v32  ;;  %v6090_v54 = vadd.f32 %v6089_v39, %v10979_v24  ;;  %v6091_v49 = vpop.f32.mrb[30].mxu1  ;;  %p8401_p5 = scmp.lt.s32.totalorder %s8399_s14, %s8393_s24 }
 0x72f   : > { %v6409_v22 = vadd.f32 %v8153_v18, %v6088_v62  ;;  %v6092_v57 = vadd.f32 %v6091_v49, %v10975_v37  ;;  %v6093_v20 = vpop.f32.mrb[31].mxu1 }
 0x730   : > { %v6410_v14 = vadd.f32 %v8154_v13, %v6090_v54  ;;  %v6094_v50 = vadd.f32 %v6093_v20, %v10979_v24  ;;  %p8402_p1 = por %p8401_p5, %p8400_p7 }
 0x731   : > { %v6537_v10 = vmax.f32 %v6409_v22, 0.0  ;;  %v6413_v30 = vadd.f32 %v8155_v11, %v6092_v57 }
 0x732   : > { %v6538_v6 = vmax.f32 %v6410_v14, 0.0  ;;  %v6414_v19 = vadd.f32 %v8156_v60, %v6094_v50  ;;  %p8403_p11 = pnand %p8402_p1, %p8396_p3 }
 0x733   : > { %6665 = vst [vmem:[%s11001_s2 + $0x3c0] sm:$0xff] %v6537_v10  ;;  %v6541_v52 = vmax.f32 %v6413_v30, 0.0 }
 0x734   : > { %6666 = vst [vmem:[%s11001_s2 + $0x3c8] sm:$0xff] %v6538_v6  ;;  %v6542_v38 = vmax.f32 %v6414_v19, 0.0  ;;  %v6270_v37 = vpop.f32.mrb[32].mxu1 }
 0x735   : > { %6669 = vst [vmem:[%s11001_s2 + $0x3e0] sm:$0xff] %v6541_v52  ;;  %v6271_v7 = vadd.f32 %v6270_v37, %v10977_v28  ;;  %v6272_v46 = vpop.f32.mrb[33].mxu1 }
 0x736   : > { %6670 = vst [vmem:[%s11001_s2 + $0x3e8] sm:$0xff] %v6542_v38  ;;  %v6273_v24 = vadd.f32 %v6272_v46, %v10981_v26  ;;  %v6274_v33 = vpop.f32.mrb[34].mxu1 }
 0x737   : > { %v6403_v42 = vadd.f32 %v8157_v56, %v6271_v7  ;;  %v6275_v40 = vadd.f32 %v6274_v33, %v10977_v28  ;;  %v6276_v0 = vpop.f32.mrb[35].mxu1 }
 0x738   : > { %v6404_v59 = vadd.f32 %v8158_v25, %v6273_v24  ;;  %v6277_v1 = vadd.f32 %v6276_v0, %v10981_v26 }
 0x739   : > { %v6531_v61 = vmax.f32 %v6403_v42, 0.0  ;;  %v6407_v35 = vadd.f32 %v8159_v5, %v6275_v40 }
 0x73a   : > { %v6532_v9 = vmax.f32 %v6404_v59, 0.0  ;;  %v6408_v47 = vadd.f32 %v8160_v31, %v6277_v1 }
 0x73b   : > { %6659 = vst [vmem:[%s11001_s2 + $0x390] sm:$0xff] %v6531_v61  ;;  %v6535_v48 = vmax.f32 %v6407_v35, 0.0 }
 0x73c   : > { %6660 = vst [vmem:[%s11001_s2 + $0x398] sm:$0xff] %v6532_v9  ;;  %v6536_v51 = vmax.f32 %v6408_v47, 0.0  ;;  %v6280_v53 = vpop.f32.mrb[36].mxu1 }
 0x73d   : > { %6663 = vst [vmem:[%s11001_s2 + $0x3b0] sm:$0xff] %v6535_v48  ;;  %v6281_v58 = vadd.f32 %v6280_v53, %v10977_v28  ;;  %v6282_v45 = vpop.f32.mrb[37].mxu1 }
 0x73e   : > { %6664 = vst [vmem:[%s11001_s2 + $0x3b8] sm:$0xff] %v6536_v51  ;;  %v6283_v21 = vadd.f32 %v6282_v45, %v10981_v26  ;;  %v6284_v29 = vpop.f32.mrb[38].mxu1 }
 0x73f   : > { %v6411_v12 = vadd.f32 %v8161_v15, %v6281_v58  ;;  %v6285_v41 = vadd.f32 %v6284_v29, %v10977_v28  ;;  %v6286_v34 = vpop.f32.mrb[39].mxu1 }
 0x740   : > { %v6412_v23 = vadd.f32 %v8162_v4, %v6283_v21  ;;  %v6287_v63 = vadd.f32 %v6286_v34, %v10981_v26 }
 0x741   : > { %v6539_v16 = vmax.f32 %v6411_v12, 0.0  ;;  %v6415_v2 = vadd.f32 %v8163_v44, %v6285_v41 }
 0x742   : > { %v6540_v27 = vmax.f32 %v6412_v23, 0.0  ;;  %v6416_v17 = vadd.f32 %v8164_v36, %v6287_v63 }
 0x743   : > { %6667 = vst [vmem:[%s11001_s2 + $0x3d0] sm:$0xff] %v6539_v16  ;;  %v6543_v28 = vmax.f32 %v6415_v2, 0.0 }
 0x744   : > { %6668 = vst [vmem:[%s11001_s2 + $0x3d8] sm:$0xff] %v6540_v27  ;;  %v6544_v26 = vmax.f32 %v6416_v17, 0.0 }
 0x745   : > { %6671 = vst [vmem:[%s11001_s2 + $0x3f0] sm:$0xff] %v6543_v28 }
 0x746   : > { %6672 = vst [vmem:[%s11001_s2 + $0x3f8] sm:$0xff] %v6544_v26 }
 0x747   : > { %8406 = shalt.err (!%p8403_p11)
}
 0x748   : > { %s8407_s13 = scalar_lea.hbm %s11377_s30, 16384  ;;  %s8411_s2 = scalar_lea.hbm %s11869_s4, 131072 }
 0x749   : > { %p8408_p12 = scmp.ne.s32.totalorder %s11377_s30, %s8407_s13  ;;  %p8412_p0 = scmp.lt.u32.totalorder %s11377_s30, %s11869_s4 }
 0x74a   : > { %p8413_p4 = scmp.lt.u32.totalorder %s8411_s2, %s8407_s13  ;;  %p8415_p6 = scmp.lt.u32.totalorder %s8407_s13, %s11377_s30 }
 0x74b   : > { %p8409_p13 = pnand %p8408_p12, %p11870_p8 }
 0x74c   : > { %p8414_p10 = por %p8413_p4, %p8412_p0 }
 0x74d   : > { %p8410_p2 = pneg %p8409_p13 }
 0x74e   : > { %p8416_p9 = por %p8415_p6, %p8414_p10 }
 0x750   : > { %p8417_p3 = pnand %p8416_p9, %p8410_p2 }
 0x752   : > { %8420 = shalt.err (!%p8417_p3)
}
 0x753   : > { %s8531_s0 = smov 512   ;;  %s8532_s6 = smov 32  }
 0x754   : > { %7757 = dma.vmem_to_hbm [thread:$0]  (%p11870_p8), %s11371_s17, 16384, %s11377_s30, %s6674_s7, %s8531_s0, %s8531_s0, %s8532_s6  }
 0x755 PF: > { %p7802_p7 = scmp.ge.s32.totalorder %s8511_s12, 2  ;;  %s6705_s16 = sand.u32 1, %s8483_s27  }
 0x756   : > { %p11871_p5 = scmp.ne.s32.totalorder %s11580_s19, 0  ;;  %s6706_s8 = scalar_lea.sflag [#allocation4], %s6705_s16 }
 0x758   : > { %p7786_p1 = pnand %p7802_p7, %p11871_p5 }
 0x75a   : > { %8478 = dma.done.wait (!%p7786_p1), %s6706_s8, 16384  }
 0x75b   : > { %8480 = vsyncadd (!%p7786_p1), %s6706_s8, 4294950912  ;;  %s30_s12 = sadd.s32 1, %s8511_s12   ;;  %s11872_s22 = smov %s11882_s9 }
 0x75c   : > { %p27_p11 = scmp.ge.s32.totalorder %s30_s12, 10   ;;  %s11873_s25 = sld [smem:[#allocation27_spill]] }
 0x75d   : > { %s11874_s27 = smov %s8487_s28  ;;  %s11875_s28 = smov %s8491_s29 }
 0x75e   : > { %s11876_s29 = smov %s8817_s18  ;;  %s11877_s30 = smov %s8503_s10 }
 0x75f   : > { %s11878_s9 = smov %s8507_s11  ;;  %s11879_s10 = smov %s11872_s22 }
 0x760   :  { %29 = sbr.rel (!%p27_p11) target bundleno = 21 (0x15), region = 134 }
 0x762   : > { %s11880_s11 = smov %s11873_s25 }
 0x767   :  { %6711 = vsyncpa [#allocation3], 1 }
 0x768   :  { %6713 = vsyncpa [#allocation3 + $0x1], 1 }
 0x769   :  { %6714 = vsyncpa [#allocation6], 1 }
 0x76a   :  { %6716 = vsyncpa [#allocation6 + $0x1], 1 }
 0x76b   :  { %6717 = vsyncpa [#allocation9], 1 }
 0x76c   :  { %6718 = vsyncpa [#allocation12], 1 }
 0x76d   :  { %6719 = vsyncpa [#allocation15], 1 }
 0x76e   :  { %6720 = vsyncpa [#allocation4], 1 }
 0x76f   :  { %6722 = vsyncpa [#allocation4 + $0x1], 1 }

</bundles_post_ra>
